<compile_context>
chip_gen: v7x
topology: tpu7x:2x2x1
jax: 0.10.0
libtpu: 0.0.40
codegen_flags: <defaults>
</compile_context>

<pallas_src>
import functools
import math

import jax
import jax.numpy as jnp
from jax import lax
from jax.experimental import pallas as pl
from jax.experimental.pallas import tpu as pltpu


def _attn_block_kernel(x_ref, gamma_ref, beta_ref,
                       wq_ref, bq_ref, wk_ref, bk_ref, wv_ref, bv_ref,
                       wp_ref, bp_ref,
                       o_ref,
                       hnorm_s, k_s, v_s, xres_s,
                       *, num_heads, n_qt):
    qt = pl.program_id(1)

    _, C, N = x_ref.shape            # full-x block: (1, C, N), channel-major
    TQ = o_ref.shape[2]              # query tile size
    d = C // num_heads
    G = 32
    gs = C // G
    scale = float(d) ** -0.5

    # ---- once per batch element: GroupNorm + residual + all-heads K/V ------
    @pl.when(qt == 0)
    def _prologue():
        xc = x_ref[0].astype(jnp.float32)                      # (C, N)
        # residual in (N, C) layout so per-tile slicing stays on the sublane axis
        xres_s[...] = jnp.transpose(xc)                        # (N, C) f32

        inv_count = 1.0 / float(N * gs)
        c_idx = lax.broadcasted_iota(jnp.int32, (C, G), 0)
        g_idx = lax.broadcasted_iota(jnp.int32, (C, G), 1)
        mcg = jnp.logical_and(c_idx >= g_idx * gs,
                              c_idx < (g_idx + 1) * gs).astype(jnp.float32)

        def group_avg(per_chan):     # (C,1) per-channel sums -> (C,1) group mean
            per_group = jnp.sum(mcg * per_chan, axis=0, keepdims=True)   # (1, G)
            return jnp.sum(mcg * per_group, axis=1, keepdims=True) * inv_count

        mean = group_avg(jnp.sum(xc, axis=1, keepdims=True))   # (C, 1)
        cen = xc - mean
        var = group_avg(jnp.sum(cen * cen, axis=1, keepdims=True))       # (C, 1)
        inv = lax.rsqrt(var + 1e-5)
        hn = cen * inv * gamma_ref[...] + beta_ref[...]        # (C, N) f32
        # cast to bf16 BEFORE the transpose: halves XLU + store volume
        hn_nc = jnp.transpose(hn.astype(jnp.bfloat16))         # (N, C) bf16
        hnorm_s[...] = hn_nc

        # all-heads K / V: full-width (N,C)@(C,C) MXU matmuls, once per batch
        k_all = jnp.dot(hn_nc, wk_ref[...],
                        preferred_element_type=jnp.float32) + bk_ref[...]
        v_all = jnp.dot(hn_nc, wv_ref[...],
                        preferred_element_type=jnp.float32) + bv_ref[...]
        k_s[...] = k_all.astype(jnp.bfloat16)                  # (N, C) bf16
        v_s[...] = v_all.astype(jnp.bfloat16)                  # (N, C) bf16

    # ----------------------------- this query tile --------------------------
    if n_qt == 1:
        q_start = 0
    else:
        q_start = pl.multiple_of(qt * TQ, TQ)

    hq = hnorm_s[pl.ds(q_start, TQ), :]                        # (TQ, C) bf16
    # all-heads Q: one full-width matmul per tile; fold the softmax scale in
    q_all = jnp.dot(hq, wq_ref[...],
                    preferred_element_type=jnp.float32) + bq_ref[...]
    q_all = (q_all * scale).astype(jnp.bfloat16)               # (TQ, C)

    k_all = k_s[...]                                           # (N, C) bf16
    v_all = v_s[...]                                           # (N, C) bf16

    # static per-head loop: all slices are compile-time constants
    o_heads = []
    for h in range(num_heads):
        lo, hi = h * d, (h + 1) * d
        q_h = q_all[:, lo:hi]                                  # (TQ, d) bf16
        k_h = k_all[:, lo:hi]                                  # (N, d)  bf16
        v_h = v_all[:, lo:hi]                                  # (N, d)  bf16
        # contract the last dims of q and k -- no explicit transpose of K
        s = lax.dot_general(q_h, k_h, (((1,), (1,)), ((), ())),
                            preferred_element_type=jnp.float32)    # (TQ, N)
        s = s - jnp.max(s, axis=-1, keepdims=True)
        p = jnp.exp(s)
        denom = jnp.sum(p, axis=-1, keepdims=True)             # (TQ, 1)
        o_un = jnp.dot(p.astype(jnp.bfloat16), v_h,
                       preferred_element_type=jnp.float32)     # (TQ, d)
        # normalize AFTER p@v: (TQ,d) multiply instead of (TQ,N)
        o_h = o_un * pl.reciprocal(denom, approx=True)
        o_heads.append(o_h.astype(jnp.bfloat16))

    o_cat = jnp.concatenate(o_heads, axis=-1)                  # (TQ, C) bf16
    # single full-depth proj_out matmul over all heads
    out = jnp.dot(o_cat, wp_ref[...],
                  preferred_element_type=jnp.float32) + bp_ref[...]    # (TQ, C)

    res = xres_s[pl.ds(q_start, TQ), :]                        # (TQ, C) f32
    o_ref[0] = jnp.transpose(out + res).astype(o_ref.dtype)    # (C, TQ)


def attention_block(x_nchw, params, num_heads):
    """x_nchw: (B, C, H, W) float32.  Returns (B, C, H, W)."""
    B, C, Hh, Ww = x_nchw.shape
    N = Hh * Ww
    assert C % 32 == 0 and C % num_heads == 0
    d = C // num_heads
    del d  # head dim is re-derived inside the kernel

    # query tile size: lane-dense multiples of 128 when possible
    if N % 128 == 0:
        TQ = 256 if (N % 256 == 0 and N >= 512) else 128
        # TODO(synk): on v7x (64 MiB VMEM) prefer TQ=128 once N >= 4096.
    else:
        TQ = N
    n_qt = N // TQ

    # channel-major I/O: a free reshape of NCHW, no wrapper transposes
    x_cn = x_nchw.reshape(B, C, N)

    f32, bf16 = jnp.float32, jnp.bfloat16
    gamma = params["gamma"].reshape(C, 1).astype(f32)
    beta = params["beta"].reshape(C, 1).astype(f32)

    w_qkv = params["w_qkv"].astype(f32)                 # (3C, C)
    b_qkv = params["b_qkv"].astype(f32)                 # (3C,)
    wq = jnp.transpose(w_qkv[0 * C:1 * C]).astype(bf16)  # (C_in, C_out)
    wk = jnp.transpose(w_qkv[1 * C:2 * C]).astype(bf16)
    wv = jnp.transpose(w_qkv[2 * C:3 * C]).astype(bf16)
    bq = b_qkv[0 * C:1 * C].reshape(1, C)
    bk = b_qkv[1 * C:2 * C].reshape(1, C)
    bv = b_qkv[2 * C:3 * C].reshape(1, C)
    wp = jnp.transpose(params["w_proj"].astype(f32)).astype(bf16)   # (C, C)
    bp = params["b_proj"].reshape(1, C).astype(f32)

    # explicit VMEM budget (double-buffered x/out blocks + weights + scratch
    # + in-flight temporaries), with 1.5x headroom
    vmem_est = (
        2 * C * N * 4            # full-x block (double-buffered f32)
        + 2 * C * TQ * 4         # output block (double-buffered f32)
        + 2 * (4 * C * C * 2 + 4 * C * 4 + 2 * C * 4)   # weights / biases / affine
        + 3 * N * C * 2          # hnorm / K / V scratch (bf16)
        + N * C * 4              # residual scratch (f32)
        + 2 * TQ * N * 4         # live score temporaries
        + C * N * 4              # GroupNorm f32 temporaries
        + 8 * TQ * C * 4         # misc per-tile temporaries
    )
    vmem_limit = int(min(100 * 2**20, max(32 * 2**20, 1.5 * vmem_est)))

    kernel = functools.partial(_attn_block_kernel,
                               num_heads=num_heads, n_qt=n_qt)
    const = lambda b, t: (0, 0)

    out = pl.pallas_call(
        kernel,
        out_shape=jax.ShapeDtypeStruct((B, C, N), x_nchw.dtype),
        grid_spec=pltpu.PrefetchScalarGridSpec(
            num_scalar_prefetch=0,
            grid=(B, n_qt),
            in_specs=[
                pl.BlockSpec((1, C, N), lambda b, t: (b, 0, 0)),  # x (full, per batch)
                pl.BlockSpec((C, 1), const),                      # gamma
                pl.BlockSpec((C, 1), const),                      # beta
                pl.BlockSpec((C, C), const),                      # Wq^T   (fetched once)
                pl.BlockSpec((1, C), const),                      # bq
                pl.BlockSpec((C, C), const),                      # Wk^T
                pl.BlockSpec((1, C), const),                      # bk
                pl.BlockSpec((C, C), const),                      # Wv^T
                pl.BlockSpec((1, C), const),                      # bv
                pl.BlockSpec((C, C), const),                      # Wproj^T
                pl.BlockSpec((1, C), const),                      # bproj
            ],
            out_specs=pl.BlockSpec((1, C, TQ), lambda b, t: (b, 0, t)),
            scratch_shapes=[
                pltpu.VMEM((N, C), bf16),      # normalized activations (lane-dense)
                pltpu.VMEM((N, C), bf16),      # K, all heads (lane-dense)
                pltpu.VMEM((N, C), bf16),      # V, all heads (lane-dense)
                pltpu.VMEM((N, C), f32),       # residual, transposed once per batch
            ],
        ),
        compiler_params=pltpu.CompilerParams(
            dimension_semantics=("parallel", "arbitrary"),
            vmem_limit_bytes=vmem_limit),
    )(x_cn, gamma, beta, wq, bq, wk, bk, wv, bv, wp, bp)

    return out.reshape(B, C, Hh, Ww)


def reference_attention_block(x, params, num_heads):
    """Pure-JAX (f32) mirror of the PyTorch forward (NCHW)."""
    B, C, H, W = x.shape
    N = H * W
    G, gs = 32, C // 32
    xr = x.reshape(B, G, gs, H, W)
    mean = xr.mean(axis=(2, 3, 4), keepdims=True)
    var = ((xr - mean) ** 2).mean(axis=(2, 3, 4), keepdims=True)
    xn = (xr - mean) / jnp.sqrt(var + 1e-5)
    xn = xn.reshape(B, C, H, W) * params["gamma"][None, :, None, None] \
        + params["beta"][None, :, None, None]
    xf = xn.reshape(B, C, N)
    qkv = jnp.einsum("oc,bcn->bon", params["w_qkv"], xf) + params["b_qkv"][None, :, None]
    q, k, v = jnp.split(qkv, 3, axis=1)
    d = C // num_heads
    q = q.reshape(B, num_heads, d, N)
    k = k.reshape(B, num_heads, d, N)
    v = v.reshape(B, num_heads, d, N)
    attn = jnp.einsum("bhcn,bhcm->bhnm", q, k) * (d ** -0.5)
    attn = jax.nn.softmax(attn, axis=-1)
    out = jnp.einsum("bhnm,bhcm->bhcn", attn, v).reshape(B, C, N)
    out = jnp.einsum("oc,bcn->bon", params["w_proj"], out) + params["b_proj"][None, :, None]
    return out.reshape(B, C, H, W) + x


if __name__ == "__main__":
    # Small shapes consistent with the module: channels divisible by 32
    # (GroupNorm) and by num_heads; C=128 keeps the channel axis lane-dense.
    B, C, H, W = 2, 128, 16, 16          # N = 256 -> two query tiles of 128
    num_heads = 4

    key = jax.random.PRNGKey(0)
    kx, kq, kbq, kp, kbp, kg, kb = jax.random.split(key, 7)

    x = jax.random.normal(kx, (B, C, H, W), dtype=jnp.float32)

    params = {
        "gamma": 1.0 + 0.1 * jax.random.normal(kg, (C,), dtype=jnp.float32),
        "beta": 0.1 * jax.random.normal(kb, (C,), dtype=jnp.float32),
        "w_qkv": jax.random.normal(kq, (3 * C, C), dtype=jnp.float32) / math.sqrt(C),
        "b_qkv": 0.05 * jax.random.normal(kbq, (3 * C,), dtype=jnp.float32),
        "w_proj": jax.random.normal(kp, (C, C), dtype=jnp.float32) / math.sqrt(C),
        "b_proj": 0.05 * jax.random.normal(kbp, (C,), dtype=jnp.float32),
    }

    out = attention_block(x, params, num_heads)
    out = jax.block_until_ready(out)

    ref = jax.block_until_ready(reference_attention_block(x, params, num_heads))
    assert out.shape == (B, C, H, W)
    # bf16 matmul operands + approx reciprocal -> slightly looser tolerance
    assert jnp.allclose(out, ref, atol=5e-2, rtol=5e-2), \
        f"max abs err {jnp.max(jnp.abs(out - ref))}"

    print("KERNEL_OK")
</pallas_src>

<mosaic_0001>
module attributes {stable_mosaic.version = 11 : i64} {
  func.func @_attn_block_kernel(%arg0: i32, %arg1: i32, %arg2: memref<1x128x256xf32, #tpu.memory_space<vmem>>, %arg3: memref<128x1xf32, #tpu.memory_space<vmem>>, %arg4: memref<128x1xf32, #tpu.memory_space<vmem>>, %arg5: memref<128x128xbf16, #tpu.memory_space<vmem>>, %arg6: memref<1x128xf32, #tpu.memory_space<vmem>>, %arg7: memref<128x128xbf16, #tpu.memory_space<vmem>>, %arg8: memref<1x128xf32, #tpu.memory_space<vmem>>, %arg9: memref<128x128xbf16, #tpu.memory_space<vmem>>, %arg10: memref<1x128xf32, #tpu.memory_space<vmem>>, %arg11: memref<128x128xbf16, #tpu.memory_space<vmem>>, %arg12: memref<1x128xf32, #tpu.memory_space<vmem>>, %arg13: memref<1x128x128xf32, #tpu.memory_space<vmem>>, %arg14: memref<256x128xbf16, #tpu.memory_space<vmem>>, %arg15: memref<256x128xbf16, #tpu.memory_space<vmem>>, %arg16: memref<256x128xbf16, #tpu.memory_space<vmem>>, %arg17: memref<256x128xf32, #tpu.memory_space<vmem>>) attributes {dimension_semantics = [#tpu.dimension_semantics<parallel>, #tpu.dimension_semantics<arbitrary>], iteration_bounds = array<i64: 2, 2>, scalar_prefetch = 0 : i64, scratch_operands = 4 : i64, tpu.core_type = #tpu.core_type<tc>, window_params = [{transform_indices = @transform_0, window_bounds = array<i64: 1, 128, 256>}, {pipeline_mode = #tpu.pipeline_mode<synchronous>, transform_indices = @transform_1, window_bounds = array<i64: 128, 1>}, {pipeline_mode = #tpu.pipeline_mode<synchronous>, transform_indices = @transform_2, window_bounds = array<i64: 128, 1>}, {pipeline_mode = #tpu.pipeline_mode<synchronous>, transform_indices = @transform_3, window_bounds = array<i64: 128, 128>}, {pipeline_mode = #tpu.pipeline_mode<synchronous>, transform_indices = @transform_4, window_bounds = array<i64: 1, 128>}, {pipeline_mode = #tpu.pipeline_mode<synchronous>, transform_indices = @transform_5, window_bounds = array<i64: 128, 128>}, {pipeline_mode = #tpu.pipeline_mode<synchronous>, transform_indices = @transform_6, window_bounds = array<i64: 1, 128>}, {pipeline_mode = #tpu.pipeline_mode<synchronous>, transform_indices = @transform_7, window_bounds = array<i64: 128, 128>}, {pipeline_mode = #tpu.pipeline_mode<synchronous>, transform_indices = @transform_8, window_bounds = array<i64: 1, 128>}, {pipeline_mode = #tpu.pipeline_mode<synchronous>, transform_indices = @transform_9, window_bounds = array<i64: 128, 128>}, {pipeline_mode = #tpu.pipeline_mode<synchronous>, transform_indices = @transform_10, window_bounds = array<i64: 1, 128>}, {transform_indices = @transform_11, window_bounds = array<i64: 1, 128, 128>}]} {
    %c0_i32 = arith.constant 0 : i32
    %0 = arith.cmpi eq, %arg1, %c0_i32 : i32
    %1 = arith.extui %0 : i1 to i32
    %c0_i32_0 = arith.constant 0 : i32
    %2 = arith.cmpi ne, %1, %c0_i32_0 : i32
    scf.if %2 {
      %c0_35 = arith.constant 0 : index
      %c0_36 = arith.constant 0 : index
      %c0_37 = arith.constant 0 : index
      %98 = vector.load %arg2[%c0_35, %c0_36, %c0_37] : memref<1x128x256xf32, #tpu.memory_space<vmem>>, vector<1x128x256xf32>
      %99 = vector.shape_cast %98 : vector<1x128x256xf32> to vector<128x256xf32>
      %100 = tpu.transpose %99, [1, 0] : vector<128x256xf32> -> vector<256x128xf32>
      %c0_38 = arith.constant 0 : index
      %c0_39 = arith.constant 0 : index
      %101 = vector.load %arg17[%c0_38, %c0_39] : memref<256x128xf32, #tpu.memory_space<vmem>>, vector<256x128xf32>
      tpu.vector_store %arg17[%c0_38, %c0_39], %100 {strides = array<i32>} : memref<256x128xf32, #tpu.memory_space<vmem>>, vector<256x128xf32>,
      %102 = tpu.iota {dimensions = array<i32: 0>} : vector<128x32xi32>
      %103 = tpu.iota {dimensions = array<i32: 1>} : vector<128x32xi32>
      %c4_i32 = arith.constant 4 : i32
      %104 = vector.broadcast %c4_i32 : i32 to vector<128x32xi32>
      %105 = arith.muli %103, %104 : vector<128x32xi32>
      %106 = arith.cmpi sge, %102, %105 : vector<128x32xi32>
      %c1_i32 = arith.constant 1 : i32
      %107 = vector.broadcast %c1_i32 : i32 to vector<128x32xi32>
      %108 = arith.addi %103, %107 : vector<128x32xi32>
      %c4_i32_40 = arith.constant 4 : i32
      %109 = vector.broadcast %c4_i32_40 : i32 to vector<128x32xi32>
      %110 = arith.muli %108, %109 : vector<128x32xi32>
      %111 = arith.cmpi slt, %102, %110 : vector<128x32xi32>
      %112 = arith.andi %106, %111 : vector<128x32xi1>
      %113 = arith.extui %112 : vector<128x32xi1> to vector<128x32xi32>
      %114 = arith.sitofp %113 : vector<128x32xi32> to vector<128x32xf32>
      %cst_41 = arith.constant dense<0.000000e+00> : vector<128xf32>
      %115 = vector.multi_reduction <add>, %99, %cst_41 [1] : vector<128x256xf32> to vector<128xf32>
      %116 = vector.shape_cast %115 : vector<128xf32> to vector<128x1xf32>
      %117 = vector.broadcast %116 : vector<128x1xf32> to vector<128x32xf32>
      %118 = arith.mulf %114, %117 : vector<128x32xf32>
      %cst_42 = arith.constant dense<0.000000e+00> : vector<32xf32>
      %119 = vector.multi_reduction <add>, %118, %cst_42 [0] : vector<128x32xf32> to vector<32xf32>
      %120 = vector.shape_cast %119 : vector<32xf32> to vector<1x32xf32>
      %121 = vector.broadcast %120 : vector<1x32xf32> to vector<128x32xf32>
      %122 = arith.mulf %114, %121 : vector<128x32xf32>
      %cst_43 = arith.constant dense<0.000000e+00> : vector<128xf32>
      %123 = vector.multi_reduction <add>, %122, %cst_43 [1] : vector<128x32xf32> to vector<128xf32>
      %124 = vector.shape_cast %123 : vector<128xf32> to vector<128x1xf32>
      %cst_44 = arith.constant 9.765625E-4 : f32
      %125 = vector.broadcast %cst_44 : f32 to vector<128x1xf32>
      %126 = arith.mulf %124, %125 : vector<128x1xf32>
      %127 = vector.broadcast %126 : vector<128x1xf32> to vector<128x256xf32>
      %128 = arith.subf %99, %127 : vector<128x256xf32>
      %129 = arith.mulf %128, %128 : vector<128x256xf32>
      %cst_45 = arith.constant dense<0.000000e+00> : vector<128xf32>
      %130 = vector.multi_reduction <add>, %129, %cst_45 [1] : vector<128x256xf32> to vector<128xf32>
      %131 = vector.shape_cast %130 : vector<128xf32> to vector<128x1xf32>
      %132 = vector.broadcast %131 : vector<128x1xf32> to vector<128x32xf32>
      %133 = arith.mulf %114, %132 : vector<128x32xf32>
      %cst_46 = arith.constant dense<0.000000e+00> : vector<32xf32>
      %134 = vector.multi_reduction <add>, %133, %cst_46 [0] : vector<128x32xf32> to vector<32xf32>
      %135 = vector.shape_cast %134 : vector<32xf32> to vector<1x32xf32>
      %136 = vector.broadcast %135 : vector<1x32xf32> to vector<128x32xf32>
      %137 = arith.mulf %114, %136 : vector<128x32xf32>
      %cst_47 = arith.constant dense<0.000000e+00> : vector<128xf32>
      %138 = vector.multi_reduction <add>, %137, %cst_47 [1] : vector<128x32xf32> to vector<128xf32>
      %139 = vector.shape_cast %138 : vector<128xf32> to vector<128x1xf32>
      %cst_48 = arith.constant 9.765625E-4 : f32
      %140 = vector.broadcast %cst_48 : f32 to vector<128x1xf32>
      %141 = arith.mulf %139, %140 : vector<128x1xf32>
      %cst_49 = arith.constant 9.99999974E-6 : f32
      %142 = vector.broadcast %cst_49 : f32 to vector<128x1xf32>
      %143 = arith.addf %141, %142 : vector<128x1xf32>
      %144 = math.rsqrt %143 : vector<128x1xf32>
      %145 = vector.broadcast %144 : vector<128x1xf32> to vector<128x256xf32>
      %146 = arith.mulf %128, %145 : vector<128x256xf32>
      %c0_50 = arith.constant 0 : index
      %c0_51 = arith.constant 0 : index
      %147 = vector.load %arg3[%c0_50, %c0_51] : memref<128x1xf32, #tpu.memory_space<vmem>>, vector<128x1xf32>
      %148 = vector.broadcast %147 : vector<128x1xf32> to vector<128x256xf32>
      %149 = arith.mulf %146, %148 : vector<128x256xf32>
      %c0_52 = arith.constant 0 : index
      %c0_53 = arith.constant 0 : index
      %150 = vector.load %arg4[%c0_52, %c0_53] : memref<128x1xf32, #tpu.memory_space<vmem>>, vector<128x1xf32>
      %151 = vector.broadcast %150 : vector<128x1xf32> to vector<128x256xf32>
      %152 = arith.addf %149, %151 : vector<128x256xf32>
      %153 = arith.truncf %152 : vector<128x256xf32> to vector<128x256xbf16>
      %154 = tpu.transpose %153, [1, 0] : vector<128x256xbf16> -> vector<256x128xbf16>
      %c0_54 = arith.constant 0 : index
      %c0_55 = arith.constant 0 : index
      %155 = vector.load %arg14[%c0_54, %c0_55] : memref<256x128xbf16, #tpu.memory_space<vmem>>, vector<256x128xbf16>
      tpu.vector_store %arg14[%c0_54, %c0_55], %154 {strides = array<i32>} : memref<256x128xbf16, #tpu.memory_space<vmem>>, vector<256x128xbf16>,
      %c0_56 = arith.constant 0 : index
      %c0_57 = arith.constant 0 : index
      %156 = vector.load %arg7[%c0_56, %c0_57] : memref<128x128xbf16, #tpu.memory_space<vmem>>, vector<128x128xbf16>
      %cst_58 = arith.constant dense<0.000000e+00> : vector<256x128xf32>
      %157 = tpu.matmul %154, %156, %cst_58 {dimension_numbers = #tpu.dot_dimension_numbers<[1], [0], [0], [1], [0, 0, 1, 1], [], []>} : vector<256x128xbf16>, vector<128x128xbf16>, vector<256x128xf32> -> vector<256x128xf32>
      %c0_59 = arith.constant 0 : index
      %c0_60 = arith.constant 0 : index
      %158 = vector.load %arg8[%c0_59, %c0_60] : memref<1x128xf32, #tpu.memory_space<vmem>>, vector<1x128xf32>
      %159 = vector.broadcast %158 : vector<1x128xf32> to vector<256x128xf32>
      %160 = arith.addf %157, %159 : vector<256x128xf32>
      %c0_61 = arith.constant 0 : index
      %c0_62 = arith.constant 0 : index
      %161 = vector.load %arg9[%c0_61, %c0_62] : memref<128x128xbf16, #tpu.memory_space<vmem>>, vector<128x128xbf16>
      %cst_63 = arith.constant dense<0.000000e+00> : vector<256x128xf32>
      %162 = tpu.matmul %154, %161, %cst_63 {dimension_numbers = #tpu.dot_dimension_numbers<[1], [0], [0], [1], [0, 0, 1, 1], [], []>} : vector<256x128xbf16>, vector<128x128xbf16>, vector<256x128xf32> -> vector<256x128xf32>
      %c0_64 = arith.constant 0 : index
      %c0_65 = arith.constant 0 : index
      %163 = vector.load %arg10[%c0_64, %c0_65] : memref<1x128xf32, #tpu.memory_space<vmem>>, vector<1x128xf32>
      %164 = vector.broadcast %163 : vector<1x128xf32> to vector<256x128xf32>
      %165 = arith.addf %162, %164 : vector<256x128xf32>
      %166 = arith.truncf %160 : vector<256x128xf32> to vector<256x128xbf16>
      %c0_66 = arith.constant 0 : index
      %c0_67 = arith.constant 0 : index
      %167 = vector.load %arg15[%c0_66, %c0_67] : memref<256x128xbf16, #tpu.memory_space<vmem>>, vector<256x128xbf16>
      tpu.vector_store %arg15[%c0_66, %c0_67], %166 {strides = array<i32>} : memref<256x128xbf16, #tpu.memory_space<vmem>>, vector<256x128xbf16>,
      %168 = arith.truncf %165 : vector<256x128xf32> to vector<256x128xbf16>
      %c0_68 = arith.constant 0 : index
      %c0_69 = arith.constant 0 : index
      %169 = vector.load %arg16[%c0_68, %c0_69] : memref<256x128xbf16, #tpu.memory_space<vmem>>, vector<256x128xbf16>
      tpu.vector_store %arg16[%c0_68, %c0_69], %168 {strides = array<i32>} : memref<256x128xbf16, #tpu.memory_space<vmem>>, vector<256x128xbf16>,
    } else {
    }
    %c128_i32 = arith.constant 128 : i32
    %3 = arith.muli %arg1, %c128_i32 : i32
    %4 = tpu.assume_multiple %3, 128 : i32
    %5 = arith.index_cast %4 : i32 to index
    %c0 = arith.constant 0 : index
    %6 = vector.load %arg14[%5, %c0] : memref<256x128xbf16, #tpu.memory_space<vmem>>, vector<128x128xbf16>
    %c0_1 = arith.constant 0 : index
    %c0_2 = arith.constant 0 : index
    %7 = vector.load %arg5[%c0_1, %c0_2] : memref<128x128xbf16, #tpu.memory_space<vmem>>, vector<128x128xbf16>
    %cst = arith.constant dense<0.000000e+00> : vector<128x128xf32>
    %8 = tpu.matmul %6, %7, %cst {dimension_numbers = #tpu.dot_dimension_numbers<[1], [0], [0], [1], [0, 0, 1, 1], [], []>} : vector<128x128xbf16>, vector<128x128xbf16>, vector<128x128xf32> -> vector<128x128xf32>
    %c0_3 = arith.constant 0 : index
    %c0_4 = arith.constant 0 : index
    %9 = vector.load %arg6[%c0_3, %c0_4] : memref<1x128xf32, #tpu.memory_space<vmem>>, vector<1x128xf32>
    %10 = vector.broadcast %9 : vector<1x128xf32> to vector<128x128xf32>
    %11 = arith.addf %8, %10 : vector<128x128xf32>
    %cst_5 = arith.constant 0.176776692 : f32
    %12 = vector.broadcast %cst_5 : f32 to vector<128x128xf32>
    %13 = arith.mulf %11, %12 : vector<128x128xf32>
    %14 = arith.truncf %13 : vector<128x128xf32> to vector<128x128xbf16>
    %c0_6 = arith.constant 0 : index
    %c0_7 = arith.constant 0 : index
    %15 = vector.load %arg15[%c0_6, %c0_7] : memref<256x128xbf16, #tpu.memory_space<vmem>>, vector<256x128xbf16>
    %c0_8 = arith.constant 0 : index
    %c0_9 = arith.constant 0 : index
    %16 = vector.load %arg16[%c0_8, %c0_9] : memref<256x128xbf16, #tpu.memory_space<vmem>>, vector<256x128xbf16>
    %17 = vector.extract_strided_slice %14 {offsets = [0, 0], sizes = [128, 32], strides = [1, 1]} : vector<128x128xbf16> to vector<128x32xbf16>
    %18 = vector.extract_strided_slice %15 {offsets = [0, 0], sizes = [256, 32], strides = [1, 1]} : vector<256x128xbf16> to vector<256x32xbf16>
    %19 = vector.extract_strided_slice %16 {offsets = [0, 0], sizes = [256, 32], strides = [1, 1]} : vector<256x128xbf16> to vector<256x32xbf16>
    %cst_10 = arith.constant dense<0.000000e+00> : vector<128x256xf32>
    %20 = tpu.matmul %17, %18, %cst_10 {dimension_numbers = #tpu.dot_dimension_numbers<[1], [1], [0], [0], [0, 0, 1, 0], [], []>} : vector<128x32xbf16>, vector<256x32xbf16>, vector<128x256xf32> -> vector<128x256xf32>
    %cst_11 = arith.constant dense<0xFF800000> : vector<128xf32>
    %21 = vector.multi_reduction <maximumf>, %20, %cst_11 [1] : vector<128x256xf32> to vector<128xf32>
    %22 = vector.shape_cast %21 : vector<128xf32> to vector<128x1xf32>
    %23 = vector.broadcast %22 : vector<128x1xf32> to vector<128x256xf32>
    %24 = arith.subf %20, %23 : vector<128x256xf32>
    %25 = math.exp %24 : vector<128x256xf32>
    %cst_12 = arith.constant dense<0.000000e+00> : vector<128xf32>
    %26 = vector.multi_reduction <add>, %25, %cst_12 [1] : vector<128x256xf32> to vector<128xf32>
    %27 = vector.shape_cast %26 : vector<128xf32> to vector<128x1xf32>
    %28 = arith.truncf %25 : vector<128x256xf32> to vector<128x256xbf16>
    %cst_13 = arith.constant dense<0.000000e+00> : vector<128x32xf32>
    %29 = tpu.matmul %28, %19, %cst_13 {dimension_numbers = #tpu.dot_dimension_numbers<[1], [0], [0], [1], [0, 0, 1, 1], [], []>} : vector<128x256xbf16>, vector<256x32xbf16>, vector<128x32xf32> -> vector<128x32xf32>
    %30 = tpu.reciprocal %27 {approx = true} : vector<128x1xf32> -> vector<128x1xf32>
    %31 = vector.broadcast %30 : vector<128x1xf32> to vector<128x32xf32>
    %32 = arith.mulf %29, %31 : vector<128x32xf32>
    %33 = arith.truncf %32 : vector<128x32xf32> to vector<128x32xbf16>
    %34 = vector.extract_strided_slice %14 {offsets = [0, 32], sizes = [128, 32], strides = [1, 1]} : vector<128x128xbf16> to vector<128x32xbf16>
    %35 = vector.extract_strided_slice %15 {offsets = [0, 32], sizes = [256, 32], strides = [1, 1]} : vector<256x128xbf16> to vector<256x32xbf16>
    %36 = vector.extract_strided_slice %16 {offsets = [0, 32], sizes = [256, 32], strides = [1, 1]} : vector<256x128xbf16> to vector<256x32xbf16>
    %cst_14 = arith.constant dense<0.000000e+00> : vector<128x256xf32>
    %37 = tpu.matmul %34, %35, %cst_14 {dimension_numbers = #tpu.dot_dimension_numbers<[1], [1], [0], [0], [0, 0, 1, 0], [], []>} : vector<128x32xbf16>, vector<256x32xbf16>, vector<128x256xf32> -> vector<128x256xf32>
    %cst_15 = arith.constant dense<0xFF800000> : vector<128xf32>
    %38 = vector.multi_reduction <maximumf>, %37, %cst_15 [1] : vector<128x256xf32> to vector<128xf32>
    %39 = vector.shape_cast %38 : vector<128xf32> to vector<128x1xf32>
    %40 = vector.broadcast %39 : vector<128x1xf32> to vector<128x256xf32>
    %41 = arith.subf %37, %40 : vector<128x256xf32>
    %42 = math.exp %41 : vector<128x256xf32>
    %cst_16 = arith.constant dense<0.000000e+00> : vector<128xf32>
    %43 = vector.multi_reduction <add>, %42, %cst_16 [1] : vector<128x256xf32> to vector<128xf32>
    %44 = vector.shape_cast %43 : vector<128xf32> to vector<128x1xf32>
    %45 = arith.truncf %42 : vector<128x256xf32> to vector<128x256xbf16>
    %cst_17 = arith.constant dense<0.000000e+00> : vector<128x32xf32>
    %46 = tpu.matmul %45, %36, %cst_17 {dimension_numbers = #tpu.dot_dimension_numbers<[1], [0], [0], [1], [0, 0, 1, 1], [], []>} : vector<128x256xbf16>, vector<256x32xbf16>, vector<128x32xf32> -> vector<128x32xf32>
    %47 = tpu.reciprocal %44 {approx = true} : vector<128x1xf32> -> vector<128x1xf32>
    %48 = vector.broadcast %47 : vector<128x1xf32> to vector<128x32xf32>
    %49 = arith.mulf %46, %48 : vector<128x32xf32>
    %50 = arith.truncf %49 : vector<128x32xf32> to vector<128x32xbf16>
    %51 = vector.extract_strided_slice %14 {offsets = [0, 64], sizes = [128, 32], strides = [1, 1]} : vector<128x128xbf16> to vector<128x32xbf16>
    %52 = vector.extract_strided_slice %15 {offsets = [0, 64], sizes = [256, 32], strides = [1, 1]} : vector<256x128xbf16> to vector<256x32xbf16>
    %53 = vector.extract_strided_slice %16 {offsets = [0, 64], sizes = [256, 32], strides = [1, 1]} : vector<256x128xbf16> to vector<256x32xbf16>
    %cst_18 = arith.constant dense<0.000000e+00> : vector<128x256xf32>
    %54 = tpu.matmul %51, %52, %cst_18 {dimension_numbers = #tpu.dot_dimension_numbers<[1], [1], [0], [0], [0, 0, 1, 0], [], []>} : vector<128x32xbf16>, vector<256x32xbf16>, vector<128x256xf32> -> vector<128x256xf32>
    %cst_19 = arith.constant dense<0xFF800000> : vector<128xf32>
    %55 = vector.multi_reduction <maximumf>, %54, %cst_19 [1] : vector<128x256xf32> to vector<128xf32>
    %56 = vector.shape_cast %55 : vector<128xf32> to vector<128x1xf32>
    %57 = vector.broadcast %56 : vector<128x1xf32> to vector<128x256xf32>
    %58 = arith.subf %54, %57 : vector<128x256xf32>
    %59 = math.exp %58 : vector<128x256xf32>
    %cst_20 = arith.constant dense<0.000000e+00> : vector<128xf32>
    %60 = vector.multi_reduction <add>, %59, %cst_20 [1] : vector<128x256xf32> to vector<128xf32>
    %61 = vector.shape_cast %60 : vector<128xf32> to vector<128x1xf32>
    %62 = arith.truncf %59 : vector<128x256xf32> to vector<128x256xbf16>
    %cst_21 = arith.constant dense<0.000000e+00> : vector<128x32xf32>
    %63 = tpu.matmul %62, %53, %cst_21 {dimension_numbers = #tpu.dot_dimension_numbers<[1], [0], [0], [1], [0, 0, 1, 1], [], []>} : vector<128x256xbf16>, vector<256x32xbf16>, vector<128x32xf32> -> vector<128x32xf32>
    %64 = tpu.reciprocal %61 {approx = true} : vector<128x1xf32> -> vector<128x1xf32>
    %65 = vector.broadcast %64 : vector<128x1xf32> to vector<128x32xf32>
    %66 = arith.mulf %63, %65 : vector<128x32xf32>
    %67 = arith.truncf %66 : vector<128x32xf32> to vector<128x32xbf16>
    %68 = vector.extract_strided_slice %14 {offsets = [0, 96], sizes = [128, 32], strides = [1, 1]} : vector<128x128xbf16> to vector<128x32xbf16>
    %69 = vector.extract_strided_slice %15 {offsets = [0, 96], sizes = [256, 32], strides = [1, 1]} : vector<256x128xbf16> to vector<256x32xbf16>
    %70 = vector.extract_strided_slice %16 {offsets = [0, 96], sizes = [256, 32], strides = [1, 1]} : vector<256x128xbf16> to vector<256x32xbf16>
    %cst_22 = arith.constant dense<0.000000e+00> : vector<128x256xf32>
    %71 = tpu.matmul %68, %69, %cst_22 {dimension_numbers = #tpu.dot_dimension_numbers<[1], [1], [0], [0], [0, 0, 1, 0], [], []>} : vector<128x32xbf16>, vector<256x32xbf16>, vector<128x256xf32> -> vector<128x256xf32>
    %cst_23 = arith.constant dense<0xFF800000> : vector<128xf32>
    %72 = vector.multi_reduction <maximumf>, %71, %cst_23 [1] : vector<128x256xf32> to vector<128xf32>
    %73 = vector.shape_cast %72 : vector<128xf32> to vector<128x1xf32>
    %74 = vector.broadcast %73 : vector<128x1xf32> to vector<128x256xf32>
    %75 = arith.subf %71, %74 : vector<128x256xf32>
    %76 = math.exp %75 : vector<128x256xf32>
    %cst_24 = arith.constant dense<0.000000e+00> : vector<128xf32>
    %77 = vector.multi_reduction <add>, %76, %cst_24 [1] : vector<128x256xf32> to vector<128xf32>
    %78 = vector.shape_cast %77 : vector<128xf32> to vector<128x1xf32>
    %79 = arith.truncf %76 : vector<128x256xf32> to vector<128x256xbf16>
    %cst_25 = arith.constant dense<0.000000e+00> : vector<128x32xf32>
    %80 = tpu.matmul %79, %70, %cst_25 {dimension_numbers = #tpu.dot_dimension_numbers<[1], [0], [0], [1], [0, 0, 1, 1], [], []>} : vector<128x256xbf16>, vector<256x32xbf16>, vector<128x32xf32> -> vector<128x32xf32>
    %81 = tpu.reciprocal %78 {approx = true} : vector<128x1xf32> -> vector<128x1xf32>
    %82 = vector.broadcast %81 : vector<128x1xf32> to vector<128x32xf32>
    %83 = arith.mulf %80, %82 : vector<128x32xf32>
    %84 = arith.truncf %83 : vector<128x32xf32> to vector<128x32xbf16>
    %85 = tpu.concatenate %33, %50, %67, %84 in 1 : vector<128x32xbf16>, vector<128x32xbf16>, vector<128x32xbf16>, vector<128x32xbf16> -> vector<128x128xbf16>
    %c0_26 = arith.constant 0 : index
    %c0_27 = arith.constant 0 : index
    %86 = vector.load %arg11[%c0_26, %c0_27] : memref<128x128xbf16, #tpu.memory_space<vmem>>, vector<128x128xbf16>
    %cst_28 = arith.constant dense<0.000000e+00> : vector<128x128xf32>
    %87 = tpu.matmul %85, %86, %cst_28 {dimension_numbers = #tpu.dot_dimension_numbers<[1], [0], [0], [1], [0, 0, 1, 1], [], []>} : vector<128x128xbf16>, vector<128x128xbf16>, vector<128x128xf32> -> vector<128x128xf32>
    %c0_29 = arith.constant 0 : index
    %c0_30 = arith.constant 0 : index
    %88 = vector.load %arg12[%c0_29, %c0_30] : memref<1x128xf32, #tpu.memory_space<vmem>>, vector<1x128xf32>
    %89 = vector.broadcast %88 : vector<1x128xf32> to vector<128x128xf32>
    %90 = arith.addf %87, %89 : vector<128x128xf32>
    %91 = arith.index_cast %4 : i32 to index
    %c0_31 = arith.constant 0 : index
    %92 = vector.load %arg17[%91, %c0_31] : memref<256x128xf32, #tpu.memory_space<vmem>>, vector<128x128xf32>
    %93 = arith.addf %90, %92 : vector<128x128xf32>
    %94 = tpu.transpose %93, [1, 0] : vector<128x128xf32> -> vector<128x128xf32>
    %c0_32 = arith.constant 0 : index
    %c0_33 = arith.constant 0 : index
    %c0_34 = arith.constant 0 : index
    %95 = vector.load %arg13[%c0_32, %c0_33, %c0_34] : memref<1x128x128xf32, #tpu.memory_space<vmem>>, vector<1x128x128xf32>
    %96 = vector.shape_cast %95 : vector<1x128x128xf32> to vector<128x128xf32>
    %97 = vector.shape_cast %94 : vector<128x128xf32> to vector<1x128x128xf32>
    tpu.vector_store %arg13[%c0_32, %c0_33, %c0_34], %97 {strides = array<i32>} : memref<1x128x128xf32, #tpu.memory_space<vmem>>, vector<1x128x128xf32>,
    return
  }
  func.func @transform_0(%arg0: i32, %arg1: i32) -> (i32, i32, i32) {
    %c0_i32 = arith.constant 0 : i32
    %c0_i32_0 = arith.constant 0 : i32
    %c0_i32_1 = arith.constant 0 : i32
    return %arg0, %c0_i32, %c0_i32_0 : i32, i32, i32
  }
  func.func @transform_1(%arg0: i32, %arg1: i32) -> (i32, i32) {
    %c0_i32 = arith.constant 0 : i32
    %c0_i32_0 = arith.constant 0 : i32
    %c0_i32_1 = arith.constant 0 : i32
    return %c0_i32, %c0_i32_0 : i32, i32
  }
  func.func @transform_2(%arg0: i32, %arg1: i32) -> (i32, i32) {
    %c0_i32 = arith.constant 0 : i32
    %c0_i32_0 = arith.constant 0 : i32
    %c0_i32_1 = arith.constant 0 : i32
    return %c0_i32, %c0_i32_0 : i32, i32
  }
  func.func @transform_3(%arg0: i32, %arg1: i32) -> (i32, i32) {
    %c0_i32 = arith.constant 0 : i32
    %c0_i32_0 = arith.constant 0 : i32
    %c0_i32_1 = arith.constant 0 : i32
    return %c0_i32, %c0_i32_0 : i32, i32
  }
  func.func @transform_4(%arg0: i32, %arg1: i32) -> (i32, i32) {
    %c0_i32 = arith.constant 0 : i32
    %c0_i32_0 = arith.constant 0 : i32
    %c0_i32_1 = arith.constant 0 : i32
    return %c0_i32, %c0_i32_0 : i32, i32
  }
  func.func @transform_5(%arg0: i32, %arg1: i32) -> (i32, i32) {
    %c0_i32 = arith.constant 0 : i32
    %c0_i32_0 = arith.constant 0 : i32
    %c0_i32_1 = arith.constant 0 : i32
    return %c0_i32, %c0_i32_0 : i32, i32
  }
  func.func @transform_6(%arg0: i32, %arg1: i32) -> (i32, i32) {
    %c0_i32 = arith.constant 0 : i32
    %c0_i32_0 = arith.constant 0 : i32
    %c0_i32_1 = arith.constant 0 : i32
    return %c0_i32, %c0_i32_0 : i32, i32
  }
  func.func @transform_7(%arg0: i32, %arg1: i32) -> (i32, i32) {
    %c0_i32 = arith.constant 0 : i32
    %c0_i32_0 = arith.constant 0 : i32
    %c0_i32_1 = arith.constant 0 : i32
    return %c0_i32, %c0_i32_0 : i32, i32
  }
  func.func @transform_8(%arg0: i32, %arg1: i32) -> (i32, i32) {
    %c0_i32 = arith.constant 0 : i32
    %c0_i32_0 = arith.constant 0 : i32
    %c0_i32_1 = arith.constant 0 : i32
    return %c0_i32, %c0_i32_0 : i32, i32
  }
  func.func @transform_9(%arg0: i32, %arg1: i32) -> (i32, i32) {
    %c0_i32 = arith.constant 0 : i32
    %c0_i32_0 = arith.constant 0 : i32
    %c0_i32_1 = arith.constant 0 : i32
    return %c0_i32, %c0_i32_0 : i32, i32
  }
  func.func @transform_10(%arg0: i32, %arg1: i32) -> (i32, i32) {
    %c0_i32 = arith.constant 0 : i32
    %c0_i32_0 = arith.constant 0 : i32
    %c0_i32_1 = arith.constant 0 : i32
    return %c0_i32, %c0_i32_0 : i32, i32
  }
  func.func @transform_11(%arg0: i32, %arg1: i32) -> (i32, i32, i32) {
    %c0_i32 = arith.constant 0 : i32
    %c0_i32_0 = arith.constant 0 : i32
    return %arg0, %c0_i32, %arg1 : i32, i32, i32
  }
}

</mosaic_0001>

<bundles_post_ra>
// kernel: tpu_custom_call.1
= control target key start
LH: loop header
LB: loop body
LE: loop exit
PB: predicated region body
PF: predicated region fallthrough
CT: control target
= control target key end

     0   :  { %s9837_s0 = inlined_call_operand.hbm [shape: f32[2,128,256], index: 0, kind: input, shape index: {}]   ;;  %s9838_s1 = inlined_call_operand.vmem [shape: f32[128,1], index: 1, kind: input, shape index: {}]   ;;  %s9839_s2 = inlined_call_operand.vmem [shape: f32[128,1], index: 2, kind: input, shape index: {}]   ;;  %s9840_s3 = inlined_call_operand.vmem [shape: bf16[128,128], index: 3, kind: input, shape index: {}]   ;;  %s9841_s4 = inlined_call_operand.vmem [shape: f32[1,128], index: 4, kind: input, shape index: {}]   ;;  %s9842_s5 = inlined_call_operand.vmem [shape: bf16[128,128], index: 5, kind: input, shape index: {}]   ;;  %s9843_s6 = inlined_call_operand.vmem [shape: f32[1,128], index: 6, kind: input, shape index: {}]   ;;  %s9844_s7 = inlined_call_operand.vmem [shape: bf16[128,128], index: 7, kind: input, shape index: {}]   ;;  %s9845_s8 = inlined_call_operand.vmem [shape: f32[1,128], index: 8, kind: input, shape index: {}]   ;;  %s9846_s9 = inlined_call_operand.vmem [shape: bf16[128,128], index: 9, kind: input, shape index: {}]   ;;  %s9847_s10 = inlined_call_operand.vmem [shape: f32[1,128], index: 10, kind: input, shape index: {}]   ;;  %s9848_s11 = inlined_call_operand.hbm [shape: f32[2,128,256], index: 11, kind: output, shape index: {}]  }
   0x1   :  { %9969 = sst [smem:[#allocation125_spill]] %s9837_s0 }
   0x2   :  { %9970 = sst [smem:[#allocation126_spill]] %s9841_s4 }
   0x3   :  { %9971 = sst [smem:[#allocation127_spill]] %s9846_s9 }
   0x4   :  { %9972 = sst [smem:[#allocation128_spill]] %s9847_s10 }
   0x5   :  { %9973 = sst [smem:[#allocation129_spill]] %s9848_s11 }
   0x6   :  { %16 = vsyncpa [#allocation7], 0 }
   0x7   :  { %18 = vsyncpa [#allocation7 + $0x1], 0 }
   0x8   :  { %19 = vsyncpa [#allocation8], 0 }
   0x9   :  { %21 = vsyncpa [#allocation8 + $0x1], 0  ;;  %s6770_s17 = smov 0   ;;  %s6772_s18 = smov 0  }
   0xa   :  { %s6774_s19 = smov 0   ;;  %s6776_s20 = smov 0  }
   0xb   :  { %s6778_s21 = smov 0   ;;  %s6780_s22 = smov 0  }
   0xc   :  { %s6782_s23 = smov 0   ;;  %s6784_s24 = smov 0  }
   0xd   :  { %s6786_s25 = smov 0   ;;  %s6788_s26 = smov 0  }
   0xe   :  { %s6790_s27 = smov 0  }
   0xf LB: > { %9974 = sst [smem:[#allocation12_spill]] %s6684_s24  ;;  %s5171_s28 = sadd.s32 4294967295, %s6696_s27   ;;  %s6696_s27 = sphi %s6790_s27, %s27_s27   ;;  %s6692_s26 = sphi %s6788_s26, %s10284_s26   ;;  %s6688_s25 = sphi %s6786_s25, %s10291_s25   ;;  %s6684_s24 = sphi %s6784_s24, %s10282_s24   ;;  %s6680_s23 = sphi %s6782_s23, %s10281_s23   ;;  %s6676_s22 = sphi %s6780_s22, %s10290_s22   ;;  %s6672_s21 = sphi %s6778_s21, %s10289_s21   ;;  %s6668_s20 = sphi %s6776_s20, %s10288_s20   ;;  %s6664_s19 = sphi %s6774_s19, %s10287_s19   ;;  %s6660_s18 = sphi %s6772_s18, %s10286_s18   ;;  %s6656_s17 = sphi %s6770_s17, %s10285_s17  }
  0x10   : > { %9975 = sst [smem:[#allocation13_spill]] %s6688_s25  ;;  %s5172_s29 = sadd.s32 4294967294, %s6696_s27  }
  0x11   : > { %9976 = sst [smem:[#allocation14_spill]] %s6692_s26  ;;  %s36_s30 = sadd.s32 1, %s6688_s25 }
  0x12   : > { %s39_s12 = sadd.s32 1, %s6692_s26  ;;  %p37_p0 = scmp.ge.s32.totalorder %s36_s30, 2 }
  0x13   : > { %s46_s13 = sadd.s32 1, %s6676_s22  ;;  %p53_p1 = scmp.ne.s32.totalorder %s6676_s22, %s6672_s21 }
  0x14   : > { %p54_p2 = scmp.eq.s32.totalorder %s6696_s27, 0  ;;  %s10293_s30 = smov (%p37_p0, %s36_s30), 0 }
  0x15   : > { %9977 = sst [smem:[#allocation15_spill]] %s10293_s30  ;;  %s10295_s12 = smov (!%p37_p0, %s39_s12), %s6692_s26 }
  0x16   : > { %p6834_p3 = por %p54_p2, %p53_p1  ;;  %p59_p4 = scmp.ne.s32.totalorder %s6672_s21, %s6668_s20 }
  0x17   : > { %p41_p5 = scmp.ge.s32.totalorder %s10295_s12, 2  ;;  %p60_p6 = scmp.eq.s32.totalorder %s5171_s28, 0 }
  0x18   : > { %s280_s15 = ssub.s32 %s6688_s25, %s10293_s30  ;;  %s284_s16 = sadd.s32 1, %s6664_s19 }
  0x19   : > { %s10297_s12 = smov (%p41_p5, %s10295_s12), 0  ;;  %p6844_p7 = por %p60_p6, %p59_p4 }
  0x1a   : > { %9979 = sst [smem:[#allocation16_spill]] %s10297_s12  ;;  %p294_p8 = scmp.ne.s32.totalorder %s6664_s19, %s6660_s18 }
  0x1b   : > { %s43_s24 = ssub.s32 %s6692_s26, %s10297_s12  ;;  %p295_p9 = scmp.eq.s32.totalorder %s5171_s28, 3 }
  0x1c   : > { %p44_p10 = scmp.eq.s32.totalorder %s43_s24, 0  ;;  %s281_s20 = sor.u32 %s280_s15, %s43_s24 }
  0x1d   : > { %p282_p11 = scmp.eq.s32.totalorder %s281_s20, 0  ;;  %p6852_p12 = por %p295_p9, %p294_p8 }
  0x1e   : > { %s6857_s25 = scalar_select %p44_p10, %s6676_s22, %s46_s13  }
  0x1f   : > { %s9981_s30 = scalar_select %p6852_p12, 1, 0 }
  0x20   : > { %s6860_s10 = scalar_select %p282_p11, %s6664_s19, %s284_s16  }
  0x21   : > { %p300_p13 = scmp.ne.s32.totalorder %s6660_s18, %s6656_s17  ;;  %p301_p0 = scmp.eq.s32.totalorder %s5172_s29, 3 }
  0x22   : > { %p5958_p1 = scmp.lt.s32.totalorder %s6696_s27, 4  ;;  %s351_s28 = sand.u32 1, %s6676_s22  }
  0x23   : > { %p6865_p2 = por %p301_p0, %p300_p13  ;;  %s5175_s24 = sshll.u32 %s351_s28, 8 }
  0x24   : > { %s5273_s15 = sshll.u32 %s6692_s26, 12  ;;  %s9983_s0 = sld [smem:[#allocation125_spill]] }
  0x25   : > { %s9982_s9 = scalar_select %p6865_p2, 1, 0 }
  0x26   : > { %s355_s13 = scalar_lea.vmem [#allocation6], %s5175_s24  ;;  %p6880_p4 = pnand %p5958_p1, %p6834_p3 }
  0x27   : > { %s362_s16 = sshll.u32 %s355_s13, 4  ;;  %s6885_s26 = scalar_lea.sflag [#allocation7], %s351_s28  ;;  %s6876_s16 = int_to_ptr.vmem [resolvable:$true] %s362_s16 }
  0x28   : > { %p6546_p8 = pneg %p6880_p4 }
  0x2a   : > { %s6874_s4 = scalar_lea.hbm %s9983_s0, %s5273_s15  ;;  %s6549_s14 = scalar_lea.hbm %s9983_s0, 8192 }
  0x2b   : > { %s6544_s12 = scalar_lea.hbm %s6874_s4, 4096  ;;  %p6550_p3 = scmp.lt.u32.totalorder %s6874_s4, %s9983_s0 }
  0x2c   : > { %p6545_p6 = scmp.ne.s32.totalorder %s6874_s4, %s6544_s12  ;;  %p6551_p11 = scmp.lt.u32.totalorder %s6549_s14, %s6544_s12 }
  0x2d   : > { %p6553_p0 = scmp.lt.u32.totalorder %s6544_s12, %s6874_s4 }
  0x2e   : > { %p6547_p9 = pnand %p6546_p8, %p6545_p6  ;;  %p6552_p13 = por %p6551_p11, %p6550_p3 }
  0x30   : > { %p6548_p10 = pneg %p6547_p9  ;;  %p6554_p1 = por %p6553_p0, %p6552_p13 }
  0x32   : > { %p6555_p5 = pnand %p6554_p1, %p6548_p10 }
  0x34   : > { %6558 = shalt.err (!%p6555_p5)
}
  0x35   : > { %s6559_s28 = scalar_lea.vmem %s6876_s16, 4096  ;;  %s6698_s24 = smov [#allocation6]  }
  0x36   : > { %p6560_p6 = scmp.ne.s32.totalorder %s6876_s16, %s6559_s28  ;;  %s6564_s15 = sshll.u32 %s6698_s24, 4  ;;  %s6565_s15 = int_to_ptr.vmem [resolvable:$false] %s6564_s15 }
  0x37   : > { %s6566_s20 = scalar_lea.vmem %s6565_s15, 8192  ;;  %p6567_p12 = scmp.lt.s32.totalorder %s6876_s16, %s6565_s15 }
  0x38   : > { %p6562_p9 = pnand %p6560_p6, %p6546_p8  ;;  %p6568_p3 = scmp.lt.s32.totalorder %s6566_s20, %s6559_s28 }
  0x3a   : > { %p6563_p2 = pneg %p6562_p9  ;;  %p6569_p11 = por %p6568_p3, %p6567_p12 }
  0x3c   : > { %p6570_p13 = pnand %p6569_p11, %p6563_p2 }
  0x3e   : > { %6573 = shalt.err (!%p6570_p13)
}
  0x3f   : > { %s6699_s12 = smov 256   ;;  %s6700_s14 = smov 16  }
  0x40   : > { %5953 = dma.hbm_to_vmem [thread:$0]  (!%p6880_p4), %s6874_s4, 4096, %s6876_s16, %s6885_s26, %s6699_s12, %s6699_s12, %s6700_s14  }
  0x41   : > { %p370_p5 = scmp.lt.s32.totalorder %s6696_s27, 5  ;;  %p9985_p8 = scmp.ge.s32.totalorder %s6696_s27, 1 }
  0x43   : > { %p371_p10 = pnand %p9985_p8, %p370_p5 }
  0x45   : > { %374 = sbr.rel (%p371_p10) target bundleno = 3294 (0xcde), region = 64 }
  0x4c   : > { %s376_s13 = sand.u32 1, %s6672_s21  }
  0x4d   : > { %s5179_s28 = sshll.u32 %s376_s13, 8  ;;  %s377_s24 = scalar_lea.sflag [#allocation7], %s376_s13 }
  0x4e   : > { %s6917_s15 = scalar_lea.vmem [#allocation6], %s5179_s28 }
  0x4f   : > { %6647 = dma.done.wait (%p6844_p7), %s377_s24, 4096  }
  0x50   : > { %6649 = vsyncadd (%p6844_p7), %s377_s24, 4294963200  ;;  %s9856_s29 = sand.u32 1, %s6660_s18   ;;  %p5181_p12 = scmp.ne.s32.totalorder %s6680_s23, 0 }
  0x51   : > { %s5180_s4 = sshll.u32 %s9856_s29, 7 }
  0x52   : > { %s6926_s26 = scalar_lea.vmem [#allocation9], %s5180_s4  ;;  %423 = sbr.rel (%p5181_p12) target bundleno = 1232 (0x4d0), region = 72 }
  0x59   : > { %v6930_v0 = vld [vmem:[%s6917_s15] sm:$0xff]  ;;  %v6933_v1 = vld [vmem:[%s6917_s15 + $0x8] sm:$0xff]  ;;  %v6944_v5 = vld [vmem:[%s6917_s15 + $0x10] sm:$0xff]  ;;  %v6701_v7 = vmov 0  }
  0x5a   : > { %v6936_v2 = vld [vmem:[%s6917_s15 + $0x20] sm:$0xff]  ;;  %v654_v3 = vadd.f32 %v6933_v1, %v6930_v0  ;;  %v6941_v4 = vld [vmem:[%s6917_s15 + $0x28] sm:$0xff]  ;;  %v6947_v6 = vld [vmem:[%s6917_s15 + $0x18] sm:$0xff]  ;;  %6059 = vset.pattern.permute.xlu1 %v6701_v7  ;;  %6058 = vset.pattern.permute.xlu0 %v6701_v7 }
  0x5b   : > { %v660_v8 = vadd.f32 %v6941_v4, %v6936_v2  ;;  %v6952_v9 = vld [vmem:[%s6917_s15 + $0x30] sm:$0xff]  ;;  %v6955_v10 = vld [vmem:[%s6917_s15 + $0x38] sm:$0xff]  ;;  %v657_v11 = vadd.f32 %v6947_v6, %v6944_v5  ;;  %v6962_v13 = vld [vmem:[%s6917_s15 + $0x40] sm:$0xff] }
  0x5c   : > { %655 = vadd.xlane.f32.xlu0 %v654_v3  ;;  %v663_v12 = vadd.f32 %v6955_v10, %v6952_v9  ;;  %v6965_v14 = vld [vmem:[%s6917_s15 + $0x48] sm:$0xff]  ;;  %v6968_v15 = vld [vmem:[%s6917_s15 + $0x50] sm:$0xff]  ;;  %v6971_v16 = vld [vmem:[%s6917_s15 + $0x58] sm:$0xff]  ;;  %v552_v3 = vlaneseq }
  0x5d   : > { %661 = vadd.xlane.f32.xlu1 %v660_v8  ;;  %v666_v17 = vadd.f32 %v6965_v14, %v6962_v13  ;;  %v669_v18 = vadd.f32 %v6971_v16, %v6968_v15  ;;  %v6978_v19 = vld [vmem:[%s6917_s15 + $0x60] sm:$0xff]  ;;  %v6981_v20 = vld [vmem:[%s6917_s15 + $0x68] sm:$0xff]  ;;  %v6984_v21 = vld [vmem:[%s6917_s15 + $0x70] sm:$0xff] }
  0x5e   : > { %v6987_v22 = vld [vmem:[%s6917_s15 + $0x78] sm:$0xff]  ;;  %v672_v23 = vadd.f32 %v6981_v20, %v6978_v19  ;;  %v6994_v25 = vld [vmem:[%s6917_s15 + $0x80] sm:$0xff]  ;;  %v6997_v26 = vld [vmem:[%s6917_s15 + $0x88] sm:$0xff]  ;;  %v570_v7 = vand.u32 127, %v552_v3 }
  0x5f   : > { %v675_v24 = vadd.f32 %v6987_v22, %v6984_v21  ;;  %v7000_v27 = vld [vmem:[%s6917_s15 + $0x90] sm:$0xff]  ;;  %v7003_v28 = vld [vmem:[%s6917_s15 + $0x98] sm:$0xff]  ;;  %v7006_v29 = vld [vmem:[%s6917_s15 + $0xa0] sm:$0xff]  ;;  %v678_v31 = vadd.f32 %v6997_v26, %v6994_v25 }
  0x60   : > { %658 = vadd.xlane.f32.xlu0 %v657_v11  ;;  %v7009_v30 = vld [vmem:[%s6917_s15 + $0xa8] sm:$0xff]  ;;  %v7014_v32 = vld [vmem:[%s6917_s15 + $0xb0] sm:$0xff]  ;;  %v681_v33 = vadd.f32 %v7003_v28, %v7000_v27  ;;  %v7019_v34 = vld [vmem:[%s6917_s15 + $0xb8] sm:$0xff]  ;;  %v588_v8 = vadd.s32 1, %v570_v7  ;;  %v7102_v11 = vshrl.u32 %v552_v3, 7 }
  0x61   : > { %664 = vadd.xlane.f32.xlu1 %v663_v12  ;;  %v7022_v35 = vld [vmem:[%s6917_s15 + $0xc0] sm:$0xff]  ;;  %v684_v36 = vadd.f32 %v7009_v30, %v7006_v29  ;;  %v7027_v37 = vld [vmem:[%s6917_s15 + $0xc8] sm:$0xff]  ;;  %v687_v38 = vadd.f32 %v7019_v34, %v7014_v32  ;;  %v7032_v39 = vld [vmem:[%s6917_s15 + $0xd0] sm:$0xff]  ;;  %v7104_v12 = vmul.u32 4, %v570_v7 }
  0x62   : > { %v7035_v40 = vld [vmem:[%s6917_s15 + $0xd8] sm:$0xff]  ;;  %v690_v41 = vadd.f32 %v7027_v37, %v7022_v35  ;;  %v7040_v42 = vld [vmem:[%s6917_s15 + $0xe0] sm:$0xff]  ;;  %v7045_v44 = vld [vmem:[%s6917_s15 + $0xe8] sm:$0xff] }
  0x63   : > { %9986 = vst [vmem:[#allocation17_spill] sm:$0xff] %v7040_v42  ;;  %v693_v43 = vadd.f32 %v7035_v40, %v7032_v39  ;;  %9987 = vst [vmem:[#allocation18_spill] sm:$0xff] %v7045_v44  ;;  %v7048_v45 = vld [vmem:[%s6917_s15 + $0xf0] sm:$0xff]  ;;  %v7051_v46 = vld [vmem:[%s6917_s15 + $0xf8] sm:$0xff]  ;;  %v696_v47 = vadd.f32 %v7045_v44, %v7040_v42  ;;  %vm572_vm0 = vcmp.ge.s32.totalorder %v7102_v11, %v7104_v12 }
  0x64   : > { %667 = vadd.xlane.f32.xlu0 %v666_v17  ;;  %9988 = vst [vmem:[#allocation19_spill] sm:$0xff] %v7048_v45  ;;  %9989 = vst [vmem:[#allocation20_spill] sm:$0xff] %v7051_v46  ;;  %v699_v48 = vadd.f32 %v7051_v46, %v7048_v45  ;;  %v1146_v49 = vld [vmem:[%s9838_s1 + $0x8] sm:$0xff]  ;;  %v1147_v50 = vld [vmem:[%s9838_s1 + $0x10] sm:$0xff]  ;;  %v7106_v17 = vmul.u32 4, %v588_v8 }
  0x65   : > { %670 = vadd.xlane.f32.xlu1 %v669_v18  ;;  %v1145_v51 = vld [vmem:[%s9838_s1] sm:$0xff]  ;;  %v1148_v52 = vld [vmem:[%s9838_s1 + $0x18] sm:$0xff]  ;;  %v1274_v56 = vld [vmem:[%s9839_s2 + $0x8] sm:$0xff]  ;;  %v555_v18 = vadd.s32 16, %v7102_v11 }
  0x66   : > { %v1276_v53 = vld [vmem:[%s9839_s2 + $0x18] sm:$0xff]  ;;  %v1273_v54 = vld [vmem:[%s9839_s2] sm:$0xff]  ;;  %v1278_v57 = vld [vmem:[%s9839_s2 + $0x28] sm:$0xff]  ;;  %vm590_vm1 = vcmp.lt.s32.totalorder %v7102_v11, %v7106_v17 }
  0x67   : > { %v1152_v55 = vld [vmem:[%s9838_s1 + $0x38] sm:$0xff]  ;;  %v1149_v58 = vld [vmem:[%s9838_s1 + $0x20] sm:$0xff]  ;;  %v1150_v59 = vld [vmem:[%s9838_s1 + $0x28] sm:$0xff]  ;;  %vm574_vm2 = vcmp.ge.s32.totalorder %v555_v18, %v7104_v12  ;;  %vm592_vm3 = vcmp.lt.s32.totalorder %v555_v18, %v7106_v17 }
  0x68   : > { %673 = vadd.xlane.f32.xlu0 %v672_v23  ;;  %v1275_v60 = vld [vmem:[%s9839_s2 + $0x10] sm:$0xff]  ;;  %v1277_v62 = vld [vmem:[%s9839_s2 + $0x20] sm:$0xff]  ;;  %v554_v23 = vadd.s32 8, %v7102_v11  ;;  %vm606_vm6 = vmand %vm572_vm0, %vm590_vm1 }
  0x69   : > { %676 = vadd.xlane.f32.xlu1 %v675_v24  ;;  %v1151_v61 = vld [vmem:[%s9838_s1 + $0x30] sm:$0xff]  ;;  %v1153_v63 = vld [vmem:[%s9838_s1 + $0x40] sm:$0xff]  ;;  %v556_v24 = vadd.s32 24, %v7102_v11  ;;  %vm608_vm9 = vmand %vm574_vm2, %vm592_vm3  ;;  %vm718_vm2 = vcmask 261120  }
  0x6a   : > { %vm573_vm4 = vcmp.ge.s32.totalorder %v554_v23, %v7104_v12  ;;  %vm591_vm5 = vcmp.lt.s32.totalorder %v554_v23, %v7106_v17  ;;  %v563_v23 = vadd.s32 80, %v7102_v11 }
  0x6b   : > { %vm575_vm7 = vcmp.ge.s32.totalorder %v556_v24, %v7104_v12  ;;  %vm593_vm8 = vcmp.lt.s32.totalorder %v556_v24, %v7106_v17  ;;  %vm607_vm10 = vmand %vm573_vm4, %vm591_vm5 }
  0x6c   : > { %679 = vadd.xlane.f32.xlu0 %v678_v31  ;;  %v557_v31 = vadd.s32 32, %v7102_v11  ;;  %vm609_vm13 = vmand %vm575_vm7, %vm593_vm8 }
  0x6d   : > { %682 = vadd.xlane.f32.xlu1 %v681_v33  ;;  %v558_v33 = vadd.s32 40, %v7102_v11 }
  0x6e   : > { %vm576_vm11 = vcmp.ge.s32.totalorder %v557_v31, %v7104_v12  ;;  %vm594_vm12 = vcmp.lt.s32.totalorder %v557_v31, %v7106_v17 }
  0x6f   : > { %vm577_vm14 = vcmp.ge.s32.totalorder %v558_v33, %v7104_v12  ;;  %vm595_vm15 = vcmp.lt.s32.totalorder %v558_v33, %v7106_v17  ;;  %vm7138_vm0 = vmand %vm576_vm11, %vm594_vm12 }
  0x70   : > { %685 = vadd.xlane.f32.xlu0 %v684_v36  ;;  %v6702_v36 = vmov 0.0   ;;  %vm611_vm1 = vmand %vm577_vm14, %vm595_vm15  ;;  %vm582_vm15 = vcmp.ge.s32.totalorder %v563_v23, %v7104_v12 }
  0x71   : > { %688 = vadd.xlane.f32.xlu1 %v687_v38  ;;  %v7126_v38 = vsel %vm606_vm6, 1.0, %v6702_v36 }
  0x74   : > { %691 = vadd.xlane.f32.xlu0 %v690_v41 }
  0x75   : > { %694 = vadd.xlane.f32.xlu1 %v693_v43  ;;  %v559_v43 = vadd.s32 48, %v7102_v11 }
  0x77   : > { %vm578_vm3 = vcmp.ge.s32.totalorder %v559_v43, %v7104_v12  ;;  %vm596_vm4 = vcmp.lt.s32.totalorder %v559_v43, %v7106_v17  ;;  %v564_v43 = vadd.s32 88, %v7102_v11 }
  0x78   : > { %697 = vadd.xlane.f32.xlu0 %v696_v47  ;;  %vm7165_vm7 = vmand %vm578_vm3, %vm596_vm4 }
  0x79   : > { %700 = vadd.xlane.f32.xlu1 %v699_v48  ;;  %v560_v48 = vadd.s32 56, %v7102_v11  ;;  %vm601_vm3 = vcmp.lt.s32.totalorder %v564_v43, %v7106_v17 }
  0x7b   : > { %vm579_vm5 = vcmp.ge.s32.totalorder %v560_v48, %v7104_v12  ;;  %vm597_vm6 = vcmp.lt.s32.totalorder %v560_v48, %v7106_v17 }
  0x8a   : > { %1168 = vperm.xlu1 %6059, %v1146_v49   ;;  %v7133_v49 = vsel %vm608_vm9, 1.0, %v6702_v36 }
  0x8e   : > { %1173 = vperm.xlu1 %6059, %v1147_v50   ;;  %1163 = vperm.xlu0 %6058, %v1145_v51   ;;  %v7136_v50 = vsel %vm607_vm10, 1.0, %v6702_v36  ;;  %vm613_vm10 = vmand %vm579_vm5, %vm597_vm6  ;;  %v7182_v51 = vsel %vm7165_vm7, 1.0, %v6702_v36 }
  0x92   : > { %1178 = vperm.xlu1 %6059, %v1148_v52   ;;  %1306 = vperm.xlu0 %6058, %v1276_v53   ;;  %v7144_v53 = vsel %vm609_vm13, 1.0, %v6702_v36 }
  0x96   : > { %1291 = vperm.xlu1 %6059, %v1273_v54   ;;  %1198 = vperm.xlu0 %6058, %v1152_v55   ;;  %v561_v54 = vadd.s32 64, %v7102_v11 }
  0x98   : > { %vm580_vm8 = vcmp.ge.s32.totalorder %v561_v54, %v7104_v12  ;;  %vm598_vm9 = vcmp.lt.s32.totalorder %v561_v54, %v7106_v17 }
  0x99   : > { %vm614_vm13 = vmand %vm580_vm8, %vm598_vm9 }
  0x9a   : > { %1296 = vperm.xlu1 %6059, %v1274_v56   ;;  %1316 = vperm.xlu0 %6058, %v1278_v57   ;;  %v562_v56 = vadd.s32 72, %v7102_v11 }
  0x9c   : > { %vm581_vm11 = vcmp.ge.s32.totalorder %v562_v56, %v7104_v12  ;;  %vm599_vm12 = vcmp.lt.s32.totalorder %v562_v56, %v7106_v17  ;;  %v7206_v56 = vsel %vm614_vm13, 1.0, %v6702_v36 }
  0x9d   : > { %vm615_vm14 = vmand %vm581_vm11, %vm599_vm12 }
  0x9e   : > { %1183 = vperm.xlu1 %6059, %v1149_v58  }
  0xa2   : > { %1188 = vperm.xlu1 %6059, %v1150_v59  }
  0xa6   : > { %1301 = vperm.xlu1 %6059, %v1275_v60  }
  0xaa   : > { %1193 = vperm.xlu1 %6059, %v1151_v61   ;;  %v7158_v61 = vsel %vm7138_vm0, 1.0, %v6702_v36  ;;  %vm600_vm0 = vcmp.lt.s32.totalorder %v563_v23, %v7106_v17  ;;  %v7210_v23 = vsel %vm615_vm14, 1.0, %v6702_v36 }
  0xab   : > { %vm616_vm4 = vmand %vm582_vm15, %vm600_vm0 }
  0xae   : > { %1311 = vperm.xlu1 %6059, %v1277_v62   ;;  %v7161_v62 = vsel %vm611_vm1, 1.0, %v6702_v36  ;;  %vm583_vm1 = vcmp.ge.s32.totalorder %v564_v43, %v7104_v12 }
  0xaf   : > { %vm617_vm6 = vmand %vm583_vm1, %vm601_vm3 }
  0xb2   : > { %1203 = vperm.xlu1 %6059, %v1153_v63  }
  0xe9   : > { %v656_v41 = vpop.xlane.xlu0 %655 }
  0xea   : > { %v662_v47 = vpop.xlane.xlu1 %661  ;;  %v702_v52 = vmul.f32 %v7126_v38, %v656_v41 }
  0xeb   : > { %v704_v57 = vmul.f32 %v7133_v49, %v662_v47 }
  0xec   : > { %v719_v63 = vsel %vm718_vm2, %v702_v52, 0.0 }
  0xed   : > { %v659_v55 = vpop.xlane.xlu0 %658  ;;  %v722_v24 = vsel %vm718_vm2, %v704_v57, 0.0  ;;  %v565_v57 = vadd.s32 96, %v7102_v11 }
  0xee   : > { %v703_v58 = vmul.f32 %v7136_v50, %v659_v55  ;;  %v665_v59 = vpop.xlane.xlu1 %664  ;;  %v7186_v55 = vsel %vm613_vm10, 1.0, %v6702_v36 }
  0xef   : > { %v705_v60 = vmul.f32 %v7144_v53, %v665_v59  ;;  %vm584_vm5 = vcmp.ge.s32.totalorder %v565_v57, %v7104_v12  ;;  %vm602_vm7 = vcmp.lt.s32.totalorder %v565_v57, %v7106_v17 }
  0xf0   : > { %v720_v3 = vsel %vm718_vm2, %v703_v58, 0.0  ;;  %vm618_vm10 = vmand %vm584_vm5, %vm602_vm7 }
  0xf1   : > { %v721_v8 = vadd.f32 %v720_v3, %v719_v63  ;;  %v668_v18 = vpop.xlane.xlu0 %667  ;;  %v724_v31 = vsel %vm718_vm2, %v705_v60, 0.0  ;;  %v566_v60 = vadd.s32 104, %v7102_v11 }
  0xf2   : > { %v706_v33 = vmul.f32 %v7158_v61, %v668_v18  ;;  %v671_v41 = vpop.xlane.xlu1 %670 }
  0xf3   : > { %v723_v47 = vadd.f32 %v722_v24, %v721_v8  ;;  %v707_v48 = vmul.f32 %v7161_v62, %v671_v41  ;;  %vm585_vm8 = vcmp.ge.s32.totalorder %v566_v60, %v7104_v12  ;;  %vm603_vm9 = vcmp.lt.s32.totalorder %v566_v60, %v7106_v17 }
  0xf4   : > { %v726_v52 = vsel %vm718_vm2, %v706_v33, 0.0  ;;  %v567_v33 = vadd.s32 112, %v7102_v11  ;;  %vm619_vm11 = vmand %vm585_vm8, %vm603_vm9 }
  0xf5   : > { %v725_v58 = vadd.f32 %v724_v31, %v723_v47  ;;  %v674_v59 = vpop.xlane.xlu0 %673  ;;  %v728_v63 = vsel %vm718_vm2, %v707_v48, 0.0  ;;  %v568_v48 = vadd.s32 120, %v7102_v11 }
  0xf6   : > { %v708_v54 = vmul.f32 %v7182_v51, %v674_v59  ;;  %v677_v3 = vpop.xlane.xlu1 %676  ;;  %v7222_v59 = vsel %vm616_vm4, 1.0, %v6702_v36  ;;  %vm586_vm12 = vcmp.ge.s32.totalorder %v567_v33, %v7104_v12  ;;  %vm604_vm13 = vcmp.lt.s32.totalorder %v567_v33, %v7106_v17 }
  0xf7   : > { %v727_v7 = vadd.f32 %v726_v52, %v725_v58  ;;  %v709_v8 = vmul.f32 %v7186_v55, %v677_v3  ;;  %vm587_vm14 = vcmp.ge.s32.totalorder %v568_v48, %v7104_v12  ;;  %vm605_vm15 = vcmp.lt.s32.totalorder %v568_v48, %v7106_v17  ;;  %vm620_vm0 = vmand %vm586_vm12, %vm604_vm13 }
  0xf8   : > { %v730_v18 = vsel %vm718_vm2, %v708_v54, 0.0  ;;  %v7226_v54 = vsel %vm617_vm6, 1.0, %v6702_v36  ;;  %vm621_vm1 = vmand %vm587_vm14, %vm605_vm15 }
  0xf9   : > { %v729_v24 = vadd.f32 %v728_v63, %v727_v7  ;;  %v680_v31 = vpop.xlane.xlu0 %679  ;;  %v732_v41 = vsel %vm718_vm2, %v709_v8, 0.0 }
  0xfa   : > { %v710_v43 = vmul.f32 %v7206_v56, %v680_v31  ;;  %v683_v47 = vpop.xlane.xlu1 %682  ;;  %v7240_v31 = vsel %vm618_vm10, 1.0, %v6702_v36 }
  0xfb   : > { %v731_v52 = vadd.f32 %v730_v18, %v729_v24  ;;  %v711_v58 = vmul.f32 %v7210_v23, %v683_v47 }
  0xfc   : > { %v734_v63 = vsel %vm718_vm2, %v710_v43, 0.0 }
  0xfd   : > { %v733_v3 = vadd.f32 %v732_v41, %v731_v52  ;;  %v686_v7 = vpop.xlane.xlu0 %685  ;;  %v736_v11 = vsel %vm718_vm2, %v711_v58, 0.0  ;;  %v7244_v41 = vsel %vm619_vm11, 1.0, %v6702_v36  ;;  %v7250_v58 = vsel %vm620_vm0, 1.0, %v6702_v36 }
  0xfe   : > { %v712_v8 = vmul.f32 %v7222_v59, %v686_v7  ;;  %v689_v18 = vpop.xlane.xlu1 %688 }
  0xff   : > { %v735_v57 = vadd.f32 %v734_v63, %v733_v3  ;;  %v713_v24 = vmul.f32 %v7226_v54, %v689_v18  ;;  %v7254_v3 = vsel %vm621_vm1, 1.0, %v6702_v36 }
 0x100   : > { %v738_v60 = vsel %vm718_vm2, %v712_v8, 0.0 }
 0x101   : > { %v737_v33 = vadd.f32 %v736_v11, %v735_v57  ;;  %v692_v43 = vpop.xlane.xlu0 %691  ;;  %v740_v47 = vsel %vm718_vm2, %v713_v24, 0.0 }
 0x102   : > { %v714_v12 = vmul.f32 %v7240_v31, %v692_v43  ;;  %v695_v17 = vpop.xlane.xlu1 %694 }
 0x103   : > { %v739_v48 = vadd.f32 %v738_v60, %v737_v33  ;;  %v715_v52 = vmul.f32 %v7244_v41, %v695_v17 }
 0x104   : > { %v742_v63 = vsel %vm718_vm2, %v714_v12, 0.0 }
 0x105   : > { %v741_v7 = vadd.f32 %v740_v47, %v739_v48  ;;  %v698_v11 = vpop.xlane.xlu0 %697  ;;  %v744_v8 = vsel %vm718_vm2, %v715_v52, 0.0 }
 0x106   : > { %v716_v18 = vmul.f32 %v7250_v58, %v698_v11  ;;  %v701_v57 = vpop.xlane.xlu1 %700 }
 0x107   : > { %v743_v24 = vadd.f32 %v742_v63, %v741_v7  ;;  %v717_v60 = vmul.f32 %v7254_v3, %v701_v57 }
 0x108   : > { %v746_v33 = vsel %vm718_vm2, %v716_v18, 0.0 }
 0x109   : > { %v745_v43 = vadd.f32 %v744_v8, %v743_v24  ;;  %v748_v17 = vsel %vm718_vm2, %v717_v60, 0.0 }
 0x10b   : > { %v747_v46 = vadd.f32 %v746_v33, %v745_v43 }
 0x10d   : > { %v749_v12 = vadd.f32 %v748_v17, %v747_v46 }
 0x10f   : > { %v750_v45 = vrot.slane %v749_v12, 4 }
 0x111   : > { %v751_v36 = vadd.f32 %v750_v45, %v749_v12 }
 0x113   : > { %v752_v44 = vrot.slane %v751_v36, 2 }
 0x115   : > { %v753_v47 = vadd.f32 %v752_v44, %v751_v36 }
 0x117   : > { %v754_v48 = vrot.slane %v753_v47, 1 }
 0x119   : > { %v755_v42 = vadd.f32 %v754_v48, %v753_v47 }
 0x11b   : > { %v757_v52 = vmul.f32 %v7136_v50, %v755_v42  ;;  %v756_v11 = vmul.f32 %v7126_v38, %v755_v42  ;;  %v759_v8 = vmul.f32 %v7144_v53, %v755_v42  ;;  %v758_v18 = vmul.f32 %v7133_v49, %v755_v42 }
 0x11c   : > { %v761_v46 = vmul.f32 %v7161_v62, %v755_v42  ;;  %v760_v57 = vmul.f32 %v7158_v61, %v755_v42  ;;  %v763_v33 = vmul.f32 %v7186_v55, %v755_v42  ;;  %v762_v43 = vmul.f32 %v7182_v51, %v755_v42 }
 0x11d   : > { %v775_v63 = vsel %vm718_vm2, %v757_v52, 0.0  ;;  %v772_v7 = vsel %vm718_vm2, %v756_v11, 0.0  ;;  %v781_v45 = vsel %vm718_vm2, %v759_v8, 0.0  ;;  %v778_v44 = vsel %vm718_vm2, %v758_v18, 0.0 }
 0x11e   : > { %776 = vadd.xlane.f32.xlu1 %v775_v63  ;;  %773 = vadd.xlane.f32.xlu0 %v772_v7  ;;  %v787_v24 = vsel %vm718_vm2, %v761_v46, 0.0  ;;  %v784_v60 = vsel %vm718_vm2, %v760_v57, 0.0  ;;  %v793_v17 = vsel %vm718_vm2, %v763_v33, 0.0  ;;  %v790_v12 = vsel %vm718_vm2, %v762_v43, 0.0  ;;  %v1154_v33 = vld [vmem:[%s9838_s1 + $0x48] sm:$0xff] }
 0x11f   : > { %v765_v36 = vmul.f32 %v7210_v23, %v755_v42  ;;  %v764_v47 = vmul.f32 %v7206_v56, %v755_v42  ;;  %v767_v11 = vmul.f32 %v7226_v54, %v755_v42  ;;  %v766_v63 = vmul.f32 %v7222_v59, %v755_v42 }
 0x120   : > { %v769_v18 = vmul.f32 %v7244_v41, %v755_v42  ;;  %v770_v57 = vmul.f32 %v7250_v58, %v755_v42  ;;  %v771_v43 = vmul.f32 %v7254_v3, %v755_v42 }
 0x121   : > { %v799_v48 = vsel %vm718_vm2, %v765_v36, 0.0  ;;  %v796_v52 = vsel %vm718_vm2, %v764_v47, 0.0  ;;  %v805_v7 = vsel %vm718_vm2, %v767_v11, 0.0  ;;  %v802_v8 = vsel %vm718_vm2, %v766_v63, 0.0 }
 0x122   : > { %782 = vadd.xlane.f32.xlu1 %v781_v45  ;;  %779 = vadd.xlane.f32.xlu0 %v778_v44  ;;  %v768_v45 = vmul.f32 %v7240_v31, %v755_v42  ;;  %v811_v44 = vsel %vm718_vm2, %v769_v18, 0.0  ;;  %v7315_v42 = vpop.permute.xlu0 %1163 }
 0x124   : > { %v808_v46 = vsel %vm718_vm2, %v768_v45, 0.0 }
 0x126   : > { %788 = vadd.xlane.f32.xlu1 %v787_v24  ;;  %785 = vadd.xlane.f32.xlu0 %v784_v60  ;;  %v814_v24 = vsel %vm718_vm2, %v770_v57, 0.0  ;;  %v1279_v60 = vld [vmem:[%s9839_s2 + $0x30] sm:$0xff]  ;;  %v7319_v18 = vpop.permute.xlu0 %1306 }
 0x127   : > { %10001 = vst [vmem:[#allocation28_spill] sm:$0xff] %v7319_v18 }
 0x12a   : > { %794 = vadd.xlane.f32.xlu1 %v793_v17  ;;  %791 = vadd.xlane.f32.xlu0 %v790_v12  ;;  %v817_v17 = vsel %vm718_vm2, %v771_v43, 0.0  ;;  %v7299_v12 = vpop.permute.xlu1 %1168 }
 0x12e   : > { %800 = vadd.xlane.f32.xlu1 %v799_v48  ;;  %797 = vadd.xlane.f32.xlu0 %v796_v52  ;;  %v7301_v36 = vpop.permute.xlu1 %1173 }
 0x12f   : > { %9994 = vst [vmem:[#allocation21_spill] sm:$0xff] %v7301_v36 }
 0x132   : > { %806 = vadd.xlane.f32.xlu1 %v805_v7  ;;  %803 = vadd.xlane.f32.xlu0 %v802_v8  ;;  %v7303_v47 = vpop.permute.xlu1 %1178 }
 0x133   : > { %9995 = vst [vmem:[#allocation22_spill] sm:$0xff] %v7303_v47 }
 0x136   : > { %812 = vadd.xlane.f32.xlu1 %v811_v44  ;;  %809 = vadd.xlane.f32.xlu0 %v808_v46  ;;  %v7305_v48 = vpop.permute.xlu1 %1291  ;;  %v7323_v44 = vpop.permute.xlu0 %1198 }
 0x137   : > { %9996 = vst [vmem:[#allocation23_spill] sm:$0xff] %v7305_v48  ;;  %10003 = vst [vmem:[#allocation30_spill] sm:$0xff] %v7323_v44 }
 0x13a   : > { %815 = vadd.xlane.f32.xlu0 %v814_v24  ;;  %v7307_v52 = vpop.permute.xlu1 %1296  ;;  %v7327_v57 = vpop.permute.xlu0 %1316 }
 0x13b   : > { %10005 = vst [vmem:[#allocation32_spill] sm:$0xff] %v7327_v57 }
 0x13e   : > { %v7309_v11 = vpop.permute.xlu1 %1183 }
 0x13f   : > { %9997 = vst [vmem:[#allocation24_spill] sm:$0xff] %v7309_v11 }
 0x142   : > { %v7311_v63 = vpop.permute.xlu1 %1188 }
 0x143   : > { %9998 = vst [vmem:[#allocation25_spill] sm:$0xff] %v7311_v63 }
 0x146   : > { %v7313_v7 = vpop.permute.xlu1 %1301 }
 0x147   : > { %1321 = vperm.xlu1 %6059, %v1279_v60   ;;  %9999 = vst [vmem:[#allocation26_spill] sm:$0xff] %v7313_v7 }
 0x14a   : > { %v7317_v8 = vpop.permute.xlu1 %1193 }
 0x14b   : > { %10000 = vst [vmem:[#allocation27_spill] sm:$0xff] %v7317_v8 }
 0x14e   : > { %v7321_v45 = vpop.permute.xlu1 %1311 }
 0x14f   : > { %10002 = vst [vmem:[#allocation29_spill] sm:$0xff] %v7321_v45 }
 0x150   : > { %1208 = vperm.xlu0 %6058, %v1154_v33  }
 0x152   : > { %v7325_v46 = vpop.permute.xlu1 %1203 }
 0x153   : > { %10004 = vst [vmem:[#allocation31_spill] sm:$0xff] %v7325_v46 }
 0x16b   : > { %818 = vadd.xlane.f32.xlu1 %v817_v17 }
 0x1ab   : > { %v777_v24 = vpop.xlane.xlu1 %776  ;;  %v774_v60 = vpop.xlane.xlu0 %773 }
 0x1ac   : > { %v821_v33 = vmul.f32 0.0009765625, %v777_v24  ;;  %v820_v43 = vmul.f32 0.0009765625, %v774_v60 }
 0x1ae   : > { %v7330_v17 = vsub.f32 %v6944_v5, %v821_v33  ;;  %v7333_v63 = vsub.f32 %v6947_v6, %v821_v33  ;;  %v7336_v8 = vsub.f32 %v6930_v0, %v820_v43  ;;  %v7339_v45 = vsub.f32 %v6933_v1, %v820_v43 }
 0x1af   : > { %v783_v44 = vpop.xlane.xlu1 %782  ;;  %v780_v46 = vpop.xlane.xlu0 %779 }
 0x1b0   : > { %v823_v11 = vmul.f32 0.0009765625, %v783_v44  ;;  %v822_v57 = vmul.f32 0.0009765625, %v780_v46  ;;  %v870_v24 = vmul.f32 %v7330_v17, %v7330_v17  ;;  %v871_v5 = vmul.f32 %v7333_v63, %v7333_v63 }
 0x1b1   : > { %v868_v6 = vmul.f32 %v7336_v8, %v7336_v8  ;;  %v869_v0 = vmul.f32 %v7339_v45, %v7339_v45 }
 0x1b2   : > { %v7350_v60 = vsub.f32 %v6952_v9, %v823_v11  ;;  %v7353_v1 = vsub.f32 %v6955_v10, %v823_v11  ;;  %v7356_v44 = vsub.f32 %v6936_v2, %v822_v57  ;;  %v7359_v46 = vsub.f32 %v6941_v4, %v822_v57 }
 0x1b3   : > { %v789_v33 = vpop.xlane.xlu1 %788  ;;  %v786_v43 = vpop.xlane.xlu0 %785  ;;  %v903_v18 = vadd.f32 %v871_v5, %v870_v24  ;;  %v900_v7 = vadd.f32 %v869_v0, %v868_v6 }
 0x1b4   : > { %v825_v47 = vmul.f32 0.0009765625, %v789_v33  ;;  %v824_v36 = vmul.f32 0.0009765625, %v786_v43  ;;  %v874_v48 = vmul.f32 %v7350_v60, %v7350_v60  ;;  %v875_v9 = vmul.f32 %v7353_v1, %v7353_v1 }
 0x1b5   : > { %904 = vadd.xlane.f32.xlu1 %v903_v18  ;;  %901 = vadd.xlane.f32.xlu0 %v900_v7  ;;  %v872_v2 = vmul.f32 %v7356_v44, %v7356_v44  ;;  %v873_v4 = vmul.f32 %v7359_v46, %v7359_v46 }
 0x1b6   : > { %v7370_v10 = vsub.f32 %v6968_v15, %v825_v47  ;;  %v7373_v11 = vsub.f32 %v6971_v16, %v825_v47  ;;  %v7376_v57 = vsub.f32 %v6962_v13, %v824_v36  ;;  %v7379_v24 = vsub.f32 %v6965_v14, %v824_v36 }
 0x1b7   : > { %v795_v18 = vpop.xlane.xlu1 %794  ;;  %v792_v7 = vpop.xlane.xlu0 %791  ;;  %v909_v5 = vadd.f32 %v875_v9, %v874_v48  ;;  %v906_v6 = vadd.f32 %v873_v4, %v872_v2 }
 0x1b8   : > { %v827_v0 = vmul.f32 0.0009765625, %v795_v18  ;;  %v826_v33 = vmul.f32 0.0009765625, %v792_v7  ;;  %v878_v43 = vmul.f32 %v7370_v10, %v7370_v10  ;;  %v879_v15 = vmul.f32 %v7373_v11, %v7373_v11 }
 0x1b9   : > { %910 = vadd.xlane.f32.xlu1 %v909_v5  ;;  %907 = vadd.xlane.f32.xlu0 %v906_v6  ;;  %v876_v13 = vmul.f32 %v7376_v57, %v7376_v57  ;;  %v877_v14 = vmul.f32 %v7379_v24, %v7379_v24 }
 0x1ba   : > { %v7390_v16 = vsub.f32 %v6984_v21, %v827_v0  ;;  %v7393_v36 = vsub.f32 %v6987_v22, %v827_v0  ;;  %v7396_v47 = vsub.f32 %v6978_v19, %v826_v33  ;;  %v7399_v48 = vsub.f32 %v6981_v20, %v826_v33 }
 0x1bb   : > { %v801_v9 = vpop.xlane.xlu1 %800  ;;  %v798_v2 = vpop.xlane.xlu0 %797  ;;  %v915_v4 = vadd.f32 %v879_v15, %v878_v43  ;;  %v912_v18 = vadd.f32 %v877_v14, %v876_v13 }
 0x1bc   : > { %v829_v7 = vmul.f32 0.0009765625, %v801_v9  ;;  %v828_v5 = vmul.f32 0.0009765625, %v798_v2  ;;  %v882_v6 = vmul.f32 %v7390_v16, %v7390_v16  ;;  %v883_v21 = vmul.f32 %v7393_v36, %v7393_v36 }
 0x1bd   : > { %916 = vadd.xlane.f32.xlu1 %v915_v4  ;;  %913 = vadd.xlane.f32.xlu0 %v912_v18  ;;  %v880_v19 = vmul.f32 %v7396_v47, %v7396_v47  ;;  %v881_v20 = vmul.f32 %v7399_v48, %v7399_v48 }
 0x1be   : > { %v7410_v22 = vsub.f32 %v7000_v27, %v829_v7  ;;  %v7413_v0 = vsub.f32 %v7003_v28, %v829_v7  ;;  %v7416_v33 = vsub.f32 %v6994_v25, %v828_v5  ;;  %v7419_v43 = vsub.f32 %v6997_v26, %v828_v5 }
 0x1bf   : > { %v807_v15 = vpop.xlane.xlu1 %806  ;;  %v804_v13 = vpop.xlane.xlu0 %803  ;;  %v921_v14 = vadd.f32 %v883_v21, %v882_v6  ;;  %v918_v9 = vadd.f32 %v881_v20, %v880_v19 }
 0x1c0   : > { %v831_v2 = vmul.f32 0.0009765625, %v807_v15  ;;  %v830_v4 = vmul.f32 0.0009765625, %v804_v13  ;;  %v886_v18 = vmul.f32 %v7410_v22, %v7410_v22  ;;  %v887_v27 = vmul.f32 %v7413_v0, %v7413_v0 }
 0x1c1   : > { %922 = vadd.xlane.f32.xlu1 %v921_v14  ;;  %919 = vadd.xlane.f32.xlu0 %v918_v9  ;;  %v884_v25 = vmul.f32 %v7416_v33, %v7416_v33  ;;  %v885_v26 = vmul.f32 %v7419_v43, %v7419_v43 }
 0x1c2   : > { %v7430_v28 = vsub.f32 %v7014_v32, %v831_v2  ;;  %v7433_v7 = vsub.f32 %v7019_v34, %v831_v2  ;;  %v7436_v5 = vsub.f32 %v7006_v29, %v830_v4  ;;  %v7439_v6 = vsub.f32 %v7009_v30, %v830_v4 }
 0x1c3   : > { %v813_v21 = vpop.xlane.xlu1 %812  ;;  %v810_v19 = vpop.xlane.xlu0 %809  ;;  %v927_v20 = vadd.f32 %v887_v27, %v886_v18  ;;  %v924_v15 = vadd.f32 %v885_v26, %v884_v25 }
 0x1c4   : > { %v833_v13 = vmul.f32 0.0009765625, %v813_v21  ;;  %v832_v14 = vmul.f32 0.0009765625, %v810_v19  ;;  %v890_v9 = vmul.f32 %v7430_v28, %v7430_v28  ;;  %v891_v32 = vmul.f32 %v7433_v7, %v7433_v7 }
 0x1c5   : > { %928 = vadd.xlane.f32.xlu1 %v927_v20  ;;  %925 = vadd.xlane.f32.xlu0 %v924_v15  ;;  %v888_v29 = vmul.f32 %v7436_v5, %v7436_v5  ;;  %v889_v30 = vmul.f32 %v7439_v6, %v7439_v6  ;;  %v10011_v15 = vld [vmem:[#allocation18_spill] sm:$0xff] }
 0x1c6   : > { %v7450_v34 = vsub.f32 %v7032_v39, %v833_v13  ;;  %v7453_v2 = vsub.f32 %v7035_v40, %v833_v13  ;;  %v7456_v4 = vsub.f32 %v7022_v35, %v832_v14  ;;  %v7459_v18 = vsub.f32 %v7027_v37, %v832_v14  ;;  %v10009_v37 = vld [vmem:[#allocation17_spill] sm:$0xff] }
 0x1c7   : > { %v816_v27 = vpop.xlane.xlu0 %815  ;;  %v933_v25 = vadd.f32 %v891_v32, %v890_v9  ;;  %v930_v26 = vadd.f32 %v889_v30, %v888_v29 }
 0x1c8   : > { %10006 = vst [vmem:[#allocation33_spill] sm:$0xff] %v7450_v34  ;;  %10007 = vst [vmem:[#allocation34_spill] sm:$0xff] %v7456_v4  ;;  %v834_v21 = vmul.f32 0.0009765625, %v816_v27  ;;  %v894_v19 = vmul.f32 %v7450_v34, %v7450_v34  ;;  %v895_v39 = vmul.f32 %v7453_v2, %v7453_v2  ;;  %v892_v40 = vmul.f32 %v7456_v4, %v7456_v4  ;;  %v1155_v27 = vld [vmem:[%s9838_s1 + $0x50] sm:$0xff] }
 0x1c9   : > { %10008 = vst [vmem:[#allocation35_spill] sm:$0xff] %v7459_v18  ;;  %934 = vadd.xlane.f32.xlu1 %v933_v25  ;;  %931 = vadd.xlane.f32.xlu0 %v930_v26  ;;  %v893_v35 = vmul.f32 %v7459_v18, %v7459_v18  ;;  %v1280_v25 = vld [vmem:[%s9839_s2 + $0x38] sm:$0xff] }
 0x1ca   : > { %v7470_v20 = vsub.f32 %v10009_v37, %v834_v21  ;;  %v7473_v13 = vsub.f32 %v10011_v15, %v834_v21  ;;  %v939_v14 = vadd.f32 %v895_v39, %v894_v19  ;;  %v1156_v26 = vld [vmem:[%s9838_s1 + $0x58] sm:$0xff]  ;;  %v1282_v21 = vld [vmem:[%s9839_s2 + $0x48] sm:$0xff]  ;;  %v7494_v39 = vpop.permute.xlu1 %1321 }
 0x1cb   : > { %v936_v9 = vadd.f32 %v893_v35, %v892_v40  ;;  %v1158_v19 = vld [vmem:[%s9838_s1 + $0x68] sm:$0xff]  ;;  %v1284_v40 = vld [vmem:[%s9839_s2 + $0x58] sm:$0xff] }
 0x1cc   : > { %10010 = vst [vmem:[#allocation17_spill] sm:$0xff] %v7470_v20  ;;  %10012 = vst [vmem:[#allocation18_spill] sm:$0xff] %v7473_v13  ;;  %v896_v32 = vmul.f32 %v7470_v20, %v7470_v20  ;;  %v897_v29 = vmul.f32 %v7473_v13, %v7473_v13  ;;  %v1160_v37 = vld [vmem:[%s9838_s1 + $0x78] sm:$0xff] }
 0x1cd   : > { %940 = vadd.xlane.f32.xlu1 %v939_v14  ;;  %937 = vadd.xlane.f32.xlu0 %v936_v9  ;;  %v10013_v14 = vld [vmem:[#allocation19_spill] sm:$0xff] }
 0x1ce   : > { %v942_v30 = vadd.f32 %v897_v29, %v896_v32  ;;  %v10015_v32 = vld [vmem:[#allocation20_spill] sm:$0xff] }
 0x1d1   : > { %943 = vadd.xlane.f32.xlu0 %v942_v30  ;;  %v1286_v30 = vld [vmem:[%s9839_s2 + $0x68] sm:$0xff] }
 0x1de   : > { %1213 = vperm.xlu1 %6059, %v1155_v27  }
 0x1e7   : > { %1326 = vperm.xlu0 %6058, %v1280_v25  }
 0x1eb   : > { %1218 = vperm.xlu0 %6058, %v1156_v26  }
 0x1ef   : > { %1336 = vperm.xlu0 %6058, %v1282_v21   ;;  %v1281_v21 = vld [vmem:[%s9839_s2 + $0x40] sm:$0xff] }
 0x1f3   : > { %1228 = vperm.xlu0 %6058, %v1158_v19   ;;  %v1157_v19 = vld [vmem:[%s9838_s1 + $0x60] sm:$0xff] }
 0x1f7   : > { %1346 = vperm.xlu0 %6058, %v1284_v40   ;;  %v1283_v40 = vld [vmem:[%s9839_s2 + $0x50] sm:$0xff] }
 0x1f8   : > { %v819_v35 = vpop.xlane.xlu1 %818 }
 0x1f9   : > { %v835_v15 = vmul.f32 0.0009765625, %v819_v35  ;;  %v1159_v35 = vld [vmem:[%s9838_s1 + $0x70] sm:$0xff] }
 0x1fb   : > { %v7503_v9 = vsub.f32 %v10013_v14, %v835_v15  ;;  %v7506_v29 = vsub.f32 %v10015_v32, %v835_v15  ;;  %1238 = vperm.xlu0 %6058, %v1160_v37   ;;  %v1285_v37 = vld [vmem:[%s9839_s2 + $0x60] sm:$0xff]  ;;  %v7530_v15 = vpop.permute.xlu0 %1208 }
 0x1fd   : > { %10014 = vst [vmem:[#allocation19_spill] sm:$0xff] %v7503_v9  ;;  %10016 = vst [vmem:[#allocation20_spill] sm:$0xff] %v7506_v29  ;;  %v898_v27 = vmul.f32 %v7503_v9, %v7503_v9  ;;  %v899_v25 = vmul.f32 %v7506_v29, %v7506_v29 }
 0x1ff   : > { %1356 = vperm.xlu0 %6058, %v1286_v30   ;;  %v945_v26 = vadd.f32 %v899_v25, %v898_v27 }
 0x202   : > { %946 = vadd.xlane.f32.xlu1 %v945_v26 }
 0x213   : > { %1331 = vperm.xlu1 %6059, %v1281_v21  }
 0x217   : > { %1223 = vperm.xlu1 %6059, %v1157_v19  }
 0x21b   : > { %1341 = vperm.xlu1 %6059, %v1283_v40  }
 0x21f   : > { %1233 = vperm.xlu1 %6059, %v1159_v35  }
 0x223   : > { %1351 = vperm.xlu1 %6059, %v1285_v37  }
 0x242   : > { %v902_v14 = vpop.xlane.xlu0 %901  ;;  %v905_v32 = vpop.xlane.xlu1 %904 }
 0x243   : > { %v949_v27 = vmul.f32 %v7136_v50, %v905_v32  ;;  %v948_v25 = vmul.f32 %v7126_v38, %v902_v14 }
 0x245   : > { %v965_v21 = vsel %vm718_vm2, %v949_v27, 0.0  ;;  %v964_v19 = vsel %vm718_vm2, %v948_v25, 0.0 }
 0x246   : > { %v908_v30 = vpop.xlane.xlu0 %907  ;;  %v911_v40 = vpop.xlane.xlu1 %910  ;;  %v966_v13 = vadd.f32 %v965_v21, %v964_v19 }
 0x247   : > { %v950_v26 = vmul.f32 %v7133_v49, %v908_v30  ;;  %v951_v20 = vmul.f32 %v7144_v53, %v911_v40 }
 0x249   : > { %v967_v35 = vsel %vm718_vm2, %v950_v26, 0.0  ;;  %v969_v32 = vsel %vm718_vm2, %v951_v20, 0.0 }
 0x24a   : > { %v914_v37 = vpop.xlane.xlu0 %913  ;;  %v968_v34 = vadd.f32 %v967_v35, %v966_v13  ;;  %v917_v9 = vpop.xlane.xlu1 %916 }
 0x24b   : > { %v952_v29 = vmul.f32 %v7158_v61, %v914_v37  ;;  %v953_v27 = vmul.f32 %v7161_v62, %v917_v9 }
 0x24c   : > { %v970_v14 = vadd.f32 %v969_v32, %v968_v34 }
 0x24d   : > { %v971_v30 = vsel %vm718_vm2, %v952_v29, 0.0  ;;  %v973_v26 = vsel %vm718_vm2, %v953_v27, 0.0 }
 0x24e   : > { %v920_v18 = vpop.xlane.xlu0 %919  ;;  %v972_v25 = vadd.f32 %v971_v30, %v970_v14  ;;  %v923_v21 = vpop.xlane.xlu1 %922 }
 0x24f   : > { %v954_v4 = vmul.f32 %v7182_v51, %v920_v18  ;;  %v955_v35 = vmul.f32 %v7186_v55, %v923_v21 }
 0x250   : > { %v974_v19 = vadd.f32 %v973_v26, %v972_v25 }
 0x251   : > { %v975_v13 = vsel %vm718_vm2, %v954_v4, 0.0  ;;  %v977_v29 = vsel %vm718_vm2, %v955_v35, 0.0 }
 0x252   : > { %v926_v40 = vpop.xlane.xlu0 %925  ;;  %v976_v20 = vadd.f32 %v975_v13, %v974_v19  ;;  %v929_v37 = vpop.xlane.xlu1 %928 }
 0x253   : > { %v956_v34 = vmul.f32 %v7206_v56, %v926_v40  ;;  %v957_v18 = vmul.f32 %v7210_v23, %v929_v37 }
 0x254   : > { %v978_v32 = vadd.f32 %v977_v29, %v976_v20 }
 0x255   : > { %v979_v9 = vsel %vm718_vm2, %v956_v34, 0.0  ;;  %v981_v4 = vsel %vm718_vm2, %v957_v18, 0.0 }
 0x256   : > { %v932_v14 = vpop.xlane.xlu0 %931  ;;  %v980_v30 = vadd.f32 %v979_v9, %v978_v32  ;;  %v935_v25 = vpop.xlane.xlu1 %934 }
 0x257   : > { %v958_v27 = vmul.f32 %v7222_v59, %v932_v14  ;;  %v959_v13 = vmul.f32 %v7226_v54, %v935_v25 }
 0x258   : > { %v982_v26 = vadd.f32 %v981_v4, %v980_v30 }
 0x259   : > { %v983_v21 = vsel %vm718_vm2, %v958_v27, 0.0  ;;  %v985_v20 = vsel %vm718_vm2, %v959_v13, 0.0 }
 0x25a   : > { %v938_v19 = vpop.xlane.xlu0 %937  ;;  %v984_v40 = vadd.f32 %v983_v21, %v982_v26  ;;  %v941_v34 = vpop.xlane.xlu1 %940 }
 0x25b   : > { %v960_v35 = vmul.f32 %v7240_v31, %v938_v19  ;;  %v961_v9 = vmul.f32 %v7244_v41, %v941_v34 }
 0x25c   : > { %v986_v29 = vadd.f32 %v985_v20, %v984_v40 }
 0x25d   : > { %v987_v37 = vsel %vm718_vm2, %v960_v35, 0.0  ;;  %v989_v27 = vsel %vm718_vm2, %v961_v9, 0.0 }
 0x25e   : > { %v944_v32 = vpop.xlane.xlu0 %943  ;;  %v988_v14 = vadd.f32 %v987_v37, %v986_v29  ;;  %v7560_v30 = vpop.permute.xlu1 %1213 }
 0x25f   : > { %v962_v18 = vmul.f32 %v7250_v58, %v944_v32  ;;  %10017 = vst [vmem:[#allocation36_spill] sm:$0xff] %v7560_v30 }
 0x260   : > { %v990_v4 = vadd.f32 %v989_v27, %v988_v14 }
 0x261   : > { %v991_v25 = vsel %vm718_vm2, %v962_v18, 0.0 }
 0x262   : > { %v992_v19 = vadd.f32 %v991_v25, %v990_v4 }
 0x28f   : > { %v947_v26 = vpop.xlane.xlu1 %946 }
 0x290   : > { %v963_v21 = vmul.f32 %v7254_v3, %v947_v26 }
 0x292   : > { %v993_v13 = vsel %vm718_vm2, %v963_v21, 0.0 }
 0x293   : > { %v994_v40 = vadd.f32 %v993_v13, %v992_v19 }
 0x295   : > { %v995_v35 = vrot.slane %v994_v40, 4 }
 0x297   : > { %v996_v20 = vadd.f32 %v995_v35, %v994_v40 }
 0x299   : > { %v997_v34 = vrot.slane %v996_v20, 2 }
 0x29b   : > { %v998_v29 = vadd.f32 %v997_v34, %v996_v20 }
 0x29d   : > { %v999_v37 = vrot.slane %v998_v29, 1 }
 0x29f   : > { %v1000_v32 = vadd.f32 %v999_v37, %v998_v29 }
 0x2a1   : > { %v1002_v30 = vmul.f32 %v7136_v50, %v1000_v32  ;;  %v1001_v9 = vmul.f32 %v7126_v38, %v1000_v32  ;;  %v1004_v27 = vmul.f32 %v7144_v53, %v1000_v32  ;;  %v1003_v4 = vmul.f32 %v7133_v49, %v1000_v32 }
 0x2a2   : > { %v1006_v21 = vmul.f32 %v7161_v62, %v1000_v32  ;;  %v1005_v50 = vmul.f32 %v7158_v61, %v1000_v32  ;;  %v1008_v53 = vmul.f32 %v7186_v55, %v1000_v32  ;;  %v1007_v49 = vmul.f32 %v7182_v51, %v1000_v32 }
 0x2a3   : > { %v1020_v14 = vsel %vm718_vm2, %v1002_v30, 0.0  ;;  %v1017_v18 = vsel %vm718_vm2, %v1001_v9, 0.0  ;;  %v1026_v25 = vsel %vm718_vm2, %v1004_v27, 0.0  ;;  %v1023_v26 = vsel %vm718_vm2, %v1003_v4, 0.0  ;;  %v6064_v27 = vld [vmem:[%s9842_s5 + $0x10] sm:$0xff]  }
 0x2a4   : > { %1021 = vadd.xlane.f32.xlu1 %v1020_v14  ;;  %1018 = vadd.xlane.f32.xlu0 %v1017_v18  ;;  %v1032_v38 = vsel %vm718_vm2, %v1006_v21, 0.0  ;;  %v1029_v30 = vsel %vm718_vm2, %v1005_v50, 0.0  ;;  %v1038_v19 = vsel %vm718_vm2, %v1008_v53, 0.0  ;;  %v1035_v13 = vsel %vm718_vm2, %v1007_v49, 0.0  ;;  %v6063_v18 = vld [vmem:[%s9844_s7 + $0x8] sm:$0xff]   ;;  %v6065_v4 = vld [vmem:[%s9844_s7 + $0x10] sm:$0xff]  }
 0x2a5   : > { %v1010_v62 = vmul.f32 %v7210_v23, %v1000_v32  ;;  %v1009_v61 = vmul.f32 %v7206_v56, %v1000_v32  ;;  %v1012_v55 = vmul.f32 %v7226_v54, %v1000_v32  ;;  %v1011_v51 = vmul.f32 %v7222_v59, %v1000_v32  ;;  %v6068_v21 = vld [vmem:[%s9842_s5 + $0x20] sm:$0xff]   ;;  %v6072_v53 = vld [vmem:[%s9842_s5 + $0x30] sm:$0xff]  }
 0x2a6   : > { %v1014_v23 = vmul.f32 %v7244_v41, %v1000_v32  ;;  %v1013_v56 = vmul.f32 %v7240_v31, %v1000_v32  ;;  %v1016_v54 = vmul.f32 %v7254_v3, %v1000_v32  ;;  %v1015_v59 = vmul.f32 %v7250_v58, %v1000_v32  ;;  %v1287_v31 = vld [vmem:[%s9839_s2 + $0x70] sm:$0xff]  ;;  %v1288_v41 = vld [vmem:[%s9839_s2 + $0x78] sm:$0xff]  ;;  %v6060_v58 = vld [vmem:[%s9842_s5] sm:$0xff]  }
 0x2a7   : > { %v1044_v40 = vsel %vm718_vm2, %v1010_v62, 0.0  ;;  %v1041_v35 = vsel %vm718_vm2, %v1009_v61, 0.0  ;;  %v1050_v20 = vsel %vm718_vm2, %v1012_v55, 0.0  ;;  %v1047_v34 = vsel %vm718_vm2, %v1011_v51, 0.0  ;;  %v6061_v3 = vld [vmem:[%s9844_s7] sm:$0xff]   ;;  %v6062_v32 = vld [vmem:[%s9842_s5 + $0x8] sm:$0xff]   ;;  %5738 = vmatprep.subr.bf16.mxu0 %v6060_v58  ;;  %v7652_v61 = vpop.permute.xlu1 %1331 }
 0x2a8   : > { %1027 = vadd.xlane.f32.xlu1 %v1026_v25  ;;  %1024 = vadd.xlane.f32.xlu0 %v1023_v26  ;;  %v1056_v29 = vsel %vm718_vm2, %v1014_v23, 0.0  ;;  %v1053_v37 = vsel %vm718_vm2, %v1013_v56, 0.0  ;;  %v1062_v9 = vsel %vm718_vm2, %v1016_v54, 0.0  ;;  %v1059_v14 = vsel %vm718_vm2, %v1015_v59, 0.0  ;;  %v6066_v25 = vld [vmem:[%s9842_s5 + $0x18] sm:$0xff]   ;;  %v6069_v50 = vld [vmem:[%s9844_s7 + $0x20] sm:$0xff]  }
 0x2a9   : > { %5786 = vmatprep.subr.bf16.mxu1 %v6061_v3  ;;  %5739 = vmatpush3.bf16.msra.mxu0 %v6060_v58  ;;  %v6067_v26 = vld [vmem:[%s9844_s7 + $0x18] sm:$0xff]   ;;  %v6073_v49 = vld [vmem:[%s9844_s7 + $0x30] sm:$0xff]  }
 0x2aa   : > { %5787 = vmatpush3.bf16.msra.mxu1 %v6061_v3  ;;  %5740 = vmatprep.subr.bf16.mxu0 %v6062_v32 }
 0x2ab   : > { %5788 = vmatprep.subr.bf16.mxu1 %v6063_v18 }
 0x2ac   : > { %1033 = vadd.xlane.f32.xlu1 %v1032_v38  ;;  %1030 = vadd.xlane.f32.xlu0 %v1029_v30  ;;  %v6070_v38 = vld [vmem:[%s9842_s5 + $0x28] sm:$0xff]  }
 0x2ad   : > { %5741 = vmatpush3.bf16.msra.mxu0 %v6062_v32  ;;  %v6071_v30 = vld [vmem:[%s9844_s7 + $0x28] sm:$0xff]   ;;  %v6074_v32 = vld [vmem:[%s9842_s5 + $0x38] sm:$0xff]  }
 0x2ae   : > { %5789 = vmatpush3.bf16.msra.mxu1 %v6063_v18  ;;  %5742 = vmatprep.subr.bf16.mxu0 %v6064_v27  ;;  %v6075_v18 = vld [vmem:[%s9844_s7 + $0x38] sm:$0xff]  }
 0x2af   : > { %5790 = vmatprep.subr.bf16.mxu1 %v6065_v4 }
 0x2b0   : > { %1039 = vadd.xlane.f32.xlu1 %v1038_v19  ;;  %1036 = vadd.xlane.f32.xlu0 %v1035_v13  ;;  %v7646_v19 = vpop.permute.xlu0 %1326 }
 0x2b1   : > { %5743 = vmatpush3.bf16.msra.mxu0 %v6064_v27 }
 0x2b2   : > { %5791 = vmatpush3.bf16.msra.mxu1 %v6065_v4  ;;  %5744 = vmatprep.subr.bf16.mxu0 %v6066_v25 }
 0x2b3   : > { %5792 = vmatprep.subr.bf16.mxu1 %v6067_v26 }
 0x2b4   : > { %1045 = vadd.xlane.f32.xlu1 %v1044_v40  ;;  %1042 = vadd.xlane.f32.xlu0 %v1041_v35  ;;  %v7648_v13 = vpop.permute.xlu0 %1218  ;;  %v7656_v35 = vpop.permute.xlu1 %1223 }
 0x2b5   : > { %5745 = vmatpush3.bf16.msra.mxu0 %v6066_v25 }
 0x2b6   : > { %5793 = vmatpush3.bf16.msra.mxu1 %v6067_v26  ;;  %5746 = vmatprep.subr.bf16.mxu0 %v6068_v21 }
 0x2b7   : > { %5794 = vmatprep.subr.bf16.mxu1 %v6069_v50 }
 0x2b8   : > { %1051 = vadd.xlane.f32.xlu1 %v1050_v20  ;;  %1048 = vadd.xlane.f32.xlu0 %v1047_v34  ;;  %v7650_v62 = vpop.permute.xlu0 %1336  ;;  %v7660_v51 = vpop.permute.xlu1 %1341 }
 0x2b9   : > { %5747 = vmatpush3.bf16.msra.mxu0 %v6068_v21 }
 0x2ba   : > { %5795 = vmatpush3.bf16.msra.mxu1 %v6069_v50  ;;  %5748 = vmatprep.subr.bf16.mxu0 %v6070_v38 }
 0x2bb   : > { %5796 = vmatprep.subr.bf16.mxu1 %v6071_v30 }
 0x2bc   : > { %1057 = vadd.xlane.f32.xlu1 %v1056_v29  ;;  %1054 = vadd.xlane.f32.xlu0 %v1053_v37  ;;  %v7654_v40 = vpop.permute.xlu0 %1228  ;;  %v7664_v34 = vpop.permute.xlu1 %1233 }
 0x2bd   : > { %5749 = vmatpush3.bf16.msra.mxu0 %v6070_v38 }
 0x2be   : > { %5797 = vmatpush3.bf16.msra.mxu1 %v6071_v30  ;;  %5750 = vmatprep.subr.bf16.mxu0 %v6072_v53 }
 0x2bf   : > { %5798 = vmatprep.subr.bf16.mxu1 %v6073_v49 }
 0x2c0   : > { %1063 = vadd.xlane.f32.xlu1 %v1062_v9  ;;  %1060 = vadd.xlane.f32.xlu0 %v1059_v14  ;;  %v7658_v55 = vpop.permute.xlu0 %1346  ;;  %v7668_v56 = vpop.permute.xlu1 %1351 }
 0x2c1   : > { %5751 = vmatpush3.bf16.msra.mxu0 %v6072_v53 }
 0x2c2   : > { %5799 = vmatpush3.bf16.msra.mxu1 %v6073_v49  ;;  %5752 = vmatprep.subr.bf16.mxu0 %v6074_v32 }
 0x2c3   : > { %5800 = vmatprep.subr.bf16.mxu1 %v6075_v18 }
 0x2c4   : > { %v7662_v20 = vpop.permute.xlu0 %1238 }
 0x2c5   : > { %5753 = vmatpush3.bf16.msra.mxu0 %v6074_v32 }
 0x2c6   : > { %5801 = vmatpush3.bf16.msra.mxu1 %v6075_v18 }
 0x2c8   : > { %v7666_v23 = vpop.permute.xlu0 %1356 }
 0x2d1   : > { %1361 = vperm.xlu1 %6059, %v1287_v31  }
 0x2d6   : > { %1366 = vperm.xlu0 %6058, %v1288_v41  }
 0x331   : > { %v1022_v29 = vpop.xlane.xlu1 %1021  ;;  %v1019_v37 = vpop.xlane.xlu0 %1018 }
 0x332   : > { %v1066_v54 = vmul.f32 0.0009765625, %v1022_v29  ;;  %v1065_v59 = vmul.f32 0.0009765625, %v1019_v37 }
 0x334   : > { %v1082_v9 = vadd.f32 1e-05, %v1066_v54  ;;  %v1081_v14 = vadd.f32 1e-05, %v1065_v59 }
 0x335   : > { %v1028_v31 = vpop.xlane.xlu1 %1027  ;;  %v1025_v41 = vpop.xlane.xlu0 %1024 }
 0x336   : > { %6076 = vrsqrt.f32 %v1082_v9  ;;  %v1068_v58 = vmul.f32 0.0009765625, %v1028_v31  ;;  %v1067_v3 = vmul.f32 0.0009765625, %v1025_v41 }
 0x337   : > { %6078 = vrsqrt.f32 %v1081_v14 }
 0x338   : > { %v1084_v27 = vadd.f32 1e-05, %v1068_v58  ;;  %v1083_v4 = vadd.f32 1e-05, %v1067_v3 }
 0x339   : > { %v1034_v25 = vpop.xlane.xlu1 %1033  ;;  %v1031_v26 = vpop.xlane.xlu0 %1030 }
 0x33a   : > { %6080 = vrsqrt.f32 %v1084_v27  ;;  %v1070_v21 = vmul.f32 0.0009765625, %v1034_v25  ;;  %v1069_v50 = vmul.f32 0.0009765625, %v1031_v26 }
 0x33b   : > { %6082 = vrsqrt.f32 %v1083_v4 }
 0x33c   : > { %v1086_v38 = vadd.f32 1e-05, %v1070_v21  ;;  %v1085_v30 = vadd.f32 1e-05, %v1069_v50 }
 0x33d   : > { %v1040_v53 = vpop.xlane.xlu1 %1039  ;;  %v1037_v49 = vpop.xlane.xlu0 %1036 }
 0x33e   : > { %6084 = vrsqrt.f32 %v1086_v38  ;;  %v1072_v29 = vmul.f32 0.0009765625, %v1040_v53  ;;  %v1071_v37 = vmul.f32 0.0009765625, %v1037_v49 }
 0x33f   : > { %6086 = vrsqrt.f32 %v1085_v30 }
 0x340   : > { %v6077_v54 = vpop.eup %6076  ;;  %v1088_v59 = vadd.f32 1e-05, %v1072_v29  ;;  %v1087_v9 = vadd.f32 1e-05, %v1071_v37 }
 0x341   : > { %v6079_v14 = vpop.eup %6078  ;;  %v1115_v31 = vmul.f32 %v6077_v54, %v7330_v17  ;;  %v1116_v41 = vmul.f32 %v6077_v54, %v7333_v63  ;;  %v1046_v58 = vpop.xlane.xlu1 %1045 }
 0x342   : > { %v1043_v3 = vpop.xlane.xlu0 %1042  ;;  %v1113_v32 = vmul.f32 %v6079_v14, %v7336_v8  ;;  %v1114_v18 = vmul.f32 %v6079_v14, %v7339_v45  ;;  %6088 = vrsqrt.f32 %v1088_v59  ;;  %v1074_v27 = vmul.f32 0.0009765625, %v1046_v58 }
 0x343   : > { %6090 = vrsqrt.f32 %v1087_v9  ;;  %v1073_v4 = vmul.f32 0.0009765625, %v1043_v3  ;;  %v1244_v25 = vmul.f32 %v7299_v12, %v1116_v41  ;;  %v1243_v63 = vmul.f32 %v7299_v12, %v1115_v31  ;;  %v10018_v9 = vld [vmem:[#allocation23_spill] sm:$0xff]  ;;  %v10019_v41 = vld [vmem:[#allocation21_spill] sm:$0xff]  ;;  %v10020_v3 = vld [vmem:[#allocation22_spill] sm:$0xff] }
 0x344   : > { %v6081_v26 = vpop.eup %6080  ;;  %v1090_v21 = vadd.f32 1e-05, %v1074_v27  ;;  %v1242_v50 = vmul.f32 %v7315_v42, %v1114_v18  ;;  %v1241_v17 = vmul.f32 %v7315_v42, %v1113_v32 }
 0x345   : > { %v6083_v38 = vpop.eup %6082  ;;  %v1119_v30 = vmul.f32 %v6081_v26, %v7350_v60  ;;  %v1120_v8 = vmul.f32 %v6081_v26, %v7353_v1  ;;  %v1089_v45 = vadd.f32 1e-05, %v1073_v4  ;;  %v1052_v53 = vpop.xlane.xlu1 %1051  ;;  %v1372_v29 = vadd.f32 %v7307_v52, %v1244_v25 }
 0x346   : > { %v1049_v49 = vpop.xlane.xlu0 %1048  ;;  %v1117_v37 = vmul.f32 %v6083_v38, %v7356_v44  ;;  %v1118_v54 = vmul.f32 %v6083_v38, %v7359_v46  ;;  %6092 = vrsqrt.f32 %v1090_v21  ;;  %v1076_v59 = vmul.f32 0.0009765625, %v1052_v53  ;;  %v10021_v38 = vld [vmem:[#allocation26_spill] sm:$0xff]  ;;  %v10022_v53 = vld [vmem:[#allocation28_spill] sm:$0xff] }
 0x347   : > { %6094 = vrsqrt.f32 %v1089_v45  ;;  %v1075_v42 = vmul.f32 0.0009765625, %v1049_v49  ;;  %v1370_v12 = vadd.f32 %v10018_v9, %v1242_v50  ;;  %v1369_v14 = vadd.f32 %v10018_v9, %v1241_v17 }
 0x348   : > { %v6085_v60 = vpop.eup %6084  ;;  %v1092_v31 = vadd.f32 1e-05, %v1076_v59  ;;  %v1371_v1 = vadd.f32 %v7307_v52, %v1243_v63  ;;  %v1246_v58 = vmul.f32 %v10019_v41, %v1118_v54  ;;  %v1248_v32 = vmul.f32 %v10020_v3, %v1120_v8 }
 0x349   : > { %v6087_v18 = vpop.eup %6086  ;;  %v1123_v44 = vmul.f32 %v6085_v60, %v7370_v10  ;;  %v1124_v46 = vmul.f32 %v6085_v60, %v7373_v11  ;;  %v1091_v27 = vadd.f32 1e-05, %v1075_v42  ;;  %v1058_v4 = vpop.xlane.xlu1 %1057  ;;  %v1402_v25 = vpack.c.bf16 %v1372_v29, %v1370_v12  ;;  %v10023_v12 = vld [vmem:[#allocation24_spill] sm:$0xff] }
 0x34a   : > { %v1055_v26 = vpop.xlane.xlu0 %1054  ;;  %v1121_v21 = vmul.f32 %v6087_v18, %v7376_v57  ;;  %v1122_v50 = vmul.f32 %v6087_v18, %v7379_v24  ;;  %6096 = vrsqrt.f32 %v1092_v31  ;;  %v1078_v17 = vmul.f32 0.0009765625, %v1058_v4  ;;  %v10025_v18 = vld [vmem:[#allocation29_spill] sm:$0xff] }
 0x34b   : > { %6098 = vrsqrt.f32 %v1091_v27  ;;  %1433 = vxpose.xlu0.c.b16.start [1/8] %v1402_v25, 128  ;;  %v1401_v52 = vpack.c.bf16 %v1371_v1, %v1369_v14  ;;  %v1077_v63 = vmul.f32 0.0009765625, %v1055_v26  ;;  %v1374_v8 = vadd.f32 %v10021_v38, %v1246_v58 }
 0x34c   : > { %v6089_v45 = vpop.eup %6088  ;;  %v1094_v10 = vadd.f32 1e-05, %v1078_v17  ;;  %v1376_v11 = vadd.f32 %v10022_v53, %v1248_v32  ;;  %v1245_v49 = vmul.f32 %v10019_v41, %v1117_v37  ;;  %v1247_v29 = vmul.f32 %v10020_v3, %v1119_v30  ;;  %v10024_v3 = vld [vmem:[#allocation25_spill] sm:$0xff] }
 0x34d   : > { %v6091_v54 = vpop.eup %6090  ;;  %v1127_v57 = vmul.f32 %v6089_v45, %v7390_v16  ;;  %v1128_v24 = vmul.f32 %v6089_v45, %v7393_v36  ;;  %1417 = vxpose.xlu1.c.b16.start [1/8] %v1401_v52, 128  ;;  %v1093_v59 = vadd.f32 1e-05, %v1077_v63  ;;  %v1064_v42 = vpop.xlane.xlu1 %1063  ;;  %v1250_v14 = vmul.f32 %v10023_v12, %v1122_v50  ;;  %v10026_v63 = vld [vmem:[#allocation32_spill] sm:$0xff] }
 0x34e   : > { %v1061_v9 = vpop.xlane.xlu0 %1060  ;;  %v1125_v60 = vmul.f32 %v6091_v54, %v7396_v47  ;;  %v1126_v31 = vmul.f32 %v6091_v54, %v7399_v48  ;;  %6100 = vrsqrt.f32 %v1094_v10  ;;  %v1080_v1 = vmul.f32 0.0009765625, %v1064_v42  ;;  %v10028_v10 = vld [vmem:[#allocation30_spill] sm:$0xff] }
 0x34f   : > { %6102 = vrsqrt.f32 %v1093_v59  ;;  %v1404_v37 = vpack.c.bf16 %v1376_v11, %v1374_v8  ;;  %v1373_v30 = vadd.f32 %v10021_v38, %v1245_v49  ;;  %v1375_v16 = vadd.f32 %v10022_v53, %v1247_v29 }
 0x350   : > { %v6093_v41 = vpop.eup %6092  ;;  %v1096_v36 = vadd.f32 1e-05, %v1080_v1  ;;  %v1079_v58 = vmul.f32 0.0009765625, %v1061_v9  ;;  %v1252_v32 = vmul.f32 %v10024_v3, %v1124_v46  ;;  %v1378_v27 = vadd.f32 %v10025_v18, %v1250_v14 }
 0x351   : > { %v6095_v4 = vpop.eup %6094  ;;  %v1131_v47 = vmul.f32 %v6093_v41, %v7410_v22  ;;  %v1132_v48 = vmul.f32 %v6093_v41, %v7413_v0  ;;  %1434 = vxpose.xlu0.c.b16.cont [2/8] %v1404_v37, 128  ;;  %v1403_v25 = vpack.c.bf16 %v1375_v16, %v1373_v30  ;;  %v1249_v26 = vmul.f32 %v10023_v12, %v1121_v21  ;;  %v10027_v22 = vld [vmem:[#allocation27_spill] sm:$0xff] }
 0x352   : > { %v1129_v50 = vmul.f32 %v6095_v4, %v7416_v33  ;;  %v1130_v17 = vmul.f32 %v6095_v4, %v7419_v43  ;;  %6104 = vrsqrt.f32 %v1096_v36  ;;  %v1095_v52 = vadd.f32 1e-05, %v1079_v58 }
 0x353   : > { %1418 = vxpose.xlu1.c.b16.cont [2/8] %v1403_v25, 128  ;;  %v1380_v46 = vadd.f32 %v10026_v63, %v1252_v32  ;;  %v1251_v38 = vmul.f32 %v10024_v3, %v1123_v44  ;;  %v1377_v8 = vadd.f32 %v10025_v18, %v1249_v26  ;;  %v1254_v45 = vmul.f32 %v10027_v22, %v1126_v31  ;;  %v10032_v18 = vld [vmem:[#allocation36_spill] sm:$0xff] }
 0x354   : > { %v6097_v0 = vpop.eup %6096  ;;  %6106 = vrsqrt.f32 %v1095_v52  ;;  %v1256_v53 = vmul.f32 %v10028_v10, %v1128_v24  ;;  %v1253_v21 = vmul.f32 %v10027_v22, %v1125_v60  ;;  %v1255_v33 = vmul.f32 %v10028_v10, %v1127_v57 }
 0x355   : > { %v6099_v43 = vpop.eup %6098  ;;  %v1135_v11 = vmul.f32 %v6097_v0, %v7430_v28  ;;  %v1136_v49 = vmul.f32 %v6097_v0, %v7433_v7  ;;  %v1406_v29 = vpack.c.bf16 %v1380_v46, %v1378_v27  ;;  %v1379_v44 = vadd.f32 %v10026_v63, %v1251_v38  ;;  %v10029_v28 = vld [vmem:[#allocation31_spill] sm:$0xff]  ;;  %v10035_v38 = vld [vmem:[#allocation33_spill] sm:$0xff] }
 0x356   : > { %v1133_v54 = vmul.f32 %v6099_v43, %v7436_v5  ;;  %v1134_v59 = vmul.f32 %v6099_v43, %v7439_v6  ;;  %v1382_v42 = vadd.f32 %v7494_v39, %v1254_v45  ;;  %v1384_v24 = vadd.f32 %v7646_v19, %v1256_v53  ;;  %v10036_v0 = vld [vmem:[#allocation17_spill] sm:$0xff]  ;;  %v10037_v53 = vld [vmem:[#allocation18_spill] sm:$0xff] }
 0x357   : > { %1435 = vxpose.xlu0.c.b16.cont [3/8] %v1406_v29, 128  ;;  %v1405_v9 = vpack.c.bf16 %v1379_v44, %v1377_v8  ;;  %v1381_v57 = vadd.f32 %v7494_v39, %v1253_v21  ;;  %v1383_v12 = vadd.f32 %v7646_v19, %v1255_v33  ;;  %v1258_v14 = vmul.f32 %v10029_v28, %v1130_v17  ;;  %v10030_v39 = vld [vmem:[#allocation34_spill] sm:$0xff]  ;;  %v10031_v19 = vld [vmem:[#allocation35_spill] sm:$0xff]  ;;  %v10034_v17 = vld [vmem:[#allocation20_spill] sm:$0xff] }
 0x358   : > { %v6101_v7 = vpop.eup %6100  ;;  %v1408_v60 = vpack.c.bf16 %v1384_v24, %v1382_v42  ;;  %v1260_v31 = vmul.f32 %v7530_v15, %v1132_v48  ;;  %v1257_v5 = vmul.f32 %v10029_v28, %v1129_v50  ;;  %v1259_v6 = vmul.f32 %v7530_v15, %v1131_v47  ;;  %v10033_v50 = vld [vmem:[#allocation19_spill] sm:$0xff]  ;;  %v1367_v42 = vpop.permute.xlu0 %1366 }
 0x359   : > { %v6103_v1 = vpop.eup %6102  ;;  %v1140_v37 = vmul.f32 %v6101_v7, %v7453_v2  ;;  %1419 = vxpose.xlu1.c.b16.cont [3/8] %v1405_v9, 128  ;;  %v1407_v30 = vpack.c.bf16 %v1383_v12, %v1381_v57  ;;  %v1386_v16 = vadd.f32 %v7652_v61, %v1258_v14  ;;  %v1262_v15 = vmul.f32 %v10032_v18, %v1134_v59  ;;  %v1362_v59 = vpop.permute.xlu1 %1361 }
 0x35a   : > { %v1137_v41 = vmul.f32 %v6103_v1, %v10030_v39  ;;  %v1138_v36 = vmul.f32 %v6103_v1, %v10031_v19  ;;  %v1388_v58 = vadd.f32 %v7650_v62, %v1260_v31  ;;  %v1385_v3 = vadd.f32 %v7652_v61, %v1257_v5  ;;  %v6111_v31 = vld [vmem:[%s6917_s15 + $0x20] sm:$0xff]  ;;  %v6112_v5 = vld [vmem:[%s6917_s15 + $0x18] sm:$0xff]  ;;  %v6114_v1 = vld [vmem:[%s6917_s15 + $0x28] sm:$0xff] }
 0x35b   : > { %1436 = vxpose.xlu0.c.b16.cont [4/8] %v1408_v60, 128  ;;  %v1387_v32 = vadd.f32 %v7650_v62, %v1259_v6  ;;  %v1264_v27 = vmul.f32 %v7648_v13, %v1136_v49  ;;  %v1261_v2 = vmul.f32 %v10032_v18, %v1133_v54  ;;  %v1263_v48 = vmul.f32 %v7648_v13, %v1135_v11  ;;  %v6109_v60 = vld [vmem:[%s6917_s15 + $0x10] sm:$0xff]  ;;  %v6118_v39 = vld [vmem:[%s6917_s15 + $0x48] sm:$0xff]  ;;  %v6120_v19 = vld [vmem:[%s6917_s15 + $0x58] sm:$0xff] }
 0x35c   : > { %v6105_v4 = vpop.eup %6104  ;;  %v1410_v47 = vpack.c.bf16 %v1388_v58, %v1386_v16  ;;  %v1266_v25 = vmul.f32 %v7656_v35, %v1138_v36  ;;  %v1268_v26 = vmul.f32 %v7654_v40, %v1140_v37  ;;  %v1390_v63 = vadd.f32 %v7660_v51, %v1262_v15  ;;  %v6113_v6 = vld [vmem:[%s6917_s15 + $0x30] sm:$0xff]  ;;  %v6115_v37 = vld [vmem:[%s6917_s15 + $0x40] sm:$0xff]  ;;  %v6122_v58 = vld [vmem:[%s6917_s15 + $0x68] sm:$0xff] }
 0x35d   : > { %1420 = vxpose.xlu1.c.b16.cont [4/8] %v1407_v30, 128  ;;  %v1143_v61 = vmul.f32 %v6105_v4, %v10033_v50  ;;  %v1144_v52 = vmul.f32 %v6105_v4, %v10034_v17  ;;  %v1409_v62 = vpack.c.bf16 %v1387_v32, %v1385_v3  ;;  %v1139_v8 = vmul.f32 %v6101_v7, %v10035_v38  ;;  %v6116_v30 = vld [vmem:[%s6917_s15 + $0x38] sm:$0xff]  ;;  %v6117_v16 = vld [vmem:[%s6917_s15 + $0x50] sm:$0xff]  ;;  %v6123_v3 = vld [vmem:[%s6917_s15 + $0x80] sm:$0xff] }
 0x35e   : > { %v6107_v46 = vpop.eup %6106  ;;  %v1392_v22 = vadd.f32 %v7658_v55, %v1264_v27  ;;  %v1389_v45 = vadd.f32 %v7660_v51, %v1261_v2  ;;  %v1391_v13 = vadd.f32 %v7658_v55, %v1263_v48  ;;  %v1394_v43 = vadd.f32 %v7668_v56, %v1266_v25  ;;  %v6121_v36 = vld [vmem:[%s6917_s15 + $0x70] sm:$0xff]  ;;  %v6124_v32 = vld [vmem:[%s6917_s15 + $0x78] sm:$0xff]  ;;  %v6126_v15 = vld [vmem:[%s6917_s15 + $0x88] sm:$0xff] }
 0x35f   : > { %v1141_v10 = vmul.f32 %v6107_v46, %v10036_v0  ;;  %v1142_v21 = vmul.f32 %v6107_v46, %v10037_v53  ;;  %v1272_v33 = vmul.f32 %v7662_v20, %v1144_v52  ;;  %1437 = vxpose.xlu0.c.b16.cont [5/8] %v1410_v47, 128  ;;  %v1396_v49 = vadd.f32 %v7666_v23, %v1268_v26  ;;  %v6125_v18 = vld [vmem:[%s6917_s15 + $0x90] sm:$0xff]  ;;  %v6127_v27 = vld [vmem:[%s6917_s15 + $0xa0] sm:$0xff]  ;;  %v6128_v2 = vld [vmem:[%s6917_s15 + $0x98] sm:$0xff] }
 0x360   : > { %v1412_v11 = vpack.c.bf16 %v1392_v22, %v1390_v63  ;;  %v1265_v29 = vmul.f32 %v7656_v35, %v1137_v41  ;;  %v1271_v55 = vmul.f32 %v7662_v20, %v1143_v61  ;;  %v1411_v54 = vpack.c.bf16 %v1391_v13, %v1389_v45  ;;  %v6119_v41 = vld [vmem:[%s6917_s15 + $0x60] sm:$0xff]  ;;  %v6129_v4 = vld [vmem:[%s6917_s15 + $0xb0] sm:$0xff]  ;;  %v6130_v47 = vld [vmem:[%s6917_s15 + $0xa8] sm:$0xff] }
 0x361   : > { %v1269_v44 = vmul.f32 %v7664_v34, %v1141_v10  ;;  %v1270_v51 = vmul.f32 %v7664_v34, %v1142_v21  ;;  %1421 = vxpose.xlu1.c.b16.cont [5/8] %v1409_v62, 128  ;;  %v1267_v24 = vmul.f32 %v7654_v40, %v1139_v8  ;;  %v1400_v12 = vadd.f32 %v1367_v42, %v1272_v33  ;;  %v6131_v48 = vld [vmem:[%s6917_s15 + $0xc0] sm:$0xff]  ;;  %v6132_v25 = vld [vmem:[%s6917_s15 + $0xb8] sm:$0xff]  ;;  %v6133_v26 = vld [vmem:[%s6917_s15 + $0xd0] sm:$0xff] }
 0x362   : > { %v1393_v9 = vadd.f32 %v7668_v56, %v1265_v29  ;;  %v1414_v35 = vpack.c.bf16 %v1396_v49, %v1394_v43  ;;  %v1399_v20 = vadd.f32 %v1367_v42, %v1271_v55  ;;  %v6108_v56 = vld [vmem:[%s6917_s15] sm:$0xff]  ;;  %v6134_v50 = vld [vmem:[%s6917_s15 + $0xc8] sm:$0xff]  ;;  %v6136_v17 = vld [vmem:[%s6917_s15 + $0xd8] sm:$0xff] }
 0x363   : > { %v1398_v57 = vadd.f32 %v1362_v59, %v1270_v51  ;;  %1438 = vxpose.xlu0.c.b16.cont [6/8] %v1412_v11, 128  ;;  %v1395_v28 = vadd.f32 %v7666_v23, %v1267_v24  ;;  %v1397_v34 = vadd.f32 %v1362_v59, %v1269_v44  ;;  %v6110_v23 = vld [vmem:[%s6917_s15 + $0x8] sm:$0xff]  ;;  %v6135_v61 = vld [vmem:[%s6917_s15 + $0xe0] sm:$0xff]  ;;  %v6137_v52 = vld [vmem:[%s6917_s15 + $0xf0] sm:$0xff] }
 0x364   : > { %v6138_v62 = vld [vmem:[%s6917_s15 + $0xe8] sm:$0xff]  ;;  %v6139_v63 = vld [vmem:[%s6917_s15 + $0xf8] sm:$0xff] }
 0x365   : > { %1422 = vxpose.xlu1.c.b16.cont [6/8] %v1411_v54, 128  ;;  %v1413_v14 = vpack.c.bf16 %v1395_v28, %v1393_v9  ;;  %v1416_v7 = vpack.c.bf16 %v1400_v12, %v1398_v57  ;;  %v1415_v40 = vpack.c.bf16 %v1399_v20, %v1397_v34 }
 0x367   : > { %1439 = vxpose.xlu0.c.b16.cont [7/8] %v1414_v35, 128 }
 0x369   : > { %1423 = vxpose.xlu1.c.b16.cont [7/8] %v1413_v14, 128 }
 0x36b   : > { %1440 = vxpose.xlu0.c.b16.end [8/8] %v1416_v7, 128 }
 0x36d   : > { %1424 = vxpose.xlu1.c.b16.end [8/8] %v1415_v40, 128 }
 0x36f   : > { %456 = vxpose.xlu0.b32.start [1/16] %v6108_v56, 128 }
 0x373   : > { %457 = vxpose.xlu0.b32.cont [2/16] %v6109_v60, 128 }
 0x377   : > { %488 = vxpose.xlu1.b32.start [1/16] %v6110_v23, 128  ;;  %458 = vxpose.xlu0.b32.cont [3/16] %v6111_v31, 128 }
 0x37b   : > { %489 = vxpose.xlu1.b32.cont [2/16] %v6112_v5, 128  ;;  %459 = vxpose.xlu0.b32.cont [4/16] %v6113_v6, 128 }
 0x37f   : > { %490 = vxpose.xlu1.b32.cont [3/16] %v6114_v1, 128  ;;  %460 = vxpose.xlu0.b32.cont [5/16] %v6115_v37, 128 }
 0x383   : > { %491 = vxpose.xlu1.b32.cont [4/16] %v6116_v30, 128  ;;  %461 = vxpose.xlu0.b32.cont [6/16] %v6117_v16, 128 }
 0x387   : > { %492 = vxpose.xlu1.b32.cont [5/16] %v6118_v39, 128  ;;  %462 = vxpose.xlu0.b32.cont [7/16] %v6119_v41, 128 }
 0x38b   : > { %493 = vxpose.xlu1.b32.cont [6/16] %v6120_v19, 128  ;;  %463 = vxpose.xlu0.b32.cont [8/16] %v6121_v36, 128 }
 0x38f   : > { %494 = vxpose.xlu1.b32.cont [7/16] %v6122_v58, 128  ;;  %464 = vxpose.xlu0.b32.cont [9/16] %v6123_v3, 128 }
 0x393   : > { %495 = vxpose.xlu1.b32.cont [8/16] %v6124_v32, 128  ;;  %465 = vxpose.xlu0.b32.cont [10/16] %v6125_v18, 128  ;;  %v7803_v18 = vld [vmem:[%s9843_s6] ss:$0 sm:$0xff] }
 0x397   : > { %496 = vxpose.xlu1.b32.cont [9/16] %v6126_v15, 128  ;;  %466 = vxpose.xlu0.b32.cont [11/16] %v6127_v27, 128  ;;  %v7808_v27 = vld [vmem:[%s9845_s8] ss:$0 sm:$0xff] }
 0x39b   : > { %497 = vxpose.xlu1.b32.cont [10/16] %v6128_v2, 128  ;;  %467 = vxpose.xlu0.b32.cont [12/16] %v6129_v4, 128 }
 0x39f   : > { %498 = vxpose.xlu1.b32.cont [11/16] %v6130_v47, 128  ;;  %468 = vxpose.xlu0.b32.cont [13/16] %v6131_v48, 128 }
 0x3a3   : > { %499 = vxpose.xlu1.b32.cont [12/16] %v6132_v25, 128  ;;  %469 = vxpose.xlu0.b32.cont [14/16] %v6133_v26, 128 }
 0x3a7   : > { %500 = vxpose.xlu1.b32.cont [13/16] %v6134_v50, 128  ;;  %470 = vxpose.xlu0.b32.cont [15/16] %v6135_v61, 128 }
 0x3ab   : > { %501 = vxpose.xlu1.b32.cont [14/16] %v6136_v17, 128  ;;  %471 = vxpose.xlu0.b32.end [16/16] %v6137_v52, 128 }
 0x3af   : > { %502 = vxpose.xlu1.b32.cont [15/16] %v6138_v62, 128 }
 0x3b3   : > { %503 = vxpose.xlu1.b32.end [16/16] %v6139_v63, 128 }
 0x3b5   : > { %v1441_v46 = vpop.trf.xlu0 }
 0x3b6   : > { %1457 = vst [vmem:[#allocation2 + $0x40] sm:$0xff] %v1441_v46 }
 0x3b7   : > { %v1425_v38 = vpop.trf.xlu1 }
 0x3b8   : > { %1449 = vst [vmem:[#allocation2] sm:$0xff] %v1425_v38  ;;  %5754 = vmatprep.mubr.bf16.mxu0 %v1425_v38  ;;  %5802 = vmatprep.mubr.bf16.mxu1 %v1425_v38 }
 0x3b9   : > { %v1442_v8 = vpop.trf.xlu0 }
 0x3ba   : > { %1458 = vst [vmem:[#allocation2 + $0x48] sm:$0xff] %v1442_v8 }
 0x3bb   : > { %v1426_v22 = vpop.trf.xlu1 }
 0x3bc   : > { %1450 = vst [vmem:[#allocation2 + $0x8] sm:$0xff] %v1426_v22  ;;  %5755 = vmatmul.mubr.bf16.vlgmr.msra.gmra.mrb[0].mxu0 %v1426_v22  ;;  %5803 = vmatmul.mubr.bf16.vlgmr.msra.gmra.mrb[0].mxu1 %v1426_v22 }
 0x3bd   : > { %v1443_v45 = vpop.trf.xlu0 }
 0x3be   : > { %1459 = vst [vmem:[#allocation2 + $0x50] sm:$0xff] %v1443_v45 }
 0x3bf   : > { %v1427_v13 = vpop.trf.xlu1 }
 0x3c0   : > { %1451 = vst [vmem:[#allocation2 + $0x10] sm:$0xff] %v1427_v13  ;;  %5758 = vmatprep.mubr.bf16.mxu0 %v1427_v13  ;;  %5806 = vmatprep.mubr.bf16.mxu1 %v1427_v13 }
 0x3c1   : > { %v1444_v0 = vpop.trf.xlu0 }
 0x3c2   : > { %1460 = vst [vmem:[#allocation2 + $0x58] sm:$0xff] %v1444_v0 }
 0x3c3   : > { %v1428_v10 = vpop.trf.xlu1 }
 0x3c4   : > { %1452 = vst [vmem:[#allocation2 + $0x18] sm:$0xff] %v1428_v10  ;;  %5759 = vmatmul.mubr.bf16.gmra.mrb[4].mxu0 %v1428_v10  ;;  %5807 = vmatmul.mubr.bf16.gmra.mrb[4].mxu1 %v1428_v10 }
 0x3c5   : > { %v1445_v53 = vpop.trf.xlu0 }
 0x3c6   : > { %1461 = vst [vmem:[#allocation2 + $0x60] sm:$0xff] %v1445_v53 }
 0x3c7   : > { %v1429_v21 = vpop.trf.xlu1 }
 0x3c8   : > { %1453 = vst [vmem:[#allocation2 + $0x20] sm:$0xff] %v1429_v21  ;;  %5762 = vmatprep.mubr.bf16.mxu0 %v1429_v21  ;;  %5810 = vmatprep.mubr.bf16.mxu1 %v1429_v21 }
 0x3c9   : > { %v1446_v33 = vpop.trf.xlu0 }
 0x3ca   : > { %1462 = vst [vmem:[#allocation2 + $0x68] sm:$0xff] %v1446_v33 }
 0x3cb   : > { %v1430_v43 = vpop.trf.xlu1 }
 0x3cc   : > { %1454 = vst [vmem:[#allocation2 + $0x28] sm:$0xff] %v1430_v43  ;;  %5763 = vmatmul.mubr.bf16.gmra.mrb[8].mxu0 %v1430_v43  ;;  %5811 = vmatmul.mubr.bf16.gmra.mrb[8].mxu1 %v1430_v43 }
 0x3cd   : > { %v1447_v11 = vpop.trf.xlu0 }
 0x3ce   : > { %1463 = vst [vmem:[#allocation2 + $0x70] sm:$0xff] %v1447_v11 }
 0x3cf   : > { %v1431_v49 = vpop.trf.xlu1 }
 0x3d0   : > { %1455 = vst [vmem:[#allocation2 + $0x30] sm:$0xff] %v1431_v49  ;;  %5766 = vmatprep.mubr.bf16.mxu0 %v1431_v49  ;;  %5814 = vmatprep.mubr.bf16.mxu1 %v1431_v49 }
 0x3d1   : > { %v1448_v29 = vpop.trf.xlu0 }
 0x3d2   : > { %1464 = vst [vmem:[#allocation2 + $0x78] sm:$0xff] %v1448_v29 }
 0x3d3   : > { %v1432_v44 = vpop.trf.xlu1 }
 0x3d4   : > { %1456 = vst [vmem:[#allocation2 + $0x38] sm:$0xff] %v1432_v44  ;;  %5767 = vmatmul.mubr.bf16.gmra.mrb[12].mxu0 %v1432_v44  ;;  %5815 = vmatmul.mubr.bf16.gmra.mrb[12].mxu1 %v1432_v44 }
 0x3d5   : > { %5770 = vmatprep.mubr.bf16.mxu0 %v1441_v46  ;;  %5818 = vmatprep.mubr.bf16.mxu1 %v1441_v46 }
 0x3dc   : > { %5771 = vmatmul.mubr.bf16.gmra.mrb[16].mxu0 %v1442_v8  ;;  %5819 = vmatmul.mubr.bf16.gmra.mrb[16].mxu1 %v1442_v8 }
 0x3dd   : > { %5774 = vmatprep.mubr.bf16.mxu0 %v1443_v45  ;;  %5822 = vmatprep.mubr.bf16.mxu1 %v1443_v45 }
 0x3e4   : > { %5775 = vmatmul.mubr.bf16.gmra.mrb[20].mxu0 %v1444_v0  ;;  %5823 = vmatmul.mubr.bf16.gmra.mrb[20].mxu1 %v1444_v0 }
 0x3e5   : > { %5778 = vmatprep.mubr.bf16.mxu0 %v1445_v53  ;;  %5826 = vmatprep.mubr.bf16.mxu1 %v1445_v53 }
 0x3ec   : > { %5779 = vmatmul.mubr.bf16.gmra.mrb[24].mxu0 %v1446_v33  ;;  %5827 = vmatmul.mubr.bf16.gmra.mrb[24].mxu1 %v1446_v33 }
 0x3ed   : > { %5782 = vmatprep.mubr.bf16.mxu0 %v1447_v11  ;;  %5830 = vmatprep.mubr.bf16.mxu1 %v1447_v11 }
 0x3ef   : > { %v472_v51 = vpop.trf.xlu0 }
 0x3f0   : > { %520 = vst [vmem:[#allocation5] sm:$0xff] %v472_v51 }
 0x3f3   : > { %v473_v54 = vpop.trf.xlu0 }
 0x3f4   : > { %5783 = vmatmul.mubr.bf16.gmra.mrb[28].mxu0 %v1448_v29  ;;  %5831 = vmatmul.mubr.bf16.gmra.mrb[28].mxu1 %v1448_v29  ;;  %521 = vst [vmem:[#allocation5 + $0x8] sm:$0xff] %v473_v54 }
 0x3f7   : > { %v504_v55 = vpop.trf.xlu1  ;;  %v474_v42 = vpop.trf.xlu0 }
 0x3f8   : > { %536 = vst [vmem:[#allocation5 + $0x80] sm:$0xff] %v504_v55  ;;  %522 = vst [vmem:[#allocation5 + $0x10] sm:$0xff] %v474_v42 }
 0x3fb   : > { %v505_v59 = vpop.trf.xlu1  ;;  %v475_v9 = vpop.trf.xlu0 }
 0x3fc   : > { %537 = vst [vmem:[#allocation5 + $0x88] sm:$0xff] %v505_v59  ;;  %523 = vst [vmem:[#allocation5 + $0x18] sm:$0xff] %v475_v9 }
 0x3ff   : > { %v506_v24 = vpop.trf.xlu1  ;;  %v476_v12 = vpop.trf.xlu0 }
 0x400   : > { %538 = vst [vmem:[#allocation5 + $0x90] sm:$0xff] %v506_v24  ;;  %524 = vst [vmem:[#allocation5 + $0x20] sm:$0xff] %v476_v12 }
 0x403   : > { %v507_v57 = vpop.trf.xlu1  ;;  %v477_v28 = vpop.trf.xlu0 }
 0x404   : > { %539 = vst [vmem:[#allocation5 + $0x98] sm:$0xff] %v507_v57  ;;  %525 = vst [vmem:[#allocation5 + $0x28] sm:$0xff] %v477_v28 }
 0x407   : > { %v508_v35 = vpop.trf.xlu1  ;;  %v478_v20 = vpop.trf.xlu0 }
 0x408   : > { %540 = vst [vmem:[#allocation5 + $0xa0] sm:$0xff] %v508_v35  ;;  %526 = vst [vmem:[#allocation5 + $0x30] sm:$0xff] %v478_v20 }
 0x40b   : > { %v509_v34 = vpop.trf.xlu1  ;;  %v479_v7 = vpop.trf.xlu0 }
 0x40c   : > { %541 = vst [vmem:[#allocation5 + $0xa8] sm:$0xff] %v509_v34  ;;  %527 = vst [vmem:[#allocation5 + $0x38] sm:$0xff] %v479_v7 }
 0x40f   : > { %v510_v14 = vpop.trf.xlu1  ;;  %v480_v56 = vpop.trf.xlu0 }
 0x410   : > { %542 = vst [vmem:[#allocation5 + $0xb0] sm:$0xff] %v510_v14  ;;  %528 = vst [vmem:[#allocation5 + $0x40] sm:$0xff] %v480_v56 }
 0x413   : > { %v511_v40 = vpop.trf.xlu1  ;;  %v481_v23 = vpop.trf.xlu0 }
 0x414   : > { %543 = vst [vmem:[#allocation5 + $0xb8] sm:$0xff] %v511_v40  ;;  %529 = vst [vmem:[#allocation5 + $0x48] sm:$0xff] %v481_v23 }
 0x417   : > { %v512_v60 = vpop.trf.xlu1  ;;  %v482_v5 = vpop.trf.xlu0 }
 0x418   : > { %544 = vst [vmem:[#allocation5 + $0xc0] sm:$0xff] %v512_v60  ;;  %530 = vst [vmem:[#allocation5 + $0x50] sm:$0xff] %v482_v5 }
 0x41b   : > { %v513_v31 = vpop.trf.xlu1  ;;  %v483_v1 = vpop.trf.xlu0 }
 0x41c   : > { %545 = vst [vmem:[#allocation5 + $0xc8] sm:$0xff] %v513_v31  ;;  %531 = vst [vmem:[#allocation5 + $0x58] sm:$0xff] %v483_v1 }
 0x41f   : > { %v514_v6 = vpop.trf.xlu1  ;;  %v484_v30 = vpop.trf.xlu0 }
 0x420   : > { %546 = vst [vmem:[#allocation5 + $0xd0] sm:$0xff] %v514_v6  ;;  %532 = vst [vmem:[#allocation5 + $0x60] sm:$0xff] %v484_v30 }
 0x423   : > { %v515_v37 = vpop.trf.xlu1  ;;  %v485_v39 = vpop.trf.xlu0 }
 0x424   : > { %547 = vst [vmem:[#allocation5 + $0xd8] sm:$0xff] %v515_v37  ;;  %533 = vst [vmem:[#allocation5 + $0x68] sm:$0xff] %v485_v39 }
 0x427   : > { %v516_v16 = vpop.trf.xlu1  ;;  %v486_v19 = vpop.trf.xlu0 }
 0x428   : > { %548 = vst [vmem:[#allocation5 + $0xe0] sm:$0xff] %v516_v16  ;;  %534 = vst [vmem:[#allocation5 + $0x70] sm:$0xff] %v486_v19 }
 0x42b   : > { %v517_v41 = vpop.trf.xlu1  ;;  %v487_v58 = vpop.trf.xlu0 }
 0x42c   : > { %549 = vst [vmem:[#allocation5 + $0xe8] sm:$0xff] %v517_v41  ;;  %535 = vst [vmem:[#allocation5 + $0x78] sm:$0xff] %v487_v58 }
 0x42f   : > { %v518_v36 = vpop.trf.xlu1 }
 0x430   : > { %550 = vst [vmem:[#allocation5 + $0xf0] sm:$0xff] %v518_v36 }
 0x433   : > { %v519_v3 = vpop.trf.xlu1 }
 0x434   : > { %551 = vst [vmem:[#allocation5 + $0xf8] sm:$0xff] %v519_v3 }
 0x48f   : > { %v5756_v32 = vpop.f32.mrb[0].mxu0  ;;  %v5804_v15 = vpop.f32.mrb[0].mxu1 }
 0x490   : > { %v1570_v2 = vpop.f32.mrb[1].mxu0  ;;  %v1802_v4 = vpop.f32.mrb[1].mxu1  ;;  %v1579_v25 = vadd.f32 %v5756_v32, %v7803_v18  ;;  %v1811_v26 = vadd.f32 %v5804_v15, %v7808_v27 }
 0x491   : > { %v5757_v47 = vpop.f32.mrb[2].mxu0  ;;  %v5805_v48 = vpop.f32.mrb[2].mxu1  ;;  %v1571_v62 = vadd.f32 %v7803_v18, %v1570_v2  ;;  %v1803_v63 = vadd.f32 %v7808_v27, %v1802_v4 }
 0x492   : > { %v1582_v50 = vadd.f32 %v5757_v47, %v7803_v18  ;;  %v1814_v61 = vadd.f32 %v5805_v48, %v7808_v27  ;;  %v1573_v17 = vpop.f32.mrb[3].mxu0  ;;  %v1805_v52 = vpop.f32.mrb[3].mxu1 }
 0x493   : > { %v1574_v46 = vadd.f32 %v7803_v18, %v1573_v17  ;;  %v1806_v38 = vadd.f32 %v7808_v27, %v1805_v52 }
 0x494   : > { %v1930_v8 = vpack.c.bf16 %v1582_v50, %v1579_v25  ;;  %v1962_v22 = vpack.c.bf16 %v1814_v61, %v1811_v26 }
 0x495   : > { %v1929_v45 = vpack.c.bf16 %v1574_v46, %v1571_v62  ;;  %v1961_v13 = vpack.c.bf16 %v1806_v38, %v1803_v63 }
 0x496   : > { %1946 = vst [vmem:[#allocation3 + $0x8] sm:$0xff] %v1930_v8  ;;  %1978 = vst [vmem:[#allocation4 + $0x8] sm:$0xff] %v1962_v22 }
 0x497   : > { %1945 = vst [vmem:[#allocation3] sm:$0xff] %v1929_v45  ;;  %1977 = vst [vmem:[#allocation4] sm:$0xff] %v1961_v13  ;;  %v5760_v0 = vpop.f32.mrb[4].mxu0  ;;  %v5808_v10 = vpop.f32.mrb[4].mxu1 }
 0x498   : > { %v1586_v53 = vpop.f32.mrb[5].mxu0  ;;  %v1818_v21 = vpop.f32.mrb[5].mxu1  ;;  %v1595_v11 = vadd.f32 %v5760_v0, %v7803_v18  ;;  %v1827_v49 = vadd.f32 %v5808_v10, %v7808_v27 }
 0x499   : > { %v5761_v33 = vpop.f32.mrb[6].mxu0  ;;  %v5809_v43 = vpop.f32.mrb[6].mxu1  ;;  %v1587_v54 = vadd.f32 %v7803_v18, %v1586_v53  ;;  %v1819_v59 = vadd.f32 %v7808_v27, %v1818_v21 }
 0x49a   : > { %v1598_v29 = vadd.f32 %v5761_v33, %v7803_v18  ;;  %v1830_v44 = vadd.f32 %v5809_v43, %v7808_v27  ;;  %v1589_v51 = vpop.f32.mrb[7].mxu0  ;;  %v1821_v55 = vpop.f32.mrb[7].mxu1 }
 0x49b   : > { %v1590_v42 = vadd.f32 %v7803_v18, %v1589_v51  ;;  %v1822_v24 = vadd.f32 %v7808_v27, %v1821_v55 }
 0x49c   : > { %v1932_v9 = vpack.c.bf16 %v1598_v29, %v1595_v11  ;;  %v1964_v57 = vpack.c.bf16 %v1830_v44, %v1827_v49 }
 0x49d   : > { %v1931_v12 = vpack.c.bf16 %v1590_v42, %v1587_v54  ;;  %v1963_v35 = vpack.c.bf16 %v1822_v24, %v1819_v59 }
 0x49e   : > { %1948 = vst [vmem:[#allocation3 + $0x18] sm:$0xff] %v1932_v9  ;;  %1980 = vst [vmem:[#allocation4 + $0x18] sm:$0xff] %v1964_v57 }
 0x49f   : > { %1947 = vst [vmem:[#allocation3 + $0x10] sm:$0xff] %v1931_v12  ;;  %1979 = vst [vmem:[#allocation4 + $0x10] sm:$0xff] %v1963_v35  ;;  %v5764_v28 = vpop.f32.mrb[8].mxu0  ;;  %v5812_v34 = vpop.f32.mrb[8].mxu1 }
 0x4a0   : > { %v1602_v20 = vpop.f32.mrb[9].mxu0  ;;  %v1834_v14 = vpop.f32.mrb[9].mxu1  ;;  %v1611_v56 = vadd.f32 %v5764_v28, %v7803_v18  ;;  %v1843_v60 = vadd.f32 %v5812_v34, %v7808_v27 }
 0x4a1   : > { %v5765_v7 = vpop.f32.mrb[10].mxu0  ;;  %v5813_v40 = vpop.f32.mrb[10].mxu1  ;;  %v1603_v1 = vadd.f32 %v7803_v18, %v1602_v20  ;;  %v1835_v37 = vadd.f32 %v7808_v27, %v1834_v14 }
 0x4a2   : > { %v1614_v23 = vadd.f32 %v5765_v7, %v7803_v18  ;;  %v1846_v31 = vadd.f32 %v5813_v40, %v7808_v27  ;;  %v1605_v5 = vpop.f32.mrb[11].mxu0  ;;  %v1837_v6 = vpop.f32.mrb[11].mxu1 }
 0x4a3   : > { %v1606_v30 = vadd.f32 %v7803_v18, %v1605_v5  ;;  %v1838_v16 = vadd.f32 %v7808_v27, %v1837_v6 }
 0x4a4   : > { %v1934_v39 = vpack.c.bf16 %v1614_v23, %v1611_v56  ;;  %v1966_v41 = vpack.c.bf16 %v1846_v31, %v1843_v60 }
 0x4a5   : > { %v1933_v19 = vpack.c.bf16 %v1606_v30, %v1603_v1  ;;  %v1965_v36 = vpack.c.bf16 %v1838_v16, %v1835_v37 }
 0x4a6   : > { %1950 = vst [vmem:[#allocation3 + $0x28] sm:$0xff] %v1934_v39  ;;  %1982 = vst [vmem:[#allocation4 + $0x28] sm:$0xff] %v1966_v41 }
 0x4a7   : > { %1949 = vst [vmem:[#allocation3 + $0x20] sm:$0xff] %v1933_v19  ;;  %1981 = vst [vmem:[#allocation4 + $0x20] sm:$0xff] %v1965_v36  ;;  %v5768_v58 = vpop.f32.mrb[12].mxu0  ;;  %v5816_v3 = vpop.f32.mrb[12].mxu1 }
 0x4a8   : > { %v1618_v32 = vpop.f32.mrb[13].mxu0  ;;  %v1850_v15 = vpop.f32.mrb[13].mxu1  ;;  %v1627_v47 = vadd.f32 %v5768_v58, %v7803_v18  ;;  %v1859_v48 = vadd.f32 %v5816_v3, %v7808_v27 }
 0x4a9   : > { %v5769_v2 = vpop.f32.mrb[14].mxu0  ;;  %v5817_v4 = vpop.f32.mrb[14].mxu1  ;;  %v1619_v17 = vadd.f32 %v7803_v18, %v1618_v32  ;;  %v1851_v52 = vadd.f32 %v7808_v27, %v1850_v15 }
 0x4aa   : > { %v1630_v25 = vadd.f32 %v5769_v2, %v7803_v18  ;;  %v1862_v26 = vadd.f32 %v5817_v4, %v7808_v27  ;;  %v1621_v50 = vpop.f32.mrb[15].mxu0  ;;  %v1853_v61 = vpop.f32.mrb[15].mxu1 }
 0x4ab   : > { %v1622_v62 = vadd.f32 %v7803_v18, %v1621_v50  ;;  %v1854_v63 = vadd.f32 %v7808_v27, %v1853_v61 }
 0x4ac   : > { %v1936_v46 = vpack.c.bf16 %v1630_v25, %v1627_v47  ;;  %v1968_v38 = vpack.c.bf16 %v1862_v26, %v1859_v48 }
 0x4ad   : > { %v1935_v8 = vpack.c.bf16 %v1622_v62, %v1619_v17  ;;  %v1967_v22 = vpack.c.bf16 %v1854_v63, %v1851_v52 }
 0x4ae   : > { %1952 = vst [vmem:[#allocation3 + $0x38] sm:$0xff] %v1936_v46  ;;  %1984 = vst [vmem:[#allocation4 + $0x38] sm:$0xff] %v1968_v38 }
 0x4af   : > { %1951 = vst [vmem:[#allocation3 + $0x30] sm:$0xff] %v1935_v8  ;;  %1983 = vst [vmem:[#allocation4 + $0x30] sm:$0xff] %v1967_v22  ;;  %v5772_v45 = vpop.f32.mrb[16].mxu0  ;;  %v5820_v13 = vpop.f32.mrb[16].mxu1 }
 0x4b0   : > { %v1634_v0 = vpop.f32.mrb[17].mxu0  ;;  %v1866_v10 = vpop.f32.mrb[17].mxu1  ;;  %v1643_v33 = vadd.f32 %v5772_v45, %v7803_v18  ;;  %v1875_v43 = vadd.f32 %v5820_v13, %v7808_v27 }
 0x4b1   : > { %v5773_v53 = vpop.f32.mrb[18].mxu0  ;;  %v5821_v21 = vpop.f32.mrb[18].mxu1  ;;  %v1635_v51 = vadd.f32 %v7803_v18, %v1634_v0  ;;  %v1867_v55 = vadd.f32 %v7808_v27, %v1866_v10 }
 0x4b2   : > { %v1646_v11 = vadd.f32 %v5773_v53, %v7803_v18  ;;  %v1878_v49 = vadd.f32 %v5821_v21, %v7808_v27  ;;  %v1637_v29 = vpop.f32.mrb[19].mxu0  ;;  %v1869_v44 = vpop.f32.mrb[19].mxu1 }
 0x4b3   : > { %v1638_v54 = vadd.f32 %v7803_v18, %v1637_v29  ;;  %v1870_v59 = vadd.f32 %v7808_v27, %v1869_v44 }
 0x4b4   : > { %v1938_v42 = vpack.c.bf16 %v1646_v11, %v1643_v33  ;;  %v1970_v24 = vpack.c.bf16 %v1878_v49, %v1875_v43 }
 0x4b5   : > { %v1937_v9 = vpack.c.bf16 %v1638_v54, %v1635_v51  ;;  %v1969_v57 = vpack.c.bf16 %v1870_v59, %v1867_v55 }
 0x4b6   : > { %1954 = vst [vmem:[#allocation3 + $0x48] sm:$0xff] %v1938_v42  ;;  %1986 = vst [vmem:[#allocation4 + $0x48] sm:$0xff] %v1970_v24 }
 0x4b7   : > { %1953 = vst [vmem:[#allocation3 + $0x40] sm:$0xff] %v1937_v9  ;;  %1985 = vst [vmem:[#allocation4 + $0x40] sm:$0xff] %v1969_v57  ;;  %v5776_v12 = vpop.f32.mrb[20].mxu0  ;;  %v5824_v35 = vpop.f32.mrb[20].mxu1 }
 0x4b8   : > { %v1650_v28 = vpop.f32.mrb[21].mxu0  ;;  %v1882_v34 = vpop.f32.mrb[21].mxu1  ;;  %v1659_v7 = vadd.f32 %v5776_v12, %v7803_v18  ;;  %v1891_v40 = vadd.f32 %v5824_v35, %v7808_v27 }
 0x4b9   : > { %v5777_v20 = vpop.f32.mrb[22].mxu0  ;;  %v5825_v14 = vpop.f32.mrb[22].mxu1  ;;  %v1651_v5 = vadd.f32 %v7803_v18, %v1650_v28  ;;  %v1883_v6 = vadd.f32 %v7808_v27, %v1882_v34 }
 0x4ba   : > { %v1662_v56 = vadd.f32 %v5777_v20, %v7803_v18  ;;  %v1894_v60 = vadd.f32 %v5825_v14, %v7808_v27  ;;  %v1653_v23 = vpop.f32.mrb[23].mxu0  ;;  %v1885_v31 = vpop.f32.mrb[23].mxu1 }
 0x4bb   : > { %v1654_v1 = vadd.f32 %v7803_v18, %v1653_v23  ;;  %v1886_v37 = vadd.f32 %v7808_v27, %v1885_v31 }
 0x4bc   : > { %v1940_v30 = vpack.c.bf16 %v1662_v56, %v1659_v7  ;;  %v1972_v16 = vpack.c.bf16 %v1894_v60, %v1891_v40 }
 0x4bd   : > { %v1939_v39 = vpack.c.bf16 %v1654_v1, %v1651_v5  ;;  %v1971_v41 = vpack.c.bf16 %v1886_v37, %v1883_v6 }
 0x4be   : > { %1956 = vst [vmem:[#allocation3 + $0x58] sm:$0xff] %v1940_v30  ;;  %1988 = vst [vmem:[#allocation4 + $0x58] sm:$0xff] %v1972_v16 }
 0x4bf   : > { %1955 = vst [vmem:[#allocation3 + $0x50] sm:$0xff] %v1939_v39  ;;  %1987 = vst [vmem:[#allocation4 + $0x50] sm:$0xff] %v1971_v41  ;;  %v5780_v19 = vpop.f32.mrb[24].mxu0  ;;  %v5828_v36 = vpop.f32.mrb[24].mxu1 }
 0x4c0   : > { %v1666_v58 = vpop.f32.mrb[25].mxu0  ;;  %v1898_v3 = vpop.f32.mrb[25].mxu1  ;;  %v1675_v2 = vadd.f32 %v5780_v19, %v7803_v18  ;;  %v1907_v4 = vadd.f32 %v5828_v36, %v7808_v27 }
 0x4c1   : > { %v5781_v32 = vpop.f32.mrb[26].mxu0  ;;  %v5829_v15 = vpop.f32.mrb[26].mxu1  ;;  %v1667_v50 = vadd.f32 %v7803_v18, %v1666_v58  ;;  %v1899_v61 = vadd.f32 %v7808_v27, %v1898_v3 }
 0x4c2   : > { %v1678_v47 = vadd.f32 %v5781_v32, %v7803_v18  ;;  %v1910_v48 = vadd.f32 %v5829_v15, %v7808_v27  ;;  %v1669_v25 = vpop.f32.mrb[27].mxu0  ;;  %v1901_v26 = vpop.f32.mrb[27].mxu1 }
 0x4c3   : > { %v1670_v17 = vadd.f32 %v7803_v18, %v1669_v25  ;;  %v1902_v52 = vadd.f32 %v7808_v27, %v1901_v26 }
 0x4c4   : > { %v1942_v62 = vpack.c.bf16 %v1678_v47, %v1675_v2  ;;  %v1974_v63 = vpack.c.bf16 %v1910_v48, %v1907_v4 }
 0x4c5   : > { %v1941_v46 = vpack.c.bf16 %v1670_v17, %v1667_v50  ;;  %v1973_v38 = vpack.c.bf16 %v1902_v52, %v1899_v61 }
 0x4c6   : > { %1958 = vst [vmem:[#allocation3 + $0x68] sm:$0xff] %v1942_v62  ;;  %1990 = vst [vmem:[#allocation4 + $0x68] sm:$0xff] %v1974_v63 }
 0x4c7   : > { %1957 = vst [vmem:[#allocation3 + $0x60] sm:$0xff] %v1941_v46  ;;  %1989 = vst [vmem:[#allocation4 + $0x60] sm:$0xff] %v1973_v38  ;;  %v5784_v8 = vpop.f32.mrb[28].mxu0  ;;  %v5832_v22 = vpop.f32.mrb[28].mxu1 }
 0x4c8   : > { %v1682_v45 = vpop.f32.mrb[29].mxu0  ;;  %v1914_v13 = vpop.f32.mrb[29].mxu1  ;;  %v1691_v53 = vadd.f32 %v5784_v8, %v7803_v18  ;;  %v1923_v21 = vadd.f32 %v5832_v22, %v7808_v27 }
 0x4c9   : > { %v5785_v0 = vpop.f32.mrb[30].mxu0  ;;  %v5833_v10 = vpop.f32.mrb[30].mxu1  ;;  %v1683_v29 = vadd.f32 %v7803_v18, %v1682_v45  ;;  %v1915_v44 = vadd.f32 %v7808_v27, %v1914_v13 }
 0x4ca   : > { %v1694_v33 = vadd.f32 %v5785_v0, %v7803_v18  ;;  %v1926_v43 = vadd.f32 %v5833_v10, %v7808_v27  ;;  %v1685_v11 = vpop.f32.mrb[31].mxu0  ;;  %v1917_v49 = vpop.f32.mrb[31].mxu1 }
 0x4cb   : > { %v1686_v51 = vadd.f32 %v7803_v18, %v1685_v11  ;;  %v1918_v55 = vadd.f32 %v7808_v27, %v1917_v49 }
 0x4cc   : > { %v1944_v54 = vpack.c.bf16 %v1694_v33, %v1691_v53  ;;  %v1976_v59 = vpack.c.bf16 %v1926_v43, %v1923_v21 }
 0x4cd   : > { %v1943_v42 = vpack.c.bf16 %v1686_v51, %v1683_v29  ;;  %v1975_v24 = vpack.c.bf16 %v1918_v55, %v1915_v44 }
 0x4ce   : > { %1960 = vst [vmem:[#allocation3 + $0x78] sm:$0xff] %v1944_v54  ;;  %1992 = vst [vmem:[#allocation4 + $0x78] sm:$0xff] %v1976_v59 }
 0x4cf   : > { %1959 = vst [vmem:[#allocation3 + $0x70] sm:$0xff] %v1943_v42  ;;  %1991 = vst [vmem:[#allocation4 + $0x70] sm:$0xff] %v1975_v24 }
 0x4d0 PF: > { %v6140_v9 = vld [vmem:[%s9840_s3] sm:$0xff]   ;;  %s5216_s16 = sshll.u32 %s6680_s23, 7  ;;  %v6141_v18 = vld [vmem:[%s9840_s3 + $0x8] sm:$0xff]   ;;  %v6142_v27 = vld [vmem:[%s9840_s3 + $0x10] sm:$0xff]   ;;  %vm2230_vm2 = vcmask 261120   ;;  %s6703_s29 = smov 96  }
 0x4d1   : > { %s1994_s14 = sshra.s32 %s5216_s16, 4  ;;  %5834 = vmatprep.subr.bf16.mxu0 %v6140_v9  ;;  %v6143_v57 = vld [vmem:[%s9840_s3 + $0x18] sm:$0xff]   ;;  %v7892_v35 = vld [vmem:[#allocation3 + $0x40] sm:$0xff]  ;;  %v7898_v34 = vld [vmem:[#allocation3 + $0x48] sm:$0xff]  ;;  %s10038_s20 = sld [smem:[#allocation126_spill]]  ;;  %vm4775_vm3 = vcmask 523264  }
 0x4d2   : > { %s5217_s13 = sshll.u32 %s1994_s14, 3  ;;  %5835 = vmatpush3.bf16.msra.mxu0 %v6140_v9  ;;  %5914 = vmatprep.subr.msk.bf16.mxu1 %vm2230_vm2, %v7892_v35  ;;  %v7896_v28 = vld [vmem:[#allocation3] sm:$0xff]  ;;  %v7905_v7 = vld [vmem:[#allocation3 + $0x8] sm:$0xff]  ;;  %v7914_v60 = vld [vmem:[#allocation3 + $0x50] sm:$0xff]  ;;  %s6704_s12 = smov 64   ;;  %vm4792_vm4 = vcmask 785408  }
 0x4d3   : > { %5836 = vmatprep.subr.bf16.mxu0 %v6141_v18  ;;  %s7889_s4 = scalar_lea.vmem [#allocation2], %s5217_s13  ;;  %v6144_v20 = vld [vmem:[%s9840_s3 + $0x20] sm:$0xff]   ;;  %v2256_v14 = vsel %vm2230_vm2, %v7896_v28, 0  ;;  %v6145_v40 = vld [vmem:[%s9840_s3 + $0x28] sm:$0xff]   ;;  %v2259_v56 = vsel %vm2230_vm2, %v7905_v7, 0  ;;  %v6146_v23 = vld [vmem:[%s9840_s3 + $0x30] sm:$0xff]   ;;  %2817 = vrot.lane.b32.xlu1 %v7892_v35, %s6703_s29 }
 0x4d4   : > { %v1998_v12 = vld [vmem:[%s7889_s4] sm:$0xff]  ;;  %5339 = vmatpush3.bf16.xpose.msra.mxu1 %v2256_v14  ;;  %v7921_v31 = vld [vmem:[#allocation3 + $0x10] sm:$0xff]  ;;  %v6147_v5 = vld [vmem:[%s9840_s3 + $0x38] sm:$0xff]   ;;  %2801 = vrot.lane.b32.xlu0 %v7896_v28, %s6703_s29  ;;  %s6705_s14 = smov 32   ;;  %s10259_s28 = sld [smem:[#allocation127_spill]] }
 0x4d5   : > { %5850 = vmatprep.mubr.bf16.mxu0 %v1998_v12  ;;  %5915 = vmatprep.subr.msk.bf16.mxu1 %vm2230_vm2, %v7898_v34  ;;  %v2262_v6 = vsel %vm2230_vm2, %v7921_v31, 0  ;;  %v7928_v1 = vld [vmem:[#allocation3 + $0x58] sm:$0xff]  ;;  %v1999_v37 = vld [vmem:[%s7889_s4 + $0x8] sm:$0xff]  ;;  %v2000_v16 = vld [vmem:[%s7889_s4 + $0x10] sm:$0xff]  ;;  %s9714_s11 = scalar_lea.vmem [#allocation5], %s5216_s16  ;;  %s10276_s16 = sld [smem:[#allocation12_spill]] }
 0x4d6   : > { %5837 = vmatpush3.bf16.msra.mxu0 %v6141_v18  ;;  %v7933_v30 = vld [vmem:[#allocation3 + $0x18] sm:$0xff]  ;;  %v7938_v41 = vld [vmem:[#allocation3 + $0x60] sm:$0xff]  ;;  %v7948_v32 = vld [vmem:[#allocation3 + $0x68] sm:$0xff]  ;;  %s5081_s15 = sshll.u32 %s6926_s26, 4  ;;  %p10279_p2 = scmp.ne.s32.totalorder %s9981_s30, 0  ;;  %s9766_s15 = int_to_ptr.vmem [resolvable:$true] %s5081_s15 }
 0x4d7   : > { %5838 = vmatprep.subr.bf16.mxu0 %v6142_v27  ;;  %v2265_v39 = vsel %vm2230_vm2, %v7933_v30, 0  ;;  %v2001_v19 = vld [vmem:[%s7889_s4 + $0x18] sm:$0xff]  ;;  %v7943_v36 = vld [vmem:[#allocation3 + $0x20] sm:$0xff]  ;;  %v2003_v15 = vld [vmem:[%s7889_s4 + $0x28] sm:$0xff]  ;;  %2819 = vrot.lane.b32.xlu1 %v7898_v34, %s6703_s29 }
 0x4d8   : > { %v2002_v58 = vld [vmem:[%s7889_s4 + $0x20] sm:$0xff]  ;;  %v2268_v3 = vsel %vm2230_vm2, %v7943_v36, 0  ;;  %v7953_v2 = vld [vmem:[#allocation3 + $0x28] sm:$0xff]  ;;  %v2004_v4 = vld [vmem:[%s7889_s4 + $0x30] sm:$0xff]  ;;  %2803 = vrot.lane.b32.xlu0 %v7905_v7, %s6703_s29 }
 0x4d9   : > { %v2271_v47 = vsel %vm2230_vm2, %v7953_v2, 0  ;;  %v7958_v48 = vld [vmem:[#allocation3 + $0x70] sm:$0xff]  ;;  %v2005_v25 = vld [vmem:[%s7889_s4 + $0x38] sm:$0xff]  ;;  %v5218_v62 = vld [vmem:[%s10038_s20] ss:$0 sm:$0xff] }
 0x4da   : > { %5839 = vmatpush3.bf16.msra.mxu0 %v6142_v27  ;;  %v7963_v26 = vld [vmem:[#allocation3 + $0x30] sm:$0xff]  ;;  %v7967_v61 = vld [vmem:[#allocation3 + $0x78] sm:$0xff] }
 0x4db   : > { %5840 = vmatprep.subr.bf16.mxu0 %v6143_v57  ;;  %v2274_v50 = vsel %vm2230_vm2, %v7963_v26, 0  ;;  %v7969_v17 = vld [vmem:[#allocation3 + $0x38] sm:$0xff]  ;;  %2821 = vrot.lane.b32.xlu1 %v7914_v60, %s6703_s29  ;;  %s5269_s20 = sshll.u32 %s10276_s16, 5 }
 0x4dc   : > { %5341 = vmatpush3.bf16.xpose.msra.mxu1 %v2259_v56  ;;  %v2277_v52 = vsel %vm2230_vm2, %v7969_v17, 0  ;;  %2805 = vrot.lane.b32.xlu0 %v7921_v31, %s6703_s29  ;;  %s5078_s13 = sadd.s32 %s6680_s23, %s5269_s20  ;;  %s6574_s23 = scalar_lea.vmem %s9766_s15, 2048 }
 0x4dd   : > { %5916 = vmatprep.subr.msk.bf16.mxu1 %vm2230_vm2, %v7914_v60  ;;  %s5270_s24 = sshll.u32 %s5078_s13, 7  ;;  %p6575_p7 = scmp.ne.s32.totalorder %s9766_s15, %s6574_s23 }
 0x4de   : > { %5841 = vmatpush3.bf16.msra.mxu0 %v6143_v57  ;;  %s6706_s20 = smov [#allocation9]  }
 0x4df   : > { %5842 = vmatprep.subr.bf16.mxu0 %v6144_v20  ;;  %2823 = vrot.lane.b32.xlu1 %v7928_v1, %s6703_s29  ;;  %p6576_p4 = pnand %p6575_p7, %p10279_p2  ;;  %s6578_s13 = sshll.u32 %s6706_s20, 4  ;;  %s6579_s13 = int_to_ptr.vmem [resolvable:$false] %s6578_s13 }
 0x4e0   : > { %2807 = vrot.lane.b32.xlu0 %v7933_v30, %s6703_s29  ;;  %s6580_s0 = scalar_lea.vmem %s6579_s13, 4096  ;;  %p6581_p1 = scmp.lt.s32.totalorder %s9766_s15, %s6579_s13 }
 0x4e1   : > { %p6577_p0 = pneg %p6576_p4  ;;  %p6582_p6 = scmp.lt.s32.totalorder %s6580_s0, %s6574_s23 }
 0x4e2   : > { %5843 = vmatpush3.bf16.msra.mxu0 %v6144_v20 }
 0x4e3   : > { %5844 = vmatprep.subr.bf16.mxu0 %v6145_v40  ;;  %2809 = vrot.lane.b32.xlu1 %v7943_v36, %s6703_s29  ;;  %p6583_p9 = por %p6582_p6, %p6581_p1 }
 0x4e4   : > { %5343 = vmatpush3.bf16.xpose.msra.mxu1 %v2262_v6 }
 0x4e5   : > { %5917 = vmatprep.subr.msk.bf16.mxu1 %vm2230_vm2, %v7928_v1  ;;  %p6584_p3 = pnand %p6583_p9, %p6577_p0 }
 0x4e6   : > { %5845 = vmatpush3.bf16.msra.mxu0 %v6145_v40 }
 0x4e7   : > { %5846 = vmatprep.subr.bf16.mxu0 %v6146_v23  ;;  %2825 = vrot.lane.b32.xlu1 %v7938_v41, %s6703_s29 }
 0x4ea   : > { %5847 = vmatpush3.bf16.msra.mxu0 %v6146_v23 }
 0x4eb   : > { %5848 = vmatprep.subr.bf16.mxu0 %v6147_v5 }
 0x4ec   : > { %5345 = vmatpush3.bf16.xpose.msra.mxu1 %v2265_v39 }
 0x4ed   : > { %5918 = vmatprep.subr.msk.bf16.mxu1 %vm2230_vm2, %v7938_v41 }
 0x4ee   : > { %5849 = vmatpush3.bf16.msra.mxu0 %v6147_v5 }
 0x4f1   : > { %5851 = vmatmul.mubr.bf16.vlgmr.msra.gmra.mrb[0].mxu0 %v1999_v37 }
 0x4f2   : > { %5854 = vmatprep.mubr.bf16.mxu0 %v2000_v16 }
 0x4f4   : > { %5347 = vmatpush3.bf16.xpose.msra.mxu1 %v2268_v3 }
 0x4f5   : > { %5919 = vmatprep.subr.msk.bf16.mxu1 %vm2230_vm2, %v7948_v32 }
 0x4f9   : > { %5855 = vmatmul.mubr.bf16.gmra.mrb[4].mxu0 %v2001_v19 }
 0x4fa   : > { %5858 = vmatprep.mubr.bf16.mxu0 %v2002_v58 }
 0x4fc   : > { %5349 = vmatpush3.bf16.xpose.msra.mxu1 %v2271_v47 }
 0x4fd   : > { %5920 = vmatprep.subr.msk.bf16.mxu1 %vm2230_vm2, %v7958_v48 }
 0x501   : > { %5859 = vmatmul.mubr.bf16.gmra.mrb[8].mxu0 %v2003_v15 }
 0x502   : > { %5862 = vmatprep.mubr.bf16.mxu0 %v2004_v4 }
 0x504   : > { %5351 = vmatpush3.bf16.xpose.msra.mxu1 %v2274_v50 }
 0x505   : > { %5921 = vmatprep.subr.msk.bf16.mxu1 %vm2230_vm2, %v7967_v61 }
 0x509   : > { %5863 = vmatmul.mubr.bf16.gmra.mrb[12].mxu0 %v2005_v25 }
 0x50c   : > { %5353 = vmatpush3.bf16.xpose.msra.mxu1 %v2277_v52 }
 0x5c4   : > { %v5852_v63 = vpop.f32.mrb[0].mxu0 }
 0x5c5   : > { %v2120_v46 = vadd.f32 %v5852_v63, %v5218_v62  ;;  %v2111_v38 = vpop.f32.mrb[1].mxu0 }
 0x5c6   : > { %v2112_v8 = vadd.f32 %v5218_v62, %v2111_v38  ;;  %v5853_v22 = vpop.f32.mrb[2].mxu0 }
 0x5c7   : > { %v2123_v45 = vadd.f32 %v5853_v22, %v5218_v62  ;;  %v2114_v13 = vpop.f32.mrb[3].mxu0  ;;  %v2176_v10 = vmul.f32 0.17677669, %v2120_v46 }
 0x5c8   : > { %v2115_v0 = vadd.f32 %v5218_v62, %v2114_v13  ;;  %v2174_v21 = vmul.f32 0.17677669, %v2112_v8 }
 0x5c9   : > { %v2177_v53 = vmul.f32 0.17677669, %v2123_v45 }
 0x5ca   : > { %v2175_v33 = vmul.f32 0.17677669, %v2115_v0 }
 0x5cb   : > { %v7998_v43 = vpack.c.bf16 %v2177_v53, %v2176_v10  ;;  %v8048_v53 = vld [vmem:[#allocation4] sm:$0xff] }
 0x5cc   : > { %v8000_v11 = vpack.c.bf16 %v2175_v33, %v2174_v21  ;;  %v5856_v49 = vpop.f32.mrb[4].mxu0  ;;  %10040 = vst [vmem:[#allocation38_spill] sm:$0xff] %v8048_v53  ;;  %v8050_v21 = vld [vmem:[#allocation4 + $0x48] sm:$0xff] }
 0x5cd   : > { %v2136_v29 = vadd.f32 %v5856_v49, %v5218_v62  ;;  %v2127_v44 = vpop.f32.mrb[5].mxu0  ;;  %10041 = vst [vmem:[#allocation39_spill] sm:$0xff] %v8050_v21  ;;  %v8055_v33 = vld [vmem:[#allocation4 + $0x8] sm:$0xff]  ;;  %v8058_v49 = vld [vmem:[#allocation4 + $0x50] sm:$0xff] }
 0x5ce   : > { %5354 = vmatprep.mubr.msk.bf16.mxu1 %vm2230_vm2, %v8000_v11  ;;  %v2128_v51 = vadd.f32 %v5218_v62, %v2127_v44  ;;  %v5857_v55 = vpop.f32.mrb[6].mxu0  ;;  %10042 = vst [vmem:[#allocation40_spill] sm:$0xff] %v8055_v33  ;;  %10043 = vst [vmem:[#allocation41_spill] sm:$0xff] %v8058_v49  ;;  %v8062_v44 = vld [vmem:[#allocation4 + $0x58] sm:$0xff] }
 0x5cf   : > { %5355 = vmatmul.mubr.msk.bf16.vlgmr.msra.gmra.mrb[0].mxu1 %vm2230_vm2, %v8000_v11  ;;  %v2180_v54 = vmul.f32 0.17677669, %v2136_v29  ;;  %v2139_v59 = vadd.f32 %v5857_v55, %v5218_v62  ;;  %v2130_v42 = vpop.f32.mrb[7].mxu0  ;;  %v8060_v29 = vld [vmem:[#allocation4 + $0x10] sm:$0xff]  ;;  %10045 = vst [vmem:[#allocation43_spill] sm:$0xff] %v8062_v44  ;;  %v8070_v55 = vld [vmem:[#allocation4 + $0x60] sm:$0xff] }
 0x5d0   : > { %5356 = vmatprep.mubr.msk.bf16.mxu1 %vm2230_vm2, %v7998_v43  ;;  %v2178_v24 = vmul.f32 0.17677669, %v2128_v51  ;;  %v2131_v9 = vadd.f32 %v5218_v62, %v2130_v42  ;;  %10044 = vst [vmem:[#allocation42_spill] sm:$0xff] %v8060_v29  ;;  %v8067_v51 = vld [vmem:[#allocation4 + $0x18] sm:$0xff]  ;;  %10047 = vst [vmem:[#allocation45_spill] sm:$0xff] %v8070_v55  ;;  %v8079_v42 = vld [vmem:[#allocation4 + $0x28] sm:$0xff] }
 0x5d1   : > { %v2181_v18 = vmul.f32 0.17677669, %v2139_v59  ;;  %10046 = vst [vmem:[#allocation44_spill] sm:$0xff] %v8067_v51  ;;  %v8075_v59 = vld [vmem:[#allocation4 + $0x68] sm:$0xff]  ;;  %10050 = vst [vmem:[#allocation48_spill] sm:$0xff] %v8079_v42 }
 0x5d2   : > { %v2179_v27 = vmul.f32 0.17677669, %v2131_v9  ;;  %10049 = vst [vmem:[#allocation47_spill] sm:$0xff] %v8075_v59  ;;  %v8085_v9 = vld [vmem:[#allocation4 + $0x30] sm:$0xff] }
 0x5d3   : > { %v8008_v57 = vpack.c.bf16 %v2181_v18, %v2180_v54  ;;  %v8072_v54 = vld [vmem:[#allocation4 + $0x20] sm:$0xff]  ;;  %10052 = vst [vmem:[#allocation50_spill] sm:$0xff] %v8085_v9  ;;  %v8087_v18 = vld [vmem:[#allocation4 + $0x78] sm:$0xff] }
 0x5d4   : > { %v8010_v12 = vpack.c.bf16 %v2179_v27, %v2178_v24  ;;  %v5860_v20 = vpop.f32.mrb[8].mxu0  ;;  %10048 = vst [vmem:[#allocation46_spill] sm:$0xff] %v8072_v54  ;;  %v8081_v24 = vld [vmem:[#allocation4 + $0x70] sm:$0xff]  ;;  %10053 = vst [vmem:[#allocation51_spill] sm:$0xff] %v8087_v18  ;;  %v8091_v27 = vld [vmem:[#allocation4 + $0x38] sm:$0xff] }
 0x5d5   : > { %v2152_v14 = vadd.f32 %v5860_v20, %v5218_v62  ;;  %v2143_v40 = vpop.f32.mrb[9].mxu0  ;;  %10051 = vst [vmem:[#allocation49_spill] sm:$0xff] %v8081_v24  ;;  %10054 = vst [vmem:[#allocation52_spill] sm:$0xff] %v8091_v27  ;;  %v2818_v20 = vpop.permute.xlu1 %2817 }
 0x5d6   : > { %v2144_v56 = vadd.f32 %v5218_v62, %v2143_v40  ;;  %v5861_v23 = vpop.f32.mrb[10].mxu0 }
 0x5d7   : > { %5357 = vmatmul.mubr.msk.bf16.gmra.mrb[4].mxu1 %vm2230_vm2, %v7998_v43  ;;  %v2184_v5 = vmul.f32 0.17677669, %v2152_v14  ;;  %v2155_v6 = vadd.f32 %v5861_v23, %v5218_v62  ;;  %v2146_v37 = vpop.f32.mrb[11].mxu0 }
 0x5d8   : > { %5358 = vmatprep.mubr.msk.bf16.mxu1 %vm2230_vm2, %v8010_v12  ;;  %v2182_v16 = vmul.f32 0.17677669, %v2144_v56  ;;  %v2147_v39 = vadd.f32 %v5218_v62, %v2146_v37 }
 0x5d9   : > { %v2185_v19 = vmul.f32 0.17677669, %v2155_v6 }
 0x5da   : > { %v2183_v58 = vmul.f32 0.17677669, %v2147_v39 }
 0x5db   : > { %v8016_v3 = vpack.c.bf16 %v2185_v19, %v2184_v5 }
 0x5dc   : > { %v8018_v15 = vpack.c.bf16 %v2183_v58, %v2182_v16  ;;  %v5864_v4 = vpop.f32.mrb[12].mxu0 }
 0x5dd   : > { %v2168_v47 = vadd.f32 %v5864_v4, %v5218_v62  ;;  %v2159_v25 = vpop.f32.mrb[13].mxu0 }
 0x5de   : > { %v2160_v50 = vadd.f32 %v5218_v62, %v2159_v25  ;;  %v5865_v52 = vpop.f32.mrb[14].mxu0 }
 0x5df   : > { %5359 = vmatmul.mubr.msk.bf16.gmra.mrb[8].mxu1 %vm2230_vm2, %v8010_v12  ;;  %v2188_v63 = vmul.f32 0.17677669, %v2168_v47  ;;  %v2171_v46 = vadd.f32 %v5865_v52, %v5218_v62  ;;  %v2162_v38 = vpop.f32.mrb[15].mxu0 }
 0x5e0   : > { %5360 = vmatprep.mubr.msk.bf16.mxu1 %vm2230_vm2, %v8008_v57  ;;  %v2186_v8 = vmul.f32 0.17677669, %v2160_v50  ;;  %v2163_v22 = vadd.f32 %v5218_v62, %v2162_v38  ;;  %v8046_v62 = vld [vmem:[#allocation4 + $0x40] sm:$0xff] }
 0x5e1   : > { %v2189_v45 = vmul.f32 0.17677669, %v2171_v46  ;;  %10039 = vst [vmem:[#allocation37_spill] sm:$0xff] %v8046_v62  ;;  %5370 = vmatprep.subr.bf16.mxu0 %v8046_v62  ;;  %v8201_v62 = vpop.permute.xlu1 %2819 }
 0x5e2   : > { %v2187_v13 = vmul.f32 0.17677669, %v2163_v22  ;;  %5371 = vmatpush3.bf16.msra.mxu0 %v8048_v53 }
 0x5e3   : > { %v8024_v0 = vpack.c.bf16 %v2189_v45, %v2188_v63  ;;  %5372 = vmatprep.subr.bf16.mxu0 %v8050_v21 }
 0x5e4   : > { %v8026_v10 = vpack.c.bf16 %v2187_v13, %v2186_v8 }
 0x5e6   : > { %5373 = vmatpush3.bf16.msra.mxu0 %v8055_v33 }
 0x5e7   : > { %5361 = vmatmul.mubr.msk.bf16.gmra.mrb[12].mxu1 %vm2230_vm2, %v8008_v57  ;;  %5374 = vmatprep.subr.bf16.mxu0 %v8058_v49 }
 0x5e8   : > { %5362 = vmatprep.mubr.msk.bf16.mxu1 %vm2230_vm2, %v8018_v15 }
 0x5ea   : > { %5375 = vmatpush3.bf16.msra.mxu0 %v8060_v29  ;;  %v8199_v29 = vpop.permute.xlu0 %2801 }
 0x5eb   : > { %5376 = vmatprep.subr.bf16.mxu0 %v8062_v44 }
 0x5ee   : > { %5377 = vmatpush3.bf16.msra.mxu0 %v8067_v51 }
 0x5ef   : > { %5363 = vmatmul.mubr.msk.bf16.gmra.mrb[16].mxu1 %vm2230_vm2, %v8018_v15  ;;  %5378 = vmatprep.subr.bf16.mxu0 %v8070_v55 }
 0x5f0   : > { %5364 = vmatprep.mubr.msk.bf16.mxu1 %vm2230_vm2, %v8016_v3 }
 0x5f2   : > { %5379 = vmatpush3.bf16.msra.mxu0 %v8072_v54 }
 0x5f3   : > { %5380 = vmatprep.subr.bf16.mxu0 %v8075_v59 }
 0x5f6   : > { %5381 = vmatpush3.bf16.msra.mxu0 %v8079_v42 }
 0x5f7   : > { %5365 = vmatmul.mubr.msk.bf16.gmra.mrb[20].mxu1 %vm2230_vm2, %v8016_v3  ;;  %5382 = vmatprep.subr.bf16.mxu0 %v8081_v24 }
 0x5f8   : > { %5366 = vmatprep.mubr.msk.bf16.mxu1 %vm2230_vm2, %v8026_v10 }
 0x5fa   : > { %5383 = vmatpush3.bf16.msra.mxu0 %v8085_v9 }
 0x5fb   : > { %5384 = vmatprep.subr.bf16.mxu0 %v8087_v18 }
 0x5fe   : > { %5385 = vmatpush3.bf16.msra.mxu0 %v8091_v27 }
 0x5ff   : > { %5367 = vmatmul.mubr.msk.bf16.gmra.mrb[24].mxu1 %vm2230_vm2, %v8026_v10  ;;  %5922 = vmatprep.subr.msk.bf16.mxu0 %vm2230_vm2, %v2818_v20 }
 0x600   : > { %5368 = vmatprep.mubr.msk.bf16.mxu1 %vm2230_vm2, %v8024_v0 }
 0x607   : > { %5369 = vmatmul.mubr.msk.bf16.gmra.mrb[28].mxu1 %vm2230_vm2, %v8024_v0 }
 0x6a2   : > { %v8095_v14 = vpop.f32.mrb[0].mxu1 }
 0x6a3   : > { %v8097_v40 = vpop.f32.mrb[1].mxu1 }
 0x6a4   : > { %v8099_v56 = vpop.f32.mrb[2].mxu1  ;;  %v2416_v23 = vmax.f32 %v8095_v14, %v8097_v40 }
 0x6a5   : > { %v8103_v5 = vpop.f32.mrb[3].mxu1 }
 0x6a6   : > { %2417 = vmax.xlane.f32.xlu0 %v2416_v23  ;;  %v2419_v6 = vmax.f32 %v8099_v56, %v8103_v5 }
 0x6aa   : > { %2420 = vmax.xlane.f32.xlu0 %v2419_v6  ;;  %v8107_v37 = vpop.f32.mrb[4].mxu1 }
 0x6ab   : > { %v8109_v16 = vpop.f32.mrb[5].mxu1 }
 0x6ac   : > { %v8111_v39 = vpop.f32.mrb[6].mxu1  ;;  %v2422_v19 = vmax.f32 %v8107_v37, %v8109_v16 }
 0x6ad   : > { %v8115_v58 = vpop.f32.mrb[7].mxu1 }
 0x6ae   : > { %2423 = vmax.xlane.f32.xlu1 %v2422_v19  ;;  %v2425_v4 = vmax.f32 %v8111_v39, %v8115_v58 }
 0x6b2   : > { %2426 = vmax.xlane.f32.xlu1 %v2425_v4  ;;  %v8119_v47 = vpop.f32.mrb[8].mxu1 }
 0x6b3   : > { %v8121_v25 = vpop.f32.mrb[9].mxu1 }
 0x6b4   : > { %v8123_v50 = vpop.f32.mrb[10].mxu1  ;;  %v2428_v52 = vmax.f32 %v8119_v47, %v8121_v25 }
 0x6b5   : > { %v8127_v63 = vpop.f32.mrb[11].mxu1 }
 0x6b6   : > { %2429 = vmax.xlane.f32.xlu0 %v2428_v52  ;;  %v2431_v46 = vmax.f32 %v8123_v50, %v8127_v63 }
 0x6b8   : > { %2432 = vmax.xlane.f32.xlu1 %v2431_v46 }
 0x6ba   : > { %v8131_v38 = vpop.f32.mrb[12].mxu1 }
 0x6bb   : > { %v8133_v8 = vpop.f32.mrb[13].mxu1 }
 0x6bc   : > { %v8135_v22 = vpop.f32.mrb[14].mxu1  ;;  %v2434_v45 = vmax.f32 %v8131_v38, %v8133_v8 }
 0x6bd   : > { %v8139_v13 = vpop.f32.mrb[15].mxu1 }
 0x6be   : > { %2435 = vmax.xlane.f32.xlu0 %v2434_v45  ;;  %v2437_v20 = vmax.f32 %v8135_v22, %v8139_v13 }
 0x6c0   : > { %2438 = vmax.xlane.f32.xlu1 %v2437_v20 }
 0x6c2   : > { %v8143_v23 = vpop.f32.mrb[16].mxu1 }
 0x6c3   : > { %v8145_v6 = vpop.f32.mrb[17].mxu1 }
 0x6c4   : > { %v8147_v19 = vpop.f32.mrb[18].mxu1  ;;  %v2440_v4 = vmax.f32 %v8143_v23, %v8145_v6 }
 0x6c5   : > { %v8151_v52 = vpop.f32.mrb[19].mxu1 }
 0x6c6   : > { %2441 = vmax.xlane.f32.xlu0 %v2440_v4  ;;  %v2443_v46 = vmax.f32 %v8147_v19, %v8151_v52 }
 0x6c8   : > { %2444 = vmax.xlane.f32.xlu1 %v2443_v46 }
 0x6ca   : > { %v8155_v45 = vpop.f32.mrb[20].mxu1 }
 0x6cb   : > { %v8157_v18 = vpop.f32.mrb[21].mxu1 }
 0x6cc   : > { %v8159_v20 = vpop.f32.mrb[22].mxu1  ;;  %v2446_v24 = vmax.f32 %v8155_v45, %v8157_v18 }
 0x6cd   : > { %v8163_v27 = vpop.f32.mrb[23].mxu1 }
 0x6ce   : > { %2447 = vmax.xlane.f32.xlu1 %v2446_v24  ;;  %v2449_v59 = vmax.f32 %v8159_v20, %v8163_v27 }
 0x6d0   : > { %2450 = vmax.xlane.f32.xlu0 %v2449_v59 }
 0x6d2   : > { %v8167_v4 = vpop.f32.mrb[24].mxu1 }
 0x6d3   : > { %10055 = vst [vmem:[#allocation53_spill] sm:$0xff] %v8167_v4  ;;  %v8169_v9 = vpop.f32.mrb[25].mxu1 }
 0x6d4   : > { %10056 = vst [vmem:[#allocation54_spill] sm:$0xff] %v8169_v9  ;;  %v8171_v46 = vpop.f32.mrb[26].mxu1  ;;  %v2452_v55 = vmax.f32 %v8167_v4, %v8169_v9 }
 0x6d5   : > { %10057 = vst [vmem:[#allocation55_spill] sm:$0xff] %v8171_v46  ;;  %v8175_v42 = vpop.f32.mrb[27].mxu1 }
 0x6d6   : > { %10058 = vst [vmem:[#allocation56_spill] sm:$0xff] %v8175_v42  ;;  %v2455_v44 = vmax.f32 %v8171_v46, %v8175_v42 }
 0x6da   : > { %v8179_v54 = vpop.f32.mrb[28].mxu1 }
 0x6db   : > { %10059 = vst [vmem:[#allocation57_spill] sm:$0xff] %v8179_v54  ;;  %v8181_v24 = vpop.f32.mrb[29].mxu1 }
 0x6dc   : > { %10060 = vst [vmem:[#allocation58_spill] sm:$0xff] %v8181_v24  ;;  %v8183_v49 = vpop.f32.mrb[30].mxu1  ;;  %v2458_v59 = vmax.f32 %v8179_v54, %v8181_v24 }
 0x6dd   : > { %10061 = vst [vmem:[#allocation59_spill] sm:$0xff] %v8183_v49  ;;  %v8187_v51 = vpop.f32.mrb[31].mxu1 }
 0x6de   : > { %10062 = vst [vmem:[#allocation60_spill] sm:$0xff] %v8187_v51  ;;  %v2461_v21 = vmax.f32 %v8183_v49, %v8187_v51 }
 0x6df   : > { %2827 = vrot.lane.b32.xlu1 %v7948_v32, %s6703_s29 }
 0x6e6   : > { %2811 = vrot.lane.b32.xlu0 %v7953_v2, %s6703_s29 }
 0x703   : > { %2453 = vmax.xlane.f32.xlu1 %v2452_v55 }
 0x705   : > { %2456 = vmax.xlane.f32.xlu0 %v2455_v44  ;;  %v8207_v44 = vpop.permute.xlu0 %2803 }
 0x707   : > { %2459 = vmax.xlane.f32.xlu1 %v2458_v59 }
 0x709   : > { %2462 = vmax.xlane.f32.xlu0 %v2461_v21  ;;  %v8213_v21 = vpop.permute.xlu1 %2821  ;;  %v8219_v55 = vpop.permute.xlu0 %2805 }
 0x70d   : > { %v8221_v59 = vpop.permute.xlu1 %2823  ;;  %v8227_v51 = vpop.permute.xlu0 %2807 }
 0x711   : > { %v8233_v49 = vpop.permute.xlu1 %2809 }
 0x712   : > { %10063 = vst [vmem:[#allocation61_spill] sm:$0xff] %v8233_v49 }
 0x715   : > { %v8241_v9 = vpop.permute.xlu1 %2825 }
 0x718   : > { %2829 = vrot.lane.b32.xlu1 %v7958_v48, %s6703_s29 }
 0x71c   : > { %2831 = vrot.lane.b32.xlu1 %v7967_v61, %s6703_s29 }
 0x71f   : > { %2813 = vrot.lane.b32.xlu0 %v7963_v26, %s6703_s29 }
 0x720   : > { %3443 = vrot.lane.b32.xlu1 %v7896_v28, %s6704_s12 }
 0x723   : > { %2815 = vrot.lane.b32.xlu0 %v7969_v17, %s6703_s29 }
 0x724   : > { %2771 = vrot.lane.b32.xlu1 %v7998_v43, %s6703_s29 }
 0x727   : > { %2769 = vrot.lane.b32.xlu0 %v8000_v11, %s6703_s29 }
 0x728   : > { %3461 = vrot.lane.b32.xlu1 %v7898_v34, %s6704_s12 }
 0x72b   : > { %3459 = vrot.lane.b32.xlu0 %v7892_v35, %s6704_s12 }
 0x72c   : > { %3447 = vrot.lane.b32.xlu1 %v7921_v31, %s6704_s12 }
 0x72f   : > { %3445 = vrot.lane.b32.xlu0 %v7905_v7, %s6704_s12 }
 0x730   : > { %2775 = vrot.lane.b32.xlu1 %v8008_v57, %s6703_s29 }
 0x733   : > { %v2418_v24 = vpop.xlane.xlu0 %2417  ;;  %2773 = vrot.lane.b32.xlu0 %v8010_v12, %s6703_s29 }
 0x734   : > { %v2464_v54 = vsub.f32 %v8095_v14, %v2418_v24  ;;  %v2465_v33 = vsub.f32 %v8097_v40, %v2418_v24  ;;  %3465 = vrot.lane.b32.xlu1 %v7928_v1, %s6704_s12 }
 0x736   : > { %v2496_v42 = vmul.f32 1.442695, %v2464_v54  ;;  %v2498_v46 = vmul.f32 1.442695, %v2465_v33 }
 0x737   : > { %v2421_v4 = vpop.xlane.xlu0 %2420  ;;  %3463 = vrot.lane.b32.xlu0 %v7914_v60, %s6704_s12 }
 0x738   : > { %6156 = vpow2.f32 %v2496_v42  ;;  %v2466_v53 = vsub.f32 %v8099_v56, %v2421_v4  ;;  %v2467_v49 = vsub.f32 %v8103_v5, %v2421_v4  ;;  %3451 = vrot.lane.b32.xlu1 %v7943_v36, %s6704_s12 }
 0x739   : > { %6158 = vpow2.f32 %v2498_v46 }
 0x73a   : > { %v2500_v14 = vmul.f32 1.442695, %v2466_v53  ;;  %v2502_v40 = vmul.f32 1.442695, %v2467_v49 }
 0x73b   : > { %v2424_v24 = vpop.xlane.xlu1 %2423  ;;  %3449 = vrot.lane.b32.xlu0 %v7933_v30, %s6704_s12 }
 0x73c   : > { %6160 = vpow2.f32 %v2500_v14  ;;  %v2468_v33 = vsub.f32 %v8107_v37, %v2424_v24  ;;  %v2469_v54 = vsub.f32 %v8109_v16, %v2424_v24  ;;  %2779 = vrot.lane.b32.xlu1 %v8016_v3, %s6703_s29 }
 0x73d   : > { %6162 = vpow2.f32 %v2502_v40 }
 0x73e   : > { %v2504_v42 = vmul.f32 1.442695, %v2468_v33  ;;  %v2506_v56 = vmul.f32 1.442695, %v2469_v54 }
 0x73f   : > { %v2427_v5 = vpop.xlane.xlu1 %2426  ;;  %2777 = vrot.lane.b32.xlu0 %v8018_v15, %s6703_s29 }
 0x740   : > { %6164 = vpow2.f32 %v2504_v42  ;;  %v2470_v53 = vsub.f32 %v8111_v39, %v2427_v5  ;;  %v2471_v49 = vsub.f32 %v8115_v58, %v2427_v5  ;;  %3469 = vrot.lane.b32.xlu1 %v7948_v32, %s6704_s12 }
 0x741   : > { %6166 = vpow2.f32 %v2506_v56 }
 0x742   : > { %v6157_v37 = vpop.eup %6156  ;;  %v2508_v16 = vmul.f32 1.442695, %v2470_v53  ;;  %v2510_v4 = vmul.f32 1.442695, %v2471_v49 }
 0x743   : > { %v6159_v46 = vpop.eup %6158  ;;  %v2430_v14 = vpop.xlane.xlu0 %2429  ;;  %3467 = vrot.lane.b32.xlu0 %v7938_v41, %s6704_s12 }
 0x744   : > { %6168 = vpow2.f32 %v2508_v16  ;;  %v2472_v40 = vsub.f32 %v8119_v47, %v2430_v14  ;;  %v2473_v24 = vsub.f32 %v8121_v25, %v2430_v14  ;;  %3455 = vrot.lane.b32.xlu1 %v7963_v26, %s6704_s12  ;;  %v8267_v39 = vadd.f32 %v6159_v46, %v6157_v37 }
 0x745   : > { %6170 = vpow2.f32 %v2510_v4  ;;  %v2433_v58 = vpop.xlane.xlu1 %2432 }
 0x746   : > { %10064 = vst [vmem:[#allocation62_spill] sm:$0xff] %v8267_v39  ;;  %v6161_v33 = vpop.eup %6160  ;;  %v2512_v54 = vmul.f32 1.442695, %v2472_v40  ;;  %v2514_v42 = vmul.f32 1.442695, %v2473_v24  ;;  %v2474_v56 = vsub.f32 %v8123_v50, %v2433_v58  ;;  %v2475_v5 = vsub.f32 %v8127_v63, %v2433_v58 }
 0x747   : > { %v6163_v53 = vpop.eup %6162  ;;  %3453 = vrot.lane.b32.xlu0 %v7953_v2, %s6704_s12  ;;  %v2608_v47 = vpack.c.bf16 %v6161_v33, %v6157_v37  ;;  %v2858_v63 = vsel %vm2230_vm2, %v8199_v29, 0 }
 0x748   : > { %6172 = vpow2.f32 %v2512_v54  ;;  %v2516_v25 = vmul.f32 1.442695, %v2474_v56  ;;  %v2518_v49 = vmul.f32 1.442695, %v2475_v5  ;;  %2783 = vrot.lane.b32.xlu1 %v8024_v0, %s6703_s29  ;;  %v2609_v16 = vpack.c.bf16 %v6163_v53, %v6159_v46 }
 0x749   : > { %6174 = vpow2.f32 %v2514_v42  ;;  %v8275_v4 = vadd.f32 %v6163_v53, %v6161_v33 }
 0x74a   : > { %v6165_v14 = vpop.eup %6164  ;;  %6176 = vpow2.f32 %v2516_v25  ;;  %2656 = vmatprep.mubr.bf16.mxu0 %v2609_v16 }
 0x74b   : > { %10065 = vst [vmem:[#allocation63_spill] sm:$0xff] %v8275_v4  ;;  %v6167_v50 = vpop.eup %6166  ;;  %6178 = vpow2.f32 %v2518_v49  ;;  %2657 = vmatmul.mubr.bf16.vlgmr.msra.gmra.mrb[16].mxu0 %v2608_v47  ;;  %v2436_v37 = vpop.xlane.xlu0 %2435  ;;  %2781 = vrot.lane.b32.xlu0 %v8026_v10, %s6703_s29 }
 0x74c   : > { %5435 = vmatpush3.bf16.xpose.msra.mxu0 %v2858_v63  ;;  %v2476_v40 = vsub.f32 %v8131_v38, %v2436_v37  ;;  %v2477_v46 = vsub.f32 %v8133_v8, %v2436_v37  ;;  %3473 = vrot.lane.b32.xlu1 %v7967_v61, %s6704_s12  ;;  %v8285_v24 = vadd.f32 %v6167_v50, %v6165_v14 }
 0x74d   : > { %5923 = vmatprep.subr.msk.bf16.mxu0 %vm2230_vm2, %v8201_v62  ;;  %v2439_v29 = vpop.xlane.xlu1 %2438 }
 0x74e   : > { %10066 = vst [vmem:[#allocation64_spill] sm:$0xff] %v8285_v24  ;;  %v6169_v58 = vpop.eup %6168  ;;  %v2520_v33 = vmul.f32 1.442695, %v2476_v40  ;;  %v2522_v54 = vmul.f32 1.442695, %v2477_v46  ;;  %v2478_v42 = vsub.f32 %v8135_v22, %v2439_v29  ;;  %v2479_v56 = vsub.f32 %v8139_v13, %v2439_v29 }
 0x74f   : > { %v6171_v5 = vpop.eup %6170  ;;  %3471 = vrot.lane.b32.xlu0 %v7958_v48, %s6704_s12  ;;  %v2610_v38 = vpack.c.bf16 %v6169_v58, %v6165_v14  ;;  %v2861_v13 = vsel %vm2230_vm2, %v8207_v44, 0 }
 0x750   : > { %6180 = vpow2.f32 %v2520_v33  ;;  %v2524_v8 = vmul.f32 1.442695, %v2478_v42  ;;  %v2526_v53 = vmul.f32 1.442695, %v2479_v56  ;;  %4069 = vrot.lane.b32.xlu1 %v7896_v28, %s6705_s14  ;;  %v2611_v62 = vpack.c.bf16 %v6171_v5, %v6167_v50 }
 0x751   : > { %6182 = vpow2.f32 %v2522_v54  ;;  %v8295_v47 = vadd.f32 %v6171_v5, %v6169_v58 }
 0x752   : > { %v6173_v25 = vpop.eup %6172  ;;  %6184 = vpow2.f32 %v2524_v8  ;;  %2664 = vmatprep.mubr.bf16.mxu0 %v2611_v62 }
 0x753   : > { %10067 = vst [vmem:[#allocation65_spill] sm:$0xff] %v8295_v47  ;;  %v6175_v22 = vpop.eup %6174  ;;  %6186 = vpow2.f32 %v2526_v53  ;;  %2665 = vmatmul.mubr.bf16.gmra.mrb[20].mxu0 %v2610_v38  ;;  %v2442_v49 = vpop.xlane.xlu0 %2441  ;;  %3457 = vrot.lane.b32.xlu0 %v7969_v17, %s6704_s12 }
 0x754   : > { %v6177_v16 = vpop.eup %6176  ;;  %5437 = vmatpush3.bf16.xpose.msra.mxu0 %v2861_v13  ;;  %v2480_v28 = vsub.f32 %v8143_v23, %v2442_v49  ;;  %v2481_v14 = vsub.f32 %v8145_v6, %v2442_v49  ;;  %3429 = vrot.lane.b32.xlu1 %v7998_v43, %s6704_s12  ;;  %v8305_v50 = vadd.f32 %v6175_v22, %v6173_v25 }
 0x755   : > { %v6179_v63 = vpop.eup %6178  ;;  %5924 = vmatprep.subr.msk.bf16.mxu0 %vm2230_vm2, %v8213_v21  ;;  %v2445_v44 = vpop.xlane.xlu1 %2444  ;;  %v2612_v37 = vpack.c.bf16 %v6177_v16, %v6173_v25 }
 0x756   : > { %10068 = vst [vmem:[#allocation66_spill] sm:$0xff] %v8305_v50  ;;  %v2528_v40 = vmul.f32 1.442695, %v2480_v28  ;;  %v2530_v46 = vmul.f32 1.442695, %v2481_v14  ;;  %v2482_v29 = vsub.f32 %v8147_v19, %v2445_v44  ;;  %v2483_v58 = vsub.f32 %v8151_v52, %v2445_v44  ;;  %v6541_v50 = vld [vmem:[#allocation4 + $0x30] sm:$0xff] }
 0x757   : > { %v2613_v23 = vpack.c.bf16 %v6179_v63, %v6175_v22  ;;  %3427 = vrot.lane.b32.xlu0 %v8000_v11, %s6704_s12  ;;  %v8313_v6 = vadd.f32 %v6179_v63, %v6177_v16  ;;  %v2864_v19 = vsel %vm2230_vm2, %v8219_v55, 0 }
 0x758   : > { %6188 = vpow2.f32 %v2528_v40  ;;  %v2532_v33 = vmul.f32 1.442695, %v2482_v29  ;;  %v2534_v54 = vmul.f32 1.442695, %v2483_v58  ;;  %4087 = vrot.lane.b32.xlu1 %v7898_v34, %s6705_s14 }
 0x759   : > { %10069 = vst [vmem:[#allocation67_spill] sm:$0xff] %v8313_v6  ;;  %6190 = vpow2.f32 %v2530_v46  ;;  %2672 = vmatprep.mubr.bf16.mxu0 %v2613_v23 }
 0x75a   : > { %v6181_v21 = vpop.eup %6180  ;;  %6192 = vpow2.f32 %v2532_v33 }
 0x75b   : > { %v6183_v42 = vpop.eup %6182  ;;  %6194 = vpow2.f32 %v2534_v54  ;;  %2673 = vmatmul.mubr.bf16.gmra.mrb[24].mxu0 %v2612_v37  ;;  %v2448_v52 = vpop.xlane.xlu1 %2447  ;;  %4085 = vrot.lane.b32.xlu0 %v7892_v35, %s6705_s14 }
 0x75c   : > { %v6185_v56 = vpop.eup %6184  ;;  %5439 = vmatpush3.bf16.xpose.msra.mxu0 %v2864_v19  ;;  %v2484_v5 = vsub.f32 %v8155_v45, %v2448_v52  ;;  %v2485_v34 = vsub.f32 %v8157_v18, %v2448_v52  ;;  %4073 = vrot.lane.b32.xlu1 %v7921_v31, %s6705_s14  ;;  %v8325_v38 = vadd.f32 %v6183_v42, %v6181_v21  ;;  %v10084_v52 = vld [vmem:[#allocation58_spill] sm:$0xff] }
 0x75d   : > { %v6187_v8 = vpop.eup %6186  ;;  %5925 = vmatprep.subr.msk.bf16.mxu0 %vm2230_vm2, %v8221_v59  ;;  %v2451_v55 = vpop.xlane.xlu0 %2450  ;;  %v2614_v53 = vpack.c.bf16 %v6185_v56, %v6181_v21 }
 0x75e   : > { %10070 = vst [vmem:[#allocation68_spill] sm:$0xff] %v8325_v38  ;;  %v2536_v62 = vmul.f32 1.442695, %v2484_v5  ;;  %v2538_v25 = vmul.f32 1.442695, %v2485_v34  ;;  %v2486_v35 = vsub.f32 %v8159_v20, %v2451_v55  ;;  %v2487_v22 = vsub.f32 %v8163_v27, %v2451_v55 }
 0x75f   : > { %v2615_v45 = vpack.c.bf16 %v6187_v8, %v6183_v42  ;;  %4071 = vrot.lane.b32.xlu0 %v7905_v7, %s6705_s14  ;;  %v8333_v18 = vadd.f32 %v6187_v8, %v6185_v56  ;;  %v2867_v27 = vsel %vm2230_vm2, %v8227_v51, 0  ;;  %v2828_v40 = vpop.permute.xlu1 %2827  ;;  %v10083_v42 = vld [vmem:[#allocation57_spill] sm:$0xff]  ;;  %v10085_v8 = vld [vmem:[#allocation59_spill] sm:$0xff] }
 0x760   : > { %6196 = vpow2.f32 %v2536_v62  ;;  %v2540_v31 = vmul.f32 1.442695, %v2486_v35  ;;  %v2542_v13 = vmul.f32 1.442695, %v2487_v22  ;;  %3433 = vrot.lane.b32.xlu1 %v8008_v57, %s6704_s12  ;;  %v10088_v22 = vld [vmem:[#allocation42_spill] sm:$0xff] }
 0x761   : > { %10071 = vst [vmem:[#allocation69_spill] sm:$0xff] %v8333_v18  ;;  %6198 = vpow2.f32 %v2538_v25  ;;  %2680 = vmatprep.mubr.bf16.mxu0 %v2615_v45  ;;  %v2812_v23 = vpop.permute.xlu0 %2811 }
 0x762   : > { %v6189_v59 = vpop.eup %6188  ;;  %6200 = vpow2.f32 %v2540_v31 }
 0x763   : > { %v6191_v49 = vpop.eup %6190  ;;  %6202 = vpow2.f32 %v2542_v13  ;;  %2681 = vmatmul.mubr.bf16.gmra.mrb[28].mxu0 %v2614_v53  ;;  %3431 = vrot.lane.b32.xlu0 %v8010_v12, %s6704_s12  ;;  %v10086_v53 = vld [vmem:[#allocation60_spill] sm:$0xff] }
 0x764   : > { %v6193_v7 = vpop.eup %6192  ;;  %5441 = vmatpush3.bf16.xpose.msra.mxu0 %v2867_v27  ;;  %4091 = vrot.lane.b32.xlu1 %v7928_v1, %s6705_s14  ;;  %v8343_v20 = vadd.f32 %v6191_v49, %v6189_v59  ;;  %v10074_v1 = vld [vmem:[#allocation61_spill] sm:$0xff] }
 0x765   : > { %v6195_v16 = vpop.eup %6194  ;;  %5926 = vmatprep.subr.msk.bf16.mxu0 %vm2230_vm2, %v8241_v9  ;;  %v2616_v28 = vpack.c.bf16 %v6193_v7, %v6189_v59  ;;  %v2870_v37 = vsel %vm2230_vm2, %v10074_v1, 0  ;;  %v10092_v1 = vld [vmem:[#allocation46_spill] sm:$0xff] }
 0x766   : > { %10072 = vst [vmem:[#allocation70_spill] sm:$0xff] %v8343_v20  ;;  %v2617_v14 = vpack.c.bf16 %v6195_v16, %v6191_v49  ;;  %v8347_v63 = vadd.f32 %v6195_v16, %v6193_v7  ;;  %v10089_v49 = vld [vmem:[#allocation39_spill] sm:$0xff]  ;;  %v10090_v7 = vld [vmem:[#allocation44_spill] sm:$0xff] }
 0x767   : > { %4089 = vrot.lane.b32.xlu0 %v7914_v60, %s6705_s14 }
 0x768   : > { %10073 = vst [vmem:[#allocation71_spill] sm:$0xff] %v8347_v63  ;;  %2688 = vmatprep.mubr.bf16.mxu0 %v2617_v14  ;;  %4077 = vrot.lane.b32.xlu1 %v7943_v36, %s6705_s14  ;;  %v10091_v14 = vld [vmem:[#allocation41_spill] sm:$0xff] }
 0x76a   : > { %v6197_v51 = vpop.eup %6196 }
 0x76b   : > { %v6199_v44 = vpop.eup %6198  ;;  %2689 = vmatmul.mubr.bf16.gmra.mrb[32].mxu0 %v2616_v28  ;;  %4075 = vrot.lane.b32.xlu0 %v7933_v30, %s6705_s14  ;;  %v2873_v30 = vsel %vm2230_vm2, %v2812_v23, 0 }
 0x76c   : > { %v6201_v9 = vpop.eup %6200  ;;  %5443 = vmatpush3.bf16.xpose.msra.mxu0 %v2870_v37  ;;  %3437 = vrot.lane.b32.xlu1 %v8016_v3, %s6704_s12  ;;  %v8359_v60 = vadd.f32 %v6199_v44, %v6197_v51 }
 0x76d   : > { %v6203_v46 = vpop.eup %6202  ;;  %5927 = vmatprep.subr.msk.bf16.mxu0 %vm2230_vm2, %v2828_v40  ;;  %v2618_v36 = vpack.c.bf16 %v6201_v9, %v6197_v51 }
 0x76e   : > { %10075 = vst [vmem:[#allocation61_spill] sm:$0xff] %v8359_v60  ;;  %v2619_v29 = vpack.c.bf16 %v6203_v46, %v6199_v44  ;;  %v8362_v58 = vadd.f32 %v6203_v46, %v6201_v9 }
 0x76f   : > { %3435 = vrot.lane.b32.xlu0 %v8018_v15, %s6704_s12 }
 0x770   : > { %10076 = vst [vmem:[#allocation72_spill] sm:$0xff] %v8362_v58  ;;  %2696 = vmatprep.mubr.bf16.mxu0 %v2619_v29  ;;  %4095 = vrot.lane.b32.xlu1 %v7948_v32, %s6705_s14  ;;  %v10077_v32 = vld [vmem:[#allocation38_spill] sm:$0xff] }
 0x773   : > { %2697 = vmatmul.mubr.bf16.gmra.mrb[36].mxu0 %v2618_v36  ;;  %4093 = vrot.lane.b32.xlu0 %v7938_v41, %s6705_s14 }
 0x774   : > { %5445 = vmatpush3.bf16.xpose.msra.mxu0 %v2873_v30  ;;  %4081 = vrot.lane.b32.xlu1 %v7963_v26, %s6705_s14  ;;  %v10079_v26 = vld [vmem:[#allocation54_spill] sm:$0xff] }
 0x777   : > { %4079 = vrot.lane.b32.xlu0 %v7953_v2, %s6705_s14  ;;  %v10078_v2 = vld [vmem:[#allocation53_spill] sm:$0xff] }
 0x778   : > { %3441 = vrot.lane.b32.xlu1 %v8024_v0, %s6704_s12 }
 0x77b   : > { %3439 = vrot.lane.b32.xlu0 %v8026_v10, %s6704_s12 }
 0x77c   : > { %4099 = vrot.lane.b32.xlu1 %v7967_v61, %s6705_s14 }
 0x77f   : > { %4097 = vrot.lane.b32.xlu0 %v7958_v48, %s6705_s14 }
 0x780   : > { %4055 = vrot.lane.b32.xlu1 %v7998_v43, %s6705_s14 }
 0x783   : > { %4083 = vrot.lane.b32.xlu0 %v7969_v17, %s6705_s14 }
 0x784   : > { %4059 = vrot.lane.b32.xlu1 %v8008_v57, %s6705_s14  ;;  %v10080_v57 = vld [vmem:[#allocation55_spill] sm:$0xff] }
 0x787   : > { %4053 = vrot.lane.b32.xlu0 %v8000_v11, %s6705_s14 }
 0x788   : > { %4063 = vrot.lane.b32.xlu1 %v8016_v3, %s6705_s14 }
 0x78b   : > { %4057 = vrot.lane.b32.xlu0 %v8010_v12, %s6705_s14  ;;  %v10081_v12 = vld [vmem:[#allocation56_spill] sm:$0xff] }
 0x78c   : > { %4067 = vrot.lane.b32.xlu1 %v8024_v0, %s6705_s14 }
 0x78f   : > { %4061 = vrot.lane.b32.xlu0 %v8018_v15, %s6705_s14  ;;  %v10082_v15 = vld [vmem:[#allocation40_spill] sm:$0xff] }
 0x790   : > { %v2454_v41 = vpop.xlane.xlu1 %2453  ;;  %3242 = vrot.lane.b32.xlu1 %v10077_v32, %s6703_s29 }
 0x791   : > { %v2488_v48 = vsub.f32 %v10078_v2, %v2454_v41  ;;  %v2489_v61 = vsub.f32 %v10079_v26, %v2454_v41  ;;  %v10094_v41 = vld [vmem:[#allocation43_spill] sm:$0xff] }
 0x792   : > { %v2457_v17 = vpop.xlane.xlu0 %2456 }
 0x793   : > { %v2544_v43 = vmul.f32 1.442695, %v2488_v48  ;;  %v2546_v11 = vmul.f32 1.442695, %v2489_v61  ;;  %v2490_v3 = vsub.f32 %v10080_v57, %v2457_v17  ;;  %v2491_v33 = vsub.f32 %v10081_v12, %v2457_v17  ;;  %4065 = vrot.lane.b32.xlu0 %v8026_v10, %s6705_s14  ;;  %v10087_v10 = vld [vmem:[#allocation37_spill] sm:$0xff]  ;;  %v10096_v61 = vld [vmem:[#allocation48_spill] sm:$0xff] }
 0x794   : > { %v2460_v0 = vpop.xlane.xlu1 %2459  ;;  %3244 = vrot.lane.b32.xlu1 %v10082_v15, %s6703_s29 }
 0x795   : > { %6204 = vpow2.f32 %v2544_v43  ;;  %v2548_v54 = vmul.f32 1.442695, %v2490_v3  ;;  %v2550_v21 = vmul.f32 1.442695, %v2491_v33  ;;  %v2492_v19 = vsub.f32 %v10083_v42, %v2460_v0  ;;  %v10098_v33 = vld [vmem:[#allocation45_spill] sm:$0xff] }
 0x796   : > { %6206 = vpow2.f32 %v2546_v11  ;;  %v2493_v56 = vsub.f32 %v10084_v52, %v2460_v0  ;;  %v2463_v5 = vpop.xlane.xlu0 %2462 }
 0x797   : > { %6208 = vpow2.f32 %v2548_v54  ;;  %v2552_v34 = vmul.f32 1.442695, %v2492_v19  ;;  %v2494_v55 = vsub.f32 %v10085_v8, %v2463_v5  ;;  %v2495_v62 = vsub.f32 %v10086_v53, %v2463_v5  ;;  %3258 = vrot.lane.b32.xlu0 %v10087_v10, %s6703_s29  ;;  %v10101_v19 = vld [vmem:[#allocation47_spill] sm:$0xff] }
 0x798   : > { %6210 = vpow2.f32 %v2550_v21  ;;  %v2554_v25 = vmul.f32 1.442695, %v2493_v56  ;;  %v2830_v35 = vpop.permute.xlu1 %2829  ;;  %3246 = vrot.lane.b32.xlu1 %v10088_v22, %s6703_s29  ;;  %v10100_v21 = vld [vmem:[#allocation50_spill] sm:$0xff]  ;;  %v10102_v56 = vld [vmem:[#allocation52_spill] sm:$0xff]  ;;  %v10104_v53 = vld [vmem:[#allocation51_spill] sm:$0xff] }
 0x799   : > { %6212 = vpow2.f32 %v2552_v34  ;;  %v2556_v45 = vmul.f32 1.442695, %v2494_v55  ;;  %v2558_v31 = vmul.f32 1.442695, %v2495_v62  ;;  %5928 = vmatprep.subr.msk.bf16.mxu0 %vm2230_vm2, %v2830_v35  ;;  %v10103_v34 = vld [vmem:[#allocation49_spill] sm:$0xff] }
 0x79a   : > { %6214 = vpow2.f32 %v2554_v25  ;;  %v2814_v13 = vpop.permute.xlu0 %2813 }
 0x79b   : > { %6216 = vpow2.f32 %v2556_v45  ;;  %v2876_v59 = vsel %vm2230_vm2, %v2814_v13, 0  ;;  %3260 = vrot.lane.b32.xlu0 %v10089_v49, %s6703_s29 }
 0x79c   : > { %6218 = vpow2.f32 %v2558_v31  ;;  %v2832_v27 = vpop.permute.xlu1 %2831  ;;  %5447 = vmatpush3.bf16.xpose.msra.mxu0 %v2876_v59  ;;  %3248 = vrot.lane.b32.xlu1 %v10090_v7, %s6703_s29 }
 0x79d   : > { %5929 = vmatprep.subr.msk.bf16.mxu0 %vm2230_vm2, %v2832_v27 }
 0x79e   : > { %v2816_v16 = vpop.permute.xlu0 %2815 }
 0x79f   : > { %v6205_v28 = vpop.eup %6204  ;;  %3262 = vrot.lane.b32.xlu0 %v10091_v14, %s6703_s29  ;;  %v2879_v9 = vsel %vm2230_vm2, %v2816_v16, 0 }
 0x7a0   : > { %v6207_v51 = vpop.eup %6206  ;;  %v3444_v44 = vpop.permute.xlu1 %3443  ;;  %3250 = vrot.lane.b32.xlu1 %v10092_v1, %s6703_s29 }
 0x7a1   : > { %v6209_v37 = vpop.eup %6208  ;;  %v8429_v40 = vadd.f32 %v6207_v51, %v6205_v28  ;;  %v3500_v62 = vsel %vm2230_vm2, %v3444_v44, 0 }
 0x7a2   : > { %v6211_v46 = vpop.eup %6210  ;;  %v2770_v36 = vpop.permute.xlu0 %2769  ;;  %v2620_v29 = vpack.c.bf16 %v6209_v37, %v6205_v28 }
 0x7a3   : > { %10093 = vst [vmem:[#allocation38_spill] sm:$0xff] %v8429_v40  ;;  %v6213_v23 = vpop.eup %6212  ;;  %v2621_v30 = vpack.c.bf16 %v6211_v46, %v6207_v51  ;;  %3264 = vrot.lane.b32.xlu0 %v10094_v41, %s6703_s29  ;;  %v8433_v2 = vadd.f32 %v6211_v46, %v6209_v37 }
 0x7a4   : > { %v6215_v48 = vpop.eup %6214  ;;  %v2772_v26 = vpop.permute.xlu1 %2771  ;;  %5449 = vmatpush3.bf16.xpose.msra.mxu0 %v2879_v9  ;;  %3252 = vrot.lane.b32.xlu1 %v10096_v61, %s6703_s29 }
 0x7a5   : > { %10095 = vst [vmem:[#allocation53_spill] sm:$0xff] %v8433_v2  ;;  %v6217_v17 = vpop.eup %6216  ;;  %2704 = vmatprep.mubr.bf16.mxu0 %v2621_v30  ;;  %v8437_v43 = vadd.f32 %v6215_v48, %v6213_v23 }
 0x7a6   : > { %v6219_v11 = vpop.eup %6218  ;;  %2705 = vmatmul.mubr.bf16.gmra.mrb[40].mxu0 %v2620_v29  ;;  %v3460_v57 = vpop.permute.xlu0 %3459  ;;  %v2622_v3 = vpack.c.bf16 %v6217_v17, %v6213_v23 }
 0x7a7   : > { %10097 = vst [vmem:[#allocation54_spill] sm:$0xff] %v8437_v43  ;;  %v2623_v12 = vpack.c.bf16 %v6219_v11, %v6215_v48  ;;  %5930 = vmatprep.subr.msk.bf16.mxu0 %vm2230_vm2, %v3460_v57  ;;  %3266 = vrot.lane.b32.xlu0 %v10098_v33, %s6703_s29  ;;  %v8442_v0 = vadd.f32 %v6219_v11, %v6217_v17 }
 0x7a8   : > { %v3462_v54 = vpop.permute.xlu1 %3461  ;;  %3254 = vrot.lane.b32.xlu1 %v10100_v21, %s6703_s29 }
 0x7a9   : > { %10099 = vst [vmem:[#allocation55_spill] sm:$0xff] %v8442_v0  ;;  %2712 = vmatprep.mubr.bf16.mxu0 %v2623_v12 }
 0x7aa   : > { %v3446_v42 = vpop.permute.xlu0 %3445 }
 0x7ab   : > { %3268 = vrot.lane.b32.xlu0 %v10101_v19, %s6703_s29  ;;  %v3503_v13 = vsel %vm2230_vm2, %v3446_v42, 0 }
 0x7ac   : > { %v3448_v52 = vpop.permute.xlu1 %3447  ;;  %3256 = vrot.lane.b32.xlu1 %v10102_v56, %s6703_s29 }
 0x7ad   : > { %v3506_v51 = vsel %vm2230_vm2, %v3448_v52, 0 }
 0x7ae   : > { %2713 = vmatmul.mubr.bf16.gmra.mrb[44].mxu0 %v2622_v3  ;;  %v2774_v5 = vpop.permute.xlu0 %2773 }
 0x7af   : > { %5450 = vmatprep.mubr.msk.bf16.mxu0 %vm2230_vm2, %v2770_v36  ;;  %3270 = vrot.lane.b32.xlu0 %v10103_v34, %s6703_s29 }
 0x7b0   : > { %v2776_v8 = vpop.permute.xlu1 %2775  ;;  %3868 = vrot.lane.b32.xlu1 %v10077_v32, %s6704_s12 }
 0x7b2   : > { %v3464_v55 = vpop.permute.xlu0 %3463 }
 0x7b3   : > { %3272 = vrot.lane.b32.xlu0 %v10104_v53, %s6703_s29 }
 0x7b4   : > { %v3466_v25 = vpop.permute.xlu1 %3465  ;;  %3886 = vrot.lane.b32.xlu1 %v10089_v49, %s6704_s12 }
 0x7b6   : > { %5451 = vmatmul.mubr.msk.bf16.vlgmr.msra.gmra.mrb[48].mxu0 %vm2230_vm2, %v2770_v36  ;;  %v3450_v35 = vpop.permute.xlu0 %3449 }
 0x7b7   : > { %5531 = vmatpush3.bf16.xpose.msra.mxu0 %v3500_v62  ;;  %5452 = vmatprep.mubr.msk.bf16.mxu0 %vm2230_vm2, %v2772_v26  ;;  %v3509_v36 = vsel %vm2230_vm2, %v3450_v35, 0 }
 0x7b8   : > { %v3452_v45 = vpop.permute.xlu1 %3451  ;;  %5931 = vmatprep.subr.msk.bf16.mxu0 %vm2230_vm2, %v3462_v54  ;;  %3870 = vrot.lane.b32.xlu1 %v10082_v15, %s6704_s12 }
 0x7b9   : > { %3884 = vrot.lane.b32.xlu0 %v10087_v10, %s6704_s12 }
 0x7ba   : > { %v2778_v31 = vpop.permute.xlu0 %2777 }
 0x7bc   : > { %v2780_v59 = vpop.permute.xlu1 %2779  ;;  %3872 = vrot.lane.b32.xlu1 %v10088_v22, %s6704_s12 }
 0x7bd   : > { %3888 = vrot.lane.b32.xlu0 %v10091_v14, %s6704_s12 }
 0x7be   : > { %5453 = vmatmul.mubr.msk.bf16.gmra.mrb[52].mxu0 %vm2230_vm2, %v2772_v26  ;;  %v3468_v27 = vpop.permute.xlu0 %3467  ;;  %v3512_v26 = vsel %vm2230_vm2, %v3452_v45, 0 }
 0x7bf   : > { %5533 = vmatpush3.bf16.xpose.msra.mxu0 %v3503_v13  ;;  %5454 = vmatprep.mubr.msk.bf16.mxu0 %vm2230_vm2, %v2774_v5 }
 0x7c0   : > { %v3470_v16 = vpop.permute.xlu1 %3469  ;;  %5932 = vmatprep.subr.msk.bf16.mxu0 %vm2230_vm2, %v3464_v55  ;;  %3874 = vrot.lane.b32.xlu1 %v10090_v7, %s6704_s12 }
 0x7c1   : > { %3890 = vrot.lane.b32.xlu0 %v10094_v41, %s6704_s12 }
 0x7c2   : > { %v3454_v28 = vpop.permute.xlu0 %3453 }
 0x7c4   : > { %v3456_v44 = vpop.permute.xlu1 %3455  ;;  %3876 = vrot.lane.b32.xlu1 %v10092_v1, %s6704_s12 }
 0x7c5   : > { %3892 = vrot.lane.b32.xlu0 %v10098_v33, %s6704_s12 }
 0x7c6   : > { %5455 = vmatmul.mubr.msk.bf16.gmra.mrb[56].mxu0 %vm2230_vm2, %v2774_v5  ;;  %v2782_v37 = vpop.permute.xlu0 %2781 }
 0x7c7   : > { %5535 = vmatpush3.bf16.xpose.msra.mxu0 %v3506_v51  ;;  %5456 = vmatprep.mubr.msk.bf16.mxu0 %vm2230_vm2, %v2776_v8 }
 0x7c8   : > { %v2784_v9 = vpop.permute.xlu1 %2783  ;;  %5933 = vmatprep.subr.msk.bf16.mxu0 %vm2230_vm2, %v3466_v25  ;;  %3878 = vrot.lane.b32.xlu1 %v10096_v61, %s6704_s12 }
 0x7c9   : > { %3894 = vrot.lane.b32.xlu0 %v10101_v19, %s6704_s12 }
 0x7ca   : > { %v3472_v46 = vpop.permute.xlu0 %3471 }
 0x7cc   : > { %v3474_v29 = vpop.permute.xlu1 %3473  ;;  %3880 = vrot.lane.b32.xlu1 %v10100_v21, %s6704_s12 }
 0x7cd   : > { %3896 = vrot.lane.b32.xlu0 %v10103_v34, %s6704_s12 }
 0x7ce   : > { %5457 = vmatmul.mubr.msk.bf16.gmra.mrb[60].mxu0 %vm2230_vm2, %v2776_v8  ;;  %v3458_v23 = vpop.permute.xlu0 %3457 }
 0x7cf   : > { %5537 = vmatpush3.bf16.xpose.msra.mxu0 %v3509_v36  ;;  %5458 = vmatprep.mubr.msk.bf16.mxu0 %vm2230_vm2, %v2778_v31  ;;  %v3521_v21 = vsel %vm2230_vm2, %v3458_v23, 0 }
 0x7d0   : > { %v4070_v30 = vpop.permute.xlu1 %4069  ;;  %5934 = vmatprep.subr.msk.bf16.mxu0 %vm2230_vm2, %v3468_v27  ;;  %3882 = vrot.lane.b32.xlu1 %v10102_v56, %s6704_s12 }
 0x7d1   : > { %3898 = vrot.lane.b32.xlu0 %v10104_v53, %s6704_s12 }
 0x7d2   : > { %v3428_v48 = vpop.permute.xlu0 %3427 }
 0x7d4   : > { %v3430_v17 = vpop.permute.xlu1 %3429  ;;  %4494 = vrot.lane.b32.xlu1 %v10077_v32, %s6705_s14  ;;  %v3515_v32 = vsel %vm2230_vm2, %v3454_v28, 0 }
 0x7d5   : > { %4510 = vrot.lane.b32.xlu0 %v10087_v10, %s6705_s14 }
 0x7d6   : > { %5459 = vmatmul.mubr.msk.bf16.gmra.mrb[64].mxu0 %vm2230_vm2, %v2778_v31  ;;  %v4086_v11 = vpop.permute.xlu0 %4085 }
 0x7d7   : > { %5539 = vmatpush3.bf16.xpose.msra.mxu0 %v3512_v26  ;;  %5460 = vmatprep.mubr.msk.bf16.mxu0 %vm2230_vm2, %v2780_v59 }
 0x7d8   : > { %v4088_v57 = vpop.permute.xlu1 %4087  ;;  %5935 = vmatprep.subr.msk.bf16.mxu0 %vm2230_vm2, %v3470_v16  ;;  %4512 = vrot.lane.b32.xlu1 %v10089_v49, %s6705_s14 }
 0x7d9   : > { %4514 = vrot.lane.b32.xlu0 %v10091_v14, %s6705_s14 }
 0x7da   : > { %v4072_v3 = vpop.permute.xlu0 %4071 }
 0x7dc   : > { %v4074_v12 = vpop.permute.xlu1 %4073  ;;  %4496 = vrot.lane.b32.xlu1 %v10082_v15, %s6705_s14  ;;  %v3518_v15 = vsel %vm2230_vm2, %v3456_v44, 0 }
 0x7dd   : > { %4516 = vrot.lane.b32.xlu0 %v10094_v41, %s6705_s14  ;;  %v4132_v55 = vsel %vm2230_vm2, %v4074_v12, 0 }
 0x7de   : > { %5461 = vmatmul.mubr.msk.bf16.gmra.mrb[68].mxu0 %vm2230_vm2, %v2780_v59  ;;  %v3432_v10 = vpop.permute.xlu0 %3431 }
 0x7df   : > { %5541 = vmatpush3.bf16.xpose.msra.mxu0 %v3515_v32  ;;  %5462 = vmatprep.mubr.msk.bf16.mxu0 %vm2230_vm2, %v2782_v37 }
 0x7e0   : > { %v3434_v49 = vpop.permute.xlu1 %3433  ;;  %5936 = vmatprep.subr.msk.bf16.mxu0 %vm2230_vm2, %v3472_v46  ;;  %4498 = vrot.lane.b32.xlu1 %v10088_v22, %s6705_s14 }
 0x7e1   : > { %4518 = vrot.lane.b32.xlu0 %v10098_v33, %s6705_s14 }
 0x7e2   : > { %v4090_v14 = vpop.permute.xlu0 %4089 }
 0x7e4   : > { %v4092_v54 = vpop.permute.xlu1 %4091  ;;  %4500 = vrot.lane.b32.xlu1 %v10090_v7, %s6705_s14 }
 0x7e5   : > { %4520 = vrot.lane.b32.xlu0 %v10101_v19, %s6705_s14  ;;  %v4126_v19 = vsel %vm2230_vm2, %v4070_v30, 0 }
 0x7e6   : > { %5463 = vmatmul.mubr.msk.bf16.gmra.mrb[72].mxu0 %vm2230_vm2, %v2782_v37  ;;  %v4076_v41 = vpop.permute.xlu0 %4075 }
 0x7e7   : > { %5543 = vmatpush3.bf16.xpose.msra.mxu0 %v3518_v15  ;;  %5464 = vmatprep.mubr.msk.bf16.mxu0 %vm2230_vm2, %v2784_v9  ;;  %v4135_v25 = vsel %vm2230_vm2, %v4076_v41, 0 }
 0x7e8   : > { %5937 = vmatprep.subr.msk.bf16.mxu0 %vm2230_vm2, %v3474_v29  ;;  %4502 = vrot.lane.b32.xlu1 %v10092_v1, %s6705_s14  ;;  %v4078_v22 = vpop.permute.xlu1 %4077 }
 0x7e9   : > { %v4138_v31 = vsel %vm2230_vm2, %v4078_v22, 0 }
 0x7ea   : > { %v3436_v33 = vpop.permute.xlu0 %3435 }
 0x7ec   : > { %4504 = vrot.lane.b32.xlu1 %v10096_v61, %s6705_s14  ;;  %v3438_v7 = vpop.permute.xlu1 %3437  ;;  %v4129_v61 = vsel %vm2230_vm2, %v4072_v3, 0 }
 0x7ee   : > { %5465 = vmatmul.mubr.msk.bf16.gmra.mrb[76].mxu0 %vm2230_vm2, %v2784_v9  ;;  %v4094_v42 = vpop.permute.xlu0 %4093 }
 0x7ef   : > { %5545 = vmatpush3.bf16.xpose.msra.mxu0 %v3521_v21  ;;  %5546 = vmatprep.mubr.msk.bf16.mxu0 %vm2230_vm2, %v3428_v48 }
 0x7f0   : > { %5938 = vmatprep.subr.msk.bf16.mxu0 %vm2230_vm2, %v4086_v11  ;;  %v4096_v52 = vpop.permute.xlu1 %4095 }
 0x7f2   : > { %v4080_v1 = vpop.permute.xlu0 %4079 }
 0x7f3   : > { %v4141_v28 = vsel %vm2230_vm2, %v4080_v1, 0 }
 0x7f4   : > { %v4082_v56 = vpop.permute.xlu1 %4081 }
 0x7f5   : > { %v4144_v30 = vsel %vm2230_vm2, %v4082_v56, 0 }
 0x7f6   : > { %5547 = vmatmul.mubr.msk.bf16.vlgmr.msra.gmra.mrb[80].mxu0 %vm2230_vm2, %v3428_v48  ;;  %v3440_v5 = vpop.permute.xlu0 %3439 }
 0x7f7   : > { %5548 = vmatprep.mubr.msk.bf16.mxu0 %vm2230_vm2, %v3430_v17  ;;  %5627 = vmatpush3.bf16.xpose.msra.mxu0 %v4126_v19 }
 0x7f8   : > { %5939 = vmatprep.subr.msk.bf16.mxu0 %vm2230_vm2, %v4088_v57  ;;  %v3442_v34 = vpop.permute.xlu1 %3441 }
 0x7fa   : > { %v4098_v8 = vpop.permute.xlu0 %4097 }
 0x7fc   : > { %v4100_v53 = vpop.permute.xlu1 %4099 }
 0x7fe   : > { %5549 = vmatmul.mubr.msk.bf16.gmra.mrb[84].mxu0 %vm2230_vm2, %v3430_v17  ;;  %v4084_v62 = vpop.permute.xlu0 %4083 }
 0x7ff   : > { %5550 = vmatprep.mubr.msk.bf16.mxu0 %vm2230_vm2, %v3432_v10  ;;  %5629 = vmatpush3.bf16.xpose.msra.mxu0 %v4129_v61 }
 0x800   : > { %5940 = vmatprep.subr.msk.bf16.mxu0 %vm2230_vm2, %v4090_v14  ;;  %v8556_v35 = vpop.permute.xlu1 %4055  ;;  %v4147_v14 = vsel %vm2230_vm2, %v4084_v62, 0 }
 0x802   : > { %v8559_v45 = vpop.permute.xlu0 %4053 }
 0x804   : > { %v8564_v13 = vpop.permute.xlu1 %4059 }
 0x806   : > { %5551 = vmatmul.mubr.msk.bf16.gmra.mrb[88].mxu0 %vm2230_vm2, %v3432_v10  ;;  %v8566_v59 = vpop.permute.xlu0 %4057 }
 0x807   : > { %5552 = vmatprep.mubr.msk.bf16.mxu0 %vm2230_vm2, %v3434_v49  ;;  %5631 = vmatpush3.bf16.xpose.msra.mxu0 %v4132_v55 }
 0x808   : > { %5941 = vmatprep.subr.msk.bf16.mxu0 %vm2230_vm2, %v4092_v54  ;;  %v8571_v27 = vpop.permute.xlu1 %4063 }
 0x80a   : > { %v8573_v16 = vpop.permute.xlu0 %4061 }
 0x80c   : > { %v8578_v37 = vpop.permute.xlu1 %4067 }
 0x80e   : > { %5553 = vmatmul.mubr.msk.bf16.gmra.mrb[92].mxu0 %vm2230_vm2, %v3434_v49  ;;  %v8583_v36 = vpop.permute.xlu0 %4065 }
 0x80f   : > { %5554 = vmatprep.mubr.msk.bf16.mxu0 %vm2230_vm2, %v3436_v33  ;;  %5633 = vmatpush3.bf16.xpose.msra.mxu0 %v4135_v25 }
 0x810   : > { %5942 = vmatprep.subr.msk.bf16.mxu0 %vm2230_vm2, %v4094_v42  ;;  %v3243_v26 = vpop.permute.xlu1 %3242 }
 0x812   : > { %v3259_v48 = vpop.permute.xlu0 %3258 }
 0x813   : > { %5466 = vmatprep.subr.bf16.mxu1 %v3259_v48 }
 0x814   : > { %5467 = vmatpush3.bf16.msra.mxu1 %v3243_v26  ;;  %v3245_v49 = vpop.permute.xlu1 %3244 }
 0x816   : > { %5555 = vmatmul.mubr.msk.bf16.gmra.mrb[96].mxu0 %vm2230_vm2, %v3436_v33  ;;  %v3261_v12 = vpop.permute.xlu0 %3260 }
 0x817   : > { %5556 = vmatprep.mubr.msk.bf16.mxu0 %vm2230_vm2, %v3438_v7  ;;  %5635 = vmatpush3.bf16.xpose.msra.mxu0 %v4138_v31 }
 0x818   : > { %5943 = vmatprep.subr.msk.bf16.mxu0 %vm2230_vm2, %v4096_v52  ;;  %5468 = vmatprep.subr.bf16.mxu1 %v3261_v12  ;;  %v3247_v41 = vpop.permute.xlu1 %3246 }
 0x819   : > { %5469 = vmatpush3.bf16.msra.mxu1 %v3245_v49 }
 0x81a   : > { %v3263_v15 = vpop.permute.xlu0 %3262 }
 0x81b   : > { %5470 = vmatprep.subr.bf16.mxu1 %v3263_v15 }
 0x81c   : > { %v3249_v52 = vpop.permute.xlu1 %3248 }
 0x81d   : > { %5471 = vmatpush3.bf16.msra.mxu1 %v3247_v41 }
 0x81e   : > { %v5386_v51 = vpop.f32.mrb[16].mxu0  ;;  %5557 = vmatmul.mubr.msk.bf16.gmra.mrb[100].mxu0 %vm2230_vm2, %v3438_v7  ;;  %v3265_v42 = vpop.permute.xlu0 %3264 }
 0x81f   : > { %v5387_v44 = vpop.f32.mrb[17].mxu0  ;;  %5558 = vmatprep.mubr.msk.bf16.mxu0 %vm2230_vm2, %v3440_v5  ;;  %5637 = vmatpush3.bf16.xpose.msra.mxu0 %v4141_v28 }
 0x820   : > { %v8580_v9 = vadd.f32 %v5387_v44, %v5386_v51  ;;  %v5389_v46 = vpop.f32.mrb[18].mxu0  ;;  %5944 = vmatprep.subr.msk.bf16.mxu0 %vm2230_vm2, %v4098_v8  ;;  %5472 = vmatprep.subr.bf16.mxu1 %v3265_v42  ;;  %v3251_v56 = vpop.permute.xlu1 %3250 }
 0x821   : > { %v5390_v29 = vpop.f32.mrb[19].mxu0  ;;  %5473 = vmatpush3.bf16.msra.mxu1 %v3249_v52 }
 0x822   : > { %10105 = vst [vmem:[#allocation56_spill] sm:$0xff] %v8580_v9  ;;  %v8585_v23 = vadd.f32 %v5390_v29, %v5389_v46  ;;  %v3267_v1 = vpop.permute.xlu0 %3266  ;;  %v6540_v9 = vld [vmem:[#allocation4 + $0x70] sm:$0xff] }
 0x823   : > { %5474 = vmatprep.subr.bf16.mxu1 %v3267_v1 }
 0x824   : > { %10106 = vst [vmem:[#allocation40_spill] sm:$0xff] %v8585_v23  ;;  %v3253_v25 = vpop.permute.xlu1 %3252 }
 0x825   : > { %5475 = vmatpush3.bf16.msra.mxu1 %v3251_v56 }
 0x826   : > { %v5392_v17 = vpop.f32.mrb[20].mxu0  ;;  %5559 = vmatmul.mubr.msk.bf16.gmra.mrb[104].mxu0 %vm2230_vm2, %v3440_v5 }
 0x827   : > { %v5393_v11 = vpop.f32.mrb[21].mxu0  ;;  %5560 = vmatprep.mubr.msk.bf16.mxu0 %vm2230_vm2, %v3442_v34  ;;  %5639 = vmatpush3.bf16.xpose.msra.mxu0 %v4144_v30 }
 0x828   : > { %v8590_v57 = vadd.f32 %v5393_v11, %v5392_v17  ;;  %v5395_v3 = vpop.f32.mrb[22].mxu0  ;;  %5945 = vmatprep.subr.msk.bf16.mxu0 %vm2230_vm2, %v4100_v53  ;;  %v3269_v53 = vpop.permute.xlu0 %3268 }
 0x829   : > { %v5396_v32 = vpop.f32.mrb[23].mxu0  ;;  %5476 = vmatprep.subr.bf16.mxu1 %v3269_v53 }
 0x82a   : > { %10107 = vst [vmem:[#allocation57_spill] sm:$0xff] %v8590_v57  ;;  %v8593_v10 = vadd.f32 %v5396_v32, %v5395_v3  ;;  %5477 = vmatpush3.bf16.msra.mxu1 %v3253_v25 }
 0x82c   : > { %10108 = vst [vmem:[#allocation58_spill] sm:$0xff] %v8593_v10  ;;  %v3271_v31 = vpop.permute.xlu0 %3270 }
 0x82d   : > { %5478 = vmatprep.subr.bf16.mxu1 %v3271_v31 }
 0x82e   : > { %v5398_v54 = vpop.f32.mrb[24].mxu0  ;;  %5561 = vmatmul.mubr.msk.bf16.gmra.mrb[108].mxu0 %vm2230_vm2, %v3442_v34 }
 0x82f   : > { %v5399_v22 = vpop.f32.mrb[25].mxu0  ;;  %5641 = vmatpush3.bf16.xpose.msra.mxu0 %v4147_v14  ;;  %5642 = vmatprep.mubr.msk.bf16.mxu0 %vm2230_vm2, %v8559_v45 }
 0x830   : > { %v8599_v33 = vadd.f32 %v5399_v22, %v5398_v54  ;;  %v5401_v21 = vpop.f32.mrb[26].mxu0  ;;  %v3273_v30 = vpop.permute.xlu0 %3272 }
 0x831   : > { %v5402_v7 = vpop.f32.mrb[27].mxu0 }
 0x832   : > { %10109 = vst [vmem:[#allocation59_spill] sm:$0xff] %v8599_v33  ;;  %v8601_v19 = vadd.f32 %v5402_v7, %v5401_v21 }
 0x834   : > { %10110 = vst [vmem:[#allocation60_spill] sm:$0xff] %v8601_v19  ;;  %v3885_v49 = vpop.permute.xlu0 %3884 }
 0x836   : > { %v5404_v61 = vpop.f32.mrb[28].mxu0  ;;  %5643 = vmatmul.mubr.msk.bf16.vlgmr.msra.gmra.mrb[112].mxu0 %vm2230_vm2, %v8559_v45  ;;  %v3255_v45 = vpop.permute.xlu1 %3254 }
 0x837   : > { %v5405_v5 = vpop.f32.mrb[29].mxu0  ;;  %5644 = vmatprep.mubr.msk.bf16.mxu0 %vm2230_vm2, %v8556_v35  ;;  %5479 = vmatpush3.bf16.msra.mxu1 %v3255_v45 }
 0x838   : > { %v8607_v34 = vadd.f32 %v5405_v5, %v5404_v61  ;;  %v5407_v8 = vpop.f32.mrb[30].mxu0  ;;  %5480 = vmatprep.subr.bf16.mxu1 %v3273_v30  ;;  %v8786_v60 = vpop.permute.xlu0 %3888 }
 0x839   : > { %v5408_v55 = vpop.f32.mrb[31].mxu0 }
 0x83a   : > { %10111 = vst [vmem:[#allocation37_spill] sm:$0xff] %v8607_v34  ;;  %v8609_v62 = vadd.f32 %v5408_v55, %v5407_v8  ;;  %v3257_v26 = vpop.permute.xlu1 %3256 }
 0x83b   : > { %5481 = vmatpush3.bf16.msra.mxu1 %v3257_v26 }
 0x83c   : > { %10112 = vst [vmem:[#allocation42_spill] sm:$0xff] %v8609_v62  ;;  %5562 = vmatprep.subr.bf16.mxu1 %v3885_v49  ;;  %v8800_v18 = vpop.permute.xlu0 %3890 }
 0x83e   : > { %v5410_v28 = vpop.f32.mrb[32].mxu0  ;;  %5645 = vmatmul.mubr.msk.bf16.gmra.mrb[116].mxu0 %vm2230_vm2, %v8556_v35 }
 0x83f   : > { %v5411_v51 = vpop.f32.mrb[33].mxu0  ;;  %5646 = vmatprep.mubr.msk.bf16.mxu0 %vm2230_vm2, %v8566_v59 }
 0x840   : > { %v8615_v44 = vadd.f32 %v5411_v51, %v5410_v28  ;;  %v5413_v46 = vpop.f32.mrb[34].mxu0 }
 0x841   : > { %v5414_v29 = vpop.f32.mrb[35].mxu0 }
 0x842   : > { %10113 = vst [vmem:[#allocation39_spill] sm:$0xff] %v8615_v44  ;;  %v8617_v48 = vadd.f32 %v5414_v29, %v5413_v46 }
 0x844   : > { %10114 = vst [vmem:[#allocation44_spill] sm:$0xff] %v8617_v48 }
 0x846   : > { %v5416_v17 = vpop.f32.mrb[36].mxu0  ;;  %5647 = vmatmul.mubr.msk.bf16.gmra.mrb[120].mxu0 %vm2230_vm2, %v8566_v59 }
 0x847   : > { %v5417_v35 = vpop.f32.mrb[37].mxu0  ;;  %5648 = vmatprep.mubr.msk.bf16.mxu0 %vm2230_vm2, %v8564_v13 }
 0x848   : > { %v8623_v11 = vadd.f32 %v5417_v35, %v5416_v17  ;;  %v5419_v3 = vpop.f32.mrb[38].mxu0 }
 0x849   : > { %v5420_v32 = vpop.f32.mrb[39].mxu0 }
 0x84a   : > { %10115 = vst [vmem:[#allocation41_spill] sm:$0xff] %v8623_v11  ;;  %v8625_v12 = vadd.f32 %v5420_v32, %v5419_v3 }
 0x84c   : > { %10116 = vst [vmem:[#allocation46_spill] sm:$0xff] %v8625_v12 }
 0x84e   : > { %5649 = vmatmul.mubr.msk.bf16.gmra.mrb[124].mxu0 %vm2230_vm2, %v8564_v13 }
 0x84f   : > { %5650 = vmatprep.mubr.msk.bf16.mxu0 %vm2230_vm2, %v8573_v16 }
 0x856   : > { %5651 = vmatmul.mubr.msk.bf16.gmra.mrb[128].mxu0 %vm2230_vm2, %v8573_v16 }
 0x857   : > { %5652 = vmatprep.mubr.msk.bf16.mxu0 %vm2230_vm2, %v8571_v27 }
 0x85e   : > { %5653 = vmatmul.mubr.msk.bf16.gmra.mrb[132].mxu0 %vm2230_vm2, %v8571_v27 }
 0x85f   : > { %5654 = vmatprep.mubr.msk.bf16.mxu0 %vm2230_vm2, %v8583_v36 }
 0x866   : > { %5655 = vmatmul.mubr.msk.bf16.gmra.mrb[136].mxu0 %vm2230_vm2, %v8583_v36 }
 0x867   : > { %5656 = vmatprep.mubr.msk.bf16.mxu0 %vm2230_vm2, %v8578_v37 }
 0x86e   : > { %5657 = vmatmul.mubr.msk.bf16.gmra.mrb[140].mxu0 %vm2230_vm2, %v8578_v37 }
 0x879   : > { %v5422_v13 = vpop.f32.mrb[40].mxu0 }
 0x87a   : > { %v5423_v59 = vpop.f32.mrb[41].mxu0 }
 0x87b   : > { %v8645_v16 = vadd.f32 %v5423_v59, %v5422_v13  ;;  %v5425_v14 = vpop.f32.mrb[42].mxu0 }
 0x87c   : > { %v5426_v15 = vpop.f32.mrb[43].mxu0 }
 0x87d   : > { %10117 = vst [vmem:[#allocation43_spill] sm:$0xff] %v8645_v16  ;;  %v8647_v54 = vadd.f32 %v5426_v15, %v5425_v14 }
 0x87f   : > { %10118 = vst [vmem:[#allocation48_spill] sm:$0xff] %v8647_v54 }
 0x881   : > { %v5428_v27 = vpop.f32.mrb[44].mxu0 }
 0x882   : > { %v5429_v41 = vpop.f32.mrb[45].mxu0 }
 0x883   : > { %v8649_v22 = vadd.f32 %v5429_v41, %v5428_v27  ;;  %v5431_v21 = vpop.f32.mrb[46].mxu0 }
 0x884   : > { %v5432_v36 = vpop.f32.mrb[47].mxu0 }
 0x885   : > { %10119 = vst [vmem:[#allocation45_spill] sm:$0xff] %v8649_v22  ;;  %v8651_v7 = vadd.f32 %v5432_v36, %v5431_v21  ;;  %v8737_v22 = vpop.permute.xlu1 %3868 }
 0x887   : > { %10120 = vst [vmem:[#allocation50_spill] sm:$0xff] %v8651_v7 }
 0x889   : > { %v8653_v42 = vpop.f32.mrb[48].mxu0  ;;  %v8749_v54 = vpop.permute.xlu1 %3886 }
 0x88a   : > { %v8655_v52 = vpop.f32.mrb[49].mxu0 }
 0x88b   : > { %v3018_v37 = vmax.f32 %v8653_v42, %v8655_v52  ;;  %v8659_v1 = vpop.f32.mrb[50].mxu0 }
 0x88c   : > { %v8661_v61 = vpop.f32.mrb[51].mxu0 }
 0x88d   : > { %v3021_v56 = vmax.f32 %v8659_v1, %v8661_v61  ;;  %3019 = vmax.xlane.f32.xlu0 %v3018_v37  ;;  %v8757_v12 = vpop.permute.xlu1 %3870 }
 0x88f   : > { %3022 = vmax.xlane.f32.xlu1 %v3021_v56 }
 0x891   : > { %v8665_v5 = vpop.f32.mrb[52].mxu0  ;;  %v8767_v19 = vpop.permute.xlu1 %3872 }
 0x892   : > { %v8667_v8 = vpop.f32.mrb[53].mxu0 }
 0x893   : > { %v3024_v55 = vmax.f32 %v8665_v5, %v8667_v8  ;;  %v8671_v53 = vpop.f32.mrb[54].mxu0 }
 0x894   : > { %v8673_v25 = vpop.f32.mrb[55].mxu0 }
 0x895   : > { %v3027_v31 = vmax.f32 %v8671_v53, %v8673_v25  ;;  %3025 = vmax.xlane.f32.xlu0 %v3024_v55 }
 0x897   : > { %3028 = vmax.xlane.f32.xlu1 %v3027_v31 }
 0x899   : > { %v8677_v28 = vpop.f32.mrb[56].mxu0 }
 0x89a   : > { %v8679_v45 = vpop.f32.mrb[57].mxu0 }
 0x89b   : > { %v3030_v51 = vmax.f32 %v8677_v28, %v8679_v45  ;;  %v8683_v46 = vpop.f32.mrb[58].mxu0 }
 0x89c   : > { %v8685_v29 = vpop.f32.mrb[59].mxu0 }
 0x89d   : > { %v3033_v30 = vmax.f32 %v8683_v46, %v8685_v29  ;;  %3031 = vmax.xlane.f32.xlu0 %v3030_v51 }
 0x89f   : > { %3034 = vmax.xlane.f32.xlu1 %v3033_v30 }
 0x8a1   : > { %v8689_v26 = vpop.f32.mrb[60].mxu0 }
 0x8a2   : > { %v8691_v17 = vpop.f32.mrb[61].mxu0 }
 0x8a3   : > { %v3036_v35 = vmax.f32 %v8689_v26, %v8691_v17  ;;  %v8695_v3 = vpop.f32.mrb[62].mxu0 }
 0x8a4   : > { %v8697_v32 = vpop.f32.mrb[63].mxu0 }
 0x8a5   : > { %v3039_v49 = vmax.f32 %v8695_v3, %v8697_v32  ;;  %3037 = vmax.xlane.f32.xlu0 %v3036_v35 }
 0x8a7   : > { %3040 = vmax.xlane.f32.xlu1 %v3039_v49 }
 0x8a9   : > { %v8701_v13 = vpop.f32.mrb[64].mxu0 }
 0x8aa   : > { %v8703_v59 = vpop.f32.mrb[65].mxu0 }
 0x8ab   : > { %v3042_v14 = vmax.f32 %v8701_v13, %v8703_v59  ;;  %v8707_v15 = vpop.f32.mrb[66].mxu0 }
 0x8ac   : > { %v8709_v27 = vpop.f32.mrb[67].mxu0 }
 0x8ad   : > { %v3045_v41 = vmax.f32 %v8707_v15, %v8709_v27  ;;  %3043 = vmax.xlane.f32.xlu0 %v3042_v14 }
 0x8af   : > { %3046 = vmax.xlane.f32.xlu1 %v3045_v41 }
 0x8b1   : > { %v8713_v21 = vpop.f32.mrb[68].mxu0 }
 0x8b2   : > { %v8715_v36 = vpop.f32.mrb[69].mxu0 }
 0x8b3   : > { %v3048_v37 = vmax.f32 %v8713_v21, %v8715_v36  ;;  %v8719_v56 = vpop.f32.mrb[70].mxu0 }
 0x8b4   : > { %v8721_v55 = vpop.f32.mrb[71].mxu0 }
 0x8b5   : > { %v3051_v31 = vmax.f32 %v8719_v56, %v8721_v55  ;;  %3049 = vmax.xlane.f32.xlu0 %v3048_v37 }
 0x8b9   : > { %3052 = vmax.xlane.f32.xlu0 %v3051_v31  ;;  %v8725_v51 = vpop.f32.mrb[72].mxu0 }
 0x8ba   : > { %v8727_v30 = vpop.f32.mrb[73].mxu0 }
 0x8bb   : > { %v3054_v35 = vmax.f32 %v8725_v51, %v8727_v30  ;;  %v8731_v49 = vpop.f32.mrb[74].mxu0 }
 0x8bc   : > { %v8733_v14 = vpop.f32.mrb[75].mxu0 }
 0x8bd   : > { %v3057_v41 = vmax.f32 %v8731_v49, %v8733_v14  ;;  %3055 = vmax.xlane.f32.xlu0 %v3054_v35 }
 0x8bf   : > { %3058 = vmax.xlane.f32.xlu1 %v3057_v41 }
 0x8c1   : > { %v8739_v37 = vpop.f32.mrb[76].mxu0 }
 0x8c2   : > { %10121 = vst [vmem:[#allocation47_spill] sm:$0xff] %v8739_v37  ;;  %v8741_v31 = vpop.f32.mrb[77].mxu0 }
 0x8c3   : > { %10122 = vst [vmem:[#allocation52_spill] sm:$0xff] %v8741_v31  ;;  %v3060_v7 = vmax.f32 %v8739_v37, %v8741_v31  ;;  %v8745_v16 = vpop.f32.mrb[78].mxu0 }
 0x8c4   : > { %10123 = vst [vmem:[#allocation49_spill] sm:$0xff] %v8745_v16  ;;  %v8747_v11 = vpop.f32.mrb[79].mxu0 }
 0x8c5   : > { %10124 = vst [vmem:[#allocation51_spill] sm:$0xff] %v8747_v11  ;;  %v3063_v44 = vmax.f32 %v8745_v16, %v8747_v11 }
 0x8c7   : > { %3064 = vmax.xlane.f32.xlu1 %v3063_v44 }
 0x8c9   : > { %v8753_v35 = vpop.f32.mrb[80].mxu0 }
 0x8ca   : > { %10125 = vst [vmem:[#allocation73_spill] sm:$0xff] %v8753_v35  ;;  %v8755_v41 = vpop.f32.mrb[81].mxu0 }
 0x8cb   : > { %10126 = vst [vmem:[#allocation74_spill] sm:$0xff] %v8755_v41  ;;  %v3660_v48 = vmax.f32 %v8753_v35, %v8755_v41  ;;  %v8761_v34 = vpop.f32.mrb[82].mxu0 }
 0x8cc   : > { %10127 = vst [vmem:[#allocation75_spill] sm:$0xff] %v8761_v34  ;;  %v8763_v62 = vpop.f32.mrb[83].mxu0 }
 0x8cd   : > { %10128 = vst [vmem:[#allocation76_spill] sm:$0xff] %v8763_v62  ;;  %v3663_v33 = vmax.f32 %v8761_v34, %v8763_v62 }
 0x8cf   : > { %3664 = vmax.xlane.f32.xlu1 %v3663_v33  ;;  %v8782_v33 = vpop.permute.xlu1 %3874 }
 0x8d1   : > { %v8769_v44 = vpop.f32.mrb[84].mxu0 }
 0x8d2   : > { %10129 = vst [vmem:[#allocation77_spill] sm:$0xff] %v8769_v44  ;;  %v8771_v57 = vpop.f32.mrb[85].mxu0 }
 0x8d3   : > { %10130 = vst [vmem:[#allocation78_spill] sm:$0xff] %v8771_v57  ;;  %v3666_v10 = vmax.f32 %v8769_v44, %v8771_v57  ;;  %4522 = vrot.lane.b32.xlu0 %v6540_v9, %s6705_s14  ;;  %v8776_v43 = vpop.f32.mrb[86].mxu0  ;;  %v8794_v9 = vpop.permute.xlu1 %3876 }
 0x8d4   : > { %10131 = vst [vmem:[#allocation79_spill] sm:$0xff] %v8776_v43  ;;  %v8778_v0 = vpop.f32.mrb[87].mxu0 }
 0x8d5   : > { %10132 = vst [vmem:[#allocation80_spill] sm:$0xff] %v8778_v0  ;;  %v3669_v40 = vmax.f32 %v8776_v43, %v8778_v0 }
 0x8d7   : > { %v8805_v43 = vpop.permute.xlu1 %3878 }
 0x8d9   : > { %v8784_v23 = vpop.f32.mrb[88].mxu0 }
 0x8da   : > { %10133 = vst [vmem:[#allocation81_spill] sm:$0xff] %v8784_v23  ;;  %v8788_v2 = vpop.f32.mrb[89].mxu0 }
 0x8db   : > { %10134 = vst [vmem:[#allocation82_spill] sm:$0xff] %v8788_v2  ;;  %v3672_v20 = vmax.f32 %v8784_v23, %v8788_v2  ;;  %v8792_v58 = vpop.f32.mrb[90].mxu0  ;;  %v8819_v57 = vpop.permute.xlu1 %3880 }
 0x8dc   : > { %10135 = vst [vmem:[#allocation83_spill] sm:$0xff] %v8792_v58  ;;  %v8796_v63 = vpop.f32.mrb[91].mxu0 }
 0x8dd   : > { %10136 = vst [vmem:[#allocation84_spill] sm:$0xff] %v8796_v63  ;;  %v3675_v38 = vmax.f32 %v8792_v58, %v8796_v63  ;;  %v8817_v58 = vpop.permute.xlu0 %3892 }
 0x8e0   : > { %4506 = vrot.lane.b32.xlu1 %v6541_v50, %s6705_s14 }
 0x8e1   : > { %v8803_v0 = vpop.f32.mrb[92].mxu0 }
 0x8e2   : > { %10137 = vst [vmem:[#allocation85_spill] sm:$0xff] %v8803_v0  ;;  %v8807_v6 = vpop.f32.mrb[93].mxu0 }
 0x8e3   : > { %10138 = vst [vmem:[#allocation86_spill] sm:$0xff] %v8807_v6  ;;  %v3678_v2 = vmax.f32 %v8803_v0, %v8807_v6  ;;  %v8811_v23 = vpop.f32.mrb[94].mxu0  ;;  %v8829_v6 = vpop.permute.xlu0 %3894 }
 0x8e4   : > { %10139 = vst [vmem:[#allocation87_spill] sm:$0xff] %v8811_v23  ;;  %v8813_v24 = vpop.f32.mrb[95].mxu0 }
 0x8e5   : > { %10140 = vst [vmem:[#allocation88_spill] sm:$0xff] %v8813_v24  ;;  %v3681_v63 = vmax.f32 %v8811_v23, %v8813_v24  ;;  %v8835_v23 = vpop.permute.xlu1 %3882 }
 0x8e7   : > { %v8839_v39 = vpop.permute.xlu0 %3896 }
 0x8e9   : > { %v8821_v50 = vpop.f32.mrb[96].mxu0  ;;  %v8847_v37 = vpop.permute.xlu1 %4494 }
 0x8ea   : > { %10141 = vst [vmem:[#allocation89_spill] sm:$0xff] %v8821_v50  ;;  %v8823_v44 = vpop.f32.mrb[97].mxu0  ;;  %10148 = vst [vmem:[#allocation96_spill] sm:$0xff] %v8847_v37 }
 0x8eb   : > { %10142 = vst [vmem:[#allocation90_spill] sm:$0xff] %v8823_v44  ;;  %v3684_v47 = vmax.f32 %v8821_v50, %v8823_v44  ;;  %v8827_v41 = vpop.f32.mrb[98].mxu0 }
 0x8ec   : > { %10143 = vst [vmem:[#allocation91_spill] sm:$0xff] %v8827_v41  ;;  %v8831_v0 = vpop.f32.mrb[99].mxu0 }
 0x8ed   : > { %10144 = vst [vmem:[#allocation92_spill] sm:$0xff] %v8831_v0  ;;  %v3687_v24 = vmax.f32 %v8827_v41, %v8831_v0  ;;  %v8853_v41 = vpop.permute.xlu0 %3898 }
 0x8f1   : > { %v8837_v35 = vpop.f32.mrb[100].mxu0 }
 0x8f2   : > { %10145 = vst [vmem:[#allocation93_spill] sm:$0xff] %v8837_v35  ;;  %3061 = vmax.xlane.f32.xlu0 %v3060_v7  ;;  %v8841_v31 = vpop.f32.mrb[101].mxu0  ;;  %v8857_v7 = vpop.permute.xlu1 %4512 }
 0x8f3   : > { %10146 = vst [vmem:[#allocation94_spill] sm:$0xff] %v8841_v31  ;;  %v3690_v44 = vmax.f32 %v8837_v35, %v8841_v31  ;;  %v8845_v50 = vpop.f32.mrb[102].mxu0  ;;  %10151 = vst [vmem:[#allocation99_spill] sm:$0xff] %v8857_v7 }
 0x8f4   : > { %10147 = vst [vmem:[#allocation95_spill] sm:$0xff] %v8845_v50  ;;  %v8849_v4 = vpop.f32.mrb[103].mxu0 }
 0x8f5   : > { %10149 = vst [vmem:[#allocation97_spill] sm:$0xff] %v8849_v4  ;;  %v3693_v0 = vmax.f32 %v8845_v50, %v8849_v4 }
 0x8f6   : > { %3661 = vmax.xlane.f32.xlu0 %v3660_v48  ;;  %v8869_v48 = vpop.permute.xlu0 %4510  ;;  %v8871_v50 = vpop.permute.xlu1 %4496 }
 0x8f9   : > { %v8855_v62 = vpop.f32.mrb[104].mxu0 }
 0x8fa   : > { %10150 = vst [vmem:[#allocation98_spill] sm:$0xff] %v8855_v62  ;;  %3667 = vmax.xlane.f32.xlu0 %v3666_v10  ;;  %v8859_v34 = vpop.f32.mrb[105].mxu0  ;;  %v8881_v7 = vpop.permute.xlu0 %4514 }
 0x8fb   : > { %10152 = vst [vmem:[#allocation100_spill] sm:$0xff] %v8859_v34  ;;  %v3696_v31 = vmax.f32 %v8855_v62, %v8859_v34  ;;  %v8863_v35 = vpop.f32.mrb[106].mxu0  ;;  %10158 = vst [vmem:[#allocation106_spill] sm:$0xff] %v8881_v7 }
 0x8fc   : > { %10153 = vst [vmem:[#allocation101_spill] sm:$0xff] %v8863_v35  ;;  %v8865_v37 = vpop.f32.mrb[107].mxu0 }
 0x8fd   : > { %10154 = vst [vmem:[#allocation102_spill] sm:$0xff] %v8865_v37  ;;  %v3699_v4 = vmax.f32 %v8863_v35, %v8865_v37  ;;  %v8887_v37 = vpop.permute.xlu1 %4498 }
 0x8fe   : > { %3673 = vmax.xlane.f32.xlu0 %v3672_v20  ;;  %v8891_v35 = vpop.permute.xlu0 %4516 }
 0x901   : > { %v8873_v11 = vpop.f32.mrb[108].mxu0  ;;  %v8899_v7 = vpop.permute.xlu1 %4500 }
 0x902   : > { %10155 = vst [vmem:[#allocation103_spill] sm:$0xff] %v8873_v11  ;;  %3679 = vmax.xlane.f32.xlu0 %v3678_v2  ;;  %v8875_v10 = vpop.f32.mrb[109].mxu0  ;;  %10163 = vst [vmem:[#allocation111_spill] sm:$0xff] %v8899_v7 }
 0x903   : > { %10156 = vst [vmem:[#allocation104_spill] sm:$0xff] %v8875_v10  ;;  %v3702_v34 = vmax.f32 %v8873_v11, %v8875_v10  ;;  %v8879_v62 = vpop.f32.mrb[110].mxu0 }
 0x904   : > { %10157 = vst [vmem:[#allocation105_spill] sm:$0xff] %v8879_v62  ;;  %3670 = vmax.xlane.f32.xlu1 %v3669_v40  ;;  %v8883_v16 = vpop.f32.mrb[111].mxu0 }
 0x905   : > { %10159 = vst [vmem:[#allocation107_spill] sm:$0xff] %v8883_v16  ;;  %v3705_v20 = vmax.f32 %v8879_v62, %v8883_v16  ;;  %v8909_v62 = vpop.permute.xlu1 %4502 }
 0x906   : > { %3685 = vmax.xlane.f32.xlu0 %v3684_v47  ;;  %10167 = vst [vmem:[#allocation115_spill] sm:$0xff] %v8909_v62 }
 0x908   : > { %3676 = vmax.xlane.f32.xlu1 %v3675_v38  ;;  %v8905_v38 = vpop.permute.xlu0 %4518 }
 0x909   : > { %v8889_v2 = vpop.f32.mrb[112].mxu0  ;;  %10165 = vst [vmem:[#allocation113_spill] sm:$0xff] %v8905_v38 }
 0x90a   : > { %10160 = vst [vmem:[#allocation108_spill] sm:$0xff] %v8889_v2  ;;  %3691 = vmax.xlane.f32.xlu0 %v3690_v44  ;;  %v8893_v10 = vpop.f32.mrb[113].mxu0 }
 0x90b   : > { %10161 = vst [vmem:[#allocation109_spill] sm:$0xff] %v8893_v10  ;;  %v4286_v11 = vmax.f32 %v8889_v2, %v8893_v10  ;;  %v8897_v40 = vpop.f32.mrb[114].mxu0 }
 0x90c   : > { %10162 = vst [vmem:[#allocation110_spill] sm:$0xff] %v8897_v40  ;;  %3682 = vmax.xlane.f32.xlu1 %v3681_v63  ;;  %v8901_v16 = vpop.f32.mrb[115].mxu0 }
 0x90d   : > { %10164 = vst [vmem:[#allocation112_spill] sm:$0xff] %v8901_v16  ;;  %v4289_v47 = vmax.f32 %v8897_v40, %v8901_v16  ;;  %v8921_v16 = vpop.permute.xlu0 %4520 }
 0x90e   : > { %3694 = vmax.xlane.f32.xlu0 %v3693_v0  ;;  %10171 = vst [vmem:[#allocation119_spill] sm:$0xff] %v8921_v16 }
 0x910   : > { %3688 = vmax.xlane.f32.xlu1 %v3687_v24  ;;  %v8923_v24 = vpop.permute.xlu1 %4504 }
 0x911   : > { %v8907_v44 = vpop.f32.mrb[116].mxu0  ;;  %10172 = vst [vmem:[#allocation120_spill] sm:$0xff] %v8923_v24 }
 0x912   : > { %10166 = vst [vmem:[#allocation114_spill] sm:$0xff] %v8907_v44  ;;  %3697 = vmax.xlane.f32.xlu0 %v3696_v31  ;;  %v8911_v10 = vpop.f32.mrb[117].mxu0 }
 0x913   : > { %10168 = vst [vmem:[#allocation116_spill] sm:$0xff] %v8911_v10  ;;  %v4292_v2 = vmax.f32 %v8907_v44, %v8911_v10  ;;  %v8915_v63 = vpop.f32.mrb[118].mxu0 }
 0x914   : > { %10169 = vst [vmem:[#allocation117_spill] sm:$0xff] %v8915_v63  ;;  %3700 = vmax.xlane.f32.xlu1 %v3699_v4  ;;  %v8917_v7 = vpop.f32.mrb[119].mxu0 }
 0x915   : > { %10170 = vst [vmem:[#allocation118_spill] sm:$0xff] %v8917_v7  ;;  %v4295_v0 = vmax.f32 %v8915_v63, %v8917_v7 }
 0x916   : > { %3703 = vmax.xlane.f32.xlu0 %v3702_v34 }
 0x918   : > { %3706 = vmax.xlane.f32.xlu1 %v3705_v20 }
 0x919   : > { %v8925_v31 = vpop.f32.mrb[120].mxu0 }
 0x91a   : > { %4287 = vmax.xlane.f32.xlu0 %v4286_v11  ;;  %v8927_v62 = vpop.f32.mrb[121].mxu0  ;;  %v3020_v10 = vpop.xlane.xlu0 %3019 }
 0x91b   : > { %10173 = vst [vmem:[#allocation121_spill] sm:$0xff] %v8927_v62  ;;  %v4298_v4 = vmax.f32 %v8925_v31, %v8927_v62  ;;  %v3066_v44 = vsub.f32 %v8653_v42, %v3020_v10  ;;  %v3067_v40 = vsub.f32 %v8655_v52, %v3020_v10  ;;  %v8933_v7 = vpop.f32.mrb[122].mxu0 }
 0x91c   : > { %v3023_v63 = vpop.xlane.xlu1 %3022  ;;  %4290 = vmax.xlane.f32.xlu1 %v4289_v47  ;;  %v8935_v34 = vpop.f32.mrb[123].mxu0 }
 0x91d   : > { %v3098_v20 = vmul.f32 1.442695, %v3066_v44  ;;  %v3100_v24 = vmul.f32 1.442695, %v3067_v40  ;;  %v3068_v11 = vsub.f32 %v8659_v1, %v3023_v63  ;;  %v3069_v16 = vsub.f32 %v8661_v61, %v3023_v63 }
 0x91e   : > { %v4301_v38 = vmax.f32 %v8933_v7, %v8935_v34  ;;  %4293 = vmax.xlane.f32.xlu0 %v4292_v2 }
 0x91f   : > { %6220 = vpow2.f32 %v3098_v20  ;;  %v3102_v42 = vmul.f32 1.442695, %v3068_v11  ;;  %v3104_v62 = vmul.f32 1.442695, %v3069_v16 }
 0x920   : > { %6222 = vpow2.f32 %v3100_v24  ;;  %4296 = vmax.xlane.f32.xlu1 %v4295_v0 }
 0x921   : > { %6224 = vpow2.f32 %v3102_v42  ;;  %v8941_v52 = vpop.f32.mrb[124].mxu0 }
 0x922   : > { %6226 = vpow2.f32 %v3104_v62  ;;  %4299 = vmax.xlane.f32.xlu0 %v4298_v4  ;;  %v8943_v10 = vpop.f32.mrb[125].mxu0  ;;  %v3026_v40 = vpop.xlane.xlu0 %3025 }
 0x923   : > { %10174 = vst [vmem:[#allocation122_spill] sm:$0xff] %v8943_v10  ;;  %v4304_v1 = vmax.f32 %v8941_v52, %v8943_v10  ;;  %v3070_v61 = vsub.f32 %v8665_v5, %v3026_v40  ;;  %v3071_v2 = vsub.f32 %v8667_v8, %v3026_v40  ;;  %v8949_v47 = vpop.f32.mrb[126].mxu0 }
 0x924   : > { %10175 = vst [vmem:[#allocation123_spill] sm:$0xff] %v8949_v47  ;;  %v3029_v16 = vpop.xlane.xlu1 %3028  ;;  %4302 = vmax.xlane.f32.xlu1 %v4301_v38  ;;  %v8951_v44 = vpop.f32.mrb[127].mxu0 }
 0x925   : > { %10176 = vst [vmem:[#allocation124_spill] sm:$0xff] %v8951_v44  ;;  %v3106_v63 = vmul.f32 1.442695, %v3070_v61  ;;  %v3108_v0 = vmul.f32 1.442695, %v3071_v2  ;;  %v3072_v62 = vsub.f32 %v8671_v53, %v3029_v16  ;;  %v3073_v24 = vsub.f32 %v8673_v25, %v3029_v16 }
 0x926   : > { %v4307_v4 = vmax.f32 %v8949_v47, %v8951_v44  ;;  %4305 = vmax.xlane.f32.xlu0 %v4304_v1 }
 0x927   : > { %6228 = vpow2.f32 %v3106_v63  ;;  %v3110_v5 = vmul.f32 1.442695, %v3072_v62  ;;  %v3112_v20 = vmul.f32 1.442695, %v3073_v24 }
 0x928   : > { %6230 = vpow2.f32 %v3108_v0  ;;  %4308 = vmax.xlane.f32.xlu1 %v4307_v4 }
 0x929   : > { %v6221_v8 = vpop.eup %6220  ;;  %6232 = vpow2.f32 %v3110_v5  ;;  %v8957_v38 = vpop.f32.mrb[128].mxu0 }
 0x92a   : > { %v6223_v11 = vpop.eup %6222  ;;  %6234 = vpow2.f32 %v3112_v20  ;;  %v8959_v42 = vpop.f32.mrb[129].mxu0 }
 0x92b   : > { %v3032_v53 = vpop.xlane.xlu0 %3031  ;;  %v6225_v40 = vpop.eup %6224  ;;  %v8967_v16 = vadd.f32 %v6223_v11, %v6221_v8 }
 0x92c   : > { %v3074_v1 = vsub.f32 %v8677_v28, %v3032_v53  ;;  %v3075_v61 = vsub.f32 %v8679_v45, %v3032_v53  ;;  %v8965_v2 = vpop.f32.mrb[130].mxu0  ;;  %v6227_v63 = vpop.eup %6226  ;;  %v3210_v24 = vpack.c.bf16 %v6225_v40, %v6221_v8 }
 0x92d   : > { %v3035_v0 = vpop.xlane.xlu1 %3034  ;;  %v8969_v62 = vpop.f32.mrb[131].mxu0  ;;  %v3211_v25 = vpack.c.bf16 %v6227_v63, %v6223_v11  ;;  %v8975_v45 = vadd.f32 %v6227_v63, %v6225_v40 }
 0x92e   : > { %v3114_v4 = vmul.f32 1.442695, %v3074_v1  ;;  %v3116_v5 = vmul.f32 1.442695, %v3075_v61  ;;  %v3076_v20 = vsub.f32 %v8683_v46, %v3035_v0  ;;  %v3077_v44 = vsub.f32 %v8685_v29, %v3035_v0 }
 0x92f   : > { %v4313_v28 = vmax.f32 %v8965_v2, %v8969_v62  ;;  %3322 = vmatprep.mubr.bf16.mxu1 %v3211_v25 }
 0x930   : > { %6236 = vpow2.f32 %v3114_v4  ;;  %v3118_v53 = vmul.f32 1.442695, %v3076_v20  ;;  %v3120_v47 = vmul.f32 1.442695, %v3077_v44  ;;  %3323 = vmatmul.mubr.bf16.vlgmr.msra.gmra.mrb[32].mxu1 %v3210_v24 }
 0x931   : > { %6238 = vpow2.f32 %v3116_v5  ;;  %v6229_v10 = vpop.eup %6228  ;;  %v8977_v8 = vpop.f32.mrb[132].mxu0  ;;  %5563 = vmatpush3.bf16.msra.mxu1 %v8737_v22 }
 0x932   : > { %6240 = vpow2.f32 %v3118_v53  ;;  %v6231_v1 = vpop.eup %6230  ;;  %v8980_v46 = vpop.f32.mrb[133].mxu0  ;;  %5564 = vmatprep.subr.bf16.mxu1 %v8749_v54 }
 0x933   : > { %6242 = vpow2.f32 %v3120_v47  ;;  %v3038_v29 = vpop.xlane.xlu0 %3037  ;;  %v6233_v11 = vpop.eup %6232  ;;  %v8989_v63 = vadd.f32 %v6231_v1, %v6229_v10 }
 0x934   : > { %v3078_v40 = vsub.f32 %v8689_v26, %v3038_v29  ;;  %v3079_v25 = vsub.f32 %v8691_v17, %v3038_v29  ;;  %v8987_v61 = vpop.f32.mrb[134].mxu0  ;;  %v6235_v47 = vpop.eup %6234  ;;  %v3212_v24 = vpack.c.bf16 %v6233_v11, %v6229_v10 }
 0x935   : > { %v3041_v0 = vpop.xlane.xlu1 %3040  ;;  %v8991_v22 = vpop.f32.mrb[135].mxu0  ;;  %5565 = vmatpush3.bf16.msra.mxu1 %v8757_v12  ;;  %v3213_v17 = vpack.c.bf16 %v6235_v47, %v6231_v1  ;;  %v8998_v53 = vadd.f32 %v6235_v47, %v6233_v11 }
 0x936   : > { %v3122_v4 = vmul.f32 1.442695, %v3078_v40  ;;  %v3124_v5 = vmul.f32 1.442695, %v3079_v25  ;;  %v3080_v54 = vsub.f32 %v8695_v3, %v3041_v0  ;;  %v3081_v20 = vsub.f32 %v8697_v32, %v3041_v0  ;;  %5566 = vmatprep.subr.bf16.mxu1 %v8786_v60  ;;  %v6542_v3 = vld [vmem:[#allocation4 + $0x38] sm:$0xff] }
 0x937   : > { %v4319_v26 = vmax.f32 %v8987_v61, %v8991_v22  ;;  %3330 = vmatprep.mubr.bf16.mxu1 %v3213_v17 }
 0x938   : > { %6244 = vpow2.f32 %v3122_v4  ;;  %v3126_v29 = vmul.f32 1.442695, %v3080_v54  ;;  %v3128_v44 = vmul.f32 1.442695, %v3081_v20  ;;  %3331 = vmatmul.mubr.bf16.gmra.mrb[36].mxu1 %v3212_v24 }
 0x939   : > { %6246 = vpow2.f32 %v3124_v5  ;;  %4508 = vrot.lane.b32.xlu1 %v6542_v3, %s6705_s14  ;;  %v9002_v12 = vpop.f32.mrb[136].mxu0  ;;  %5567 = vmatpush3.bf16.msra.mxu1 %v8767_v19  ;;  %v6543_v19 = vld [vmem:[#allocation4 + $0x78] sm:$0xff] }
 0x93a   : > { %v6237_v10 = vpop.eup %6236  ;;  %6248 = vpow2.f32 %v3126_v29  ;;  %v9005_v1 = vpop.f32.mrb[137].mxu0  ;;  %5568 = vmatprep.subr.bf16.mxu1 %v8800_v18 }
 0x93b   : > { %v6239_v32 = vpop.eup %6238  ;;  %6250 = vpow2.f32 %v3128_v44  ;;  %v3044_v11 = vpop.xlane.xlu0 %3043  ;;  %v4322_v60 = vmax.f32 %v9002_v12, %v9005_v1 }
 0x93c   : > { %v6241_v40 = vpop.eup %6240  ;;  %v3082_v25 = vsub.f32 %v8701_v13, %v3044_v11  ;;  %v3083_v47 = vsub.f32 %v8703_v59, %v3044_v11  ;;  %v9012_v0 = vpop.f32.mrb[138].mxu0  ;;  %v9014_v24 = vadd.f32 %v6239_v32, %v6237_v10  ;;  %4524 = vrot.lane.b32.xlu0 %v6543_v19, %s6705_s14 }
 0x93d   : > { %v6243_v44 = vpop.eup %6242  ;;  %v3047_v4 = vpop.xlane.xlu1 %3046  ;;  %v3214_v54 = vpack.c.bf16 %v6241_v40, %v6237_v10  ;;  %5569 = vmatpush3.bf16.msra.mxu1 %v8782_v33 }
 0x93e   : > { %v9017_v5 = vpop.f32.mrb[139].mxu0  ;;  %v3130_v18 = vmul.f32 1.442695, %v3082_v25  ;;  %v3132_v20 = vmul.f32 1.442695, %v3083_v47  ;;  %v3084_v17 = vsub.f32 %v8707_v15, %v3047_v4  ;;  %v3085_v13 = vsub.f32 %v8709_v27, %v3047_v4  ;;  %5570 = vmatprep.subr.bf16.mxu1 %v8817_v58 }
 0x93f   : > { %v4325_v59 = vmax.f32 %v9012_v0, %v9017_v5  ;;  %v3215_v29 = vpack.c.bf16 %v6243_v44, %v6239_v32  ;;  %v9024_v3 = vadd.f32 %v6243_v44, %v6241_v40 }
 0x940   : > { %6252 = vpow2.f32 %v3130_v18  ;;  %v3134_v11 = vmul.f32 1.442695, %v3084_v17  ;;  %v3136_v19 = vmul.f32 1.442695, %v3085_v13 }
 0x941   : > { %6254 = vpow2.f32 %v3132_v20  ;;  %3338 = vmatprep.mubr.bf16.mxu1 %v3215_v29  ;;  %v9027_v15 = vpop.f32.mrb[140].mxu0  ;;  %5571 = vmatpush3.bf16.msra.mxu1 %v8794_v9 }
 0x942   : > { %v6245_v10 = vpop.eup %6244  ;;  %6256 = vpow2.f32 %v3134_v11  ;;  %3339 = vmatmul.mubr.bf16.gmra.mrb[40].mxu1 %v3214_v54  ;;  %v9030_v33 = vpop.f32.mrb[141].mxu0  ;;  %5572 = vmatprep.subr.bf16.mxu1 %v8829_v6 }
 0x943   : > { %v6247_v27 = vpop.eup %6246  ;;  %6258 = vpow2.f32 %v3136_v19  ;;  %v3050_v32 = vpop.xlane.xlu0 %3049  ;;  %v4328_v58 = vmax.f32 %v9027_v15, %v9030_v33 }
 0x944   : > { %v6249_v40 = vpop.eup %6248  ;;  %v3086_v25 = vsub.f32 %v8713_v21, %v3050_v32  ;;  %v3087_v47 = vsub.f32 %v8715_v36, %v3050_v32  ;;  %v9037_v44 = vpop.f32.mrb[142].mxu0  ;;  %v9039_v4 = vadd.f32 %v6247_v27, %v6245_v10 }
 0x945   : > { %v6251_v54 = vpop.eup %6250  ;;  %v9041_v18 = vpop.f32.mrb[143].mxu0  ;;  %v3216_v9 = vpack.c.bf16 %v6249_v40, %v6245_v10  ;;  %5573 = vmatpush3.bf16.msra.mxu1 %v8805_v43 }
 0x946   : > { %v3138_v20 = vmul.f32 1.442695, %v3086_v25  ;;  %v3140_v17 = vmul.f32 1.442695, %v3087_v47  ;;  %v4331_v6 = vmax.f32 %v9037_v44, %v9041_v18  ;;  %v3217_v13 = vpack.c.bf16 %v6251_v54, %v6247_v27  ;;  %5574 = vmatprep.subr.bf16.mxu1 %v8839_v39 }
 0x947   : > { %v3053_v29 = vpop.xlane.xlu0 %3052  ;;  %v9046_v21 = vadd.f32 %v6251_v54, %v6249_v40 }
 0x948   : > { %6260 = vpow2.f32 %v3138_v20  ;;  %3346 = vmatprep.mubr.bf16.mxu1 %v3217_v13  ;;  %v3088_v36 = vsub.f32 %v8719_v56, %v3053_v29  ;;  %v3089_v11 = vsub.f32 %v8721_v55, %v3053_v29 }
 0x949   : > { %6262 = vpow2.f32 %v3140_v17  ;;  %5575 = vmatpush3.bf16.msra.mxu1 %v8819_v57 }
 0x94a   : > { %v6253_v19 = vpop.eup %6252  ;;  %v3142_v10 = vmul.f32 1.442695, %v3088_v36  ;;  %v3144_v32 = vmul.f32 1.442695, %v3089_v11  ;;  %3347 = vmatmul.mubr.bf16.gmra.mrb[44].mxu1 %v3216_v9  ;;  %5576 = vmatprep.subr.bf16.mxu1 %v8853_v41 }
 0x94b   : > { %v6255_v25 = vpop.eup %6254  ;;  %v3056_v43 = vpop.xlane.xlu0 %3055 }
 0x94c   : > { %v6257_v27 = vpop.eup %6256  ;;  %6264 = vpow2.f32 %v3142_v10  ;;  %v3090_v39 = vsub.f32 %v8725_v51, %v3056_v43  ;;  %v3091_v40 = vsub.f32 %v8727_v30, %v3056_v43  ;;  %v9055_v56 = vadd.f32 %v6255_v25, %v6253_v19  ;;  %v3059_v47 = vpop.xlane.xlu1 %3058  ;;  %v10178_v10 = vld [vmem:[#allocation51_spill] sm:$0xff] }
 0x94d   : > { %v6259_v55 = vpop.eup %6258  ;;  %6266 = vpow2.f32 %v3144_v32  ;;  %v3218_v54 = vpack.c.bf16 %v6257_v27, %v6253_v19  ;;  %v3092_v17 = vsub.f32 %v8731_v49, %v3059_v47  ;;  %v3093_v57 = vsub.f32 %v8733_v14, %v3059_v47  ;;  %5577 = vmatpush3.bf16.msra.mxu1 %v8835_v23  ;;  %v10177_v23 = vld [vmem:[#allocation49_spill] sm:$0xff] }
 0x94e   : > { %v3146_v20 = vmul.f32 1.442695, %v3090_v39  ;;  %v3148_v9 = vmul.f32 1.442695, %v3091_v40  ;;  %v3219_v13 = vpack.c.bf16 %v6259_v55, %v6255_v25  ;;  %v9060_v41 = vadd.f32 %v6259_v55, %v6257_v27  ;;  %5658 = vmatprep.subr.bf16.mxu1 %v8869_v48 }
 0x94f   : > { %v3150_v51 = vmul.f32 1.442695, %v3092_v17  ;;  %v3152_v30 = vmul.f32 1.442695, %v3093_v57 }
 0x950   : > { %6268 = vpow2.f32 %v3146_v20  ;;  %3354 = vmatprep.mubr.bf16.mxu1 %v3219_v13  ;;  %v10179_v20 = vmax.f32 %v8957_v38, %v8959_v42 }
 0x951   : > { %6270 = vpow2.f32 %v3148_v9 }
 0x952   : > { %v6261_v29 = vpop.eup %6260  ;;  %6272 = vpow2.f32 %v3150_v51  ;;  %3355 = vmatmul.mubr.bf16.gmra.mrb[48].mxu1 %v3218_v54  ;;  %v10180_v51 = vld [vmem:[#allocation75_spill] sm:$0xff] }
 0x953   : > { %v6263_v36 = vpop.eup %6262  ;;  %6274 = vpow2.f32 %v3152_v30 }
 0x954   : > { %v9063_v49 = vadd.f32 %v6263_v36, %v6261_v29  ;;  %v3065_v14 = vpop.xlane.xlu1 %3064 }
 0x955   : > { %v3096_v19 = vsub.f32 %v10177_v23, %v3065_v14  ;;  %v3097_v32 = vsub.f32 %v10178_v10, %v3065_v14  ;;  %v10182_v10 = vmax.f32 %v8977_v8, %v8980_v46 }
 0x956   : > { %v6265_v11 = vpop.eup %6264 }
 0x957   : > { %v6267_v25 = vpop.eup %6266  ;;  %v3220_v43 = vpack.c.bf16 %v6265_v11, %v6261_v29  ;;  %v3158_v27 = vmul.f32 1.442695, %v3096_v19  ;;  %v3160_v39 = vmul.f32 1.442695, %v3097_v32  ;;  %v10181_v29 = vld [vmem:[#allocation76_spill] sm:$0xff] }
 0x958   : > { %v3221_v48 = vpack.c.bf16 %v6267_v25, %v6263_v36  ;;  %v3195_v40 = vadd.f32 %v6267_v25, %v6265_v11 }
 0x959   : > { %6276 = vpow2.f32 %v3158_v27  ;;  %v10186_v27 = vld [vmem:[#allocation62_spill] sm:$0xff] }
 0x95a   : > { %v6269_v55 = vpop.eup %6268  ;;  %3362 = vmatprep.mubr.bf16.mxu1 %v3221_v48  ;;  %6278 = vpow2.f32 %v3160_v39  ;;  %v10188_v48 = vld [vmem:[#allocation74_spill] sm:$0xff] }
 0x95b   : > { %v6271_v47 = vpop.eup %6270  ;;  %3363 = vmatmul.mubr.bf16.gmra.mrb[52].mxu1 %v3220_v43  ;;  %4311 = vmax.xlane.f32.xlu0 %v10179_v20 }
 0x95c   : > { %v6273_v54 = vpop.eup %6272  ;;  %v9070_v9 = vadd.f32 %v6271_v47, %v6269_v55  ;;  %v3665_v57 = vpop.xlane.xlu1 %3664 }
 0x95d   : > { %v6275_v17 = vpop.eup %6274  ;;  %v3222_v13 = vpack.c.bf16 %v6273_v54, %v6269_v55  ;;  %v3710_v30 = vsub.f32 %v10180_v51, %v3665_v57  ;;  %v3711_v36 = vsub.f32 %v10181_v29, %v3665_v57  ;;  %4314 = vmax.xlane.f32.xlu1 %v4313_v28  ;;  %v10189_v55 = vld [vmem:[#allocation65_spill] sm:$0xff] }
 0x95e   : > { %v3223_v14 = vpack.c.bf16 %v6275_v17, %v6271_v47  ;;  %v3201_v11 = vadd.f32 %v6275_v17, %v6273_v54  ;;  %v10191_v17 = vld [vmem:[#allocation78_spill] sm:$0xff] }
 0x95f   : > { %v3744_v23 = vmul.f32 1.442695, %v3710_v30  ;;  %v3746_v19 = vmul.f32 1.442695, %v3711_v36  ;;  %4317 = vmax.xlane.f32.xlu0 %v10182_v10  ;;  %v10192_v30 = vld [vmem:[#allocation64_spill] sm:$0xff]  ;;  %v10193_v36 = vld [vmem:[#allocation81_spill] sm:$0xff] }
 0x960   : > { %3370 = vmatprep.mubr.bf16.mxu1 %v3223_v14  ;;  %v9134_v10 = vpop.permute.xlu1 %4506 }
 0x961   : > { %6280 = vpow2.f32 %v3744_v23  ;;  %4326 = vmax.xlane.f32.xlu1 %v4325_v59  ;;  %v10194_v23 = vld [vmem:[#allocation82_spill] sm:$0xff] }
 0x962   : > { %6282 = vpow2.f32 %v3746_v19 }
 0x963   : > { %3371 = vmatmul.mubr.bf16.gmra.mrb[56].mxu1 %v3222_v13  ;;  %v9083_v32 = vpop.eup %6276  ;;  %4320 = vmax.xlane.f32.xlu0 %v4319_v26 }
 0x964   : > { %v9088_v28 = vpop.eup %6278 }
 0x965   : > { %4332 = vmax.xlane.f32.xlu1 %v4331_v6  ;;  %v3207_v25 = vadd.f32 %v9088_v28, %v9083_v32 }
 0x967   : > { %4323 = vmax.xlane.f32.xlu0 %v4322_v60 }
 0x969   : > { %3166 = vadd.xlane.f32.xlu1 %v8975_v45  ;;  %v9117_v45 = vpop.permute.xlu0 %4522 }
 0x96b   : > { %v9099_v59 = vpop.eup %6280  ;;  %4329 = vmax.xlane.f32.xlu0 %v4328_v58 }
 0x96c   : > { %v9104_v26 = vpop.eup %6282 }
 0x96d   : > { %3172 = vadd.xlane.f32.xlu1 %v8998_v53  ;;  %v9109_v6 = vadd.f32 %v9104_v26, %v9099_v59  ;;  %v10183_v53 = vld [vmem:[#allocation63_spill] sm:$0xff] }
 0x96f   : > { %3163 = vadd.xlane.f32.xlu0 %v8967_v16  ;;  %v10184_v16 = vld [vmem:[#allocation47_spill] sm:$0xff] }
 0x971   : > { %3178 = vadd.xlane.f32.xlu1 %v9024_v3  ;;  %v10185_v3 = vld [vmem:[#allocation52_spill] sm:$0xff] }
 0x973   : > { %3169 = vadd.xlane.f32.xlu0 %v8989_v63 }
 0x975   : > { %3184 = vadd.xlane.f32.xlu1 %v9046_v21 }
 0x977   : > { %3175 = vadd.xlane.f32.xlu0 %v9014_v24 }
 0x979   : > { %3190 = vadd.xlane.f32.xlu1 %v9060_v41  ;;  %v10187_v41 = vld [vmem:[#allocation73_spill] sm:$0xff] }
 0x97b   : > { %3181 = vadd.xlane.f32.xlu0 %v9039_v4 }
 0x97d   : > { %2564 = vadd.xlane.f32.xlu1 %v10183_v53 }
 0x97f   : > { %3187 = vadd.xlane.f32.xlu0 %v9055_v56  ;;  %v3062_v60 = vpop.xlane.xlu0 %3061 }
 0x980   : > { %v3094_v58 = vsub.f32 %v10184_v16, %v3062_v60  ;;  %v3095_v43 = vsub.f32 %v10185_v3, %v3062_v60 }
 0x981   : > { %3196 = vadd.xlane.f32.xlu1 %v3195_v40  ;;  %v10190_v40 = vld [vmem:[#allocation77_spill] sm:$0xff] }
 0x982   : > { %v3154_v63 = vmul.f32 1.442695, %v3094_v58  ;;  %v3156_v21 = vmul.f32 1.442695, %v3095_v43  ;;  %v10196_v43 = vld [vmem:[#allocation85_spill] sm:$0xff] }
 0x983   : > { %2561 = vadd.xlane.f32.xlu0 %v10186_v27  ;;  %v3662_v24 = vpop.xlane.xlu0 %3661 }
 0x984   : > { %6284 = vpow2.f32 %v3154_v63  ;;  %v3708_v39 = vsub.f32 %v10187_v41, %v3662_v24  ;;  %v3709_v4 = vsub.f32 %v10188_v48, %v3662_v24 }
 0x985   : > { %6286 = vpow2.f32 %v3156_v21  ;;  %2570 = vadd.xlane.f32.xlu1 %v10189_v55  ;;  %v10197_v21 = vld [vmem:[#allocation86_spill] sm:$0xff] }
 0x986   : > { %v3740_v56 = vmul.f32 1.442695, %v3708_v39  ;;  %v3742_v47 = vmul.f32 1.442695, %v3709_v4 }
 0x987   : > { %3193 = vadd.xlane.f32.xlu0 %v9063_v49  ;;  %v3668_v54 = vpop.xlane.xlu0 %3667  ;;  %v10195_v49 = vld [vmem:[#allocation67_spill] sm:$0xff] }
 0x988   : > { %6288 = vpow2.f32 %v3740_v56  ;;  %v3712_v20 = vsub.f32 %v10190_v40, %v3668_v54  ;;  %v3713_v57 = vsub.f32 %v10191_v17, %v3668_v54  ;;  %v10198_v56 = vld [vmem:[#allocation79_spill] sm:$0xff]  ;;  %v10200_v40 = vld [vmem:[#allocation66_spill] sm:$0xff] }
 0x989   : > { %6290 = vpow2.f32 %v3742_v47  ;;  %3202 = vadd.xlane.f32.xlu1 %v3201_v11 }
 0x98a   : > { %v3748_v13 = vmul.f32 1.442695, %v3712_v20  ;;  %v3750_v51 = vmul.f32 1.442695, %v3713_v57 }
 0x98b   : > { %2567 = vadd.xlane.f32.xlu0 %v10192_v30  ;;  %v3674_v29 = vpop.xlane.xlu0 %3673 }
 0x98c   : > { %6292 = vpow2.f32 %v3748_v13  ;;  %v3716_v14 = vsub.f32 %v10193_v36, %v3674_v29  ;;  %v3717_v19 = vsub.f32 %v10194_v23, %v3674_v29  ;;  %v10203_v36 = vld [vmem:[#allocation69_spill] sm:$0xff] }
 0x98d   : > { %6294 = vpow2.f32 %v3750_v51  ;;  %2576 = vadd.xlane.f32.xlu1 %v10195_v49  ;;  %v10202_v51 = vld [vmem:[#allocation90_spill] sm:$0xff] }
 0x98e   : > { %v6285_v53 = vpop.eup %6284  ;;  %v3756_v60 = vmul.f32 1.442695, %v3716_v14  ;;  %v3758_v16 = vmul.f32 1.442695, %v3717_v19 }
 0x98f   : > { %v6287_v58 = vpop.eup %6286  ;;  %3199 = vadd.xlane.f32.xlu0 %v9070_v9  ;;  %v3680_v11 = vpop.xlane.xlu0 %3679  ;;  %v3224_v3 = vpack.c.bf16 %v9083_v32, %v6285_v53  ;;  %v10199_v9 = vld [vmem:[#allocation80_spill] sm:$0xff] }
 0x990   : > { %6296 = vpow2.f32 %v3756_v60  ;;  %v3720_v63 = vsub.f32 %v10196_v43, %v3680_v11  ;;  %v3721_v27 = vsub.f32 %v10197_v21, %v3680_v11  ;;  %v3225_v24 = vpack.c.bf16 %v9088_v28, %v6287_v58  ;;  %v10205_v60 = vld [vmem:[#allocation84_spill] sm:$0xff] }
 0x991   : > { %6298 = vpow2.f32 %v3758_v16  ;;  %v3671_v41 = vpop.xlane.xlu1 %3670  ;;  %3208 = vadd.xlane.f32.xlu1 %v3207_v25  ;;  %v3204_v39 = vadd.f32 %v6287_v58, %v6285_v53  ;;  %v10201_v25 = vld [vmem:[#allocation89_spill] sm:$0xff]  ;;  %v10204_v53 = vld [vmem:[#allocation83_spill] sm:$0xff] }
 0x992   : > { %v6289_v48 = vpop.eup %6288  ;;  %v3764_v4 = vmul.f32 1.442695, %v3720_v63  ;;  %v3766_v55 = vmul.f32 1.442695, %v3721_v27  ;;  %v3714_v47 = vsub.f32 %v10198_v56, %v3671_v41  ;;  %v3715_v54 = vsub.f32 %v10199_v9, %v3671_v41  ;;  %3378 = vmatprep.mubr.bf16.mxu1 %v3225_v24  ;;  %v10207_v27 = vld [vmem:[#allocation94_spill] sm:$0xff] }
 0x993   : > { %v6291_v32 = vpop.eup %6290  ;;  %3379 = vmatmul.mubr.bf16.gmra.mrb[60].mxu1 %v3224_v3  ;;  %2573 = vadd.xlane.f32.xlu0 %v10200_v40  ;;  %v3686_v20 = vpop.xlane.xlu0 %3685  ;;  %v3852_v17 = vpack.c.bf16 %v9099_v59, %v6289_v48  ;;  %v10210_v40 = vld [vmem:[#allocation68_spill] sm:$0xff] }
 0x994   : > { %6300 = vpow2.f32 %v3764_v4  ;;  %v3752_v28 = vmul.f32 1.442695, %v3714_v47  ;;  %v3754_v57 = vmul.f32 1.442695, %v3715_v54  ;;  %v3724_v13 = vsub.f32 %v10201_v25, %v3686_v20  ;;  %v10209_v47 = vld [vmem:[#allocation88_spill] sm:$0xff]  ;;  %v10212_v25 = vld [vmem:[#allocation95_spill] sm:$0xff] }
 0x995   : > { %6302 = vpow2.f32 %v3766_v55  ;;  %v3725_v30 = vsub.f32 %v10202_v51, %v3686_v20  ;;  %v3677_v29 = vpop.xlane.xlu1 %3676  ;;  %2582 = vadd.xlane.f32.xlu1 %v10203_v36  ;;  %v3853_v14 = vpack.c.bf16 %v9104_v26, %v6291_v32  ;;  %v3804_v23 = vadd.f32 %v6291_v32, %v6289_v48  ;;  %v10206_v26 = vld [vmem:[#allocation93_spill] sm:$0xff]  ;;  %v10213_v51 = vld [vmem:[#allocation99_spill] sm:$0xff] }
 0x996   : > { %v9150_v19 = vpop.eup %6292  ;;  %6304 = vpow2.f32 %v3752_v28  ;;  %v3772_v49 = vmul.f32 1.442695, %v3724_v13  ;;  %v3718_v59 = vsub.f32 %v10204_v53, %v3677_v29  ;;  %v3719_v16 = vsub.f32 %v10205_v60, %v3677_v29  ;;  %v10215_v53 = vld [vmem:[#allocation91_spill] sm:$0xff]  ;;  %v10216_v60 = vld [vmem:[#allocation92_spill] sm:$0xff] }
 0x997   : > { %v9154_v58 = vpop.eup %6294  ;;  %6306 = vpow2.f32 %v3754_v57  ;;  %v3774_v11 = vmul.f32 1.442695, %v3725_v30  ;;  %3948 = vmatprep.mubr.bf16.mxu1 %v3853_v14  ;;  %3205 = vadd.xlane.f32.xlu0 %v3204_v39  ;;  %v3692_v3 = vpop.xlane.xlu0 %3691  ;;  %v10208_v39 = vld [vmem:[#allocation87_spill] sm:$0xff]  ;;  %v10211_v57 = vld [vmem:[#allocation96_spill] sm:$0xff]  ;;  %v10214_v30 = vld [vmem:[#allocation97_spill] sm:$0xff] }
 0x998   : > { %6308 = vpow2.f32 %v3772_v49  ;;  %v3760_v43 = vmul.f32 1.442695, %v3718_v59  ;;  %v3762_v63 = vmul.f32 1.442695, %v3719_v16  ;;  %v3728_v21 = vsub.f32 %v10206_v26, %v3692_v3 }
 0x999   : > { %6310 = vpow2.f32 %v3774_v11  ;;  %v3729_v24 = vsub.f32 %v10207_v27, %v3692_v3  ;;  %v3683_v41 = vpop.xlane.xlu1 %3682  ;;  %3808 = vadd.xlane.f32.xlu1 %v9109_v6  ;;  %v3810_v48 = vadd.f32 %v9154_v58, %v9150_v19  ;;  %v10217_v27 = vld [vmem:[#allocation98_spill] sm:$0xff] }
 0x99a   : > { %v9161_v4 = vpop.eup %6296  ;;  %6312 = vpow2.f32 %v3760_v43  ;;  %v3780_v55 = vmul.f32 1.442695, %v3728_v21  ;;  %v3722_v56 = vsub.f32 %v10208_v39, %v3683_v41  ;;  %v3723_v9 = vsub.f32 %v10209_v47, %v3683_v41  ;;  %v10219_v39 = vld [vmem:[#allocation100_spill] sm:$0xff] }
 0x99b   : > { %v9165_v54 = vpop.eup %6298  ;;  %6314 = vpow2.f32 %v3762_v63  ;;  %v3782_v32 = vmul.f32 1.442695, %v3729_v24  ;;  %3949 = vmatmul.mubr.bf16.vlgmr.msra.gmra.mrb[64].mxu1 %v3852_v17  ;;  %2579 = vadd.xlane.f32.xlu0 %v10210_v40  ;;  %v3695_v20 = vpop.xlane.xlu0 %3694 }
 0x99c   : > { %6316 = vpow2.f32 %v3780_v55  ;;  %v3768_v6 = vmul.f32 1.442695, %v3722_v56  ;;  %v3770_v28 = vmul.f32 1.442695, %v3723_v9  ;;  %5659 = vmatpush3.bf16.msra.mxu1 %v10211_v57  ;;  %v3730_v13 = vsub.f32 %v10212_v25, %v3695_v20  ;;  %v10218_v55 = vld [vmem:[#allocation106_spill] sm:$0xff] }
 0x99d   : > { %6318 = vpow2.f32 %v3782_v32  ;;  %5660 = vmatprep.subr.bf16.mxu1 %v10213_v51  ;;  %v3731_v29 = vsub.f32 %v10214_v30, %v3695_v20  ;;  %v3689_v36 = vpop.xlane.xlu1 %3688  ;;  %v3816_v14 = vadd.f32 %v9165_v54, %v9161_v4 }
 0x99e   : > { %v9174_v17 = vpop.eup %6300  ;;  %6320 = vpow2.f32 %v3768_v6  ;;  %v3784_v49 = vmul.f32 1.442695, %v3730_v13  ;;  %v3726_v59 = vsub.f32 %v10215_v53, %v3689_v36  ;;  %v3727_v16 = vsub.f32 %v10216_v60, %v3689_v36  ;;  %v10221_v6 = vld [vmem:[#allocation102_spill] sm:$0xff]  ;;  %v10223_v60 = vld [vmem:[#allocation104_spill] sm:$0xff] }
 0x99f   : > { %v9178_v11 = vpop.eup %6302  ;;  %6322 = vpow2.f32 %v3770_v28  ;;  %v3786_v3 = vmul.f32 1.442695, %v3731_v29  ;;  %3805 = vadd.xlane.f32.xlu0 %v3804_v23  ;;  %v3698_v43 = vpop.xlane.xlu0 %3697 }
 0x9a0   : > { %v6305_v63 = vpop.eup %6304  ;;  %6324 = vpow2.f32 %v3784_v49  ;;  %v3776_v26 = vmul.f32 1.442695, %v3726_v59  ;;  %v3778_v21 = vmul.f32 1.442695, %v3727_v16  ;;  %5661 = vmatpush3.bf16.msra.mxu1 %v8871_v50  ;;  %v3732_v24 = vsub.f32 %v10217_v27, %v3698_v43  ;;  %v10220_v50 = vld [vmem:[#allocation101_spill] sm:$0xff]  ;;  %v10222_v49 = vld [vmem:[#allocation103_spill] sm:$0xff] }
 0x9a1   : > { %v6307_v41 = vpop.eup %6306  ;;  %6326 = vpow2.f32 %v3786_v3  ;;  %5662 = vmatprep.subr.bf16.mxu1 %v10218_v55  ;;  %v3733_v56 = vsub.f32 %v10219_v39, %v3698_v43  ;;  %v3701_v47 = vpop.xlane.xlu1 %3700  ;;  %v3854_v9 = vpack.c.bf16 %v6305_v63, %v9150_v19  ;;  %v9187_v23 = vadd.f32 %v9178_v11, %v9174_v17 }
 0x9a2   : > { %v9189_v32 = vpop.eup %6308  ;;  %6328 = vpow2.f32 %v3776_v26  ;;  %v3788_v40 = vmul.f32 1.442695, %v3732_v24  ;;  %v3734_v20 = vsub.f32 %v10220_v50, %v3701_v47  ;;  %v3735_v28 = vsub.f32 %v10221_v6, %v3701_v47  ;;  %v10228_v6 = vld [vmem:[#allocation109_spill] sm:$0xff] }
 0x9a3   : > { %v9193_v57 = vpop.eup %6310  ;;  %6330 = vpow2.f32 %v3778_v21  ;;  %v3790_v25 = vmul.f32 1.442695, %v3733_v56  ;;  %v3813_v13 = vadd.f32 %v6307_v41, %v6305_v63  ;;  %v3855_v51 = vpack.c.bf16 %v6307_v41, %v9154_v58  ;;  %3811 = vadd.xlane.f32.xlu0 %v3810_v48  ;;  %v3704_v19 = vpop.xlane.xlu0 %3703  ;;  %v10224_v63 = vld [vmem:[#allocation105_spill] sm:$0xff]  ;;  %v10225_v21 = vld [vmem:[#allocation107_spill] sm:$0xff] }
 0x9a4   : > { %v9196_v30 = vpop.eup %6312  ;;  %6332 = vpow2.f32 %v3788_v40  ;;  %v3792_v29 = vmul.f32 1.442695, %v3734_v20  ;;  %v3794_v36 = vmul.f32 1.442695, %v3735_v28  ;;  %5663 = vmatpush3.bf16.msra.mxu1 %v8887_v37  ;;  %v3736_v53 = vsub.f32 %v10222_v49, %v3704_v19  ;;  %v10227_v40 = vld [vmem:[#allocation108_spill] sm:$0xff] }
 0x9a5   : > { %v6315_v59 = vpop.eup %6314  ;;  %6334 = vpow2.f32 %v3790_v25  ;;  %3814 = vadd.xlane.f32.xlu1 %v3813_v13  ;;  %3956 = vmatprep.mubr.bf16.mxu1 %v3855_v51  ;;  %v3737_v16 = vsub.f32 %v10223_v60, %v3704_v19  ;;  %v3707_v3 = vpop.xlane.xlu1 %3706  ;;  %v3856_v58 = vpack.c.bf16 %v9196_v30, %v9161_v4  ;;  %v9205_v48 = vadd.f32 %v9193_v57, %v9189_v32  ;;  %v10229_v51 = vld [vmem:[#allocation113_spill] sm:$0xff] }
 0x9a6   : > { %v9207_v43 = vpop.eup %6316  ;;  %6336 = vpow2.f32 %v3792_v29  ;;  %5664 = vmatprep.subr.bf16.mxu1 %v8891_v35  ;;  %v3796_v37 = vmul.f32 1.442695, %v3736_v53  ;;  %3957 = vmatmul.mubr.bf16.gmra.mrb[68].mxu1 %v3854_v9  ;;  %v3738_v26 = vsub.f32 %v10224_v63, %v3707_v3  ;;  %v3739_v27 = vsub.f32 %v10225_v21, %v3707_v3  ;;  %v10226_v9 = vld [vmem:[#allocation111_spill] sm:$0xff] }
 0x9a7   : > { %v9212_v24 = vpop.eup %6318  ;;  %6338 = vpow2.f32 %v3794_v36  ;;  %v3798_v41 = vmul.f32 1.442695, %v3737_v16  ;;  %v3819_v4 = vadd.f32 %v6315_v59, %v9196_v30  ;;  %v3857_v55 = vpack.c.bf16 %v6315_v59, %v9165_v54  ;;  %3817 = vadd.xlane.f32.xlu0 %v3816_v14  ;;  %v4288_v39 = vpop.xlane.xlu0 %4287  ;;  %v10230_v30 = vld [vmem:[#allocation110_spill] sm:$0xff]  ;;  %v10231_v36 = vld [vmem:[#allocation112_spill] sm:$0xff]  ;;  %v10232_v21 = vld [vmem:[#allocation115_spill] sm:$0xff] }
 0x9a8   : > { %v9216_v56 = vpop.eup %6320  ;;  %6340 = vpow2.f32 %v3796_v37  ;;  %v3800_v35 = vmul.f32 1.442695, %v3738_v26  ;;  %v3802_v47 = vmul.f32 1.442695, %v3739_v27  ;;  %5665 = vmatpush3.bf16.msra.mxu1 %v10226_v9  ;;  %v4334_v50 = vsub.f32 %v10227_v40, %v4288_v39  ;;  %v10233_v27 = vld [vmem:[#allocation114_spill] sm:$0xff] }
 0x9a9   : > { %v6323_v20 = vpop.eup %6322  ;;  %6342 = vpow2.f32 %v3798_v41  ;;  %3820 = vadd.xlane.f32.xlu1 %v3819_v4  ;;  %3964 = vmatprep.mubr.bf16.mxu1 %v3857_v55  ;;  %v4335_v28 = vsub.f32 %v10228_v6, %v4288_v39  ;;  %v4291_v25 = vpop.xlane.xlu1 %4290  ;;  %v9223_v54 = vadd.f32 %v9212_v24, %v9207_v43  ;;  %v3858_v14 = vpack.c.bf16 %v9216_v56, %v9174_v17  ;;  %v10234_v55 = vld [vmem:[#allocation119_spill] sm:$0xff]  ;;  %v10235_v39 = vld [vmem:[#allocation116_spill] sm:$0xff]  ;;  %v10237_v6 = vld [vmem:[#allocation118_spill] sm:$0xff] }
 0x9aa   : > { %v9227_v13 = vpop.eup %6324  ;;  %6344 = vpow2.f32 %v3800_v35  ;;  %5666 = vmatprep.subr.bf16.mxu1 %v10229_v51  ;;  %v4366_v19 = vmul.f32 1.442695, %v4334_v50  ;;  %v4336_v29 = vsub.f32 %v10230_v30, %v4291_v25  ;;  %v4337_v49 = vsub.f32 %v10231_v36, %v4291_v25  ;;  %v10236_v50 = vld [vmem:[#allocation117_spill] sm:$0xff] }
 0x9ab   : > { %v9232_v53 = vpop.eup %6326  ;;  %6346 = vpow2.f32 %v3802_v47  ;;  %v4368_v59 = vmul.f32 1.442695, %v4335_v28  ;;  %v3825_v60 = vadd.f32 %v6323_v20, %v9216_v56  ;;  %3823 = vadd.xlane.f32.xlu0 %v9187_v23  ;;  %v4294_v16 = vpop.xlane.xlu0 %4293  ;;  %v3859_v3 = vpack.c.bf16 %v6323_v20, %v9178_v11 }
 0x9ac   : > { %v9237_v37 = vpop.eup %6328  ;;  %6348 = vpow2.f32 %v4366_v19  ;;  %v4370_v63 = vmul.f32 1.442695, %v4336_v29  ;;  %v4372_v26 = vmul.f32 1.442695, %v4337_v49  ;;  %5667 = vmatpush3.bf16.msra.mxu1 %v10232_v21  ;;  %v4338_v41 = vsub.f32 %v10233_v27, %v4294_v16 }
 0x9ad   : > { %v9241_v4 = vpop.eup %6330  ;;  %6350 = vpow2.f32 %v4368_v59  ;;  %3826 = vadd.xlane.f32.xlu1 %v3825_v60  ;;  %5668 = vmatprep.subr.bf16.mxu1 %v10234_v55  ;;  %v4339_v23 = vsub.f32 %v10235_v39, %v4294_v16  ;;  %v4297_v35 = vpop.xlane.xlu1 %4296  ;;  %v3837_v11 = vadd.f32 %v9232_v53, %v9227_v13  ;;  %v3860_v47 = vpack.c.bf16 %v9237_v37, %v9189_v32  ;;  %v10238_v59 = vld [vmem:[#allocation120_spill] sm:$0xff] }
 0x9ae   : > { %v9249_v9 = vpop.eup %6332  ;;  %6352 = vpow2.f32 %v4370_v63  ;;  %v4374_v40 = vmul.f32 1.442695, %v4338_v41  ;;  %3965 = vmatmul.mubr.bf16.gmra.mrb[72].mxu1 %v3856_v58  ;;  %v4340_v20 = vsub.f32 %v10236_v50, %v4297_v35  ;;  %v4341_v28 = vsub.f32 %v10237_v6, %v4297_v35 }
 0x9af   : > { %v9253_v25 = vpop.eup %6334  ;;  %6354 = vpow2.f32 %v4372_v26  ;;  %v4376_v51 = vmul.f32 1.442695, %v4339_v23  ;;  %3972 = vmatprep.mubr.bf16.mxu1 %v3859_v3  ;;  %v3831_v19 = vadd.f32 %v9241_v4, %v9237_v37  ;;  %3829 = vadd.xlane.f32.xlu0 %v9205_v48  ;;  %v4300_v30 = vpop.xlane.xlu0 %4299  ;;  %v3861_v29 = vpack.c.bf16 %v9241_v4, %v9193_v57  ;;  %v10239_v48 = vld [vmem:[#allocation121_spill] sm:$0xff] }
 0x9b0   : > { %v9260_v36 = vpop.eup %6336  ;;  %6356 = vpow2.f32 %v4374_v40  ;;  %v4378_v58 = vmul.f32 1.442695, %v4340_v20  ;;  %v4380_v49 = vmul.f32 1.442695, %v4341_v28  ;;  %5669 = vmatpush3.bf16.msra.mxu1 %v10238_v59  ;;  %v4342_v60 = vsub.f32 %v8925_v31, %v4300_v30 }
 0x9b1   : > { %v9264_v16 = vpop.eup %6338  ;;  %6358 = vpow2.f32 %v4376_v51  ;;  %3832 = vadd.xlane.f32.xlu1 %v3831_v19  ;;  %5670 = vmatprep.subr.bf16.mxu1 %v9117_v45  ;;  %v4343_v3 = vsub.f32 %v10239_v48, %v4300_v30  ;;  %v4303_v63 = vpop.xlane.xlu1 %4302  ;;  %v3840_v57 = vadd.f32 %v9253_v25, %v9249_v9  ;;  %v3863_v26 = vpack.c.bf16 %v9232_v53, %v9212_v24 }
 0x9b2   : > { %v9272_v21 = vpop.eup %6340  ;;  %6360 = vpow2.f32 %v4378_v58  ;;  %v4382_v27 = vmul.f32 1.442695, %v4342_v60  ;;  %v4344_v31 = vsub.f32 %v8933_v7, %v4303_v63  ;;  %v4345_v41 = vsub.f32 %v8935_v34, %v4303_v63 }
 0x9b3   : > { %v9276_v4 = vpop.eup %6342  ;;  %6362 = vpow2.f32 %v4380_v49  ;;  %v4384_v45 = vmul.f32 1.442695, %v4343_v3  ;;  %3835 = vadd.xlane.f32.xlu0 %v9223_v54  ;;  %v4306_v55 = vpop.xlane.xlu0 %4305  ;;  %v3843_v39 = vadd.f32 %v9264_v16, %v9260_v36  ;;  %v3862_v23 = vpack.c.bf16 %v9227_v13, %v9207_v43  ;;  %v10240_v54 = vld [vmem:[#allocation122_spill] sm:$0xff] }
 0x9b4   : > { %v9283_v35 = vpop.eup %6344  ;;  %6364 = vpow2.f32 %v4382_v27  ;;  %v4386_v40 = vmul.f32 1.442695, %v4344_v31  ;;  %v4388_v7 = vmul.f32 1.442695, %v4345_v41  ;;  %5671 = vmatpush3.bf16.msra.mxu1 %v9134_v10  ;;  %v4346_v34 = vsub.f32 %v8941_v52, %v4306_v55  ;;  %v10241_v52 = vld [vmem:[#allocation123_spill] sm:$0xff] }
 0x9b5   : > { %v9287_v50 = vpop.eup %6346  ;;  %6366 = vpow2.f32 %v4384_v45  ;;  %3838 = vadd.xlane.f32.xlu1 %v3837_v11  ;;  %v4347_v20 = vsub.f32 %v10240_v54, %v4306_v55  ;;  %v4309_v6 = vpop.xlane.xlu1 %4308  ;;  %v3846_v28 = vadd.f32 %v9276_v4, %v9272_v21  ;;  %v3865_v51 = vpack.c.bf16 %v9264_v16, %v9253_v25  ;;  %v10242_v11 = vld [vmem:[#allocation124_spill] sm:$0xff] }
 0x9b6   : > { %v9294_v19 = vpop.eup %6348  ;;  %6368 = vpow2.f32 %v4386_v40  ;;  %v4390_v30 = vmul.f32 1.442695, %v4346_v34  ;;  %3973 = vmatmul.mubr.bf16.gmra.mrb[76].mxu1 %v3858_v14  ;;  %v4348_v10 = vsub.f32 %v10241_v52, %v4309_v6  ;;  %v4349_v58 = vsub.f32 %v10242_v11, %v4309_v6 }
 0x9b7   : > { %v9301_v49 = vpop.eup %6350  ;;  %6370 = vpow2.f32 %v4388_v7  ;;  %v4392_v59 = vmul.f32 1.442695, %v4347_v20  ;;  %3980 = vmatprep.mubr.bf16.mxu1 %v3861_v29  ;;  %3841 = vadd.xlane.f32.xlu0 %v3840_v57  ;;  %v4525_v60 = vpop.permute.xlu0 %4524  ;;  %v3849_v48 = vadd.f32 %v9287_v50, %v9283_v35  ;;  %v3864_v3 = vpack.c.bf16 %v9260_v36, %v9249_v9 }
 0x9b8   : > { %v6353_v63 = vpop.eup %6352  ;;  %6372 = vpow2.f32 %v4390_v30  ;;  %v4394_v17 = vmul.f32 1.442695, %v4348_v10  ;;  %v4396_v56 = vmul.f32 1.442695, %v4349_v58  ;;  %5672 = vmatprep.subr.bf16.mxu1 %v4525_v60  ;;  %v4430_v14 = vadd.f32 %v9301_v49, %v9294_v19 }
 0x9b9   : > { %v6355_v27 = vpop.eup %6354  ;;  %6374 = vpow2.f32 %v4392_v59  ;;  %3844 = vadd.xlane.f32.xlu1 %v3843_v39  ;;  %v4509_v29 = vpop.permute.xlu1 %4508  ;;  %v3867_v57 = vpack.c.bf16 %v9287_v50, %v9276_v4  ;;  %v3866_v31 = vpack.c.bf16 %v9283_v35, %v9272_v21  ;;  %v4478_v9 = vpack.c.bf16 %v6353_v63, %v9294_v19 }
 0x9ba   : > { %v6357_v36 = vpop.eup %6356  ;;  %6376 = vpow2.f32 %v4394_v17  ;;  %5673 = vmatpush3.bf16.msra.mxu1 %v4509_v29  ;;  %v4433_v41 = vadd.f32 %v6355_v27, %v6353_v63  ;;  %v4479_v45 = vpack.c.bf16 %v6355_v27, %v9301_v49 }
 0x9bb   : > { %v6359_v55 = vpop.eup %6358  ;;  %6378 = vpow2.f32 %v4396_v56  ;;  %3847 = vadd.xlane.f32.xlu0 %v3846_v28 }
 0x9bc   : > { %v6361_v40 = vpop.eup %6360  ;;  %v4436_v39 = vadd.f32 %v6359_v55, %v6357_v36 }
 0x9bd   : > { %v6363_v7 = vpop.eup %6362  ;;  %3850 = vadd.xlane.f32.xlu1 %v3849_v48  ;;  %v4480_v34 = vpack.c.bf16 %v6361_v40, %v6357_v36 }
 0x9be   : > { %v6365_v4 = vpop.eup %6364  ;;  %3981 = vmatmul.mubr.bf16.gmra.mrb[80].mxu1 %v3860_v47  ;;  %v4439_v21 = vadd.f32 %v6363_v7, %v6361_v40  ;;  %v4481_v35 = vpack.c.bf16 %v6363_v7, %v6359_v55 }
 0x9bf   : > { %v6367_v50 = vpop.eup %6366  ;;  %3988 = vmatprep.mubr.bf16.mxu1 %v3863_v26  ;;  %4431 = vadd.xlane.f32.xlu0 %v4430_v14 }
 0x9c0   : > { %v6369_v54 = vpop.eup %6368  ;;  %v4442_v20 = vadd.f32 %v6367_v50, %v6365_v4 }
 0x9c1   : > { %v6371_v6 = vpop.eup %6370  ;;  %4434 = vadd.xlane.f32.xlu1 %v4433_v41  ;;  %v4482_v28 = vpack.c.bf16 %v6369_v54, %v6365_v4 }
 0x9c2   : > { %v9321_v19 = vpop.eup %6372  ;;  %v4445_v30 = vadd.f32 %v6371_v6, %v6369_v54  ;;  %v4483_v52 = vpack.c.bf16 %v6371_v6, %v6367_v50 }
 0x9c3   : > { %v6375_v10 = vpop.eup %6374  ;;  %4437 = vadd.xlane.f32.xlu0 %v4436_v39 }
 0x9c4   : > { %v9323_v32 = vpop.eup %6376  ;;  %v4448_v37 = vadd.f32 %v6375_v10, %v9321_v19 }
 0x9c5   : > { %v6379_v47 = vpop.eup %6378  ;;  %4440 = vadd.xlane.f32.xlu1 %v4439_v21  ;;  %v4484_v24 = vpack.c.bf16 %v9323_v32, %v9321_v19 }
 0x9c6   : > { %3989 = vmatmul.mubr.bf16.gmra.mrb[84].mxu1 %v3862_v23  ;;  %v4451_v53 = vadd.f32 %v6379_v47, %v9323_v32  ;;  %v4485_v26 = vpack.c.bf16 %v6379_v47, %v6375_v10 }
 0x9c7   : > { %3996 = vmatprep.mubr.bf16.mxu1 %v3865_v51  ;;  %4443 = vadd.xlane.f32.xlu0 %v4442_v20 }
 0x9c9   : > { %4446 = vadd.xlane.f32.xlu1 %v4445_v30 }
 0x9cb   : > { %4449 = vadd.xlane.f32.xlu0 %v4448_v37 }
 0x9cd   : > { %4452 = vadd.xlane.f32.xlu1 %v4451_v53 }
 0x9ce   : > { %3997 = vmatmul.mubr.bf16.gmra.mrb[88].mxu1 %v3864_v3 }
 0x9cf   : > { %4004 = vmatprep.mubr.bf16.mxu1 %v3867_v57 }
 0x9d6   : > { %4005 = vmatmul.mubr.bf16.gmra.mrb[92].mxu1 %v3866_v31 }
 0x9d7   : > { %4574 = vmatprep.mubr.bf16.mxu1 %v4479_v45 }
 0x9de   : > { %4575 = vmatmul.mubr.bf16.vlgmr.msra.gmra.mrb[96].mxu1 %v4478_v9 }
 0x9df   : > { %4582 = vmatprep.mubr.bf16.mxu1 %v4481_v35 }
 0x9e6   : > { %4583 = vmatmul.mubr.bf16.gmra.mrb[100].mxu1 %v4480_v34 }
 0x9e7   : > { %4590 = vmatprep.mubr.bf16.mxu1 %v4483_v52 }
 0x9e8   : > { %v4312_v43 = vpop.xlane.xlu0 %4311 }
 0x9e9   : > { %v4350_v13 = vsub.f32 %v8957_v38, %v4312_v43  ;;  %v4351_v23 = vsub.f32 %v8959_v42, %v4312_v43 }
 0x9ea   : > { %v4315_v11 = vpop.xlane.xlu1 %4314 }
 0x9eb   : > { %v4398_v25 = vmul.f32 1.442695, %v4350_v13  ;;  %v4400_v16 = vmul.f32 1.442695, %v4351_v23  ;;  %v4352_v51 = vsub.f32 %v8965_v2, %v4315_v11  ;;  %v4353_v58 = vsub.f32 %v8969_v62, %v4315_v11 }
 0x9ec   : > { %v4318_v49 = vpop.xlane.xlu0 %4317 }
 0x9ed   : > { %6380 = vpow2.f32 %v4398_v25  ;;  %v4402_v59 = vmul.f32 1.442695, %v4352_v51  ;;  %v4404_v60 = vmul.f32 1.442695, %v4353_v58  ;;  %v4354_v48 = vsub.f32 %v8977_v8, %v4318_v49 }
 0x9ee   : > { %6382 = vpow2.f32 %v4400_v16  ;;  %4591 = vmatmul.mubr.bf16.gmra.mrb[104].mxu1 %v4482_v28  ;;  %v4355_v3 = vsub.f32 %v8980_v46, %v4318_v49  ;;  %v4327_v38 = vpop.xlane.xlu1 %4326 }
 0x9ef   : > { %6384 = vpow2.f32 %v4402_v59  ;;  %v4406_v42 = vmul.f32 1.442695, %v4354_v48  ;;  %4598 = vmatprep.mubr.bf16.mxu1 %v4485_v26  ;;  %v4360_v63 = vsub.f32 %v9012_v0, %v4327_v38  ;;  %v4361_v2 = vsub.f32 %v9017_v5, %v4327_v38 }
 0x9f0   : > { %6386 = vpow2.f32 %v4404_v60  ;;  %v4408_v62 = vmul.f32 1.442695, %v4355_v3  ;;  %v4321_v17 = vpop.xlane.xlu0 %4320 }
 0x9f1   : > { %6388 = vpow2.f32 %v4406_v42  ;;  %v4418_v56 = vmul.f32 1.442695, %v4360_v63  ;;  %v4420_v14 = vmul.f32 1.442695, %v4361_v2  ;;  %v4356_v8 = vsub.f32 %v8987_v61, %v4321_v17 }
 0x9f2   : > { %6390 = vpow2.f32 %v4408_v62  ;;  %v4357_v27 = vsub.f32 %v8991_v22, %v4321_v17  ;;  %v4333_v46 = vpop.xlane.xlu1 %4332 }
 0x9f3   : > { %6392 = vpow2.f32 %v4418_v56  ;;  %v4410_v29 = vmul.f32 1.442695, %v4356_v8  ;;  %v4364_v57 = vsub.f32 %v9037_v44, %v4333_v46  ;;  %v4365_v0 = vsub.f32 %v9041_v18, %v4333_v46 }
 0x9f4   : > { %6394 = vpow2.f32 %v4420_v14  ;;  %v4412_v5 = vmul.f32 1.442695, %v4357_v27  ;;  %v4324_v31 = vpop.xlane.xlu0 %4323 }
 0x9f5   : > { %6396 = vpow2.f32 %v4410_v29  ;;  %v4426_v9 = vmul.f32 1.442695, %v4364_v57  ;;  %v4428_v36 = vmul.f32 1.442695, %v4365_v0  ;;  %v4358_v41 = vsub.f32 %v9002_v12, %v4324_v31 }
 0x9f6   : > { %6398 = vpow2.f32 %v4412_v5  ;;  %4599 = vmatmul.mubr.bf16.gmra.mrb[108].mxu1 %v4484_v24  ;;  %v4359_v61 = vsub.f32 %v9005_v1, %v4324_v31  ;;  %v3167_v22 = vpop.xlane.xlu1 %3166  ;;  %v10243_v31 = vld [vmem:[#allocation71_spill] sm:$0xff] }
 0x9f7   : > { %v6381_v45 = vpop.eup %6380  ;;  %6400 = vpow2.f32 %v4426_v9  ;;  %v4414_v55 = vmul.f32 1.442695, %v4358_v41 }
 0x9f8   : > { %v6383_v40 = vpop.eup %6382  ;;  %6402 = vpow2.f32 %v4428_v36  ;;  %v4416_v44 = vmul.f32 1.442695, %v4359_v61  ;;  %v4330_v18 = vpop.xlane.xlu0 %4329 }
 0x9f9   : > { %v6385_v39 = vpop.eup %6384  ;;  %6404 = vpow2.f32 %v4414_v55  ;;  %v4362_v7 = vsub.f32 %v9027_v15, %v4330_v18  ;;  %v4363_v34 = vsub.f32 %v9030_v33, %v4330_v18  ;;  %v4454_v4 = vadd.f32 %v6383_v40, %v6381_v45 }
 0x9fa   : > { %v6387_v12 = vpop.eup %6386  ;;  %6406 = vpow2.f32 %v4416_v44  ;;  %v3173_v21 = vpop.xlane.xlu1 %3172  ;;  %v4486_v35 = vpack.c.bf16 %v6385_v39, %v6381_v45  ;;  %v10244_v44 = vld [vmem:[#allocation72_spill] sm:$0xff] }
 0x9fb   : > { %v6389_v1 = vpop.eup %6388  ;;  %v4422_v50 = vmul.f32 1.442695, %v4362_v7  ;;  %v4424_v54 = vmul.f32 1.442695, %v4363_v34  ;;  %4455 = vadd.xlane.f32.xlu0 %v4454_v4  ;;  %v4457_v20 = vadd.f32 %v6387_v12, %v6385_v39  ;;  %6408 = vrcp.f32 %v3167_v22  ;;  %v10245_v7 = vld [vmem:[#allocation70_spill] sm:$0xff] }
 0x9fc   : > { %v6391_v6 = vpop.eup %6390  ;;  %v4487_v28 = vpack.c.bf16 %v6387_v12, %v6383_v40  ;;  %v3164_v19 = vpop.xlane.xlu0 %3163 }
 0x9fd   : > { %v9351_v30 = vpop.eup %6392  ;;  %6410 = vpow2.f32 %v4422_v50  ;;  %4458 = vadd.xlane.f32.xlu1 %v4457_v20  ;;  %v4460_v15 = vadd.f32 %v6391_v6, %v6389_v1  ;;  %v10247_v20 = vld [vmem:[#allocation61_spill] sm:$0xff] }
 0x9fe   : > { %v6395_v33 = vpop.eup %6394  ;;  %6412 = vpow2.f32 %v4424_v54  ;;  %4606 = vmatprep.mubr.bf16.mxu1 %v4487_v28  ;;  %v3179_v52 = vpop.xlane.xlu1 %3178 }
 0x9ff   : > { %v6397_v10 = vpop.eup %6396  ;;  %6414 = vrcp.f32 %v3164_v19  ;;  %4607 = vmatmul.mubr.bf16.gmra.mrb[112].mxu1 %v4486_v35  ;;  %4461 = vadd.xlane.f32.xlu0 %v4460_v15  ;;  %v4469_v32 = vadd.f32 %v6395_v33, %v9351_v30 }
 0xa00   : > { %v6399_v37 = vpop.eup %6398  ;;  %v3170_v47 = vpop.xlane.xlu0 %3169  ;;  %v4488_v24 = vpack.c.bf16 %v6397_v10, %v6389_v1  ;;  %6416 = vrcp.f32 %v3173_v21  ;;  %v10246_v1 = vld [vmem:[#allocation53_spill] sm:$0xff] }
 0xa01   : > { %v9354_v53 = vpop.eup %6400  ;;  %v4489_v26 = vpack.c.bf16 %v6399_v37, %v6391_v6  ;;  %v4463_v43 = vadd.f32 %v6399_v37, %v6397_v10  ;;  %6418 = vrcp.f32 %v3170_v47 }
 0xa02   : > { %v6403_v13 = vpop.eup %6402  ;;  %v9356_v23 = vpop.xlane.xlu1 %3184 }
 0xa03   : > { %v6405_v11 = vpop.eup %6404  ;;  %4614 = vmatprep.mubr.bf16.mxu1 %v4489_v26  ;;  %4464 = vadd.xlane.f32.xlu1 %v4463_v43  ;;  %v9359_v25 = vadd.f32 %v6403_v13, %v9354_v53  ;;  %v5482_v51 = vpop.f32.mrb[32].mxu1 }
 0xa04   : > { %v6407_v16 = vpop.eup %6406  ;;  %v3176_v58 = vpop.xlane.xlu0 %3175  ;;  %v4490_v49 = vpack.c.bf16 %v9351_v30, %v6405_v11 }
 0xa05   : > { %v5483_v59 = vpop.f32.mrb[33].mxu1  ;;  %v4491_v60 = vpack.c.bf16 %v6395_v33, %v6407_v16  ;;  %v4466_v48 = vadd.f32 %v6407_v16, %v6405_v11  ;;  %v6409_v3 = vpop.eup %6408  ;;  %v10250_v16 = vld [vmem:[#allocation55_spill] sm:$0xff] }
 0xa06   : > { %v5484_v38 = vadd.f32 %v5483_v59, %v5482_v51  ;;  %v5485_v42 = vpop.f32.mrb[34].mxu1  ;;  %v9362_v63 = vpop.xlane.xlu1 %3190  ;;  %v10252_v59 = vld [vmem:[#allocation56_spill] sm:$0xff] }
 0xa07   : > { %v6411_v2 = vpop.eup %6410  ;;  %v5486_v62 = vpop.f32.mrb[35].mxu1  ;;  %4615 = vmatmul.mubr.bf16.gmra.mrb[116].mxu1 %v4488_v24  ;;  %4470 = vadd.xlane.f32.xlu1 %v4469_v32  ;;  %v10249_v24 = vld [vmem:[#allocation38_spill] sm:$0xff] }
 0xa08   : > { %v6413_v17 = vpop.eup %6412  ;;  %v5487_v56 = vadd.f32 %v5486_v62, %v5485_v42  ;;  %4622 = vmatprep.mubr.bf16.mxu1 %v4491_v60  ;;  %4467 = vadd.xlane.f32.xlu0 %v4466_v48  ;;  %v3182_v14 = vpop.xlane.xlu0 %3181  ;;  %v4492_v8 = vpack.c.bf16 %v9354_v53, %v6411_v2  ;;  %v10253_v62 = vld [vmem:[#allocation58_spill] sm:$0xff] }
 0xa09   : > { %v6415_v27 = vpop.eup %6414  ;;  %v4472_v46 = vadd.f32 %v6413_v17, %v6411_v2  ;;  %v4493_v29 = vpack.c.bf16 %v6403_v13, %v6413_v17 }
 0xa0a   : > { %v9365_v57 = vmul.f32 %v6415_v27, %v5484_v38  ;;  %v9367_v0 = vmul.f32 %v6409_v3, %v5487_v56  ;;  %v2565_v5 = vpop.xlane.xlu1 %2564  ;;  %v6417_v18 = vpop.eup %6416 }
 0xa0b   : > { %6420 = vrcp.f32 %v2565_v5  ;;  %2588 = vadd.xlane.f32.xlu1 %v10243_v31  ;;  %v5488_v36 = vpop.f32.mrb[36].mxu1  ;;  %v6419_v4 = vpop.eup %6418 }
 0xa0c   : > { %v3419_v9 = vpack.c.bf16 %v9367_v0, %v9365_v57  ;;  %4473 = vadd.xlane.f32.xlu0 %v4472_v46  ;;  %v3188_v41 = vpop.xlane.xlu0 %3187  ;;  %v5489_v61 = vpop.f32.mrb[37].mxu1  ;;  %6422 = vrcp.f32 %v3179_v52  ;;  %v10248_v52 = vld [vmem:[#allocation40_spill] sm:$0xff] }
 0xa0d   : > { %v5490_v22 = vadd.f32 %v5489_v61, %v5488_v36  ;;  %v5491_v45 = vpop.f32.mrb[38].mxu1  ;;  %6424 = vrcp.f32 %v3176_v58  ;;  %v10251_v58 = vld [vmem:[#allocation54_spill] sm:$0xff] }
 0xa0e   : > { %v9372_v55 = vpop.xlane.xlu1 %3196  ;;  %v5492_v40 = vpop.f32.mrb[39].mxu1 }
 0xa0f   : > { %4623 = vmatmul.mubr.bf16.gmra.mrb[120].mxu1 %v4490_v49  ;;  %2594 = vadd.xlane.f32.xlu1 %v10244_v44  ;;  %v5493_v39 = vadd.f32 %v5492_v40, %v5491_v45  ;;  %v9376_v12 = vmul.f32 %v6419_v4, %v5490_v22  ;;  %v10254_v40 = vld [vmem:[#allocation57_spill] sm:$0xff]  ;;  %v10255_v4 = vld [vmem:[#allocation60_spill] sm:$0xff] }
 0xa10   : > { %4630 = vmatprep.mubr.bf16.mxu1 %v4493_v29  ;;  %2585 = vadd.xlane.f32.xlu0 %v10245_v7  ;;  %v2562_v34 = vpop.xlane.xlu0 %2561 }
 0xa11   : > { %6426 = vrcp.f32 %v2562_v34  ;;  %v9378_v21 = vmul.f32 %v6417_v18, %v5493_v39 }
 0xa12   : > { %v2571_v35 = vpop.xlane.xlu1 %2570 }
 0xa13   : > { %6428 = vrcp.f32 %v2571_v35  ;;  %2600 = vadd.xlane.f32.xlu1 %v10246_v1  ;;  %v3420_v50 = vpack.c.bf16 %v9378_v21, %v9376_v12 }
 0xa14   : > { %2591 = vadd.xlane.f32.xlu0 %v10247_v20  ;;  %v3194_v6 = vpop.xlane.xlu0 %3193  ;;  %6430 = vrcp.f32 %v9356_v23 }
 0xa15   : > { %v5494_v54 = vpop.f32.mrb[40].mxu1  ;;  %v6421_v28 = vpop.eup %6420  ;;  %6432 = vrcp.f32 %v3182_v14 }
 0xa16   : > { %v5495_v19 = vpop.f32.mrb[41].mxu1  ;;  %v9385_v33 = vpop.xlane.xlu1 %3202  ;;  %v9388_v10 = vmul.f32 %v6421_v28, %v10248_v52 }
 0xa17   : > { %v5496_v30 = vadd.f32 %v5495_v19, %v5494_v54  ;;  %v5497_v15 = vpop.f32.mrb[42].mxu1  ;;  %4631 = vmatmul.mubr.bf16.gmra.mrb[124].mxu1 %v4492_v8  ;;  %4476 = vadd.xlane.f32.xlu1 %v9359_v25  ;;  %v6423_v37 = vpop.eup %6422 }
 0xa18   : > { %v5498_v32 = vpop.f32.mrb[43].mxu1  ;;  %2597 = vadd.xlane.f32.xlu0 %v10249_v24  ;;  %v2568_v53 = vpop.xlane.xlu0 %2567 }
 0xa19   : > { %v5499_v47 = vadd.f32 %v5498_v32, %v5497_v15  ;;  %v6425_v26 = vpop.eup %6424  ;;  %6434 = vrcp.f32 %v2568_v53  ;;  %v10257_v53 = vld [vmem:[#allocation42_spill] sm:$0xff] }
 0xa1a   : > { %v9392_v43 = vmul.f32 %v6425_v26, %v5496_v30  ;;  %v2577_v23 = vpop.xlane.xlu1 %2576 }
 0xa1b   : > { %v9394_v13 = vmul.f32 %v6423_v37, %v5499_v47  ;;  %v6427_v11 = vpop.eup %6426  ;;  %6436 = vrcp.f32 %v2577_v23  ;;  %2606 = vadd.xlane.f32.xlu1 %v10250_v16  ;;  %v10256_v37 = vld [vmem:[#allocation59_spill] sm:$0xff] }
 0xa1c   : > { %2603 = vadd.xlane.f32.xlu0 %v10251_v58  ;;  %v3200_v49 = vpop.xlane.xlu0 %3199  ;;  %v9401_v60 = vmul.f32 %v6427_v11, %v10252_v59  ;;  %6438 = vrcp.f32 %v9362_v63 }
 0xa1d   : > { %v3421_v51 = vpack.c.bf16 %v9394_v13, %v9392_v43  ;;  %v5500_v25 = vpop.f32.mrb[44].mxu1  ;;  %v6429_v48 = vpop.eup %6428  ;;  %6440 = vrcp.f32 %v3188_v41 }
 0xa1e   : > { %v5501_v3 = vpop.f32.mrb[45].mxu1  ;;  %v9404_v2 = vpop.xlane.xlu1 %3208  ;;  %v9407_v17 = vmul.f32 %v6429_v48, %v10253_v62  ;;  %v10258_v48 = vld [vmem:[#allocation37_spill] sm:$0xff] }
 0xa1f   : > { %v5502_v38 = vadd.f32 %v5501_v3, %v5500_v25  ;;  %v5503_v42 = vpop.f32.mrb[46].mxu1  ;;  %v6431_v8 = vpop.eup %6430 }
 0xa20   : > { %v5504_v14 = vpop.f32.mrb[47].mxu1  ;;  %v2574_v46 = vpop.xlane.xlu0 %2573 }
 0xa21   : > { %v5505_v27 = vadd.f32 %v5504_v14, %v5503_v42  ;;  %v6433_v29 = vpop.eup %6432  ;;  %6442 = vrcp.f32 %v2574_v46 }
 0xa22   : > { %v3409_v5 = vmul.f32 %v6433_v29, %v5502_v38  ;;  %v2583_v63 = vpop.xlane.xlu1 %2582 }
 0xa23   : > { %v3410_v31 = vmul.f32 %v6431_v8, %v5505_v27  ;;  %v6435_v36 = vpop.eup %6434  ;;  %6444 = vrcp.f32 %v2583_v63 }
 0xa24   : > { %v9411_v45 = vpop.xlane.xlu0 %3205  ;;  %v9414_v44 = vmul.f32 %v6435_v36, %v10254_v40  ;;  %6446 = vrcp.f32 %v9372_v55 }
 0xa25   : > { %v3422_v61 = vpack.c.bf16 %v3410_v31, %v3409_v5  ;;  %v5506_v22 = vpop.f32.mrb[48].mxu1  ;;  %v6437_v18 = vpop.eup %6436  ;;  %6448 = vrcp.f32 %v3194_v6 }
 0xa26   : > { %v5507_v41 = vpop.f32.mrb[49].mxu1  ;;  %v9419_v35 = vmul.f32 %v6437_v18, %v10255_v4  ;;  %v6439_v54 = vpop.eup %6438 }
 0xa27   : > { %v5508_v39 = vadd.f32 %v5507_v41, %v5506_v22  ;;  %v5509_v7 = vpop.f32.mrb[50].mxu1  ;;  %v6441_v19 = vpop.eup %6440 }
 0xa28   : > { %v5510_v1 = vpop.f32.mrb[51].mxu1  ;;  %v2580_v28 = vpop.xlane.xlu0 %2579 }
 0xa29   : > { %v5511_v20 = vadd.f32 %v5510_v1, %v5509_v7  ;;  %6450 = vrcp.f32 %v2580_v28  ;;  %v3411_v30 = vmul.f32 %v6441_v19, %v5508_v39 }
 0xa2a   : > { %6452 = vrcp.f32 %v3200_v49 }
 0xa2b   : > { %v3412_v15 = vmul.f32 %v6439_v54, %v5511_v20  ;;  %v6443_v52 = vpop.eup %6442  ;;  %6454 = vrcp.f32 %v9385_v33 }
 0xa2c   : > { %4689 = vrot.lane.b32.xlu1 %v3420_v50, %s6705_s14  ;;  %v9427_v47 = vmul.f32 %v6443_v52, %v10256_v37  ;;  %v3806_v13 = vpop.xlane.xlu0 %3805  ;;  %6456 = vrcp.f32 %v9411_v45 }
 0xa2d   : > { %v3423_v32 = vpack.c.bf16 %v3412_v15, %v3411_v30  ;;  %v6445_v55 = vpop.eup %6444  ;;  %6458 = vrcp.f32 %v9404_v2 }
 0xa2e   : > { %v5512_v24 = vpop.f32.mrb[52].mxu1  ;;  %v9430_v26 = vmul.f32 %v6445_v55, %v10257_v53  ;;  %v6447_v12 = vpop.eup %6446 }
 0xa2f   : > { %v5513_v6 = vpop.f32.mrb[53].mxu1  ;;  %v6449_v50 = vpop.eup %6448 }
 0xa30   : > { %v5514_v11 = vadd.f32 %v5513_v6, %v5512_v24  ;;  %v5515_v16 = vpop.f32.mrb[54].mxu1  ;;  %4693 = vrot.lane.b32.xlu1 %v3422_v61, %s6705_s14  ;;  %v3812_v5 = vpop.xlane.xlu0 %3811 }
 0xa31   : > { %v5516_v25 = vpop.f32.mrb[55].mxu1 }
 0xa32   : > { %v5517_v21 = vadd.f32 %v5516_v25, %v5515_v16  ;;  %4687 = vrot.lane.b32.xlu0 %v3419_v9, %s6705_s14  ;;  %v3413_v49 = vmul.f32 %v6449_v50, %v5514_v11 }
 0xa33   : > { %v6451_v58 = vpop.eup %6450 }
 0xa34   : > { %v3414_v59 = vmul.f32 %v6447_v12, %v5517_v21  ;;  %v9441_v3 = vmul.f32 %v6451_v58, %v10258_v48  ;;  %v6453_v0 = vpop.eup %6452  ;;  %v3818_v63 = vpop.xlane.xlu0 %3817 }
 0xa35   : > { %v6455_v46 = vpop.eup %6454 }
 0xa36   : > { %v3424_v38 = vpack.c.bf16 %v3414_v59, %v3413_v49  ;;  %v5518_v42 = vpop.f32.mrb[56].mxu1  ;;  %4691 = vrot.lane.b32.xlu0 %v3421_v51, %s6705_s14  ;;  %v3809_v51 = vpop.xlane.xlu1 %3808 }
 0xa37   : > { %v5519_v33 = vpop.f32.mrb[57].mxu1  ;;  %6460 = vrcp.f32 %v3809_v51  ;;  %v6457_v20 = vpop.eup %6456 }
 0xa38   : > { %v5520_v14 = vadd.f32 %v5519_v33, %v5518_v42  ;;  %v5521_v57 = vpop.f32.mrb[58].mxu1  ;;  %4697 = vrot.lane.b32.xlu1 %v3424_v38, %s6705_s14  ;;  %v9457_v61 = vpop.xlane.xlu0 %3823  ;;  %6462 = vrcp.f32 %v3806_v13  ;;  %v6148_v38 = vld [vmem:[%s10259_s28] sm:$0xff]  }
 0xa39   : > { %v5522_v9 = vpop.f32.mrb[59].mxu1  ;;  %v6459_v2 = vpop.eup %6458  ;;  %6464 = vrcp.f32 %v3812_v5  ;;  %5866 = vmatprep.subr.bf16.mxu0 %v6148_v38  ;;  %5898 = vmatprep.subr.bf16.mxu1 %v6148_v38  ;;  %v6149_v5 = vld [vmem:[%s10259_s28 + $0x8] sm:$0xff]  }
 0xa3a   : > { %v9450_v8 = vmul.f32 %v6453_v0, %v5520_v14  ;;  %v5523_v27 = vadd.f32 %v5522_v9, %v5521_v57  ;;  %4695 = vrot.lane.b32.xlu0 %v3423_v32, %s6705_s14  ;;  %v3815_v31 = vpop.xlane.xlu1 %3814  ;;  %5867 = vmatpush3.bf16.msra.mxu0 %v6148_v38 }
 0xa3b   : > { %6466 = vrcp.f32 %v3815_v31  ;;  %5906 = vmatpush3.bf16.msra.mxu1 %v6148_v38  ;;  %5868 = vmatprep.subr.bf16.mxu0 %v6149_v5 }
 0xa3c   : > { %v9453_v29 = vmul.f32 %v6455_v46, %v5523_v27  ;;  %v9461_v40 = vpop.xlane.xlu0 %3829  ;;  %6468 = vrcp.f32 %v3818_v63  ;;  %5899 = vmatprep.subr.bf16.mxu1 %v6149_v5 }
 0xa3e   : > { %v3425_v43 = vpack.c.bf16 %v9453_v29, %v9450_v8  ;;  %v3821_v36 = vpop.xlane.xlu1 %3820  ;;  %5869 = vmatpush3.bf16.msra.mxu0 %v6149_v5 }
 0xa3f   : > { %6470 = vrcp.f32 %v3821_v36  ;;  %5907 = vmatpush3.bf16.msra.mxu1 %v6149_v5 }
 0xa40   : > { %v9467_v41 = vpop.xlane.xlu0 %3835  ;;  %6472 = vrcp.f32 %v9457_v61 }
 0xa41   : > { %v6461_v25 = vpop.eup %6460 }
 0xa42   : > { %v9459_v22 = vpop.xlane.xlu1 %3826  ;;  %v6463_v21 = vpop.eup %6462 }
 0xa43   : > { %v6465_v46 = vpop.eup %6464  ;;  %6474 = vrcp.f32 %v9459_v22 }
 0xa44   : > { %v9471_v28 = vpop.xlane.xlu0 %3841  ;;  %6476 = vrcp.f32 %v9461_v40  ;;  %v6153_v40 = vld [vmem:[%s10259_s28 + $0x28] sm:$0xff]  }
 0xa45   : > { %v6467_v51 = vpop.eup %6466 }
 0xa46   : > { %v9463_v18 = vpop.xlane.xlu1 %3832 }
 0xa47   : > { %6478 = vrcp.f32 %v9463_v18 }
 0xa48   : > { %v9481_v55 = vpop.xlane.xlu0 %3847  ;;  %6480 = vrcp.f32 %v9467_v41 }
 0xa4a   : > { %v9469_v39 = vpop.xlane.xlu1 %3838 }
 0xa4b   : > { %6482 = vrcp.f32 %v9469_v39 }
 0xa4c   : > { %v9485_v49 = vpop.xlane.xlu0 %4431 }
 0xa4e   : > { %v9473_v30 = vpop.xlane.xlu1 %3844 }
 0xa50   : > { %v9493_v14 = vpop.xlane.xlu0 %4437 }
 0xa52   : > { %v9483_v6 = vpop.xlane.xlu1 %3850 }
 0xa54   : > { %v9500_v63 = vpop.xlane.xlu0 %4443 }
 0xa56   : > { %v9487_v59 = vpop.xlane.xlu1 %4434 }
 0xa5a   : > { %v9495_v9 = vpop.xlane.xlu1 %4440 }
 0xa5e   : > { %v9502_v36 = vpop.xlane.xlu1 %4446 }
 0xa66   : > { %v5524_v7 = vpop.f32.mrb[60].mxu1 }
 0xa67   : > { %v5525_v4 = vpop.f32.mrb[61].mxu1 }
 0xa68   : > { %v5526_v1 = vadd.f32 %v5525_v4, %v5524_v7  ;;  %v5527_v54 = vpop.f32.mrb[62].mxu1 }
 0xa69   : > { %v5528_v19 = vpop.f32.mrb[63].mxu1 }
 0xa6a   : > { %v9475_v15 = vmul.f32 %v6457_v20, %v5526_v1  ;;  %v5529_v45 = vadd.f32 %v5528_v19, %v5527_v54 }
 0xa6c   : > { %v9477_v52 = vmul.f32 %v6459_v2, %v5529_v45  ;;  %v6469_v2 = vpop.eup %6468 }
 0xa6e   : > { %v3426_v32 = vpack.c.bf16 %v9477_v52, %v9475_v15  ;;  %v5578_v37 = vpop.f32.mrb[64].mxu1 }
 0xa6f   : > { %v5579_v24 = vpop.f32.mrb[65].mxu1 }
 0xa70   : > { %v5580_v53 = vadd.f32 %v5579_v24, %v5578_v37  ;;  %v5581_v11 = vpop.f32.mrb[66].mxu1  ;;  %v6471_v24 = vpop.eup %6470 }
 0xa71   : > { %v5582_v16 = vpop.f32.mrb[67].mxu1 }
 0xa72   : > { %v5583_v12 = vadd.f32 %v5582_v16, %v5581_v11  ;;  %v4029_v50 = vmul.f32 %v6463_v21, %v5580_v53  ;;  %v6150_v53 = vld [vmem:[%s10259_s28 + $0x10] sm:$0xff]   ;;  %v6151_v11 = vld [vmem:[%s10259_s28 + $0x18] sm:$0xff]   ;;  %v9513_v16 = vpop.xlane.xlu0 %4449 }
 0xa73   : > { %5870 = vmatprep.subr.bf16.mxu0 %v6150_v53  ;;  %5900 = vmatprep.subr.bf16.mxu1 %v6150_v53 }
 0xa74   : > { %v4030_v58 = vmul.f32 %v6461_v25, %v5583_v12  ;;  %v9515_v12 = vpop.xlane.xlu1 %4452  ;;  %5871 = vmatpush3.bf16.msra.mxu0 %v6150_v53  ;;  %5908 = vmatpush3.bf16.msra.mxu1 %v6150_v53 }
 0xa75   : > { %5872 = vmatprep.subr.bf16.mxu0 %v6151_v11  ;;  %5901 = vmatprep.subr.bf16.mxu1 %v6151_v11 }
 0xa76   : > { %v4045_v48 = vpack.c.bf16 %v4030_v58, %v4029_v50  ;;  %v6152_v58 = vld [vmem:[%s10259_s28 + $0x20] sm:$0xff]  }
 0xa78   : > { %4711 = vrot.lane.b32.xlu1 %v4045_v48, %s6704_s12  ;;  %5873 = vmatpush3.bf16.msra.mxu0 %v6151_v11 }
 0xa79   : > { %v5584_v42 = vpop.f32.mrb[68].mxu1  ;;  %5909 = vmatpush3.bf16.msra.mxu1 %v6151_v11  ;;  %5874 = vmatprep.subr.bf16.mxu0 %v6152_v58 }
 0xa7a   : > { %v5585_v33 = vpop.f32.mrb[69].mxu1  ;;  %5902 = vmatprep.subr.bf16.mxu1 %v6152_v58 }
 0xa7b   : > { %v5586_v57 = vadd.f32 %v5585_v33, %v5584_v42  ;;  %v5587_v0 = vpop.f32.mrb[70].mxu1 }
 0xa7c   : > { %v5588_v27 = vpop.f32.mrb[71].mxu1  ;;  %5875 = vmatpush3.bf16.msra.mxu0 %v6152_v58 }
 0xa7d   : > { %v5589_v13 = vadd.f32 %v5588_v27, %v5587_v0  ;;  %v4031_v31 = vmul.f32 %v6465_v46, %v5586_v57  ;;  %v6473_v0 = vpop.eup %6472  ;;  %5910 = vmatpush3.bf16.msra.mxu1 %v6152_v58  ;;  %5876 = vmatprep.subr.bf16.mxu0 %v6153_v40 }
 0xa7e   : > { %v6475_v46 = vpop.eup %6474  ;;  %5903 = vmatprep.subr.bf16.mxu1 %v6153_v40 }
 0xa7f   : > { %v4032_v7 = vmul.f32 %v6467_v51, %v5589_v13 }
 0xa80   : > { %5877 = vmatpush3.bf16.msra.mxu0 %v6153_v40 }
 0xa81   : > { %v4046_v4 = vpack.c.bf16 %v4032_v7, %v4031_v31  ;;  %v5590_v1 = vpop.f32.mrb[72].mxu1  ;;  %5911 = vmatpush3.bf16.msra.mxu1 %v6153_v40 }
 0xa82   : > { %v5591_v54 = vpop.f32.mrb[73].mxu1 }
 0xa83   : > { %v5592_v20 = vadd.f32 %v5591_v54, %v5590_v1  ;;  %v5593_v19 = vpop.f32.mrb[74].mxu1  ;;  %4713 = vrot.lane.b32.xlu1 %v4046_v4, %s6704_s12  ;;  %v6154_v1 = vld [vmem:[%s10259_s28 + $0x30] sm:$0xff]  }
 0xa84   : > { %v5594_v45 = vpop.f32.mrb[75].mxu1  ;;  %5878 = vmatprep.subr.bf16.mxu0 %v6154_v1  ;;  %5904 = vmatprep.subr.bf16.mxu1 %v6154_v1 }
 0xa85   : > { %v5595_v37 = vadd.f32 %v5594_v45, %v5593_v19  ;;  %v4033_v61 = vmul.f32 %v6469_v2, %v5592_v20  ;;  %v6477_v2 = vpop.eup %6476  ;;  %5879 = vmatpush3.bf16.msra.mxu0 %v6154_v1  ;;  %5912 = vmatpush3.bf16.msra.mxu1 %v6154_v1 }
 0xa86   : > { %v6479_v53 = vpop.eup %6478 }
 0xa87   : > { %v4034_v25 = vmul.f32 %v6471_v24, %v5595_v37 }
 0xa88   : > { %v9521_v48 = vpop.xlane.xlu0 %4455 }
 0xa89   : > { %v4047_v22 = vpack.c.bf16 %v4034_v25, %v4033_v61  ;;  %v5596_v21 = vpop.f32.mrb[76].mxu1 }
 0xa8a   : > { %v5597_v50 = vpop.f32.mrb[77].mxu1  ;;  %v9525_v33 = vpop.xlane.xlu1 %4458 }
 0xa8b   : > { %v5598_v38 = vadd.f32 %v5597_v50, %v5596_v21  ;;  %v5599_v42 = vpop.f32.mrb[78].mxu1  ;;  %4715 = vrot.lane.b32.xlu0 %v4047_v22, %s6704_s12 }
 0xa8c   : > { %v5600_v57 = vpop.f32.mrb[79].mxu1  ;;  %v9532_v18 = vpop.xlane.xlu0 %4461 }
 0xa8d   : > { %v5601_v27 = vadd.f32 %v5600_v57, %v5599_v42  ;;  %v4035_v13 = vmul.f32 %v6473_v0, %v5598_v38  ;;  %v6481_v57 = vpop.eup %6480 }
 0xa8f   : > { %v4036_v51 = vmul.f32 %v6475_v46, %v5601_v27  ;;  %v6483_v46 = vpop.eup %6482 }
 0xa90   : > { %v9530_v5 = vpop.xlane.xlu1 %4464 }
 0xa91   : > { %v4048_v31 = vpack.c.bf16 %v4036_v51, %v4035_v13  ;;  %v5602_v7 = vpop.f32.mrb[80].mxu1 }
 0xa92   : > { %v5603_v4 = vpop.f32.mrb[81].mxu1 }
 0xa93   : > { %v5604_v54 = vadd.f32 %v5603_v4, %v5602_v7  ;;  %v5605_v20 = vpop.f32.mrb[82].mxu1  ;;  %4717 = vrot.lane.b32.xlu1 %v4048_v31, %s6704_s12 }
 0xa94   : > { %v5606_v19 = vpop.f32.mrb[83].mxu1  ;;  %v9540_v45 = vpop.xlane.xlu1 %4470 }
 0xa95   : > { %v5607_v37 = vadd.f32 %v5606_v19, %v5605_v20  ;;  %v9542_v24 = vpop.xlane.xlu0 %4467  ;;  %v9544_v11 = vmul.f32 %v6477_v2, %v5604_v54  ;;  %v10260_v2 = vld [vmem:[#allocation44_spill] sm:$0xff] }
 0xa97   : > { %v9546_v41 = vmul.f32 %v6479_v53, %v5607_v37 }
 0xa98   : > { %v2589_v61 = vpop.xlane.xlu1 %2588 }
 0xa99   : > { %v4049_v39 = vpack.c.bf16 %v9546_v41, %v9544_v11  ;;  %v5608_v25 = vpop.f32.mrb[84].mxu1  ;;  %6484 = vrcp.f32 %v2589_v61  ;;  %v9550_v22 = vpop.xlane.xlu0 %4473 }
 0xa9a   : > { %v5609_v21 = vpop.f32.mrb[85].mxu1  ;;  %6486 = vrcp.f32 %v9471_v28 }
 0xa9b   : > { %v5610_v50 = vadd.f32 %v5609_v21, %v5608_v25  ;;  %v5611_v58 = vpop.f32.mrb[86].mxu1  ;;  %6488 = vrcp.f32 %v9473_v30 }
 0xa9c   : > { %v5612_v38 = vpop.f32.mrb[87].mxu1  ;;  %v2595_v42 = vpop.xlane.xlu1 %2594 }
 0xa9d   : > { %v5613_v0 = vadd.f32 %v5612_v38, %v5611_v58  ;;  %6490 = vrcp.f32 %v2595_v42  ;;  %v2586_v27 = vpop.xlane.xlu0 %2585  ;;  %v9554_v40 = vmul.f32 %v6481_v57, %v5610_v50  ;;  %v10261_v57 = vld [vmem:[#allocation46_spill] sm:$0xff] }
 0xa9e   : > { %6492 = vrcp.f32 %v2586_v27 }
 0xa9f   : > { %v9556_v13 = vmul.f32 %v6483_v46, %v5613_v0 }
 0xaa0   : > { %v2601_v51 = vpop.xlane.xlu1 %2600 }
 0xaa1   : > { %v4050_v28 = vpack.c.bf16 %v9556_v13, %v9554_v40  ;;  %v5614_v31 = vpop.f32.mrb[88].mxu1  ;;  %6494 = vrcp.f32 %v2601_v51  ;;  %v2592_v7 = vpop.xlane.xlu0 %2591  ;;  %v10262_v51 = vld [vmem:[#allocation39_spill] sm:$0xff] }
 0xaa2   : > { %6496 = vrcp.f32 %v2592_v7  ;;  %v5615_v30 = vpop.f32.mrb[89].mxu1 }
 0xaa3   : > { %v6485_v4 = vpop.eup %6484  ;;  %6498 = vrcp.f32 %v9481_v55  ;;  %v5616_v1 = vadd.f32 %v5615_v30, %v5614_v31  ;;  %v5617_v54 = vpop.f32.mrb[90].mxu1 }
 0xaa4   : > { %6500 = vrcp.f32 %v9483_v6  ;;  %v5618_v20 = vpop.f32.mrb[91].mxu1  ;;  %v9562_v19 = vpop.xlane.xlu1 %4476  ;;  %v9565_v37 = vmul.f32 %v6485_v4, %v10260_v2 }
 0xaa5   : > { %v6487_v53 = vpop.eup %6486  ;;  %v5619_v61 = vadd.f32 %v5618_v20, %v5617_v54  ;;  %v2598_v25 = vpop.xlane.xlu0 %2597 }
 0xaa6   : > { %v6489_v21 = vpop.eup %6488  ;;  %6502 = vrcp.f32 %v2598_v25  ;;  %v9567_v58 = vmul.f32 %v6487_v53, %v5616_v1  ;;  %v10263_v53 = vld [vmem:[#allocation48_spill] sm:$0xff] }
 0xaa7   : > { %v6491_v50 = vpop.eup %6490  ;;  %v9569_v38 = vmul.f32 %v6489_v21, %v5619_v61 }
 0xaa8   : > { %v6493_v55 = vpop.eup %6492  ;;  %v2607_v42 = vpop.xlane.xlu1 %2606  ;;  %v9572_v6 = vmul.f32 %v6491_v50, %v10261_v57  ;;  %v10264_v50 = vld [vmem:[#allocation41_spill] sm:$0xff] }
 0xaa9   : > { %v4051_v0 = vpack.c.bf16 %v9569_v38, %v9567_v58  ;;  %v5620_v27 = vpop.f32.mrb[92].mxu1  ;;  %6504 = vrcp.f32 %v2607_v42  ;;  %v2604_v46 = vpop.xlane.xlu0 %2603  ;;  %v9577_v31 = vmul.f32 %v6493_v55, %v10262_v51 }
 0xaaa   : > { %6506 = vrcp.f32 %v2604_v46  ;;  %v5621_v7 = vpop.f32.mrb[93].mxu1 }
 0xaab   : > { %v6495_v30 = vpop.eup %6494  ;;  %6508 = vrcp.f32 %v9485_v49  ;;  %v5622_v4 = vadd.f32 %v5621_v7, %v5620_v27  ;;  %v5623_v1 = vpop.f32.mrb[94].mxu1  ;;  %v6155_v49 = vld [vmem:[%s10259_s28 + $0x38] sm:$0xff]  }
 0xaac   : > { %v6497_v20 = vpop.eup %6496  ;;  %6510 = vrcp.f32 %v9487_v59  ;;  %v5624_v2 = vpop.f32.mrb[95].mxu1  ;;  %v9584_v61 = vmul.f32 %v6495_v30, %v10263_v53  ;;  %5880 = vmatprep.subr.bf16.mxu0 %v6155_v49  ;;  %5905 = vmatprep.subr.bf16.mxu1 %v6155_v49  ;;  %v10265_v30 = vld [vmem:[#allocation43_spill] sm:$0xff] }
 0xaad   : > { %v6499_v25 = vpop.eup %6498  ;;  %v5625_v21 = vadd.f32 %v5624_v2, %v5623_v1  ;;  %v9587_v55 = vmul.f32 %v6497_v20, %v10264_v50  ;;  %5881 = vmatpush3.bf16.msra.mxu0 %v6155_v49  ;;  %5913 = vmatpush3.bf16.msra.mxu1 %v6155_v49  ;;  %6512 = vrcp.f32 %v9493_v14  ;;  %v10266_v49 = vld [vmem:[#allocation50_spill] sm:$0xff] }
 0xaae   : > { %v6501_v42 = vpop.eup %6500  ;;  %v9592_v57 = vmul.f32 %v6499_v25, %v5622_v4  ;;  %6514 = vrcp.f32 %v9495_v9 }
 0xaaf   : > { %v9594_v27 = vmul.f32 %v6501_v42, %v5625_v21  ;;  %6516 = vrcp.f32 %v9500_v63 }
 0xab0   : > { %v6503_v46 = vpop.eup %6502  ;;  %6518 = vrcp.f32 %v9502_v36 }
 0xab1   : > { %v4052_v51 = vpack.c.bf16 %v9594_v27, %v9592_v57  ;;  %v5674_v7 = vpop.f32.mrb[96].mxu1  ;;  %v9601_v1 = vmul.f32 %v6503_v46, %v10265_v30  ;;  %v10267_v46 = vld [vmem:[#allocation45_spill] sm:$0xff]  ;;  %6520 = vrcp.f32 %v9513_v16 }
 0xab2   : > { %v5675_v20 = vpop.f32.mrb[97].mxu1  ;;  %6522 = vrcp.f32 %v9515_v12 }
 0xab3   : > { %v6505_v4 = vpop.eup %6504  ;;  %v5676_v2 = vadd.f32 %v5675_v20, %v5674_v7  ;;  %v5677_v53 = vpop.f32.mrb[98].mxu1  ;;  %6524 = vrcp.f32 %v9521_v48 }
 0xab4   : > { %v6507_v21 = vpop.eup %6506  ;;  %v5678_v50 = vpop.f32.mrb[99].mxu1  ;;  %v9608_v42 = vmul.f32 %v6505_v4, %v10266_v49  ;;  %6526 = vrcp.f32 %v9525_v33 }
 0xab5   : > { %v6509_v59 = vpop.eup %6508  ;;  %v5679_v54 = vadd.f32 %v5678_v50, %v5677_v53  ;;  %v9611_v30 = vmul.f32 %v6507_v21, %v10267_v46  ;;  %6528 = vrcp.f32 %v9532_v18 }
 0xab6   : > { %v6511_v62 = vpop.eup %6510  ;;  %v4655_v23 = vmul.f32 %v6509_v59, %v5676_v2  ;;  %6530 = vrcp.f32 %v9530_v5 }
 0xab7   : > { %v4656_v14 = vmul.f32 %v6511_v62, %v5679_v54  ;;  %v2760_v7 = vpack.c.bf16 %v9608_v42, %v9611_v30  ;;  %v6513_v53 = vpop.eup %6512  ;;  %6532 = vrcp.f32 %v9540_v45  ;;  %v4988_v42 = vld [vmem:[%s9714_s11 + $0x10] sm:$0xff] }
 0xab8   : > { %v6515_v50 = vpop.eup %6514  ;;  %6534 = vrcp.f32 %v9542_v24 }
 0xab9   : > { %v4671_v20 = vpack.c.bf16 %v4656_v14, %v4655_v23  ;;  %v5680_v25 = vpop.f32.mrb[100].mxu1  ;;  %v6517_v36 = vpop.eup %6516  ;;  %6536 = vrcp.f32 %v9550_v22 }
 0xaba   : > { %v5681_v34 = vpop.f32.mrb[101].mxu1  ;;  %v6519_v49 = vpop.eup %6518  ;;  %6538 = vrcp.f32 %v9562_v19 }
 0xabb   : > { %v5682_v9 = vadd.f32 %v5681_v34, %v5680_v25  ;;  %v5683_v56 = vpop.f32.mrb[102].mxu1  ;;  %4735 = vrot.lane.b32.xlu0 %v4671_v20, %s6703_s29 }
 0xabc   : > { %v5684_v4 = vpop.f32.mrb[103].mxu1 }
 0xabd   : > { %v5685_v21 = vadd.f32 %v5684_v4, %v5683_v56  ;;  %v4657_v59 = vmul.f32 %v6513_v53, %v5682_v9  ;;  %v6521_v9 = vpop.eup %6520 }
 0xabe   : > { %v6523_v53 = vpop.eup %6522 }
 0xabf   : > { %v4658_v62 = vmul.f32 %v6515_v50, %v5685_v21  ;;  %4719 = vrot.lane.b32.xlu0 %v4049_v39, %s6704_s12 }
 0xac1   : > { %v4672_v23 = vpack.c.bf16 %v4658_v62, %v4657_v59  ;;  %v5686_v54 = vpop.f32.mrb[104].mxu1  ;;  %v6525_v62 = vpop.eup %6524 }
 0xac2   : > { %v5687_v63 = vpop.f32.mrb[105].mxu1 }
 0xac3   : > { %v5688_v34 = vadd.f32 %v5687_v63, %v5686_v54  ;;  %v5689_v2 = vpop.f32.mrb[106].mxu1  ;;  %4737 = vrot.lane.b32.xlu1 %v4672_v23, %s6703_s29  ;;  %v6527_v54 = vpop.eup %6526 }
 0xac4   : > { %v5690_v56 = vpop.f32.mrb[107].mxu1 }
 0xac5   : > { %v5691_v25 = vadd.f32 %v5690_v56, %v5689_v2  ;;  %v4659_v46 = vmul.f32 %v6517_v36, %v5688_v34  ;;  %v6529_v56 = vpop.eup %6528 }
 0xac7   : > { %v4660_v14 = vmul.f32 %v6519_v49, %v5691_v25  ;;  %4721 = vrot.lane.b32.xlu1 %v4050_v28, %s6704_s12  ;;  %v6531_v25 = vpop.eup %6530 }
 0xac9   : > { %v4673_v11 = vpack.c.bf16 %v4660_v14, %v4659_v46  ;;  %v5692_v41 = vpop.f32.mrb[108].mxu1 }
 0xaca   : > { %v5693_v16 = vpop.f32.mrb[109].mxu1 }
 0xacb   : > { %v5694_v39 = vadd.f32 %v5693_v16, %v5692_v41  ;;  %v5695_v20 = vpop.f32.mrb[110].mxu1  ;;  %4739 = vrot.lane.b32.xlu0 %v4673_v11, %s6703_s29  ;;  %v6533_v11 = vpop.eup %6532 }
 0xacc   : > { %v5696_v12 = vpop.f32.mrb[111].mxu1  ;;  %v6535_v16 = vpop.eup %6534 }
 0xacd   : > { %v5697_v4 = vadd.f32 %v5696_v12, %v5695_v20  ;;  %v4661_v21 = vmul.f32 %v6521_v9, %v5694_v39  ;;  %v6537_v19 = vpop.eup %6536 }
 0xacf   : > { %v4662_v50 = vmul.f32 %v6523_v53, %v5697_v4  ;;  %4699 = vrot.lane.b32.xlu0 %v3425_v43, %s6705_s14  ;;  %v6539_v53 = vpop.eup %6538 }
 0xad1   : > { %v4674_v40 = vpack.c.bf16 %v4662_v50, %v4661_v21 }
 0xad2   : > { %v5698_v13 = vpop.f32.mrb[112].mxu1 }
 0xad3   : > { %v5699_v28 = vpop.f32.mrb[113].mxu1  ;;  %4741 = vrot.lane.b32.xlu1 %v4674_v40, %s6703_s29 }
 0xad4   : > { %v5700_v48 = vadd.f32 %v5699_v28, %v5698_v13  ;;  %v5701_v59 = vpop.f32.mrb[114].mxu1  ;;  %v4690_v13 = vpop.permute.xlu1 %4689 }
 0xad5   : > { %v5702_v33 = vpop.f32.mrb[115].mxu1  ;;  %v4688_v28 = vpop.permute.xlu0 %4687 }
 0xad6   : > { %v5703_v23 = vadd.f32 %v5702_v33, %v5701_v59  ;;  %v4663_v8 = vmul.f32 %v6525_v62, %v5700_v48  ;;  %v10268_v62 = vpack.c.bf16 %v9388_v10, %v9401_v60 }
 0xad7   : > { %4701 = vrot.lane.b32.xlu1 %v3426_v32, %s6705_s14  ;;  %s10275_s14 = sld [smem:[#allocation128_spill]] }
 0xad8   : > { %v4664_v29 = vmul.f32 %v6527_v54, %v5703_v23  ;;  %v4694_v57 = vpop.permute.xlu1 %4693  ;;  %v4753_v23 = vsel %vm2230_vm2, %v10268_v62, %v4688_v28 }
 0xad9   : > { %v4692_v27 = vpop.permute.xlu0 %4691 }
 0xada   : > { %v4675_v43 = vpack.c.bf16 %v4664_v29, %v4663_v8  ;;  %v5704_v63 = vpop.f32.mrb[116].mxu1 }
 0xadb   : > { %v5705_v34 = vpop.f32.mrb[117].mxu1 }
 0xadc   : > { %v5706_v18 = vadd.f32 %v5705_v34, %v5704_v63  ;;  %v5707_v2 = vpop.f32.mrb[118].mxu1  ;;  %4743 = vrot.lane.b32.xlu0 %v4675_v43, %s6703_s29  ;;  %v10269_v34 = vpack.c.bf16 %v9407_v17, %v9414_v44  ;;  %v10271_v44 = vpack.c.bf16 %v9430_v26, %v9441_v3  ;;  %v10273_v3 = vpack.c.bf16 %v9572_v6, %v9587_v55 }
 0xadd   : > { %v5708_v5 = vpop.f32.mrb[119].mxu1  ;;  %v4696_v48 = vpop.permute.xlu0 %4695 }
 0xade   : > { %v5709_v36 = vadd.f32 %v5708_v5, %v5707_v2  ;;  %v4665_v49 = vmul.f32 %v6529_v56, %v5706_v18  ;;  %v4756_v18 = vsel %vm2230_vm2, %v10269_v34, %v4690_v13  ;;  %v10270_v56 = vpack.c.bf16 %v9419_v35, %v9427_v47  ;;  %v4993_v34 = vld [vmem:[%s9714_s11 + $0x38] sm:$0xff] }
 0xadf   : > { %v10272_v47 = vpack.c.bf16 %v9565_v37, %v9577_v31  ;;  %v10274_v31 = vpack.c.bf16 %v9584_v61, %v9601_v1  ;;  %v9710_v61 = vld [vmem:[%s10275_s14] ss:$0 sm:$0xff] }
 0xae0   : > { %v4666_v15 = vmul.f32 %v6531_v25, %v5709_v36  ;;  %4723 = vrot.lane.b32.xlu0 %v4051_v0, %s6704_s12  ;;  %v4759_v36 = vsel %vm2230_vm2, %v10270_v56, %v4692_v27  ;;  %v4987_v27 = vld [vmem:[%s9714_s11 + $0x8] sm:$0xff] }
 0xae2   : > { %v4676_v52 = vpack.c.bf16 %v4666_v15, %v4665_v49  ;;  %v5710_v32 = vpop.f32.mrb[120].mxu1 }
 0xae3   : > { %v5711_v45 = vpop.f32.mrb[121].mxu1 }
 0xae4   : > { %v5712_v46 = vadd.f32 %v5711_v45, %v5710_v32  ;;  %v5713_v14 = vpop.f32.mrb[122].mxu1  ;;  %4745 = vrot.lane.b32.xlu1 %v4676_v52, %s6703_s29  ;;  %v4762_v52 = vsel %vm2230_vm2, %v10271_v44, %v4694_v57 }
 0xae5   : > { %v5714_v24 = vpop.f32.mrb[123].mxu1 }
 0xae6   : > { %v5715_v41 = vadd.f32 %v5714_v24, %v5713_v14  ;;  %v4667_v39 = vmul.f32 %v6535_v16, %v5712_v46  ;;  %v4765_v14 = vsel %vm2230_vm2, %v10272_v47, %v4696_v48 }
 0xae8   : > { %v4668_v20 = vmul.f32 %v6533_v11, %v5715_v41  ;;  %4725 = vrot.lane.b32.xlu1 %v4052_v51, %s6704_s12  ;;  %v4698_v51 = vpop.permute.xlu1 %4697  ;;  %s10277_s12 = sld [smem:[#allocation129_spill]] }
 0xae9   : > { %v4768_v16 = vsel %vm2230_vm2, %v10273_v3, %v4698_v51 }
 0xaea   : > { %v4677_v58 = vpack.c.bf16 %v4668_v20, %v4667_v39  ;;  %v5716_v38 = vpop.f32.mrb[124].mxu1 }
 0xaeb   : > { %v5717_v22 = vpop.f32.mrb[125].mxu1 }
 0xaec   : > { %v5718_v0 = vadd.f32 %v5717_v22, %v5716_v38  ;;  %v5719_v12 = vpop.f32.mrb[126].mxu1  ;;  %4747 = vrot.lane.b32.xlu0 %v4677_v58, %s6703_s29  ;;  %v4712_v59 = vpop.permute.xlu1 %4711 }
 0xaed   : > { %v5720_v9 = vpop.f32.mrb[127].mxu1  ;;  %v4777_v54 = vsel %vm4775_vm3, %v4753_v23, %v4712_v59  ;;  %v4992_v23 = vld [vmem:[%s9714_s11 + $0x30] sm:$0xff] }
 0xaee   : > { %v5721_v4 = vadd.f32 %v5720_v9, %v5719_v12  ;;  %v4669_v21 = vmul.f32 %v6537_v19, %v5718_v0  ;;  %s9771_s14 = scalar_lea.hbm %s10277_s12, %s5270_s24 }
 0xaf0   : > { %v4670_v50 = vmul.f32 %v6539_v53, %v5721_v4  ;;  %v4986_v53 = vld [vmem:[%s9714_s11] sm:$0xff] }
 0xaf2   : > { %v4678_v40 = vpack.c.bf16 %v4670_v50, %v4669_v21 }
 0xaf4   : > { %4749 = vrot.lane.b32.xlu1 %v4678_v40, %s6703_s29  ;;  %v4989_v40 = vld [vmem:[%s9714_s11 + $0x18] sm:$0xff] }
 0xaf5   : > { %v4714_v8 = vpop.permute.xlu1 %4713 }
 0xaf6   : > { %v4779_v2 = vsel %vm4775_vm3, %v4756_v18, %v4714_v8 }
 0xafd   : > { %v4716_v33 = vpop.permute.xlu0 %4715 }
 0xafe   : > { %v4781_v25 = vsel %vm4775_vm3, %v4759_v36, %v4716_v33 }
 0xb05   : > { %v4718_v63 = vpop.permute.xlu1 %4717 }
 0xb06   : > { %v4783_v32 = vsel %vm4775_vm3, %v4762_v52, %v4718_v63  ;;  %v4994_v52 = vld [vmem:[%s9714_s11 + $0x40] sm:$0xff] }
 0xb2d   : > { %v4736_v29 = vpop.permute.xlu0 %4735 }
 0xb2e   : > { %v4794_v43 = vsel %vm4792_vm4, %v4777_v54, %v4736_v29  ;;  %v4990_v29 = vld [vmem:[%s9714_s11 + $0x20] sm:$0xff] }
 0xb2f   : > { %5882 = vmatprep.mubr.bf16.mxu0 %v4794_v43 }
 0xb31   : > { %v4720_v60 = vpop.permute.xlu0 %4719 }
 0xb32   : > { %v4785_v24 = vsel %vm4775_vm3, %v4765_v14, %v4720_v60 }
 0xb35   : > { %v4738_v5 = vpop.permute.xlu1 %4737 }
 0xb36   : > { %v4797_v10 = vsel %vm4792_vm4, %v4779_v2, %v4738_v5 }
 0xb37   : > { %5883 = vmatmul.mubr.bf16.vlgmr.msra.gmra.mrb[144].mxu0 %v4797_v10  ;;  %v4991_v10 = vld [vmem:[%s9714_s11 + $0x28] sm:$0xff] }
 0xb39   : > { %v4722_v17 = vpop.permute.xlu1 %4721 }
 0xb3a   : > { %v4787_v39 = vsel %vm4775_vm3, %v4768_v16, %v4722_v17 }
 0xb3d   : > { %v4740_v49 = vpop.permute.xlu0 %4739 }
 0xb3e   : > { %v4800_v15 = vsel %vm4792_vm4, %v4781_v25, %v4740_v49 }
 0xb3f   : > { %5886 = vmatprep.mubr.bf16.mxu0 %v4800_v15  ;;  %v4996_v15 = vld [vmem:[%s9714_s11 + $0x50] sm:$0xff] }
 0xb41   : > { %v4700_v35 = vpop.permute.xlu0 %4699 }
 0xb42   : > { %v4771_v38 = vsel %vm2230_vm2, %v10274_v31, %v4700_v35 }
 0xb45   : > { %v4742_v45 = vpop.permute.xlu1 %4741 }
 0xb46   : > { %v4803_v46 = vsel %vm4792_vm4, %v4783_v32, %v4742_v45 }
 0xb47   : > { %5887 = vmatmul.mubr.bf16.gmra.mrb[148].mxu0 %v4803_v46  ;;  %v4997_v46 = vld [vmem:[%s9714_s11 + $0x58] sm:$0xff] }
 0xb49   : > { %v4702_v26 = vpop.permute.xlu1 %4701 }
 0xb4a   : > { %v4774_v12 = vsel %vm2230_vm2, %v2760_v7, %v4702_v26 }
 0xb4e   : > { %v4744_v11 = vpop.permute.xlu0 %4743 }
 0xb4f   : > { %v4806_v41 = vsel %vm4792_vm4, %v4785_v24, %v4744_v11  ;;  %v4995_v24 = vld [vmem:[%s9714_s11 + $0x48] sm:$0xff] }
 0xb50   : > { %5890 = vmatprep.mubr.bf16.mxu1 %v4806_v41 }
 0xb52   : > { %v4724_v37 = vpop.permute.xlu0 %4723 }
 0xb53   : > { %v4789_v22 = vsel %vm4775_vm3, %v4771_v38, %v4724_v37  ;;  %v4998_v37 = vld [vmem:[%s9714_s11 + $0x60] sm:$0xff] }
 0xb56   : > { %v4746_v20 = vpop.permute.xlu1 %4745 }
 0xb57   : > { %v4809_v58 = vsel %vm4792_vm4, %v4787_v39, %v4746_v20  ;;  %v5000_v39 = vld [vmem:[%s9714_s11 + $0x70] sm:$0xff] }
 0xb58   : > { %5891 = vmatmul.mubr.bf16.vlgmr.msra.gmra.mrb[128].mxu1 %v4809_v58 }
 0xb5a   : > { %v4726_v55 = vpop.permute.xlu1 %4725 }
 0xb5b   : > { %v4791_v9 = vsel %vm4775_vm3, %v4774_v12, %v4726_v55  ;;  %v4999_v12 = vld [vmem:[%s9714_s11 + $0x68] sm:$0xff] }
 0xb5e   : > { %v4748_v0 = vpop.permute.xlu0 %4747 }
 0xb5f   : > { %v4812_v6 = vsel %vm4792_vm4, %v4789_v22, %v4748_v0  ;;  %v5001_v22 = vld [vmem:[%s9714_s11 + $0x78] sm:$0xff]  ;;  %s10278_s11 = sand.u32 1, %s6660_s18  }
 0xb60   : > { %5894 = vmatprep.mubr.bf16.mxu1 %v4812_v6  ;;  %s9776_s16 = scalar_lea.sflag [#allocation8], %s10278_s11 }
 0xb66   : > { %v4750_v19 = vpop.permute.xlu1 %4749 }
 0xb67   : > { %v4815_v4 = vsel %vm4792_vm4, %v4791_v9, %v4750_v19 }
 0xb68   : > { %5895 = vmatmul.mubr.bf16.gmra.mrb[132].mxu1 %v4815_v4 }
 0xc0a   : > { %v5884_v1 = vpop.f32.mrb[144].mxu0 }
 0xc0b   : > { %v4931_v30 = vadd.f32 %v5884_v1, %v9710_v61  ;;  %v4922_v7 = vpop.f32.mrb[145].mxu0 }
 0xc0c   : > { %v4923_v21 = vadd.f32 %v9710_v61, %v4922_v7  ;;  %v5885_v50 = vpop.f32.mrb[146].mxu0 }
 0xc0d   : > { %v5004_v13 = vadd.f32 %v4988_v42, %v4931_v30  ;;  %v4934_v28 = vadd.f32 %v5885_v50, %v9710_v61  ;;  %v4925_v57 = vpop.f32.mrb[147].mxu0 }
 0xc0e   : > { %v5002_v51 = vadd.f32 %v4986_v53, %v4923_v21  ;;  %v4926_v48 = vadd.f32 %v9710_v61, %v4925_v57 }
 0xc0f   : > { %v5005_v59 = vadd.f32 %v4989_v40, %v4934_v28 }
 0xc10   : > { %v5003_v33 = vadd.f32 %v4987_v27, %v4926_v48  ;;  %5018 = vxpose.xlu0.b32.start [1/16] %v5002_v51, 128 }
 0xc14   : > { %5019 = vxpose.xlu0.b32.cont [2/16] %v5003_v33, 128 }
 0xc18   : > { %5020 = vxpose.xlu0.b32.cont [3/16] %v5004_v13, 128 }
 0xc1a   : > { %v5888_v62 = vpop.f32.mrb[148].mxu0 }
 0xc1b   : > { %v4947_v54 = vadd.f32 %v5888_v62, %v9710_v61  ;;  %v4938_v8 = vpop.f32.mrb[149].mxu0 }
 0xc1c   : > { %v4939_v43 = vadd.f32 %v9710_v61, %v4938_v8  ;;  %5021 = vxpose.xlu0.b32.cont [4/16] %v5005_v59, 128  ;;  %v5889_v63 = vpop.f32.mrb[150].mxu0 }
 0xc1d   : > { %v5008_v18 = vadd.f32 %v4992_v23, %v4947_v54  ;;  %v4950_v2 = vadd.f32 %v5889_v63, %v9710_v61  ;;  %v4941_v5 = vpop.f32.mrb[151].mxu0 }
 0xc1e   : > { %v5006_v60 = vadd.f32 %v4990_v29, %v4939_v43  ;;  %v4942_v56 = vadd.f32 %v9710_v61, %v4941_v5 }
 0xc1f   : > { %v5009_v36 = vadd.f32 %v4993_v34, %v4950_v2 }
 0xc20   : > { %v5007_v25 = vadd.f32 %v4991_v10, %v4942_v56  ;;  %5022 = vxpose.xlu0.b32.cont [5/16] %v5006_v60, 128 }
 0xc24   : > { %5023 = vxpose.xlu0.b32.cont [6/16] %v5007_v25, 128 }
 0xc28   : > { %5024 = vxpose.xlu0.b32.cont [7/16] %v5008_v18, 128 }
 0xc2b   : > { %v5892_v49 = vpop.f32.mrb[128].mxu1 }
 0xc2c   : > { %v4963_v17 = vadd.f32 %v5892_v49, %v9710_v61  ;;  %5025 = vxpose.xlu0.b32.cont [8/16] %v5009_v36, 128  ;;  %v4954_v44 = vpop.f32.mrb[129].mxu1 }
 0xc2d   : > { %v4955_v32 = vadd.f32 %v9710_v61, %v4954_v44  ;;  %v5893_v45 = vpop.f32.mrb[130].mxu1 }
 0xc2e   : > { %v5012_v35 = vadd.f32 %v4996_v15, %v4963_v17  ;;  %v4966_v47 = vadd.f32 %v5893_v45, %v9710_v61  ;;  %v4957_v14 = vpop.f32.mrb[131].mxu1 }
 0xc2f   : > { %v5010_v11 = vadd.f32 %v4994_v52, %v4955_v32  ;;  %v4958_v41 = vadd.f32 %v9710_v61, %v4957_v14 }
 0xc30   : > { %v5013_v26 = vadd.f32 %v4997_v46, %v4966_v47 }
 0xc31   : > { %v5011_v3 = vadd.f32 %v4995_v24, %v4958_v41  ;;  %5026 = vxpose.xlu0.b32.cont [9/16] %v5010_v11, 128 }
 0xc35   : > { %5027 = vxpose.xlu0.b32.cont [10/16] %v5011_v3, 128 }
 0xc39   : > { %5028 = vxpose.xlu0.b32.cont [11/16] %v5012_v35, 128 }
 0xc3b   : > { %v5896_v16 = vpop.f32.mrb[132].mxu1 }
 0xc3c   : > { %v4979_v20 = vadd.f32 %v5896_v16, %v9710_v61  ;;  %v4970_v58 = vpop.f32.mrb[133].mxu1 }
 0xc3d   : > { %v4971_v31 = vadd.f32 %v9710_v61, %v4970_v58  ;;  %5029 = vxpose.xlu0.b32.cont [12/16] %v5013_v26, 128  ;;  %v5897_v38 = vpop.f32.mrb[134].mxu1 }
 0xc3e   : > { %v5016_v0 = vadd.f32 %v5000_v39, %v4979_v20  ;;  %v4982_v6 = vadd.f32 %v5897_v38, %v9710_v61  ;;  %v4973_v55 = vpop.f32.mrb[135].mxu1 }
 0xc3f   : > { %v5014_v9 = vadd.f32 %v4998_v37, %v4971_v31  ;;  %v4974_v19 = vadd.f32 %v9710_v61, %v4973_v55 }
 0xc40   : > { %v5017_v4 = vadd.f32 %v5001_v22, %v4982_v6 }
 0xc41   : > { %v5015_v1 = vadd.f32 %v4999_v12, %v4974_v19  ;;  %5030 = vxpose.xlu0.b32.cont [13/16] %v5014_v9, 128 }
 0xc45   : > { %5031 = vxpose.xlu0.b32.cont [14/16] %v5015_v1, 128 }
 0xc49   : > { %5032 = vxpose.xlu0.b32.cont [15/16] %v5016_v0, 128 }
 0xc4d   : > { %5033 = vxpose.xlu0.b32.end [16/16] %v5017_v4, 128 }
 0xc91   : > { %v5034_v42 = vpop.trf.xlu0 }
 0xc92   : > { %5050 = vst [vmem:[%s6926_s26] sm:$0xff] %v5034_v42 }
 0xc95   : > { %v5035_v30 = vpop.trf.xlu0 }
 0xc96   : > { %5051 = vst [vmem:[%s6926_s26 + $0x8] sm:$0xff] %v5035_v30 }
 0xc99   : > { %v5036_v7 = vpop.trf.xlu0 }
 0xc9a   : > { %5052 = vst [vmem:[%s6926_s26 + $0x10] sm:$0xff] %v5036_v7 }
 0xc9d   : > { %v5037_v61 = vpop.trf.xlu0 }
 0xc9e   : > { %5053 = vst [vmem:[%s6926_s26 + $0x18] sm:$0xff] %v5037_v61 }
 0xca1   : > { %v5038_v53 = vpop.trf.xlu0 }
 0xca2   : > { %5054 = vst [vmem:[%s6926_s26 + $0x20] sm:$0xff] %v5038_v53 }
 0xca5   : > { %v5039_v21 = vpop.trf.xlu0 }
 0xca6   : > { %5055 = vst [vmem:[%s6926_s26 + $0x28] sm:$0xff] %v5039_v21 }
 0xca9   : > { %v5040_v50 = vpop.trf.xlu0 }
 0xcaa   : > { %5056 = vst [vmem:[%s6926_s26 + $0x30] sm:$0xff] %v5040_v50 }
 0xcad   : > { %v5041_v40 = vpop.trf.xlu0 }
 0xcae   : > { %5057 = vst [vmem:[%s6926_s26 + $0x38] sm:$0xff] %v5041_v40 }
 0xcb1   : > { %v5042_v13 = vpop.trf.xlu0 }
 0xcb2   : > { %5058 = vst [vmem:[%s6926_s26 + $0x40] sm:$0xff] %v5042_v13 }
 0xcb5   : > { %v5043_v28 = vpop.trf.xlu0 }
 0xcb6   : > { %5059 = vst [vmem:[%s6926_s26 + $0x48] sm:$0xff] %v5043_v28 }
 0xcb9   : > { %v5044_v57 = vpop.trf.xlu0 }
 0xcba   : > { %5060 = vst [vmem:[%s6926_s26 + $0x50] sm:$0xff] %v5044_v57 }
 0xcbd   : > { %v5045_v27 = vpop.trf.xlu0 }
 0xcbe   : > { %5061 = vst [vmem:[%s6926_s26 + $0x58] sm:$0xff] %v5045_v27 }
 0xcc1   : > { %v5046_v51 = vpop.trf.xlu0 }
 0xcc2   : > { %5062 = vst [vmem:[%s6926_s26 + $0x60] sm:$0xff] %v5046_v51 }
 0xcc5   : > { %v5047_v48 = vpop.trf.xlu0 }
 0xcc6   : > { %5063 = vst [vmem:[%s6926_s26 + $0x68] sm:$0xff] %v5047_v48 }
 0xcc9   : > { %v5048_v59 = vpop.trf.xlu0 }
 0xcca   : > { %5064 = vst [vmem:[%s6926_s26 + $0x70] sm:$0xff] %v5048_v59 }
 0xccd   : > { %v5049_v33 = vpop.trf.xlu0 }
 0xcce   : > { %5065 = vst [vmem:[%s6926_s26 + $0x78] sm:$0xff] %v5049_v33 }
 0xccf   : > { %6587 = shalt.err (!%p6584_p3)
}
 0xcd0   : > { %s6588_s26 = scalar_lea.hbm %s9771_s14, 2048  ;;  %s6592_s29 = scalar_lea.hbm %s10277_s12, 8192 }
 0xcd1   : > { %p6589_p11 = scmp.ne.s32.totalorder %s9771_s14, %s6588_s26  ;;  %p6593_p8 = scmp.lt.u32.totalorder %s9771_s14, %s10277_s12 }
 0xcd2   : > { %p6594_p10 = scmp.lt.u32.totalorder %s6592_s29, %s6588_s26  ;;  %p6596_p7 = scmp.lt.u32.totalorder %s6588_s26, %s9771_s14 }
 0xcd3   : > { %p6590_p13 = pnand %p6589_p11, %p10279_p2 }
 0xcd4   : > { %p6595_p12 = por %p6594_p10, %p6593_p8 }
 0xcd5   : > { %p6591_p5 = pneg %p6590_p13 }
 0xcd6   : > { %p6597_p4 = por %p6596_p7, %p6595_p12 }
 0xcd8   : > { %p6598_p0 = pnand %p6597_p4, %p6591_p5 }
 0xcda   : > { %6601 = shalt.err (!%p6598_p0)
}
 0xcdb   : > { %s6707_s0 = smov 128   ;;  %s6708_s23 = smov 256  }
 0xcdc   : > { %s6709_s13 = smov 8  }
 0xcdd   : > { %5948 = dma.vmem_to_hbm [thread:$0]  (%p10279_p2), %s9766_s15, 2048, %s9771_s14, %s9776_s16, %s6707_s0, %s6708_s23, %s6709_s13  }
 0xcde PF: > { %p5959_p1 = scmp.ge.s32.totalorder %s6696_s27, 2  ;;  %s5096_s24 = sand.u32 1, %s6656_s17  }
 0xcdf   : > { %p10280_p6 = scmp.ne.s32.totalorder %s9982_s9, 0  ;;  %s5097_s26 = scalar_lea.sflag [#allocation8], %s5096_s24 }
 0xce1   : > { %p5955_p9 = pnand %p5959_p1, %p10280_p6 }
 0xce3   : > { %6651 = dma.done.wait (!%p5955_p9), %s5097_s26, 2048  }
 0xce4   : > { %6653 = vsyncadd (!%p5955_p9), %s5097_s26, 4294965248  ;;  %s27_s27 = sadd.s32 1, %s6696_s27   ;;  %s10281_s23 = sld [smem:[#allocation13_spill]] }
 0xce5   : > { %p24_p3 = scmp.ge.s32.totalorder %s27_s27, 6   ;;  %s10282_s24 = sld [smem:[#allocation14_spill]] }
 0xce6   : > { %s10283_s30 = sld [smem:[#allocation15_spill]]  ;;  %s10284_s26 = sld [smem:[#allocation16_spill]] }
 0xce7   : > { %s10285_s17 = smov %s6660_s18  ;;  %s10286_s18 = smov %s6664_s19 }
 0xce8   : > { %s10287_s19 = smov %s6860_s10  ;;  %s10288_s20 = smov %s6672_s21 }
 0xce9   : > { %s10289_s21 = smov %s6676_s22  ;;  %s10290_s22 = smov %s6857_s25 }
 0xcea   :  { %26 = sbr.rel (!%p24_p3) target bundleno = 15 (0xf), region = 115 }
 0xcec   : > { %s10291_s25 = smov %s10283_s30 }
 0xcf1   :  { %5102 = vsyncpa [#allocation7], 1 }
 0xcf2   :  { %5104 = vsyncpa [#allocation7 + $0x1], 1 }
 0xcf3   :  { %5105 = vsyncpa [#allocation8], 1 }
 0xcf4   :  { %5107 = vsyncpa [#allocation8 + $0x1], 1 }

</bundles_post_ra>
